<compile_context>
chip_gen: v7x
topology: tpu7x:2x2x1
jax: 0.10.0
libtpu: 0.0.40
codegen_flags: <defaults>
</compile_context>

<pallas_src>
import functools

import jax
import jax.numpy as jnp
from jax.experimental import pallas as pl
from jax.experimental.pallas import tpu as pltpu

# ---------------- config (consistent with the module) ----------------
B = 2             # batch
T = 12            # his_num == pred_num == 12 (hard-coded "repeat(1, 12)")
N = 8             # node_num
F = 1             # num_of_features
C = 32            # d_model
NUM_TIMES = 288
NUM_DAYS = 7
PRED = 12
LATENT = 8
TDX = 12
NUM_MODULES = 4
MEAN, STD = 3.5, 10.0

assert TDX == T   # the [:, :TDX] slice of the reference is the identity here

R2 = 2 * B * T    # 48  batched rows: (ti|yti, t) for embeddings, (x|dx, t) for state
RN = 2 * B * T * N  # 384
TN = T * N        # 96


# ------------------------------ fused kernel ------------------------------
def _rdnet_kernel(
    # ---- global inputs ----
    xdx_ref,        # (R2, N, F)   [x ; x+delta], F squeezed into trailing 1
    emb_w_ref,      # (F, C)
    emb_b_ref,      # (1, C)
    re_wt_ref,      # (1, C)       re_w transposed
    re_b_ref,       # (1, 1)
    # ---- per-module inputs (leading block dim of size 1) ----
    tem_ref,        # (1, R2, C)   gathered time embeddings, rows (bt, t)
    day_ref,        # (1, R2, C)
    node_ref,       # (1, N, C)
    fc1w_ref, fc1b_ref,            # (1, C, C), (1, 1, C)
    fc2w_ref, fc2b_ref,
    fc3w_ref, fc3b_ref,
    giw_ref, gib_ref,              # fused GLU weights (1, C, 2C), (1, 1, 2C)
    u_ref, vt_ref,                 # (1, 3, N, L), (1, 3, L, N)
    gdw_ref, gdb_ref,              # fused GLU weights (1, C, 2C), (1, 1, 2C)
    k1_ref, f1w_ref, f1b_ref,      # (1, 3*TN, TN), (1, 3C, C), (1, 1, C)
    k2_ref, f2w_ref, f2b_ref,
    # ---- outputs ----
    ys_ref,         # (B, T, N)
    iys_ref,        # (B, T, N)
    loss_ref,       # (1, 1)
    # ---- scratch (resident across the module grid) ----
    state_s,        # (2B, T, N, C)  [xh ; dx]
    acc_iy_s,       # (B, T, N, C)   sum_m iy
    acc_v_s,        # (2B, T, N, C)  sum_m [vy ; dvy]
):
    f32 = jnp.float32
    m = pl.program_id(0)

    # -------- module 0: input embedding relu(x*W+b) and accumulator init -----
    @pl.when(m == 0)
    def _init():
        xv = xdx_ref[...]                                     # (48, N, 1)
        ew = emb_w_ref[...].reshape(1, 1, C)
        eb = emb_b_ref[...].reshape(1, 1, C)
        e = jnp.maximum(xv * ew + eb, 0.0)                    # (48, N, C)
        state_s[...] = e.reshape(2 * B, T, N, C)              # [xh ; dx]
        acc_iy_s[...] = jnp.zeros_like(acc_iy_s)
        acc_v_s[...] = jnp.zeros_like(acc_v_s)

    # -------- invariant block, batched over [ti ; yti] ------------------------
    a2 = jnp.maximum(
        jnp.dot(tem_ref[0], fc1w_ref[0], preferred_element_type=f32)
        + fc1b_ref[0], 0.0)                                   # (48, C)
    b2 = jnp.maximum(
        jnp.dot(day_ref[0], fc2w_ref[0], preferred_element_type=f32)
        + fc2b_ref[0], 0.0)                                   # (48, C)
    c2 = jnp.maximum(
        jnp.dot(node_ref[0], fc3w_ref[0], preferred_element_type=f32)
        + fc3b_ref[0], 0.0)                                   # (N, C)
    pre = (a2 + b2)[:, None, :] + c2[None, :, :]              # (48, N, C)
    z = jnp.dot(pre.reshape(RN, C), giw_ref[0],
                preferred_element_type=f32) + gib_ref[0]      # (384, 2C) fused GLU
    xinv = (z[:, :C] * jax.nn.sigmoid(z[:, C:])).reshape(2 * B, T, N, C)
    ix = xinv[:B]                                             # current window
    iy = xinv[B:]                                             # label window
    acc_iy_s[...] += iy

    # -------- decouple: h = xh - ix, dh = dx - ix (batched) -------------------
    hcat = state_s[...] - jnp.concatenate([ix, ix], axis=0)   # (2B, T, N, C)

    # -------- dsgnn: low-rank ReLU adjacency + spatial mix + GLU + residual ---
    u = u_ref[0]
    vt = vt_ref[0]
    adj = jnp.zeros((N, N), f32)
    for k in range(3):
        adj = adj + jnp.maximum(
            jnp.dot(u[k], vt[k], preferred_element_type=f32), 0.0)
    # TODO(synk): Dropout(0.8) on the spatial adjacency is eval-mode identity.
    h3 = hcat.reshape(2 * B * T, N, C)                        # (48, N, C)
    mixed = jnp.einsum(
        'rnm,rmc->rnc',
        jnp.broadcast_to(adj, (2 * B * T, N, N)), h3,
        preferred_element_type=f32)                           # (48, N, C)
    zz = jnp.dot(mixed.reshape(RN, C), gdw_ref[0],
                 preferred_element_type=f32) + gdb_ref[0]     # (384, 2C)
    s = (zz[:, :C] * jax.nn.sigmoid(zz[:, C:])).reshape(2 * B, T, N, C) + hcat

    # -------- two dtgnn branches: temporal mix via kron(adj, I_N) + fc + relu -
    s3 = s.reshape(2 * B, TN, C)                              # (2B, 96, C)

    def _dtgnn(kron_ref, fcw_ref, fcb_ref):
        kron = jnp.broadcast_to(kron_ref[0], (2 * B, 3 * TN, TN))
        mix = jnp.einsum('bij,bjc->bic', kron, s3,
                         preferred_element_type=f32)          # (2B, 3*TN, C)
        fcw = fcw_ref[0]                                      # (3C, C)
        acc = jnp.zeros((RN, C), f32)
        for k in range(3):
            blk = mix[:, k * TN:(k + 1) * TN, :].reshape(RN, C)
            acc = acc + jnp.dot(blk, fcw[k * C:(k + 1) * C, :],
                                preferred_element_type=f32)
        y = jnp.maximum(acc + fcb_ref[0], 0.0).reshape(2 * B, T, N, C)
        return y + s                                          # inner residual

    xo = _dtgnn(k1_ref, f1w_ref, f1b_ref) + s                 # variable-block residual
    yo = _dtgnn(k2_ref, f2w_ref, f2b_ref) + s
    acc_v_s[...] += yo                                        # [vy ; dvy] streams
    state_s[...] = hcat - xo                                  # next-module xh / dx

    # -------- last module: shared re-embedding, renorm, Huber loss ------------
    @pl.when(m == NUM_MODULES - 1)
    def _final():
        re_w = re_wt_ref[...].reshape(1, 1, 1, C)
        re_b = re_b_ref[...].reshape(1, 1, 1) * NUM_MODULES   # bias once per module
        s_iy = acc_iy_s[...]
        s_v = acc_v_s[...]
        s_vy, s_dvy = s_v[:B], s_v[B:]

        def _re(acc4):                                        # (B,T,N,C) -> (B,T,N)
            return (jnp.sum(acc4 * re_w, axis=-1) + re_b) * STD + MEAN

        iys_ref[...] = _re(s_iy)
        ys_ref[...] = _re(s_iy + s_vy)
        vys = _re(s_vy)
        dvys = _re(s_dvy)
        d = vys - dvys
        ad = jnp.abs(d)
        hub = jnp.where(ad < 1.0, 0.5 * d * d, ad - 0.5)      # Huber(delta=1)
        tot = jnp.sum(jnp.sum(jnp.sum(hub, axis=2, keepdims=True),
                              axis=1, keepdims=True),
                      axis=0, keepdims=True)                  # (1,1,1)
        loss_ref[...] = tot.reshape(1, 1) * (1.0 / (B * T * N))


# --------------------------- spec / glue helpers ---------------------------
def _mod_spec(*shape):
    z = (0,) * len(shape)
    return pl.BlockSpec((1,) + tuple(shape), lambda m, _z=z: (m,) + _z)


def _glob_spec(*shape):
    z = (0,) * len(shape)
    return pl.BlockSpec(tuple(shape), lambda m, _z=z: _z)


def _expand_time_adj(adj):
    # (M, 3T, T) -> (M, 3T*N, T*N) = kron(adj, I_N): the temporal graph mix
    # becomes a plain batched matmul over (t*N + n) rows (no in-kernel transpose).
    eye_n = jnp.eye(N, dtype=adj.dtype)
    k = adj[:, :, None, :, None] * eye_n[None, None, :, None, :]
    return k.reshape(adj.shape[0], 3 * TN, TN)


# ------------------------------- forward pass -------------------------------
def forward(params, x, ti, di, delta):
    p = params
    # ---- current / label window indices (same math as the reference) ----
    yti = (ti + PRED) % NUM_TIMES
    ydi = jnp.where(yti < PRED, di + 1, di) % NUM_DAYS
    ti2 = jnp.concatenate([ti, yti], axis=0)                  # (2B,)
    di2 = jnp.concatenate([di, ydi], axis=0)
    tt = (ti2[:, None] + jnp.arange(T, dtype=jnp.int32)[None, :]) % NUM_TIMES
    dd = jnp.broadcast_to(di2[:, None], (2 * B, T))
    dd = jnp.where(tt < PRED, dd + 1, dd) % NUM_DAYS

    # ---- glue: int gathers, stacking, kron expansion (no heavy compute) ----
    tem = p["time_emb"][:, tt].reshape(NUM_MODULES, R2, C)
    day = p["day_emb"][:, dd].reshape(NUM_MODULES, R2, C)
    xdx = jnp.concatenate([x, x + delta], axis=0).reshape(R2, N, F)
    kron1 = _expand_time_adj(p["t1_adj"])
    kron2 = _expand_time_adj(p["t2_adj"])
    re_wt = p["re_w"].reshape(1, C)
    re_b = p["re_b"].reshape(1, 1)

    operands = (
        xdx, p["emb_w"], p["emb_b"], re_wt, re_b,
        tem, day, p["node_emb"],
        p["fc1_w"], p["fc1_b"], p["fc2_w"], p["fc2_b"], p["fc3_w"], p["fc3_b"],
        p["glu_inv_w"], p["glu_inv_b"],
        p["ds_u"], p["ds_vt"], p["glu_ds_w"], p["glu_ds_b"],
        kron1, p["t1_fc_w"], p["t1_fc_b"],
        kron2, p["t2_fc_w"], p["t2_fc_b"],
    )
    in_specs = [
        _glob_spec(R2, N, F), _glob_spec(F, C), _glob_spec(1, C),
        _glob_spec(1, C), _glob_spec(1, 1),
        _mod_spec(R2, C), _mod_spec(R2, C), _mod_spec(N, C),
        _mod_spec(C, C), _mod_spec(1, C), _mod_spec(C, C), _mod_spec(1, C),
        _mod_spec(C, C), _mod_spec(1, C),
        _mod_spec(C, 2 * C), _mod_spec(1, 2 * C),
        _mod_spec(3, N, LATENT), _mod_spec(3, LATENT, N),
        _mod_spec(C, 2 * C), _mod_spec(1, 2 * C),
        _mod_spec(3 * TN, TN), _mod_spec(3 * C, C), _mod_spec(1, C),
        _mod_spec(3 * TN, TN), _mod_spec(3 * C, C), _mod_spec(1, C),
    ]
    out_specs = [
        pl.BlockSpec((B, T, N), lambda m: (0, 0, 0)),
        pl.BlockSpec((B, T, N), lambda m: (0, 0, 0)),
        pl.BlockSpec((1, 1), lambda m: (0, 0)),
    ]
    out_shape = (
        jax.ShapeDtypeStruct((B, T, N), jnp.float32),
        jax.ShapeDtypeStruct((B, T, N), jnp.float32),
        jax.ShapeDtypeStruct((1, 1), jnp.float32),
    )

    ys, iys, loss = pl.pallas_call(
        _rdnet_kernel,
        out_shape=out_shape,
        grid_spec=pltpu.PrefetchScalarGridSpec(
            num_scalar_prefetch=0,
            grid=(NUM_MODULES,),
            in_specs=in_specs,
            out_specs=out_specs,
            scratch_shapes=[
                pltpu.VMEM((2 * B, T, N, C), jnp.float32),   # xh | dx residual state
                pltpu.VMEM((B, T, N, C), jnp.float32),       # sum_m iy
                pltpu.VMEM((2 * B, T, N, C), jnp.float32),   # sum_m [vy | dvy]
            ],
        ),
        compiler_params=pltpu.CompilerParams(
            dimension_semantics=("arbitrary",)),
    )(*operands)
    return ys, iys, loss[0, 0]


# --------------------------- parameter construction -------------------------
class _KeyGen:
    def __init__(self, key):
        self._key = key

    def __call__(self):
        self._key, sub = jax.random.split(self._key)
        return sub


def _w(kg, shape, scale=0.1):
    return scale * jax.random.normal(kg(), shape, dtype=jnp.float32)


def init_params(key):
    kg = _KeyGen(key)
    M = NUM_MODULES
    return {
        "emb_w": _w(kg, (F, C)), "emb_b": _w(kg, (1, C), 0.01),
        "re_w": _w(kg, (C, F)), "re_b": _w(kg, (1, F), 0.01),
        "time_emb": _w(kg, (M, NUM_TIMES, C)),
        "day_emb": _w(kg, (M, NUM_DAYS, C)),
        "node_emb": _w(kg, (M, N, C)),
        "fc1_w": _w(kg, (M, C, C)), "fc1_b": _w(kg, (M, 1, C), 0.01),
        "fc2_w": _w(kg, (M, C, C)), "fc2_b": _w(kg, (M, 1, C), 0.01),
        "fc3_w": _w(kg, (M, C, C)), "fc3_b": _w(kg, (M, 1, C), 0.01),
        "glu_inv_w": _w(kg, (M, C, 2 * C)), "glu_inv_b": _w(kg, (M, 1, 2 * C), 0.01),
        "ds_u": _w(kg, (M, 3, N, LATENT)), "ds_vt": _w(kg, (M, 3, LATENT, N)),
        "glu_ds_w": _w(kg, (M, C, 2 * C)), "glu_ds_b": _w(kg, (M, 1, 2 * C), 0.01),
        "t1_adj": _w(kg, (M, 3 * T, T)),
        "t1_fc_w": _w(kg, (M, 3 * C, C)), "t1_fc_b": _w(kg, (M, 1, C), 0.01),
        "t2_adj": _w(kg, (M, 3 * T, T)),
        "t2_fc_w": _w(kg, (M, 3 * C, C)), "t2_fc_b": _w(kg, (M, 1, C), 0.01),
    }


# ---------------------------------- driver ----------------------------------
if __name__ == "__main__":
    key = jax.random.PRNGKey(0)
    kp, kx, kd, kt, kdi = jax.random.split(key, 5)
    params = init_params(kp)

    x = jax.random.normal(kx, (B, T, N, F), dtype=jnp.float32)
    delta = 0.1 * jax.random.normal(kd, (B, T, N, F), dtype=jnp.float32)
    ti = jax.random.randint(kt, (B,), 0, NUM_TIMES, dtype=jnp.int32)
    di = jax.random.randint(kdi, (B,), 0, NUM_DAYS, dtype=jnp.int32)

    fwd = jax.jit(functools.partial(forward, params))
    ys, iys, loss = fwd(x, ti, di, delta)
    jax.block_until_ready((ys, iys, loss))

    assert ys.shape == (B, TDX, N)
    assert iys.shape == (B, TDX, N)
    assert loss.shape == ()
    print("KERNEL_OK")
</pallas_src>

<mosaic_0001>
module attributes {stable_mosaic.version = 11 : i64} {
  func.func @_rdnet_kernel(%arg0: i32, %arg1: memref<48x8x1xf32, #tpu.memory_space<vmem>>, %arg2: memref<1x32xf32, #tpu.memory_space<vmem>>, %arg3: memref<1x32xf32, #tpu.memory_space<vmem>>, %arg4: memref<1x32xf32, #tpu.memory_space<vmem>>, %arg5: memref<1x1xf32, #tpu.memory_space<vmem>>, %arg6: memref<1x48x32xf32, #tpu.memory_space<vmem>>, %arg7: memref<1x48x32xf32, #tpu.memory_space<vmem>>, %arg8: memref<1x8x32xf32, #tpu.memory_space<vmem>>, %arg9: memref<1x32x32xf32, #tpu.memory_space<vmem>>, %arg10: memref<1x1x32xf32, #tpu.memory_space<vmem>>, %arg11: memref<1x32x32xf32, #tpu.memory_space<vmem>>, %arg12: memref<1x1x32xf32, #tpu.memory_space<vmem>>, %arg13: memref<1x32x32xf32, #tpu.memory_space<vmem>>, %arg14: memref<1x1x32xf32, #tpu.memory_space<vmem>>, %arg15: memref<1x32x64xf32, #tpu.memory_space<vmem>>, %arg16: memref<1x1x64xf32, #tpu.memory_space<vmem>>, %arg17: memref<1x3x8x8xf32, #tpu.memory_space<vmem>>, %arg18: memref<1x3x8x8xf32, #tpu.memory_space<vmem>>, %arg19: memref<1x32x64xf32, #tpu.memory_space<vmem>>, %arg20: memref<1x1x64xf32, #tpu.memory_space<vmem>>, %arg21: memref<1x288x96xf32, #tpu.memory_space<vmem>>, %arg22: memref<1x96x32xf32, #tpu.memory_space<vmem>>, %arg23: memref<1x1x32xf32, #tpu.memory_space<vmem>>, %arg24: memref<1x288x96xf32, #tpu.memory_space<vmem>>, %arg25: memref<1x96x32xf32, #tpu.memory_space<vmem>>, %arg26: memref<1x1x32xf32, #tpu.memory_space<vmem>>, %arg27: memref<2x12x8xf32, #tpu.memory_space<vmem>>, %arg28: memref<2x12x8xf32, #tpu.memory_space<vmem>>, %arg29: memref<1x1xf32, #tpu.memory_space<vmem>>, %arg30: memref<4x12x8x32xf32, #tpu.memory_space<vmem>>, %arg31: memref<2x12x8x32xf32, #tpu.memory_space<vmem>>, %arg32: memref<4x12x8x32xf32, #tpu.memory_space<vmem>>) attributes {dimension_semantics = [#tpu.dimension_semantics<arbitrary>], iteration_bounds = array<i64: 4>, scalar_prefetch = 0 : i64, scratch_operands = 3 : i64, tpu.core_type = #tpu.core_type<tc>, window_params = [{pipeline_mode = #tpu.pipeline_mode<synchronous>, transform_indices = @transform_0, window_bounds = array<i64: 48, 8, 1>}, {pipeline_mode = #tpu.pipeline_mode<synchronous>, transform_indices = @transform_1, window_bounds = array<i64: 1, 32>}, {pipeline_mode = #tpu.pipeline_mode<synchronous>, transform_indices = @transform_2, window_bounds = array<i64: 1, 32>}, {pipeline_mode = #tpu.pipeline_mode<synchronous>, transform_indices = @transform_3, window_bounds = array<i64: 1, 32>}, {pipeline_mode = #tpu.pipeline_mode<synchronous>, transform_indices = @transform_4, window_bounds = array<i64: 1, 1>}, {transform_indices = @transform_5, window_bounds = array<i64: 1, 48, 32>}, {transform_indices = @transform_6, window_bounds = array<i64: 1, 48, 32>}, {transform_indices = @transform_7, window_bounds = array<i64: 1, 8, 32>}, {transform_indices = @transform_8, window_bounds = array<i64: 1, 32, 32>}, {transform_indices = @transform_9, window_bounds = array<i64: 1, 1, 32>}, {transform_indices = @transform_10, window_bounds = array<i64: 1, 32, 32>}, {transform_indices = @transform_11, window_bounds = array<i64: 1, 1, 32>}, {transform_indices = @transform_12, window_bounds = array<i64: 1, 32, 32>}, {transform_indices = @transform_13, window_bounds = array<i64: 1, 1, 32>}, {transform_indices = @transform_14, window_bounds = array<i64: 1, 32, 64>}, {transform_indices = @transform_15, window_bounds = array<i64: 1, 1, 64>}, {transform_indices = @transform_16, window_bounds = array<i64: 1, 3, 8, 8>}, {transform_indices = @transform_17, window_bounds = array<i64: 1, 3, 8, 8>}, {transform_indices = @transform_18, window_bounds = array<i64: 1, 32, 64>}, {transform_indices = @transform_19, window_bounds = array<i64: 1, 1, 64>}, {transform_indices = @transform_20, window_bounds = array<i64: 1, 288, 96>}, {transform_indices = @transform_21, window_bounds = array<i64: 1, 96, 32>}, {transform_indices = @transform_22, window_bounds = array<i64: 1, 1, 32>}, {transform_indices = @transform_23, window_bounds = array<i64: 1, 288, 96>}, {transform_indices = @transform_24, window_bounds = array<i64: 1, 96, 32>}, {transform_indices = @transform_25, window_bounds = array<i64: 1, 1, 32>}, {pipeline_mode = #tpu.pipeline_mode<synchronous>, transform_indices = @transform_26, window_bounds = array<i64: 2, 12, 8>}, {pipeline_mode = #tpu.pipeline_mode<synchronous>, transform_indices = @transform_27, window_bounds = array<i64: 2, 12, 8>}, {pipeline_mode = #tpu.pipeline_mode<synchronous>, transform_indices = @transform_28, window_bounds = array<i64: 1, 1>}]} {
    %c0_i32 = arith.constant 0 : i32
    %0 = arith.cmpi eq, %arg0, %c0_i32 : i32
    %1 = arith.extui %0 : i1 to i32
    %c0_i32_0 = arith.constant 0 : i32
    %2 = arith.cmpi ne, %1, %c0_i32_0 : i32
    scf.if %2 {
      %c0_119 = arith.constant 0 : index
      %c0_120 = arith.constant 0 : index
      %c0_121 = arith.constant 0 : index
      %191 = vector.load %arg1[%c0_119, %c0_120, %c0_121] : memref<48x8x1xf32, #tpu.memory_space<vmem>>, vector<48x8x1xf32>
      %c0_122 = arith.constant 0 : index
      %c0_123 = arith.constant 0 : index
      %192 = vector.load %arg2[%c0_122, %c0_123] : memref<1x32xf32, #tpu.memory_space<vmem>>, vector<1x32xf32>
      %193 = vector.shape_cast %192 : vector<1x32xf32> to vector<1x1x32xf32>
      %c0_124 = arith.constant 0 : index
      %c0_125 = arith.constant 0 : index
      %194 = vector.load %arg3[%c0_124, %c0_125] : memref<1x32xf32, #tpu.memory_space<vmem>>, vector<1x32xf32>
      %195 = vector.shape_cast %194 : vector<1x32xf32> to vector<1x1x32xf32>
      %196 = vector.broadcast %191 : vector<48x8x1xf32> to vector<48x8x32xf32>
      %197 = vector.broadcast %193 : vector<1x1x32xf32> to vector<48x8x32xf32>
      %198 = arith.mulf %196, %197 : vector<48x8x32xf32>
      %199 = vector.broadcast %195 : vector<1x1x32xf32> to vector<48x8x32xf32>
      %200 = arith.addf %198, %199 : vector<48x8x32xf32>
      %cst_126 = arith.constant 0.000000e+00 : f32
      %201 = vector.broadcast %cst_126 : f32 to vector<48x8x32xf32>
      %202 = arith.maximumf %200, %201 : vector<48x8x32xf32>
      %203 = vector.shape_cast %202 : vector<48x8x32xf32> to vector<4x12x8x32xf32>
      %c0_127 = arith.constant 0 : index
      %c0_128 = arith.constant 0 : index
      %c0_129 = arith.constant 0 : index
      %c0_130 = arith.constant 0 : index
      %204 = vector.load %arg30[%c0_127, %c0_128, %c0_129, %c0_130] : memref<4x12x8x32xf32, #tpu.memory_space<vmem>>, vector<4x12x8x32xf32>
      tpu.vector_store %arg30[%c0_127, %c0_128, %c0_129, %c0_130], %203 {strides = array<i32>} : memref<4x12x8x32xf32, #tpu.memory_space<vmem>>, vector<4x12x8x32xf32>,
      %cst_131 = arith.constant 0.000000e+00 : f32
      %205 = vector.broadcast %cst_131 : f32 to vector<2x12x8x32xf32>
      %c0_132 = arith.constant 0 : index
      %c0_133 = arith.constant 0 : index
      %c0_134 = arith.constant 0 : index
      %c0_135 = arith.constant 0 : index
      %206 = vector.load %arg31[%c0_132, %c0_133, %c0_134, %c0_135] : memref<2x12x8x32xf32, #tpu.memory_space<vmem>>, vector<2x12x8x32xf32>
      tpu.vector_store %arg31[%c0_132, %c0_133, %c0_134, %c0_135], %205 {strides = array<i32>} : memref<2x12x8x32xf32, #tpu.memory_space<vmem>>, vector<2x12x8x32xf32>,
      %cst_136 = arith.constant 0.000000e+00 : f32
      %207 = vector.broadcast %cst_136 : f32 to vector<4x12x8x32xf32>
      %c0_137 = arith.constant 0 : index
      %c0_138 = arith.constant 0 : index
      %c0_139 = arith.constant 0 : index
      %c0_140 = arith.constant 0 : index
      %208 = vector.load %arg32[%c0_137, %c0_138, %c0_139, %c0_140] : memref<4x12x8x32xf32, #tpu.memory_space<vmem>>, vector<4x12x8x32xf32>
      tpu.vector_store %arg32[%c0_137, %c0_138, %c0_139, %c0_140], %207 {strides = array<i32>} : memref<4x12x8x32xf32, #tpu.memory_space<vmem>>, vector<4x12x8x32xf32>,
    } else {
    }
    %c0 = arith.constant 0 : index
    %c0_1 = arith.constant 0 : index
    %c0_2 = arith.constant 0 : index
    %3 = vector.load %arg6[%c0, %c0_1, %c0_2] : memref<1x48x32xf32, #tpu.memory_space<vmem>>, vector<1x48x32xf32>
    %4 = vector.shape_cast %3 : vector<1x48x32xf32> to vector<48x32xf32>
    %c0_3 = arith.constant 0 : index
    %c0_4 = arith.constant 0 : index
    %c0_5 = arith.constant 0 : index
    %5 = vector.load %arg9[%c0_3, %c0_4, %c0_5] : memref<1x32x32xf32, #tpu.memory_space<vmem>>, vector<1x32x32xf32>
    %6 = vector.shape_cast %5 : vector<1x32x32xf32> to vector<32x32xf32>
    %cst = arith.constant dense<0.000000e+00> : vector<48x32xf32>
    %7 = tpu.matmul %4, %6, %cst {dimension_numbers = #tpu.dot_dimension_numbers<[1], [0], [0], [1], [0, 0, 1, 1], [], []>} : vector<48x32xf32>, vector<32x32xf32>, vector<48x32xf32> -> vector<48x32xf32>
    %c0_6 = arith.constant 0 : index
    %c0_7 = arith.constant 0 : index
    %c0_8 = arith.constant 0 : index
    %8 = vector.load %arg10[%c0_6, %c0_7, %c0_8] : memref<1x1x32xf32, #tpu.memory_space<vmem>>, vector<1x1x32xf32>
    %9 = vector.shape_cast %8 : vector<1x1x32xf32> to vector<1x32xf32>
    %10 = vector.broadcast %9 : vector<1x32xf32> to vector<48x32xf32>
    %11 = arith.addf %7, %10 : vector<48x32xf32>
    %cst_9 = arith.constant 0.000000e+00 : f32
    %12 = vector.broadcast %cst_9 : f32 to vector<48x32xf32>
    %13 = arith.maximumf %11, %12 : vector<48x32xf32>
    %c0_10 = arith.constant 0 : index
    %c0_11 = arith.constant 0 : index
    %c0_12 = arith.constant 0 : index
    %14 = vector.load %arg7[%c0_10, %c0_11, %c0_12] : memref<1x48x32xf32, #tpu.memory_space<vmem>>, vector<1x48x32xf32>
    %15 = vector.shape_cast %14 : vector<1x48x32xf32> to vector<48x32xf32>
    %c0_13 = arith.constant 0 : index
    %c0_14 = arith.constant 0 : index
    %c0_15 = arith.constant 0 : index
    %16 = vector.load %arg11[%c0_13, %c0_14, %c0_15] : memref<1x32x32xf32, #tpu.memory_space<vmem>>, vector<1x32x32xf32>
    %17 = vector.shape_cast %16 : vector<1x32x32xf32> to vector<32x32xf32>
    %cst_16 = arith.constant dense<0.000000e+00> : vector<48x32xf32>
    %18 = tpu.matmul %15, %17, %cst_16 {dimension_numbers = #tpu.dot_dimension_numbers<[1], [0], [0], [1], [0, 0, 1, 1], [], []>} : vector<48x32xf32>, vector<32x32xf32>, vector<48x32xf32> -> vector<48x32xf32>
    %c0_17 = arith.constant 0 : index
    %c0_18 = arith.constant 0 : index
    %c0_19 = arith.constant 0 : index
    %19 = vector.load %arg12[%c0_17, %c0_18, %c0_19] : memref<1x1x32xf32, #tpu.memory_space<vmem>>, vector<1x1x32xf32>
    %20 = vector.shape_cast %19 : vector<1x1x32xf32> to vector<1x32xf32>
    %21 = vector.broadcast %20 : vector<1x32xf32> to vector<48x32xf32>
    %22 = arith.addf %18, %21 : vector<48x32xf32>
    %cst_20 = arith.constant 0.000000e+00 : f32
    %23 = vector.broadcast %cst_20 : f32 to vector<48x32xf32>
    %24 = arith.maximumf %22, %23 : vector<48x32xf32>
    %c0_21 = arith.constant 0 : index
    %c0_22 = arith.constant 0 : index
    %c0_23 = arith.constant 0 : index
    %25 = vector.load %arg8[%c0_21, %c0_22, %c0_23] : memref<1x8x32xf32, #tpu.memory_space<vmem>>, vector<1x8x32xf32>
    %26 = vector.shape_cast %25 : vector<1x8x32xf32> to vector<8x32xf32>
    %c0_24 = arith.constant 0 : index
    %c0_25 = arith.constant 0 : index
    %c0_26 = arith.constant 0 : index
    %27 = vector.load %arg13[%c0_24, %c0_25, %c0_26] : memref<1x32x32xf32, #tpu.memory_space<vmem>>, vector<1x32x32xf32>
    %28 = vector.shape_cast %27 : vector<1x32x32xf32> to vector<32x32xf32>
    %cst_27 = arith.constant dense<0.000000e+00> : vector<8x32xf32>
    %29 = tpu.matmul %26, %28, %cst_27 {dimension_numbers = #tpu.dot_dimension_numbers<[1], [0], [0], [1], [0, 0, 1, 1], [], []>} : vector<8x32xf32>, vector<32x32xf32>, vector<8x32xf32> -> vector<8x32xf32>
    %c0_28 = arith.constant 0 : index
    %c0_29 = arith.constant 0 : index
    %c0_30 = arith.constant 0 : index
    %30 = vector.load %arg14[%c0_28, %c0_29, %c0_30] : memref<1x1x32xf32, #tpu.memory_space<vmem>>, vector<1x1x32xf32>
    %31 = vector.shape_cast %30 : vector<1x1x32xf32> to vector<1x32xf32>
    %32 = vector.broadcast %31 : vector<1x32xf32> to vector<8x32xf32>
    %33 = arith.addf %29, %32 : vector<8x32xf32>
    %cst_31 = arith.constant 0.000000e+00 : f32
    %34 = vector.broadcast %cst_31 : f32 to vector<8x32xf32>
    %35 = arith.maximumf %33, %34 : vector<8x32xf32>
    %36 = arith.addf %13, %24 : vector<48x32xf32>
    %37 = vector.shape_cast %36 : vector<48x32xf32> to vector<48x1x32xf32>
    %38 = vector.shape_cast %35 : vector<8x32xf32> to vector<1x8x32xf32>
    %39 = vector.broadcast %37 : vector<48x1x32xf32> to vector<48x8x32xf32>
    %40 = vector.broadcast %38 : vector<1x8x32xf32> to vector<48x8x32xf32>
    %41 = arith.addf %39, %40 : vector<48x8x32xf32>
    %42 = vector.shape_cast %41 : vector<48x8x32xf32> to vector<384x32xf32>
    %c0_32 = arith.constant 0 : index
    %c0_33 = arith.constant 0 : index
    %c0_34 = arith.constant 0 : index
    %43 = vector.load %arg15[%c0_32, %c0_33, %c0_34] : memref<1x32x64xf32, #tpu.memory_space<vmem>>, vector<1x32x64xf32>
    %44 = vector.shape_cast %43 : vector<1x32x64xf32> to vector<32x64xf32>
    %cst_35 = arith.constant dense<0.000000e+00> : vector<384x64xf32>
    %45 = tpu.matmul %42, %44, %cst_35 {dimension_numbers = #tpu.dot_dimension_numbers<[1], [0], [0], [1], [0, 0, 1, 1], [], []>} : vector<384x32xf32>, vector<32x64xf32>, vector<384x64xf32> -> vector<384x64xf32>
    %c0_36 = arith.constant 0 : index
    %c0_37 = arith.constant 0 : index
    %c0_38 = arith.constant 0 : index
    %46 = vector.load %arg16[%c0_36, %c0_37, %c0_38] : memref<1x1x64xf32, #tpu.memory_space<vmem>>, vector<1x1x64xf32>
    %47 = vector.shape_cast %46 : vector<1x1x64xf32> to vector<1x64xf32>
    %48 = vector.broadcast %47 : vector<1x64xf32> to vector<384x64xf32>
    %49 = arith.addf %45, %48 : vector<384x64xf32>
    %50 = vector.extract_strided_slice %49 {offsets = [0, 0], sizes = [384, 32], strides = [1, 1]} : vector<384x64xf32> to vector<384x32xf32>
    %51 = vector.extract_strided_slice %49 {offsets = [0, 32], sizes = [384, 32], strides = [1, 1]} : vector<384x64xf32> to vector<384x32xf32>
    %52 = arith.negf %51 : vector<384x32xf32>
    %53 = math.exp %52 : vector<384x32xf32>
    %cst_39 = arith.constant 1.000000e+00 : f32
    %54 = vector.broadcast %cst_39 : f32 to vector<384x32xf32>
    %55 = arith.addf %54, %53 : vector<384x32xf32>
    %56 = arith.divf %54, %55 : vector<384x32xf32>
    %57 = arith.mulf %50, %56 : vector<384x32xf32>
    %58 = vector.shape_cast %57 : vector<384x32xf32> to vector<4x12x8x32xf32>
    %59 = vector.extract_strided_slice %58 {offsets = [0, 0, 0, 0], sizes = [2, 12, 8, 32], strides = [1, 1, 1, 1]} : vector<4x12x8x32xf32> to vector<2x12x8x32xf32>
    %60 = vector.extract_strided_slice %58 {offsets = [2, 0, 0, 0], sizes = [2, 12, 8, 32], strides = [1, 1, 1, 1]} : vector<4x12x8x32xf32> to vector<2x12x8x32xf32>
    %c0_40 = arith.constant 0 : index
    %c0_41 = arith.constant 0 : index
    %c0_42 = arith.constant 0 : index
    %c0_43 = arith.constant 0 : index
    %61 = vector.load %arg31[%c0_40, %c0_41, %c0_42, %c0_43] : memref<2x12x8x32xf32, #tpu.memory_space<vmem>>, vector<2x12x8x32xf32>
    %62 = arith.addf %61, %60 : vector<2x12x8x32xf32>
    %c0_44 = arith.constant 0 : index
    %c0_45 = arith.constant 0 : index
    %c0_46 = arith.constant 0 : index
    %c0_47 = arith.constant 0 : index
    %63 = vector.load %arg31[%c0_44, %c0_45, %c0_46, %c0_47] : memref<2x12x8x32xf32, #tpu.memory_space<vmem>>, vector<2x12x8x32xf32>
    tpu.vector_store %arg31[%c0_44, %c0_45, %c0_46, %c0_47], %62 {strides = array<i32>} : memref<2x12x8x32xf32, #tpu.memory_space<vmem>>, vector<2x12x8x32xf32>,
    %c0_48 = arith.constant 0 : index
    %c0_49 = arith.constant 0 : index
    %c0_50 = arith.constant 0 : index
    %c0_51 = arith.constant 0 : index
    %64 = vector.load %arg30[%c0_48, %c0_49, %c0_50, %c0_51] : memref<4x12x8x32xf32, #tpu.memory_space<vmem>>, vector<4x12x8x32xf32>
    %65 = tpu.concatenate %59, %59 in 0 : vector<2x12x8x32xf32>, vector<2x12x8x32xf32> -> vector<4x12x8x32xf32>
    %66 = arith.subf %64, %65 : vector<4x12x8x32xf32>
    %c0_52 = arith.constant 0 : index
    %c0_53 = arith.constant 0 : index
    %c0_54 = arith.constant 0 : index
    %c0_55 = arith.constant 0 : index
    %67 = vector.load %arg17[%c0_52, %c0_53, %c0_54, %c0_55] : memref<1x3x8x8xf32, #tpu.memory_space<vmem>>, vector<1x3x8x8xf32>
    %68 = vector.shape_cast %67 : vector<1x3x8x8xf32> to vector<3x8x8xf32>
    %c0_56 = arith.constant 0 : index
    %c0_57 = arith.constant 0 : index
    %c0_58 = arith.constant 0 : index
    %c0_59 = arith.constant 0 : index
    %69 = vector.load %arg18[%c0_56, %c0_57, %c0_58, %c0_59] : memref<1x3x8x8xf32, #tpu.memory_space<vmem>>, vector<1x3x8x8xf32>
    %70 = vector.shape_cast %69 : vector<1x3x8x8xf32> to vector<3x8x8xf32>
    %cst_60 = arith.constant 0.000000e+00 : f32
    %71 = vector.broadcast %cst_60 : f32 to vector<8x8xf32>
    %72 = vector.extract_strided_slice %68 {offsets = [0, 0, 0], sizes = [1, 8, 8], strides = [1, 1, 1]} : vector<3x8x8xf32> to vector<1x8x8xf32>
    %73 = vector.shape_cast %72 : vector<1x8x8xf32> to vector<8x8xf32>
    %74 = vector.extract_strided_slice %70 {offsets = [0, 0, 0], sizes = [1, 8, 8], strides = [1, 1, 1]} : vector<3x8x8xf32> to vector<1x8x8xf32>
    %75 = vector.shape_cast %74 : vector<1x8x8xf32> to vector<8x8xf32>
    %cst_61 = arith.constant dense<0.000000e+00> : vector<8x8xf32>
    %76 = tpu.matmul %73, %75, %cst_61 {dimension_numbers = #tpu.dot_dimension_numbers<[1], [0], [0], [1], [0, 0, 1, 1], [], []>} : vector<8x8xf32>, vector<8x8xf32>, vector<8x8xf32> -> vector<8x8xf32>
    %cst_62 = arith.constant 0.000000e+00 : f32
    %77 = vector.broadcast %cst_62 : f32 to vector<8x8xf32>
    %78 = arith.maximumf %76, %77 : vector<8x8xf32>
    %79 = arith.addf %71, %78 : vector<8x8xf32>
    %80 = vector.extract_strided_slice %68 {offsets = [1, 0, 0], sizes = [1, 8, 8], strides = [1, 1, 1]} : vector<3x8x8xf32> to vector<1x8x8xf32>
    %81 = vector.shape_cast %80 : vector<1x8x8xf32> to vector<8x8xf32>
    %82 = vector.extract_strided_slice %70 {offsets = [1, 0, 0], sizes = [1, 8, 8], strides = [1, 1, 1]} : vector<3x8x8xf32> to vector<1x8x8xf32>
    %83 = vector.shape_cast %82 : vector<1x8x8xf32> to vector<8x8xf32>
    %cst_63 = arith.constant dense<0.000000e+00> : vector<8x8xf32>
    %84 = tpu.matmul %81, %83, %cst_63 {dimension_numbers = #tpu.dot_dimension_numbers<[1], [0], [0], [1], [0, 0, 1, 1], [], []>} : vector<8x8xf32>, vector<8x8xf32>, vector<8x8xf32> -> vector<8x8xf32>
    %cst_64 = arith.constant 0.000000e+00 : f32
    %85 = vector.broadcast %cst_64 : f32 to vector<8x8xf32>
    %86 = arith.maximumf %84, %85 : vector<8x8xf32>
    %87 = arith.addf %79, %86 : vector<8x8xf32>
    %88 = vector.extract_strided_slice %68 {offsets = [2, 0, 0], sizes = [1, 8, 8], strides = [1, 1, 1]} : vector<3x8x8xf32> to vector<1x8x8xf32>
    %89 = vector.shape_cast %88 : vector<1x8x8xf32> to vector<8x8xf32>
    %90 = vector.extract_strided_slice %70 {offsets = [2, 0, 0], sizes = [1, 8, 8], strides = [1, 1, 1]} : vector<3x8x8xf32> to vector<1x8x8xf32>
    %91 = vector.shape_cast %90 : vector<1x8x8xf32> to vector<8x8xf32>
    %cst_65 = arith.constant dense<0.000000e+00> : vector<8x8xf32>
    %92 = tpu.matmul %89, %91, %cst_65 {dimension_numbers = #tpu.dot_dimension_numbers<[1], [0], [0], [1], [0, 0, 1, 1], [], []>} : vector<8x8xf32>, vector<8x8xf32>, vector<8x8xf32> -> vector<8x8xf32>
    %cst_66 = arith.constant 0.000000e+00 : f32
    %93 = vector.broadcast %cst_66 : f32 to vector<8x8xf32>
    %94 = arith.maximumf %92, %93 : vector<8x8xf32>
    %95 = arith.addf %87, %94 : vector<8x8xf32>
    %96 = vector.shape_cast %66 : vector<4x12x8x32xf32> to vector<48x8x32xf32>
    %97 = vector.shape_cast %95 : vector<8x8xf32> to vector<1x8x8xf32>
    %98 = vector.broadcast %97 : vector<1x8x8xf32> to vector<48x8x8xf32>
    "tpu.trace_start"() <{level = 10 : i32, message = "rnm,rmc->rnc"}> : () -> ()
    %cst_67 = arith.constant dense<0.000000e+00> : vector<48x8x32xf32>
    %99 = tpu.matmul %98, %96, %cst_67 {dimension_numbers = #tpu.dot_dimension_numbers<[2], [1], [1], [2], [0, 0, 0, 1, 1, 2], [0], [0]>} : vector<48x8x8xf32>, vector<48x8x32xf32>, vector<48x8x32xf32> -> vector<48x8x32xf32>
    "tpu.trace_stop"() : () -> ()
    %100 = vector.shape_cast %99 : vector<48x8x32xf32> to vector<384x32xf32>
    %c0_68 = arith.constant 0 : index
    %c0_69 = arith.constant 0 : index
    %c0_70 = arith.constant 0 : index
    %101 = vector.load %arg19[%c0_68, %c0_69, %c0_70] : memref<1x32x64xf32, #tpu.memory_space<vmem>>, vector<1x32x64xf32>
    %102 = vector.shape_cast %101 : vector<1x32x64xf32> to vector<32x64xf32>
    %cst_71 = arith.constant dense<0.000000e+00> : vector<384x64xf32>
    %103 = tpu.matmul %100, %102, %cst_71 {dimension_numbers = #tpu.dot_dimension_numbers<[1], [0], [0], [1], [0, 0, 1, 1], [], []>} : vector<384x32xf32>, vector<32x64xf32>, vector<384x64xf32> -> vector<384x64xf32>
    %c0_72 = arith.constant 0 : index
    %c0_73 = arith.constant 0 : index
    %c0_74 = arith.constant 0 : index
    %104 = vector.load %arg20[%c0_72, %c0_73, %c0_74] : memref<1x1x64xf32, #tpu.memory_space<vmem>>, vector<1x1x64xf32>
    %105 = vector.shape_cast %104 : vector<1x1x64xf32> to vector<1x64xf32>
    %106 = vector.broadcast %105 : vector<1x64xf32> to vector<384x64xf32>
    %107 = arith.addf %103, %106 : vector<384x64xf32>
    %108 = vector.extract_strided_slice %107 {offsets = [0, 0], sizes = [384, 32], strides = [1, 1]} : vector<384x64xf32> to vector<384x32xf32>
    %109 = vector.extract_strided_slice %107 {offsets = [0, 32], sizes = [384, 32], strides = [1, 1]} : vector<384x64xf32> to vector<384x32xf32>
    %110 = arith.negf %109 : vector<384x32xf32>
    %111 = math.exp %110 : vector<384x32xf32>
    %cst_75 = arith.constant 1.000000e+00 : f32
    %112 = vector.broadcast %cst_75 : f32 to vector<384x32xf32>
    %113 = arith.addf %112, %111 : vector<384x32xf32>
    %114 = arith.divf %112, %113 : vector<384x32xf32>
    %115 = arith.mulf %108, %114 : vector<384x32xf32>
    %116 = vector.shape_cast %115 : vector<384x32xf32> to vector<4x12x8x32xf32>
    %117 = arith.addf %116, %66 : vector<4x12x8x32xf32>
    %118 = vector.shape_cast %117 : vector<4x12x8x32xf32> to vector<4x96x32xf32>
    %c0_76 = arith.constant 0 : index
    %c0_77 = arith.constant 0 : index
    %c0_78 = arith.constant 0 : index
    %119 = vector.load %arg21[%c0_76, %c0_77, %c0_78] : memref<1x288x96xf32, #tpu.memory_space<vmem>>, vector<1x288x96xf32>
    %120 = vector.shape_cast %119 : vector<1x288x96xf32> to vector<288x96xf32>
    %121 = vector.shape_cast %120 : vector<288x96xf32> to vector<1x288x96xf32>
    %122 = vector.broadcast %121 : vector<1x288x96xf32> to vector<4x288x96xf32>
    "tpu.trace_start"() <{level = 10 : i32, message = "bij,bjc->bic"}> : () -> ()
    %cst_79 = arith.constant dense<0.000000e+00> : vector<4x288x32xf32>
    %123 = tpu.matmul %122, %118, %cst_79 {dimension_numbers = #tpu.dot_dimension_numbers<[2], [1], [1], [2], [0, 0, 0, 1, 1, 2], [0], [0]>} : vector<4x288x96xf32>, vector<4x96x32xf32>, vector<4x288x32xf32> -> vector<4x288x32xf32>
    "tpu.trace_stop"() : () -> ()
    %c0_80 = arith.constant 0 : index
    %c0_81 = arith.constant 0 : index
    %c0_82 = arith.constant 0 : index
    %124 = vector.load %arg22[%c0_80, %c0_81, %c0_82] : memref<1x96x32xf32, #tpu.memory_space<vmem>>, vector<1x96x32xf32>
    %125 = vector.shape_cast %124 : vector<1x96x32xf32> to vector<96x32xf32>
    %cst_83 = arith.constant 0.000000e+00 : f32
    %126 = vector.broadcast %cst_83 : f32 to vector<384x32xf32>
    %127 = vector.extract_strided_slice %123 {offsets = [0, 0, 0], sizes = [4, 96, 32], strides = [1, 1, 1]} : vector<4x288x32xf32> to vector<4x96x32xf32>
    %128 = vector.shape_cast %127 : vector<4x96x32xf32> to vector<384x32xf32>
    %129 = vector.extract_strided_slice %125 {offsets = [0, 0], sizes = [32, 32], strides = [1, 1]} : vector<96x32xf32> to vector<32x32xf32>
    %cst_84 = arith.constant dense<0.000000e+00> : vector<384x32xf32>
    %130 = tpu.matmul %128, %129, %cst_84 {dimension_numbers = #tpu.dot_dimension_numbers<[1], [0], [0], [1], [0, 0, 1, 1], [], []>} : vector<384x32xf32>, vector<32x32xf32>, vector<384x32xf32> -> vector<384x32xf32>
    %131 = arith.addf %126, %130 : vector<384x32xf32>
    %132 = vector.extract_strided_slice %123 {offsets = [0, 96, 0], sizes = [4, 96, 32], strides = [1, 1, 1]} : vector<4x288x32xf32> to vector<4x96x32xf32>
    %133 = vector.shape_cast %132 : vector<4x96x32xf32> to vector<384x32xf32>
    %134 = vector.extract_strided_slice %125 {offsets = [32, 0], sizes = [32, 32], strides = [1, 1]} : vector<96x32xf32> to vector<32x32xf32>
    %cst_85 = arith.constant dense<0.000000e+00> : vector<384x32xf32>
    %135 = tpu.matmul %133, %134, %cst_85 {dimension_numbers = #tpu.dot_dimension_numbers<[1], [0], [0], [1], [0, 0, 1, 1], [], []>} : vector<384x32xf32>, vector<32x32xf32>, vector<384x32xf32> -> vector<384x32xf32>
    %136 = arith.addf %131, %135 : vector<384x32xf32>
    %137 = vector.extract_strided_slice %123 {offsets = [0, 192, 0], sizes = [4, 96, 32], strides = [1, 1, 1]} : vector<4x288x32xf32> to vector<4x96x32xf32>
    %138 = vector.shape_cast %137 : vector<4x96x32xf32> to vector<384x32xf32>
    %139 = vector.extract_strided_slice %125 {offsets = [64, 0], sizes = [32, 32], strides = [1, 1]} : vector<96x32xf32> to vector<32x32xf32>
    %cst_86 = arith.constant dense<0.000000e+00> : vector<384x32xf32>
    %140 = tpu.matmul %138, %139, %cst_86 {dimension_numbers = #tpu.dot_dimension_numbers<[1], [0], [0], [1], [0, 0, 1, 1], [], []>} : vector<384x32xf32>, vector<32x32xf32>, vector<384x32xf32> -> vector<384x32xf32>
    %141 = arith.addf %136, %140 : vector<384x32xf32>
    %c0_87 = arith.constant 0 : index
    %c0_88 = arith.constant 0 : index
    %c0_89 = arith.constant 0 : index
    %142 = vector.load %arg23[%c0_87, %c0_88, %c0_89] : memref<1x1x32xf32, #tpu.memory_space<vmem>>, vector<1x1x32xf32>
    %143 = vector.shape_cast %142 : vector<1x1x32xf32> to vector<1x32xf32>
    %144 = vector.broadcast %143 : vector<1x32xf32> to vector<384x32xf32>
    %145 = arith.addf %141, %144 : vector<384x32xf32>
    %cst_90 = arith.constant 0.000000e+00 : f32
    %146 = vector.broadcast %cst_90 : f32 to vector<384x32xf32>
    %147 = arith.maximumf %145, %146 : vector<384x32xf32>
    %148 = vector.shape_cast %147 : vector<384x32xf32> to vector<4x12x8x32xf32>
    %149 = arith.addf %148, %117 : vector<4x12x8x32xf32>
    %150 = arith.addf %149, %117 : vector<4x12x8x32xf32>
    %c0_91 = arith.constant 0 : index
    %c0_92 = arith.constant 0 : index
    %c0_93 = arith.constant 0 : index
    %151 = vector.load %arg24[%c0_91, %c0_92, %c0_93] : memref<1x288x96xf32, #tpu.memory_space<vmem>>, vector<1x288x96xf32>
    %152 = vector.shape_cast %151 : vector<1x288x96xf32> to vector<288x96xf32>
    %153 = vector.shape_cast %152 : vector<288x96xf32> to vector<1x288x96xf32>
    %154 = vector.broadcast %153 : vector<1x288x96xf32> to vector<4x288x96xf32>
    "tpu.trace_start"() <{level = 10 : i32, message = "bij,bjc->bic"}> : () -> ()
    %cst_94 = arith.constant dense<0.000000e+00> : vector<4x288x32xf32>
    %155 = tpu.matmul %154, %118, %cst_94 {dimension_numbers = #tpu.dot_dimension_numbers<[2], [1], [1], [2], [0, 0, 0, 1, 1, 2], [0], [0]>} : vector<4x288x96xf32>, vector<4x96x32xf32>, vector<4x288x32xf32> -> vector<4x288x32xf32>
    "tpu.trace_stop"() : () -> ()
    %c0_95 = arith.constant 0 : index
    %c0_96 = arith.constant 0 : index
    %c0_97 = arith.constant 0 : index
    %156 = vector.load %arg25[%c0_95, %c0_96, %c0_97] : memref<1x96x32xf32, #tpu.memory_space<vmem>>, vector<1x96x32xf32>
    %157 = vector.shape_cast %156 : vector<1x96x32xf32> to vector<96x32xf32>
    %cst_98 = arith.constant 0.000000e+00 : f32
    %158 = vector.broadcast %cst_98 : f32 to vector<384x32xf32>
    %159 = vector.extract_strided_slice %155 {offsets = [0, 0, 0], sizes = [4, 96, 32], strides = [1, 1, 1]} : vector<4x288x32xf32> to vector<4x96x32xf32>
    %160 = vector.shape_cast %159 : vector<4x96x32xf32> to vector<384x32xf32>
    %161 = vector.extract_strided_slice %157 {offsets = [0, 0], sizes = [32, 32], strides = [1, 1]} : vector<96x32xf32> to vector<32x32xf32>
    %cst_99 = arith.constant dense<0.000000e+00> : vector<384x32xf32>
    %162 = tpu.matmul %160, %161, %cst_99 {dimension_numbers = #tpu.dot_dimension_numbers<[1], [0], [0], [1], [0, 0, 1, 1], [], []>} : vector<384x32xf32>, vector<32x32xf32>, vector<384x32xf32> -> vector<384x32xf32>
    %163 = arith.addf %158, %162 : vector<384x32xf32>
    %164 = vector.extract_strided_slice %155 {offsets = [0, 96, 0], sizes = [4, 96, 32], strides = [1, 1, 1]} : vector<4x288x32xf32> to vector<4x96x32xf32>
    %165 = vector.shape_cast %164 : vector<4x96x32xf32> to vector<384x32xf32>
    %166 = vector.extract_strided_slice %157 {offsets = [32, 0], sizes = [32, 32], strides = [1, 1]} : vector<96x32xf32> to vector<32x32xf32>
    %cst_100 = arith.constant dense<0.000000e+00> : vector<384x32xf32>
    %167 = tpu.matmul %165, %166, %cst_100 {dimension_numbers = #tpu.dot_dimension_numbers<[1], [0], [0], [1], [0, 0, 1, 1], [], []>} : vector<384x32xf32>, vector<32x32xf32>, vector<384x32xf32> -> vector<384x32xf32>
    %168 = arith.addf %163, %167 : vector<384x32xf32>
    %169 = vector.extract_strided_slice %155 {offsets = [0, 192, 0], sizes = [4, 96, 32], strides = [1, 1, 1]} : vector<4x288x32xf32> to vector<4x96x32xf32>
    %170 = vector.shape_cast %169 : vector<4x96x32xf32> to vector<384x32xf32>
    %171 = vector.extract_strided_slice %157 {offsets = [64, 0], sizes = [32, 32], strides = [1, 1]} : vector<96x32xf32> to vector<32x32xf32>
    %cst_101 = arith.constant dense<0.000000e+00> : vector<384x32xf32>
    %172 = tpu.matmul %170, %171, %cst_101 {dimension_numbers = #tpu.dot_dimension_numbers<[1], [0], [0], [1], [0, 0, 1, 1], [], []>} : vector<384x32xf32>, vector<32x32xf32>, vector<384x32xf32> -> vector<384x32xf32>
    %173 = arith.addf %168, %172 : vector<384x32xf32>
    %c0_102 = arith.constant 0 : index
    %c0_103 = arith.constant 0 : index
    %c0_104 = arith.constant 0 : index
    %174 = vector.load %arg26[%c0_102, %c0_103, %c0_104] : memref<1x1x32xf32, #tpu.memory_space<vmem>>, vector<1x1x32xf32>
    %175 = vector.shape_cast %174 : vector<1x1x32xf32> to vector<1x32xf32>
    %176 = vector.broadcast %175 : vector<1x32xf32> to vector<384x32xf32>
    %177 = arith.addf %173, %176 : vector<384x32xf32>
    %cst_105 = arith.constant 0.000000e+00 : f32
    %178 = vector.broadcast %cst_105 : f32 to vector<384x32xf32>
    %179 = arith.maximumf %177, %178 : vector<384x32xf32>
    %180 = vector.shape_cast %179 : vector<384x32xf32> to vector<4x12x8x32xf32>
    %181 = arith.addf %180, %117 : vector<4x12x8x32xf32>
    %182 = arith.addf %181, %117 : vector<4x12x8x32xf32>
    %c0_106 = arith.constant 0 : index
    %c0_107 = arith.constant 0 : index
    %c0_108 = arith.constant 0 : index
    %c0_109 = arith.constant 0 : index
    %183 = vector.load %arg32[%c0_106, %c0_107, %c0_108, %c0_109] : memref<4x12x8x32xf32, #tpu.memory_space<vmem>>, vector<4x12x8x32xf32>
    %184 = arith.addf %183, %182 : vector<4x12x8x32xf32>
    %c0_110 = arith.constant 0 : index
    %c0_111 = arith.constant 0 : index
    %c0_112 = arith.constant 0 : index
    %c0_113 = arith.constant 0 : index
    %185 = vector.load %arg32[%c0_110, %c0_111, %c0_112, %c0_113] : memref<4x12x8x32xf32, #tpu.memory_space<vmem>>, vector<4x12x8x32xf32>
    tpu.vector_store %arg32[%c0_110, %c0_111, %c0_112, %c0_113], %184 {strides = array<i32>} : memref<4x12x8x32xf32, #tpu.memory_space<vmem>>, vector<4x12x8x32xf32>,
    %186 = arith.subf %66, %150 : vector<4x12x8x32xf32>
    %c0_114 = arith.constant 0 : index
    %c0_115 = arith.constant 0 : index
    %c0_116 = arith.constant 0 : index
    %c0_117 = arith.constant 0 : index
    %187 = vector.load %arg30[%c0_114, %c0_115, %c0_116, %c0_117] : memref<4x12x8x32xf32, #tpu.memory_space<vmem>>, vector<4x12x8x32xf32>
    tpu.vector_store %arg30[%c0_114, %c0_115, %c0_116, %c0_117], %186 {strides = array<i32>} : memref<4x12x8x32xf32, #tpu.memory_space<vmem>>, vector<4x12x8x32xf32>,
    %c3_i32 = arith.constant 3 : i32
    %188 = arith.cmpi eq, %arg0, %c3_i32 : i32
    %189 = arith.extui %188 : i1 to i32
    %c0_i32_118 = arith.constant 0 : i32
    %190 = arith.cmpi ne, %189, %c0_i32_118 : i32
    scf.if %190 {
      %c0_119 = arith.constant 0 : index
      %c0_120 = arith.constant 0 : index
      %191 = vector.load %arg4[%c0_119, %c0_120] : memref<1x32xf32, #tpu.memory_space<vmem>>, vector<1x32xf32>
      %192 = vector.shape_cast %191 : vector<1x32xf32> to vector<1x1x1x32xf32>
      %c0_121 = arith.constant 0 : index
      %c0_122 = arith.constant 0 : index
      %193 = vector.load %arg5[%c0_121, %c0_122] : memref<1x1xf32, #tpu.memory_space<vmem>>, vector<1x1xf32>
      %194 = vector.shape_cast %193 : vector<1x1xf32> to vector<1x1x1xf32>
      %cst_123 = arith.constant 4.000000e+00 : f32
      %195 = vector.broadcast %cst_123 : f32 to vector<1x1x1xf32>
      %196 = arith.mulf %194, %195 : vector<1x1x1xf32>
      %c0_124 = arith.constant 0 : index
      %c0_125 = arith.constant 0 : index
      %c0_126 = arith.constant 0 : index
      %c0_127 = arith.constant 0 : index
      %197 = vector.load %arg31[%c0_124, %c0_125, %c0_126, %c0_127] : memref<2x12x8x32xf32, #tpu.memory_space<vmem>>, vector<2x12x8x32xf32>
      %c0_128 = arith.constant 0 : index
      %c0_129 = arith.constant 0 : index
      %c0_130 = arith.constant 0 : index
      %c0_131 = arith.constant 0 : index
      %198 = vector.load %arg32[%c0_128, %c0_129, %c0_130, %c0_131] : memref<4x12x8x32xf32, #tpu.memory_space<vmem>>, vector<4x12x8x32xf32>
      %199 = vector.extract_strided_slice %198 {offsets = [0, 0, 0, 0], sizes = [2, 12, 8, 32], strides = [1, 1, 1, 1]} : vector<4x12x8x32xf32> to vector<2x12x8x32xf32>
      %200 = vector.extract_strided_slice %198 {offsets = [2, 0, 0, 0], sizes = [2, 12, 8, 32], strides = [1, 1, 1, 1]} : vector<4x12x8x32xf32> to vector<2x12x8x32xf32>
      %201 = vector.broadcast %192 : vector<1x1x1x32xf32> to vector<2x12x8x32xf32>
      %202 = arith.mulf %197, %201 : vector<2x12x8x32xf32>
      %cst_132 = arith.constant dense<0.000000e+00> : vector<2x12x8xf32>
      %203 = vector.multi_reduction <add>, %202, %cst_132 [3] : vector<2x12x8x32xf32> to vector<2x12x8xf32>
      %204 = vector.broadcast %196 : vector<1x1x1xf32> to vector<2x12x8xf32>
      %205 = arith.addf %203, %204 : vector<2x12x8xf32>
      %cst_133 = arith.constant 1.000000e+01 : f32
      %206 = vector.broadcast %cst_133 : f32 to vector<2x12x8xf32>
      %207 = arith.mulf %205, %206 : vector<2x12x8xf32>
      %cst_134 = arith.constant 3.500000e+00 : f32
      %208 = vector.broadcast %cst_134 : f32 to vector<2x12x8xf32>
      %209 = arith.addf %207, %208 : vector<2x12x8xf32>
      %c0_135 = arith.constant 0 : index
      %c0_136 = arith.constant 0 : index
      %c0_137 = arith.constant 0 : index
      %210 = vector.load %arg28[%c0_135, %c0_136, %c0_137] : memref<2x12x8xf32, #tpu.memory_space<vmem>>, vector<2x12x8xf32>
      tpu.vector_store %arg28[%c0_135, %c0_136, %c0_137], %209 {strides = array<i32>} : memref<2x12x8xf32, #tpu.memory_space<vmem>>, vector<2x12x8xf32>,
      %211 = arith.addf %197, %199 : vector<2x12x8x32xf32>
      %212 = vector.broadcast %192 : vector<1x1x1x32xf32> to vector<2x12x8x32xf32>
      %213 = arith.mulf %211, %212 : vector<2x12x8x32xf32>
      %cst_138 = arith.constant dense<0.000000e+00> : vector<2x12x8xf32>
      %214 = vector.multi_reduction <add>, %213, %cst_138 [3] : vector<2x12x8x32xf32> to vector<2x12x8xf32>
      %215 = vector.broadcast %196 : vector<1x1x1xf32> to vector<2x12x8xf32>
      %216 = arith.addf %214, %215 : vector<2x12x8xf32>
      %cst_139 = arith.constant 1.000000e+01 : f32
      %217 = vector.broadcast %cst_139 : f32 to vector<2x12x8xf32>
      %218 = arith.mulf %216, %217 : vector<2x12x8xf32>
      %cst_140 = arith.constant 3.500000e+00 : f32
      %219 = vector.broadcast %cst_140 : f32 to vector<2x12x8xf32>
      %220 = arith.addf %218, %219 : vector<2x12x8xf32>
      %c0_141 = arith.constant 0 : index
      %c0_142 = arith.constant 0 : index
      %c0_143 = arith.constant 0 : index
      %221 = vector.load %arg27[%c0_141, %c0_142, %c0_143] : memref<2x12x8xf32, #tpu.memory_space<vmem>>, vector<2x12x8xf32>
      tpu.vector_store %arg27[%c0_141, %c0_142, %c0_143], %220 {strides = array<i32>} : memref<2x12x8xf32, #tpu.memory_space<vmem>>, vector<2x12x8xf32>,
      %222 = vector.broadcast %192 : vector<1x1x1x32xf32> to vector<2x12x8x32xf32>
      %223 = arith.mulf %199, %222 : vector<2x12x8x32xf32>
      %cst_144 = arith.constant dense<0.000000e+00> : vector<2x12x8xf32>
      %224 = vector.multi_reduction <add>, %223, %cst_144 [3] : vector<2x12x8x32xf32> to vector<2x12x8xf32>
      %225 = vector.broadcast %196 : vector<1x1x1xf32> to vector<2x12x8xf32>
      %226 = arith.addf %224, %225 : vector<2x12x8xf32>
      %cst_145 = arith.constant 1.000000e+01 : f32
      %227 = vector.broadcast %cst_145 : f32 to vector<2x12x8xf32>
      %228 = arith.mulf %226, %227 : vector<2x12x8xf32>
      %cst_146 = arith.constant 3.500000e+00 : f32
      %229 = vector.broadcast %cst_146 : f32 to vector<2x12x8xf32>
      %230 = arith.addf %228, %229 : vector<2x12x8xf32>
      %231 = vector.broadcast %192 : vector<1x1x1x32xf32> to vector<2x12x8x32xf32>
      %232 = arith.mulf %200, %231 : vector<2x12x8x32xf32>
      %cst_147 = arith.constant dense<0.000000e+00> : vector<2x12x8xf32>
      %233 = vector.multi_reduction <add>, %232, %cst_147 [3] : vector<2x12x8x32xf32> to vector<2x12x8xf32>
      %234 = vector.broadcast %196 : vector<1x1x1xf32> to vector<2x12x8xf32>
      %235 = arith.addf %233, %234 : vector<2x12x8xf32>
      %cst_148 = arith.constant 1.000000e+01 : f32
      %236 = vector.broadcast %cst_148 : f32 to vector<2x12x8xf32>
      %237 = arith.mulf %235, %236 : vector<2x12x8xf32>
      %cst_149 = arith.constant 3.500000e+00 : f32
      %238 = vector.broadcast %cst_149 : f32 to vector<2x12x8xf32>
      %239 = arith.addf %237, %238 : vector<2x12x8xf32>
      %240 = arith.subf %230, %239 : vector<2x12x8xf32>
      %241 = math.absf %240 : vector<2x12x8xf32>
      %cst_150 = arith.constant 1.000000e+00 : f32
      %242 = vector.broadcast %cst_150 : f32 to vector<2x12x8xf32>
      %243 = arith.cmpf olt, %241, %242 : vector<2x12x8xf32>
      %cst_151 = arith.constant 5.000000e-01 : f32
      %244 = vector.broadcast %cst_151 : f32 to vector<2x12x8xf32>
      %245 = arith.mulf %244, %240 : vector<2x12x8xf32>
      %246 = arith.mulf %245, %240 : vector<2x12x8xf32>
      %cst_152 = arith.constant 5.000000e-01 : f32
      %247 = vector.broadcast %cst_152 : f32 to vector<2x12x8xf32>
      %248 = arith.subf %241, %247 : vector<2x12x8xf32>
      %249 = arith.select %243, %246, %248 : vector<2x12x8xi1>, vector<2x12x8xf32>
      %cst_153 = arith.constant dense<0.000000e+00> : vector<2x12xf32>
      %250 = vector.multi_reduction <add>, %249, %cst_153 [2] : vector<2x12x8xf32> to vector<2x12xf32>
      %251 = vector.shape_cast %250 : vector<2x12xf32> to vector<2x12x1xf32>
      %cst_154 = arith.constant dense<0.000000e+00> : vector<2x1xf32>
      %252 = vector.multi_reduction <add>, %251, %cst_154 [1] : vector<2x12x1xf32> to vector<2x1xf32>
      %253 = vector.shape_cast %252 : vector<2x1xf32> to vector<2x1x1xf32>
      %cst_155 = arith.constant dense<0.000000e+00> : vector<1x1xf32>
      %254 = vector.multi_reduction <add>, %253, %cst_155 [0] : vector<2x1x1xf32> to vector<1x1xf32>
      %255 = vector.shape_cast %254 : vector<1x1xf32> to vector<1x1x1xf32>
      %256 = vector.shape_cast %255 : vector<1x1x1xf32> to vector<1x1xf32>
      %cst_156 = arith.constant 0.00520833349 : f32
      %257 = vector.broadcast %cst_156 : f32 to vector<1x1xf32>
      %258 = arith.mulf %256, %257 : vector<1x1xf32>
      %c0_157 = arith.constant 0 : index
      %c0_158 = arith.constant 0 : index
      %259 = vector.load %arg29[%c0_157, %c0_158] : memref<1x1xf32, #tpu.memory_space<vmem>>, vector<1x1xf32>
      tpu.vector_store %arg29[%c0_157, %c0_158], %258 {strides = array<i32>} : memref<1x1xf32, #tpu.memory_space<vmem>>, vector<1x1xf32>,
    } else {
    }
    return
  }
  func.func @transform_0(%arg0: i32) -> (i32, i32, i32) {
    %c0_i32 = arith.constant 0 : i32
    %c0_i32_0 = arith.constant 0 : i32
    %c0_i32_1 = arith.constant 0 : i32
    %c0_i32_2 = arith.constant 0 : i32
    return %c0_i32, %c0_i32_0, %c0_i32_1 : i32, i32, i32
  }
  func.func @transform_1(%arg0: i32) -> (i32, i32) {
    %c0_i32 = arith.constant 0 : i32
    %c0_i32_0 = arith.constant 0 : i32
    %c0_i32_1 = arith.constant 0 : i32
    return %c0_i32, %c0_i32_0 : i32, i32
  }
  func.func @transform_2(%arg0: i32) -> (i32, i32) {
    %c0_i32 = arith.constant 0 : i32
    %c0_i32_0 = arith.constant 0 : i32
    %c0_i32_1 = arith.constant 0 : i32
    return %c0_i32, %c0_i32_0 : i32, i32
  }
  func.func @transform_3(%arg0: i32) -> (i32, i32) {
    %c0_i32 = arith.constant 0 : i32
    %c0_i32_0 = arith.constant 0 : i32
    %c0_i32_1 = arith.constant 0 : i32
    return %c0_i32, %c0_i32_0 : i32, i32
  }
  func.func @transform_4(%arg0: i32) -> (i32, i32) {
    %c0_i32 = arith.constant 0 : i32
    %c0_i32_0 = arith.constant 0 : i32
    %c0_i32_1 = arith.constant 0 : i32
    return %c0_i32, %c0_i32_0 : i32, i32
  }
  func.func @transform_5(%arg0: i32) -> (i32, i32, i32) {
    %c0_i32 = arith.constant 0 : i32
    %c0_i32_0 = arith.constant 0 : i32
    %c0_i32_1 = arith.constant 0 : i32
    return %arg0, %c0_i32, %c0_i32_0 : i32, i32, i32
  }
  func.func @transform_6(%arg0: i32) -> (i32, i32, i32) {
    %c0_i32 = arith.constant 0 : i32
    %c0_i32_0 = arith.constant 0 : i32
    %c0_i32_1 = arith.constant 0 : i32
    return %arg0, %c0_i32, %c0_i32_0 : i32, i32, i32
  }
  func.func @transform_7(%arg0: i32) -> (i32, i32, i32) {
    %c0_i32 = arith.constant 0 : i32
    %c0_i32_0 = arith.constant 0 : i32
    %c0_i32_1 = arith.constant 0 : i32
    return %arg0, %c0_i32, %c0_i32_0 : i32, i32, i32
  }
  func.func @transform_8(%arg0: i32) -> (i32, i32, i32) {
    %c0_i32 = arith.constant 0 : i32
    %c0_i32_0 = arith.constant 0 : i32
    %c0_i32_1 = arith.constant 0 : i32
    return %arg0, %c0_i32, %c0_i32_0 : i32, i32, i32
  }
  func.func @transform_9(%arg0: i32) -> (i32, i32, i32) {
    %c0_i32 = arith.constant 0 : i32
    %c0_i32_0 = arith.constant 0 : i32
    %c0_i32_1 = arith.constant 0 : i32
    return %arg0, %c0_i32, %c0_i32_0 : i32, i32, i32
  }
  func.func @transform_10(%arg0: i32) -> (i32, i32, i32) {
    %c0_i32 = arith.constant 0 : i32
    %c0_i32_0 = arith.constant 0 : i32
    %c0_i32_1 = arith.constant 0 : i32
    return %arg0, %c0_i32, %c0_i32_0 : i32, i32, i32
  }
  func.func @transform_11(%arg0: i32) -> (i32, i32, i32) {
    %c0_i32 = arith.constant 0 : i32
    %c0_i32_0 = arith.constant 0 : i32
    %c0_i32_1 = arith.constant 0 : i32
    return %arg0, %c0_i32, %c0_i32_0 : i32, i32, i32
  }
  func.func @transform_12(%arg0: i32) -> (i32, i32, i32) {
    %c0_i32 = arith.constant 0 : i32
    %c0_i32_0 = arith.constant 0 : i32
    %c0_i32_1 = arith.constant 0 : i32
    return %arg0, %c0_i32, %c0_i32_0 : i32, i32, i32
  }
  func.func @transform_13(%arg0: i32) -> (i32, i32, i32) {
    %c0_i32 = arith.constant 0 : i32
    %c0_i32_0 = arith.constant 0 : i32
    %c0_i32_1 = arith.constant 0 : i32
    return %arg0, %c0_i32, %c0_i32_0 : i32, i32, i32
  }
  func.func @transform_14(%arg0: i32) -> (i32, i32, i32) {
    %c0_i32 = arith.constant 0 : i32
    %c0_i32_0 = arith.constant 0 : i32
    %c0_i32_1 = arith.constant 0 : i32
    return %arg0, %c0_i32, %c0_i32_0 : i32, i32, i32
  }
  func.func @transform_15(%arg0: i32) -> (i32, i32, i32) {
    %c0_i32 = arith.constant 0 : i32
    %c0_i32_0 = arith.constant 0 : i32
    %c0_i32_1 = arith.constant 0 : i32
    return %arg0, %c0_i32, %c0_i32_0 : i32, i32, i32
  }
  func.func @transform_16(%arg0: i32) -> (i32, i32, i32, i32) {
    %c0_i32 = arith.constant 0 : i32
    %c0_i32_0 = arith.constant 0 : i32
    %c0_i32_1 = arith.constant 0 : i32
    %c0_i32_2 = arith.constant 0 : i32
    return %arg0, %c0_i32, %c0_i32_0, %c0_i32_1 : i32, i32, i32, i32
  }
  func.func @transform_17(%arg0: i32) -> (i32, i32, i32, i32) {
    %c0_i32 = arith.constant 0 : i32
    %c0_i32_0 = arith.constant 0 : i32
    %c0_i32_1 = arith.constant 0 : i32
    %c0_i32_2 = arith.constant 0 : i32
    return %arg0, %c0_i32, %c0_i32_0, %c0_i32_1 : i32, i32, i32, i32
  }
  func.func @transform_18(%arg0: i32) -> (i32, i32, i32) {
    %c0_i32 = arith.constant 0 : i32
    %c0_i32_0 = arith.constant 0 : i32
    %c0_i32_1 = arith.constant 0 : i32
    return %arg0, %c0_i32, %c0_i32_0 : i32, i32, i32
  }
  func.func @transform_19(%arg0: i32) -> (i32, i32, i32) {
    %c0_i32 = arith.constant 0 : i32
    %c0_i32_0 = arith.constant 0 : i32
    %c0_i32_1 = arith.constant 0 : i32
    return %arg0, %c0_i32, %c0_i32_0 : i32, i32, i32
  }
  func.func @transform_20(%arg0: i32) -> (i32, i32, i32) {
    %c0_i32 = arith.constant 0 : i32
    %c0_i32_0 = arith.constant 0 : i32
    %c0_i32_1 = arith.constant 0 : i32
    return %arg0, %c0_i32, %c0_i32_0 : i32, i32, i32
  }
  func.func @transform_21(%arg0: i32) -> (i32, i32, i32) {
    %c0_i32 = arith.constant 0 : i32
    %c0_i32_0 = arith.constant 0 : i32
    %c0_i32_1 = arith.constant 0 : i32
    return %arg0, %c0_i32, %c0_i32_0 : i32, i32, i32
  }
  func.func @transform_22(%arg0: i32) -> (i32, i32, i32) {
    %c0_i32 = arith.constant 0 : i32
    %c0_i32_0 = arith.constant 0 : i32
    %c0_i32_1 = arith.constant 0 : i32
    return %arg0, %c0_i32, %c0_i32_0 : i32, i32, i32
  }
  func.func @transform_23(%arg0: i32) -> (i32, i32, i32) {
    %c0_i32 = arith.constant 0 : i32
    %c0_i32_0 = arith.constant 0 : i32
    %c0_i32_1 = arith.constant 0 : i32
    return %arg0, %c0_i32, %c0_i32_0 : i32, i32, i32
  }
  func.func @transform_24(%arg0: i32) -> (i32, i32, i32) {
    %c0_i32 = arith.constant 0 : i32
    %c0_i32_0 = arith.constant 0 : i32
    %c0_i32_1 = arith.constant 0 : i32
    return %arg0, %c0_i32, %c0_i32_0 : i32, i32, i32
  }
  func.func @transform_25(%arg0: i32) -> (i32, i32, i32) {
    %c0_i32 = arith.constant 0 : i32
    %c0_i32_0 = arith.constant 0 : i32
    %c0_i32_1 = arith.constant 0 : i32
    return %arg0, %c0_i32, %c0_i32_0 : i32, i32, i32
  }
  func.func @transform_26(%arg0: i32) -> (i32, i32, i32) {
    %c0_i32 = arith.constant 0 : i32
    %c0_i32_0 = arith.constant 0 : i32
    %c0_i32_1 = arith.constant 0 : i32
    %c0_i32_2 = arith.constant 0 : i32
    return %c0_i32, %c0_i32_0, %c0_i32_1 : i32, i32, i32
  }
  func.func @transform_27(%arg0: i32) -> (i32, i32, i32) {
    %c0_i32 = arith.constant 0 : i32
    %c0_i32_0 = arith.constant 0 : i32
    %c0_i32_1 = arith.constant 0 : i32
    %c0_i32_2 = arith.constant 0 : i32
    return %c0_i32, %c0_i32_0, %c0_i32_1 : i32, i32, i32
  }
  func.func @transform_28(%arg0: i32) -> (i32, i32) {
    %c0_i32 = arith.constant 0 : i32
    %c0_i32_0 = arith.constant 0 : i32
    %c0_i32_1 = arith.constant 0 : i32
    return %c0_i32, %c0_i32_0 : i32, i32
  }
}

</mosaic_0001>

<bundles_post_ra>
// kernel: forward.1
= control target key start
LH: loop header
LB: loop body
LE: loop exit
PB: predicated region body
PF: predicated region fallthrough
CT: control target
= control target key end

     0   :  { %s25941_s0 = inlined_call_operand.vmem [shape: f32[48,8,1], index: 0, kind: input, shape index: {}]   ;;  %s25942_s1 = inlined_call_operand.vmem [shape: f32[1,32], index: 1, kind: input, shape index: {}]   ;;  %s25943_s2 = inlined_call_operand.vmem [shape: f32[1,32], index: 2, kind: input, shape index: {}]   ;;  %s25944_s3 = inlined_call_operand.vmem [shape: f32[1,32], index: 3, kind: input, shape index: {}]   ;;  %s25945_s4 = inlined_call_operand.<no memory space> [shape: f32[1,1], index: 4, kind: input, shape index: {}]   ;;  %s25946_s5 = inlined_call_operand.vmem [shape: f32[4,48,32], index: 5, kind: input, shape index: {}]   ;;  %s25947_s6 = inlined_call_operand.vmem [shape: f32[4,48,32], index: 6, kind: input, shape index: {}]   ;;  %s25948_s7 = inlined_call_operand.vmem [shape: f32[4,8,32], index: 7, kind: input, shape index: {}]   ;;  %s25949_s8 = inlined_call_operand.vmem [shape: f32[4,32,32], index: 8, kind: input, shape index: {}]   ;;  %s25950_s9 = inlined_call_operand.vmem [shape: f32[4,1,32], index: 9, kind: input, shape index: {}]   ;;  %s25951_s10 = inlined_call_operand.vmem [shape: f32[4,32,32], index: 10, kind: input, shape index: {}]   ;;  %s25952_s11 = inlined_call_operand.vmem [shape: f32[4,1,32], index: 11, kind: input, shape index: {}]   ;;  %s25953_s12 = inlined_call_operand.vmem [shape: f32[4,32,32], index: 12, kind: input, shape index: {}]   ;;  %s25954_s13 = inlined_call_operand.vmem [shape: f32[4,1,32], index: 13, kind: input, shape index: {}]   ;;  %s25955_s14 = inlined_call_operand.vmem [shape: f32[4,32,64], index: 14, kind: input, shape index: {}]   ;;  %s25956_s15 = inlined_call_operand.vmem [shape: f32[4,1,64], index: 15, kind: input, shape index: {}]   ;;  %s25957_s16 = inlined_call_operand.vmem [shape: f32[4,3,8,8], index: 16, kind: input, shape index: {}]   ;;  %s25958_s17 = inlined_call_operand.vmem [shape: f32[4,3,8,8], index: 17, kind: input, shape index: {}]   ;;  %s25959_s18 = inlined_call_operand.vmem [shape: f32[4,32,64], index: 18, kind: input, shape index: {}]   ;;  %s25960_s19 = inlined_call_operand.vmem [shape: f32[4,1,64], index: 19, kind: input, shape index: {}]   ;;  %s25961_s20 = inlined_call_operand.vmem [shape: f32[4,288,96], index: 20, kind: input, shape index: {}]   ;;  %s25962_s21 = inlined_call_operand.vmem [shape: f32[4,96,32], index: 21, kind: input, shape index: {}]   ;;  %s25963_s22 = inlined_call_operand.vmem [shape: f32[4,1,32], index: 22, kind: input, shape index: {}]   ;;  %s25964_s23 = inlined_call_operand.vmem [shape: f32[4,288,96], index: 23, kind: input, shape index: {}]   ;;  %s25965_s24 = inlined_call_operand.vmem [shape: f32[4,96,32], index: 24, kind: input, shape index: {}]   ;;  %s25966_s25 = inlined_call_operand.vmem [shape: f32[4,1,32], index: 25, kind: input, shape index: {}]   ;;  %s25967_s26 = inlined_call_operand.vmem [shape: f32[2,12,8], index: 26, kind: output, shape index: {0}]   ;;  %s25968_s27 = inlined_call_operand.vmem [shape: f32[2,12,8], index: 27, kind: output, shape index: {1}]   ;;  %s25969_s28 = inlined_call_operand.hbm [shape: f32[1,1], index: 28, kind: output, shape index: {2}]  }
   0x1   :  { %26306 = sst [smem:[#allocation148_spill]] %s25941_s0 }
   0x2   :  { %26307 = sst [smem:[#allocation149_spill]] %s25942_s1 }
   0x3   :  { %26308 = sst [smem:[#allocation150_spill]] %s25943_s2 }
   0x4   :  { %26309 = sst [smem:[#allocation151_spill]] %s25944_s3 }
   0x5   :  { %26310 = sst [smem:[#allocation152_spill]] %s25945_s4 }
   0x6   :  { %26311 = sst [smem:[#allocation153_spill]] %s25946_s5 }
   0x7   :  { %26312 = sst [smem:[#allocation154_spill]] %s25947_s6 }
   0x8   :  { %26313 = sst [smem:[#allocation155_spill]] %s25948_s7 }
   0x9   :  { %26314 = sst [smem:[#allocation156_spill]] %s25949_s8 }
   0xa   :  { %26315 = sst [smem:[#allocation157_spill]] %s25950_s9  ;;  %s26330_s9 = sld [smem:[#allocation152_spill]] }
   0xb   :  { %26316 = sst [smem:[#allocation158_spill]] %s25951_s10 }
   0xc   :  { %26317 = sst [smem:[#allocation159_spill]] %s25952_s11 }
   0xd   :  { %26318 = sst [smem:[#allocation160_spill]] %s25953_s12 }
   0xe   :  { %26319 = sst [smem:[#allocation161_spill]] %s25955_s14 }
   0xf   :  { %26320 = sst [smem:[#allocation162_spill]] %s25956_s15 }
  0x10   :  { %26321 = sst [smem:[#allocation163_spill]] %s25957_s16  ;;  %v34_v0 = vstv %s26330_s9 }
  0x11   :  { %26322 = sst [smem:[#allocation164_spill]] %s25958_s17  ;;  %35 = vst [vmem:[#allocation5] sm:$0x1] %v34_v0 }
  0x12   :  { %26323 = sst [smem:[#allocation165_spill]] %s25959_s18 }
  0x13   :  { %26324 = sst [smem:[#allocation166_spill]] %s25961_s20 }
  0x14   :  { %26325 = sst [smem:[#allocation167_spill]] %s25965_s24 }
  0x15   :  { %26326 = sst [smem:[#allocation168_spill]] %s25966_s25 }
  0x16   :  { %26327 = sst [smem:[#allocation169_spill]] %s25967_s26 }
  0x17   :  { %26328 = sst [smem:[#allocation170_spill]] %s25968_s27 }
  0x18   :  { %26329 = sst [smem:[#allocation171_spill]] %s25969_s28 }
  0x19   :  { %36 = vsyncpa [#allocation7], 0  ;;  %s20434_s30 = smov 0  }
  0x1a LB: > { %26331 = sst [smem:[#allocation9_spill]] %s20275_s30  ;;  %s20440_s3 = sadd.s32 4294967295, %s20275_s30   ;;  %s20275_s30 = sphi %s20434_s30, %s42_s30  }
  0x1b   : > { %26332 = sst [smem:[#allocation10_spill]] %s20440_s3  ;;  %p15917_p0 = scmp.ge.s32.totalorder %s20275_s30, 1 }
  0x1c   : > { %p940_p1 = scmp.lt.s32.totalorder %s20275_s30, 5 }
  0x1e   : > { %p941_p2 = pnand %p15917_p0, %p940_p1 }
  0x20   : > { %944 = sbr.rel (%p941_p2) target bundleno = 3384 (0xd38), region = 124 }
  0x27   : > { %p1094_p3 = scmp.lt.s32.totalorder %s20440_s3, 3  ;;  %s26333_s2 = sld [smem:[#allocation155_spill]] }
  0x28   : > { %s26335_s8 = sld [smem:[#allocation153_spill]]  ;;  %s26337_s28 = sld [smem:[#allocation154_spill]] }
  0x29   : > { %s20446_s6 = scalar_select %p1094_p3, %s20440_s3, 3 }
  0x2a   : > { %s26339_s25 = sld [smem:[#allocation156_spill]]  ;;  %s26342_s4 = sld [smem:[#allocation158_spill]] }
  0x2b   : > { %s19779_s10 = smul.u32 48, %s20446_s6  ;;  %s15920_s0 = sshll.u32 %s20446_s6, 3 }
  0x2c   : > { %s16809_s12 = sshll.u32 %s20446_s6, 5  ;;  %s26344_s27 = sld [smem:[#allocation160_spill]] }
  0x2d   : > { %s20453_s7 = scalar_lea.vmem %s26333_s2, %s15920_s0  ;;  %s26345_s14 = sld [smem:[#allocation161_spill]] }
  0x2e   : > { %26334 = sst [smem:[#allocation11_spill]] %s20453_s7  ;;  %s20459_s5 = scalar_lea.vmem %s26335_s8, %s19779_s10 }
  0x2f   : > { %26336 = sst [smem:[#allocation12_spill]] %s20459_s5  ;;  %s20464_s26 = scalar_lea.vmem %s26337_s28, %s19779_s10 }
  0x30   : > { %26338 = sst [smem:[#allocation13_spill]] %s20464_s26  ;;  %s20469_s24 = scalar_lea.vmem %s26339_s25, %s16809_s12 }
  0x31   : > { %26340 = sst [smem:[#allocation14_spill]] %s20469_s24  ;;  %s20478_s8 = scalar_lea.vmem %s26342_s4, %s16809_s12 }
  0x32   : > { %s20487_s3 = scalar_lea.vmem %s26344_s27, %s16809_s12  ;;  %s26346_s15 = sld [smem:[#allocation162_spill]] }
  0x33   : > { %s20496_s7 = scalar_lea.vmem %s26345_s14, %s16809_s12  ;;  %s19780_s30 = smul.u32 24, %s20446_s6 }
  0x34   : > { %s26347_s18 = sld [smem:[#allocation165_spill]]  ;;  %s19781_s11 = smul.u32 288, %s20446_s6 }
  0x35   : > { %s26348_s16 = sld [smem:[#allocation163_spill]]  ;;  %s26349_s17 = sld [smem:[#allocation164_spill]] }
  0x36   : > { %s26350_s20 = sld [smem:[#allocation166_spill]]  ;;  %s19782_s28 = smul.u32 96, %s20446_s6 }
  0x37   : > { %s20538_s10 = scalar_lea.vmem %s25964_s23, %s19781_s11  ;;  %s26352_s14 = sld [smem:[#allocation167_spill]] }
  0x38   : > { %s20502_s5 = scalar_lea.vmem %s26346_s15, %s20446_s6  ;;  %s20543_s2 = scalar_lea.vmem %s25962_s21, %s19782_s28 }
  0x39   : > { %s26354_s27 = sld [smem:[#allocation10_spill]] }
  0x3a   : > { %s20508_s9 = scalar_lea.vmem %s26347_s18, %s16809_s12 }
  0x3b   : > { %s20518_s29 = scalar_lea.vmem %s26348_s16, %s19780_s30  ;;  %s20523_s4 = scalar_lea.vmem %s26349_s17, %s19780_s30 }
  0x3c   : > { %s20528_s12 = scalar_lea.vmem %s26350_s20, %s19781_s11 }
  0x3d   : > { %26351 = sst [smem:[#allocation15_spill]] %s20528_s12  ;;  %s20548_s15 = scalar_lea.vmem %s26352_s14, %s19782_s28 }
  0x3e   : > { %s26353_s12 = sld [smem:[#allocation168_spill]] }
  0x3f   : > { %p15937_p4 = scmp.ne.s32.totalorder %s26354_s27, 0 }
  0x40   : > { %s26355_s25 = sld [smem:[#allocation148_spill]] (!%p15937_p4)  ;;  %v20277_v3 = vmov (!%p15937_p4), 0   ;;  %vm1634_vm0 = vcmask (!%p15937_p4), 261120   ;;  %v20278_v50 = vmov (!%p15937_p4), 0.0   ;;  %s26356_s20 = sld [smem:[#allocation149_spill]] (!%p15937_p4) }
  0x41   : > { %1187 = sbr.rel (%p15937_p4) target bundleno = 298 (0x12a), region = 128  ;;  %19807 = vset.pattern.permute.xlu1 (!%p15937_p4), %v20277_v3  ;;  %19806 = vset.pattern.permute.xlu0 (!%p15937_p4), %v20277_v3  ;;  %1683 = vst.msk [vmem:[#allocation3] sm:$0xff] (!%p15937_p4), %vm1634_vm0, %v20278_v50  ;;  %1684 = vst.msk [vmem:[#allocation3 + $0x8] sm:$0xff] (!%p15937_p4), %vm1634_vm0, %v20278_v50  ;;  %s26357_s24 = sld [smem:[#allocation150_spill]] (!%p15937_p4) }
  0x42   : > { %1685 = vst.msk [vmem:[#allocation3 + $0x10] sm:$0xff] (!%p15937_p4), %vm1634_vm0, %v20278_v50  ;;  %1686 = vst.msk [vmem:[#allocation3 + $0x18] sm:$0xff] (!%p15937_p4), %vm1634_vm0, %v20278_v50 }
  0x43   : > { %1687 = vst.msk [vmem:[#allocation3 + $0x20] sm:$0xff] (!%p15937_p4), %vm1634_vm0, %v20278_v50  ;;  %1688 = vst.msk [vmem:[#allocation3 + $0x28] sm:$0xff] (!%p15937_p4), %vm1634_vm0, %v20278_v50 }
  0x44   : > { %s1183_s26 = scalar_lea.vmem %s26353_s12, %s20446_s6  ;;  %1689 = vst.msk [vmem:[#allocation3 + $0x30] sm:$0xff] (!%p15937_p4), %vm1634_vm0, %v20278_v50  ;;  %1690 = vst.msk [vmem:[#allocation3 + $0x38] sm:$0xff] (!%p15937_p4), %vm1634_vm0, %v20278_v50 }
  0x45   : > { %1691 = vst.msk [vmem:[#allocation3 + $0x40] sm:$0xff] (!%p15937_p4), %vm1634_vm0, %v20278_v50  ;;  %1692 = vst.msk [vmem:[#allocation3 + $0x48] sm:$0xff] (!%p15937_p4), %vm1634_vm0, %v20278_v50 }
  0x46   : > { %v1190_v1 = vld [vmem:[%s26355_s25 + $0x10] sm:$0xff] (!%p15937_p4)  ;;  %v1188_v2 = vld [vmem:[%s26355_s25] sm:$0xff] (!%p15937_p4)  ;;  %v1191_v4 = vld [vmem:[%s26355_s25 + $0x18] sm:$0xff] (!%p15937_p4)  ;;  %1693 = vst.msk [vmem:[#allocation3 + $0x50] sm:$0xff] (!%p15937_p4), %vm1634_vm0, %v20278_v50 }
  0x47   : > { %1250 = vperm.xlu1 (!%p15937_p4), %19807, %v1190_v1   ;;  %1240 = vperm.xlu0 (!%p15937_p4), %19806, %v1188_v2   ;;  %v1189_v5 = vld [vmem:[%s26355_s25 + $0x8] sm:$0xff] (!%p15937_p4)  ;;  %v1192_v7 = vld [vmem:[%s26355_s25 + $0x20] sm:$0xff] (!%p15937_p4)  ;;  %v1195_v8 = vld [vmem:[%s26355_s25 + $0x38] sm:$0xff] (!%p15937_p4)  ;;  %1694 = vst.msk [vmem:[#allocation3 + $0x58] sm:$0xff] (!%p15937_p4), %vm1634_vm0, %v20278_v50 }
  0x48   : > { %v1193_v6 = vld [vmem:[%s26355_s25 + $0x28] sm:$0xff]  ;;  %v1194_v9 = vld [vmem:[%s26355_s25 + $0x30] sm:$0xff]  ;;  %v1196_v11 = vld [vmem:[%s26355_s25 + $0x40] sm:$0xff]  ;;  %1695 = vst.msk [vmem:[#allocation3 + $0x60] sm:$0xff] %vm1634_vm0, %v20278_v50 }
  0x49   : > { %v1197_v10 = vld [vmem:[%s26355_s25 + $0x48] sm:$0xff]  ;;  %v1199_v12 = vld [vmem:[%s26355_s25 + $0x58] sm:$0xff]  ;;  %v1198_v13 = vld [vmem:[%s26355_s25 + $0x50] sm:$0xff]  ;;  %1696 = vst.msk [vmem:[#allocation3 + $0x68] sm:$0xff] %vm1634_vm0, %v20278_v50 }
  0x4a   : > { %v1201_v14 = vld [vmem:[%s26355_s25 + $0x68] sm:$0xff]  ;;  %v1200_v15 = vld [vmem:[%s26355_s25 + $0x60] sm:$0xff]  ;;  %v1203_v16 = vld [vmem:[%s26355_s25 + $0x78] sm:$0xff]  ;;  %1697 = vst.msk [vmem:[#allocation3 + $0x70] sm:$0xff] %vm1634_vm0, %v20278_v50 }
  0x4b   : > { %1255 = vperm.xlu1 %19807, %v1191_v4   ;;  %1245 = vperm.xlu0 %19806, %v1189_v5   ;;  %v1202_v17 = vld [vmem:[%s26355_s25 + $0x70] sm:$0xff]  ;;  %v1205_v18 = vld [vmem:[%s26355_s25 + $0x88] sm:$0xff]  ;;  %v1204_v19 = vld [vmem:[%s26355_s25 + $0x80] sm:$0xff]  ;;  %1698 = vst.msk [vmem:[#allocation3 + $0x78] sm:$0xff] %vm1634_vm0, %v20278_v50 }
  0x4c   : > { %v1207_v20 = vld [vmem:[%s26355_s25 + $0x98] sm:$0xff]  ;;  %v1206_v21 = vld [vmem:[%s26355_s25 + $0x90] sm:$0xff]  ;;  %v1209_v22 = vld [vmem:[%s26355_s25 + $0xa8] sm:$0xff]  ;;  %1699 = vst.msk [vmem:[#allocation3 + $0x80] sm:$0xff] %vm1634_vm0, %v20278_v50 }
  0x4d   : > { %v1208_v23 = vld [vmem:[%s26355_s25 + $0xa0] sm:$0xff]  ;;  %v1211_v24 = vld [vmem:[%s26355_s25 + $0xb8] sm:$0xff]  ;;  %v1210_v25 = vld [vmem:[%s26355_s25 + $0xb0] sm:$0xff]  ;;  %1700 = vst.msk [vmem:[#allocation3 + $0x88] sm:$0xff] %vm1634_vm0, %v20278_v50 }
  0x4e   : > { %v1213_v26 = vld [vmem:[%s26355_s25 + $0xc8] sm:$0xff]  ;;  %v1212_v27 = vld [vmem:[%s26355_s25 + $0xc0] sm:$0xff]  ;;  %v1215_v28 = vld [vmem:[%s26355_s25 + $0xd8] sm:$0xff]  ;;  %1701 = vst.msk [vmem:[#allocation3 + $0x90] sm:$0xff] %vm1634_vm0, %v20278_v50 }
  0x4f   : > { %1265 = vperm.xlu1 %19807, %v1193_v6   ;;  %1260 = vperm.xlu0 %19806, %v1192_v7   ;;  %v1214_v29 = vld [vmem:[%s26355_s25 + $0xd0] sm:$0xff]  ;;  %v1217_v30 = vld [vmem:[%s26355_s25 + $0xe8] sm:$0xff]  ;;  %v1216_v31 = vld [vmem:[%s26355_s25 + $0xe0] sm:$0xff]  ;;  %1702 = vst.msk [vmem:[#allocation3 + $0x98] sm:$0xff] %vm1634_vm0, %v20278_v50 }
  0x50   : > { %v1219_v32 = vld [vmem:[%s26355_s25 + $0xf8] sm:$0xff]  ;;  %v1218_v33 = vld [vmem:[%s26355_s25 + $0xf0] sm:$0xff]  ;;  %v1221_v34 = vld [vmem:[%s26355_s25 + $0x108] sm:$0xff]  ;;  %1703 = vst.msk [vmem:[#allocation3 + $0xa0] sm:$0xff] %vm1634_vm0, %v20278_v50 }
  0x51   : > { %v1220_v35 = vld [vmem:[%s26355_s25 + $0x100] sm:$0xff]  ;;  %v1223_v36 = vld [vmem:[%s26355_s25 + $0x118] sm:$0xff]  ;;  %v1222_v37 = vld [vmem:[%s26355_s25 + $0x110] sm:$0xff]  ;;  %1704 = vst.msk [vmem:[#allocation3 + $0xa8] sm:$0xff] %vm1634_vm0, %v20278_v50 }
  0x52   : > { %v1225_v38 = vld [vmem:[%s26355_s25 + $0x128] sm:$0xff]  ;;  %v1224_v39 = vld [vmem:[%s26355_s25 + $0x120] sm:$0xff]  ;;  %v1227_v40 = vld [vmem:[%s26355_s25 + $0x138] sm:$0xff]  ;;  %1705 = vst.msk [vmem:[#allocation3 + $0xb0] sm:$0xff] %vm1634_vm0, %v20278_v50 }
  0x53   : > { %1275 = vperm.xlu1 %19807, %v1195_v8   ;;  %1270 = vperm.xlu0 %19806, %v1194_v9   ;;  %v1226_v41 = vld [vmem:[%s26355_s25 + $0x130] sm:$0xff]  ;;  %v1229_v42 = vld [vmem:[%s26355_s25 + $0x148] sm:$0xff]  ;;  %v1228_v43 = vld [vmem:[%s26355_s25 + $0x140] sm:$0xff]  ;;  %1706 = vst.msk [vmem:[#allocation3 + $0xb8] sm:$0xff] %vm1634_vm0, %v20278_v50 }
  0x54   : > { %v1231_v44 = vld [vmem:[%s26355_s25 + $0x158] sm:$0xff]  ;;  %v1230_v45 = vld [vmem:[%s26355_s25 + $0x150] sm:$0xff]  ;;  %v1233_v46 = vld [vmem:[%s26355_s25 + $0x168] sm:$0xff]  ;;  %1707 = vst.msk [vmem:[#allocation4] sm:$0xff] %vm1634_vm0, %v20278_v50 }
  0x55   : > { %v1232_v47 = vld [vmem:[%s26355_s25 + $0x160] sm:$0xff]  ;;  %v1235_v48 = vld [vmem:[%s26355_s25 + $0x178] sm:$0xff]  ;;  %v1234_v49 = vld [vmem:[%s26355_s25 + $0x170] sm:$0xff]  ;;  %1708 = vst.msk [vmem:[#allocation4 + $0x8] sm:$0xff] %vm1634_vm0, %v20278_v50 }
  0x56   : > { %1709 = vst.msk [vmem:[#allocation4 + $0x10] sm:$0xff] %vm1634_vm0, %v20278_v50  ;;  %1710 = vst.msk [vmem:[#allocation4 + $0x18] sm:$0xff] %vm1634_vm0, %v20278_v50  ;;  %v20846_v51 = vld [vmem:[%s26356_s20] ss:$0 sm:$0xff] }
  0x57   : > { %1285 = vperm.xlu1 %19807, %v1197_v10   ;;  %1280 = vperm.xlu0 %19806, %v1196_v11   ;;  %1711 = vst.msk [vmem:[#allocation4 + $0x20] sm:$0xff] %vm1634_vm0, %v20278_v50  ;;  %1712 = vst.msk [vmem:[#allocation4 + $0x28] sm:$0xff] %vm1634_vm0, %v20278_v50  ;;  %v20851_v52 = vld [vmem:[%s26357_s24] ss:$0 sm:$0xff] }
  0x58   : > { %1713 = vst.msk [vmem:[#allocation4 + $0x30] sm:$0xff] %vm1634_vm0, %v20278_v50  ;;  %1714 = vst.msk [vmem:[#allocation4 + $0x38] sm:$0xff] %vm1634_vm0, %v20278_v50 }
  0x59   : > { %1715 = vst.msk [vmem:[#allocation4 + $0x40] sm:$0xff] %vm1634_vm0, %v20278_v50  ;;  %1716 = vst.msk [vmem:[#allocation4 + $0x48] sm:$0xff] %vm1634_vm0, %v20278_v50 }
  0x5a   : > { %1717 = vst.msk [vmem:[#allocation4 + $0x50] sm:$0xff] %vm1634_vm0, %v20278_v50  ;;  %1718 = vst.msk [vmem:[#allocation4 + $0x58] sm:$0xff] %vm1634_vm0, %v20278_v50 }
  0x5b   : > { %1295 = vperm.xlu1 %19807, %v1199_v12   ;;  %1290 = vperm.xlu0 %19806, %v1198_v13   ;;  %1719 = vst.msk [vmem:[#allocation4 + $0x60] sm:$0xff] %vm1634_vm0, %v20278_v50  ;;  %1720 = vst.msk [vmem:[#allocation4 + $0x68] sm:$0xff] %vm1634_vm0, %v20278_v50 }
  0x5c   : > { %1721 = vst.msk [vmem:[#allocation4 + $0x70] sm:$0xff] %vm1634_vm0, %v20278_v50  ;;  %1722 = vst.msk [vmem:[#allocation4 + $0x78] sm:$0xff] %vm1634_vm0, %v20278_v50 }
  0x5d   : > { %1723 = vst.msk [vmem:[#allocation4 + $0x80] sm:$0xff] %vm1634_vm0, %v20278_v50  ;;  %1724 = vst.msk [vmem:[#allocation4 + $0x88] sm:$0xff] %vm1634_vm0, %v20278_v50 }
  0x5e   : > { %1725 = vst.msk [vmem:[#allocation4 + $0x90] sm:$0xff] %vm1634_vm0, %v20278_v50  ;;  %1726 = vst.msk [vmem:[#allocation4 + $0x98] sm:$0xff] %vm1634_vm0, %v20278_v50 }
  0x5f   : > { %1305 = vperm.xlu1 %19807, %v1201_v14   ;;  %1300 = vperm.xlu0 %19806, %v1200_v15   ;;  %1727 = vst.msk [vmem:[#allocation4 + $0xa0] sm:$0xff] %vm1634_vm0, %v20278_v50  ;;  %1728 = vst.msk [vmem:[#allocation4 + $0xa8] sm:$0xff] %vm1634_vm0, %v20278_v50 }
  0x60   : > { %1729 = vst.msk [vmem:[#allocation4 + $0xb0] sm:$0xff] %vm1634_vm0, %v20278_v50  ;;  %1730 = vst.msk [vmem:[#allocation4 + $0xb8] sm:$0xff] %vm1634_vm0, %v20278_v50 }
  0x61   : > { %1731 = vst.msk [vmem:[#allocation4 + $0xc0] sm:$0xff] %vm1634_vm0, %v20278_v50  ;;  %1732 = vst.msk [vmem:[#allocation4 + $0xc8] sm:$0xff] %vm1634_vm0, %v20278_v50 }
  0x62   : > { %1733 = vst.msk [vmem:[#allocation4 + $0xd0] sm:$0xff] %vm1634_vm0, %v20278_v50  ;;  %1734 = vst.msk [vmem:[#allocation4 + $0xd8] sm:$0xff] %vm1634_vm0, %v20278_v50 }
  0x63   : > { %1315 = vperm.xlu1 %19807, %v1203_v16   ;;  %1310 = vperm.xlu0 %19806, %v1202_v17   ;;  %1735 = vst.msk [vmem:[#allocation4 + $0xe0] sm:$0xff] %vm1634_vm0, %v20278_v50  ;;  %1736 = vst.msk [vmem:[#allocation4 + $0xe8] sm:$0xff] %vm1634_vm0, %v20278_v50 }
  0x64   : > { %1737 = vst.msk [vmem:[#allocation4 + $0xf0] sm:$0xff] %vm1634_vm0, %v20278_v50  ;;  %1738 = vst.msk [vmem:[#allocation4 + $0xf8] sm:$0xff] %vm1634_vm0, %v20278_v50 }
  0x65   : > { %1739 = vst.msk [vmem:[#allocation4 + $0x100] sm:$0xff] %vm1634_vm0, %v20278_v50  ;;  %1740 = vst.msk [vmem:[#allocation4 + $0x108] sm:$0xff] %vm1634_vm0, %v20278_v50 }
  0x66   : > { %1741 = vst.msk [vmem:[#allocation4 + $0x110] sm:$0xff] %vm1634_vm0, %v20278_v50  ;;  %1742 = vst.msk [vmem:[#allocation4 + $0x118] sm:$0xff] %vm1634_vm0, %v20278_v50 }
  0x67   : > { %1325 = vperm.xlu1 %19807, %v1205_v18   ;;  %1320 = vperm.xlu0 %19806, %v1204_v19   ;;  %1743 = vst.msk [vmem:[#allocation4 + $0x120] sm:$0xff] %vm1634_vm0, %v20278_v50  ;;  %1744 = vst.msk [vmem:[#allocation4 + $0x128] sm:$0xff] %vm1634_vm0, %v20278_v50 }
  0x68   : > { %1745 = vst.msk [vmem:[#allocation4 + $0x130] sm:$0xff] %vm1634_vm0, %v20278_v50  ;;  %1746 = vst.msk [vmem:[#allocation4 + $0x138] sm:$0xff] %vm1634_vm0, %v20278_v50 }
  0x69   : > { %1747 = vst.msk [vmem:[#allocation4 + $0x140] sm:$0xff] %vm1634_vm0, %v20278_v50  ;;  %1748 = vst.msk [vmem:[#allocation4 + $0x148] sm:$0xff] %vm1634_vm0, %v20278_v50 }
  0x6a   : > { %1749 = vst.msk [vmem:[#allocation4 + $0x150] sm:$0xff] %vm1634_vm0, %v20278_v50  ;;  %1750 = vst.msk [vmem:[#allocation4 + $0x158] sm:$0xff] %vm1634_vm0, %v20278_v50 }
  0x6b   : > { %1335 = vperm.xlu1 %19807, %v1207_v20   ;;  %1330 = vperm.xlu0 %19806, %v1206_v21   ;;  %1751 = vst.msk [vmem:[#allocation4 + $0x160] sm:$0xff] %vm1634_vm0, %v20278_v50  ;;  %1752 = vst.msk [vmem:[#allocation4 + $0x168] sm:$0xff] %vm1634_vm0, %v20278_v50 }
  0x6c   : > { %1753 = vst.msk [vmem:[#allocation4 + $0x170] sm:$0xff] %vm1634_vm0, %v20278_v50  ;;  %1754 = vst.msk [vmem:[#allocation4 + $0x178] sm:$0xff] %vm1634_vm0, %v20278_v50 }
  0x6f   : > { %1345 = vperm.xlu1 %19807, %v1209_v22   ;;  %1340 = vperm.xlu0 %19806, %v1208_v23  }
  0x73   : > { %1355 = vperm.xlu1 %19807, %v1211_v24   ;;  %1350 = vperm.xlu0 %19806, %v1210_v25  }
  0x77   : > { %1365 = vperm.xlu1 %19807, %v1213_v26   ;;  %1360 = vperm.xlu0 %19806, %v1212_v27  }
  0x7b   : > { %1375 = vperm.xlu1 %19807, %v1215_v28   ;;  %1370 = vperm.xlu0 %19806, %v1214_v29  }
  0x7f   : > { %1385 = vperm.xlu1 %19807, %v1217_v30   ;;  %1380 = vperm.xlu0 %19806, %v1216_v31  }
  0x83   : > { %1395 = vperm.xlu1 %19807, %v1219_v32   ;;  %1390 = vperm.xlu0 %19806, %v1218_v33  }
  0x87   : > { %1405 = vperm.xlu1 %19807, %v1221_v34   ;;  %1400 = vperm.xlu0 %19806, %v1220_v35  }
  0x8b   : > { %1415 = vperm.xlu1 %19807, %v1223_v36   ;;  %1410 = vperm.xlu0 %19806, %v1222_v37  }
  0x8f   : > { %1425 = vperm.xlu1 %19807, %v1225_v38   ;;  %1420 = vperm.xlu0 %19806, %v1224_v39  }
  0x93   : > { %1435 = vperm.xlu1 %19807, %v1227_v40   ;;  %1430 = vperm.xlu0 %19806, %v1226_v41  }
  0x97   : > { %1445 = vperm.xlu1 %19807, %v1229_v42   ;;  %1440 = vperm.xlu0 %19806, %v1228_v43  }
  0x9b   : > { %1455 = vperm.xlu1 %19807, %v1231_v44   ;;  %1450 = vperm.xlu0 %19806, %v1230_v45  }
  0x9f   : > { %1465 = vperm.xlu1 %19807, %v1233_v46   ;;  %1460 = vperm.xlu0 %19806, %v1232_v47  }
  0xa3   : > { %1475 = vperm.xlu1 %19807, %v1235_v48   ;;  %1470 = vperm.xlu0 %19806, %v1234_v49  }
  0xc6   : > { %v1251_v53 = vpop.permute.xlu1 %1250  ;;  %v1241_v54 = vpop.permute.xlu0 %1240 }
  0xc7   : > { %v1486_v55 = vmul.f32 %v20846_v51, %v1251_v53  ;;  %v1484_v56 = vmul.f32 %v20846_v51, %v1241_v54 }
  0xc9   : > { %v1540_v57 = vadd.f32 %v20851_v52, %v1486_v55  ;;  %v1538_v58 = vadd.f32 %v20851_v52, %v1484_v56 }
  0xca   : > { %v1256_v59 = vpop.permute.xlu1 %1255  ;;  %v1246_v60 = vpop.permute.xlu0 %1245 }
  0xcb   : > { %v1588_v61 = vmax.f32 %v1540_v57, 0.0  ;;  %v1586_v62 = vmax.f32 %v1538_v58, 0.0  ;;  %v1487_v63 = vmul.f32 %v20846_v51, %v1256_v59  ;;  %v1485_v0 = vmul.f32 %v20846_v51, %v1246_v60 }
  0xcd   : > { %1637 = vst.msk [vmem:[#allocation2 + $0x10] sm:$0xff] %vm1634_vm0, %v1588_v61  ;;  %1635 = vst.msk [vmem:[#allocation2] sm:$0xff] %vm1634_vm0, %v1586_v62  ;;  %v1541_v1 = vadd.f32 %v20851_v52, %v1487_v63  ;;  %v1539_v2 = vadd.f32 %v20851_v52, %v1485_v0 }
  0xce   : > { %v1266_v3 = vpop.permute.xlu1 %1265  ;;  %v1261_v4 = vpop.permute.xlu0 %1260 }
  0xcf   : > { %v1589_v5 = vmax.f32 %v1541_v1, 0.0  ;;  %v1587_v6 = vmax.f32 %v1539_v2, 0.0  ;;  %v1489_v7 = vmul.f32 %v20846_v51, %v1266_v3  ;;  %v1488_v8 = vmul.f32 %v20846_v51, %v1261_v4 }
  0xd1   : > { %1638 = vst.msk [vmem:[#allocation2 + $0x18] sm:$0xff] %vm1634_vm0, %v1589_v5  ;;  %1636 = vst.msk [vmem:[#allocation2 + $0x8] sm:$0xff] %vm1634_vm0, %v1587_v6  ;;  %v1543_v9 = vadd.f32 %v20851_v52, %v1489_v7  ;;  %v1542_v10 = vadd.f32 %v20851_v52, %v1488_v8 }
  0xd2   : > { %v1276_v11 = vpop.permute.xlu1 %1275  ;;  %v1271_v12 = vpop.permute.xlu0 %1270 }
  0xd3   : > { %v1591_v13 = vmax.f32 %v1543_v9, 0.0  ;;  %v1590_v14 = vmax.f32 %v1542_v10, 0.0  ;;  %v1491_v15 = vmul.f32 %v20846_v51, %v1276_v11  ;;  %v1490_v16 = vmul.f32 %v20846_v51, %v1271_v12 }
  0xd5   : > { %1640 = vst.msk [vmem:[#allocation2 + $0x28] sm:$0xff] %vm1634_vm0, %v1591_v13  ;;  %1639 = vst.msk [vmem:[#allocation2 + $0x20] sm:$0xff] %vm1634_vm0, %v1590_v14  ;;  %v1545_v17 = vadd.f32 %v20851_v52, %v1491_v15  ;;  %v1544_v18 = vadd.f32 %v20851_v52, %v1490_v16 }
  0xd6   : > { %v1286_v19 = vpop.permute.xlu1 %1285  ;;  %v1281_v20 = vpop.permute.xlu0 %1280 }
  0xd7   : > { %v1593_v21 = vmax.f32 %v1545_v17, 0.0  ;;  %v1592_v22 = vmax.f32 %v1544_v18, 0.0  ;;  %v1493_v23 = vmul.f32 %v20846_v51, %v1286_v19  ;;  %v1492_v24 = vmul.f32 %v20846_v51, %v1281_v20 }
  0xd9   : > { %1642 = vst.msk [vmem:[#allocation2 + $0x38] sm:$0xff] %vm1634_vm0, %v1593_v21  ;;  %1641 = vst.msk [vmem:[#allocation2 + $0x30] sm:$0xff] %vm1634_vm0, %v1592_v22  ;;  %v1547_v25 = vadd.f32 %v20851_v52, %v1493_v23  ;;  %v1546_v26 = vadd.f32 %v20851_v52, %v1492_v24 }
  0xda   : > { %v1296_v27 = vpop.permute.xlu1 %1295  ;;  %v1291_v28 = vpop.permute.xlu0 %1290 }
  0xdb   : > { %v1595_v29 = vmax.f32 %v1547_v25, 0.0  ;;  %v1594_v30 = vmax.f32 %v1546_v26, 0.0  ;;  %v1495_v31 = vmul.f32 %v20846_v51, %v1296_v27  ;;  %v1494_v32 = vmul.f32 %v20846_v51, %v1291_v28 }
  0xdd   : > { %1644 = vst.msk [vmem:[#allocation2 + $0x48] sm:$0xff] %vm1634_vm0, %v1595_v29  ;;  %1643 = vst.msk [vmem:[#allocation2 + $0x40] sm:$0xff] %vm1634_vm0, %v1594_v30  ;;  %v1549_v33 = vadd.f32 %v20851_v52, %v1495_v31  ;;  %v1548_v34 = vadd.f32 %v20851_v52, %v1494_v32 }
  0xde   : > { %v1306_v35 = vpop.permute.xlu1 %1305  ;;  %v1301_v36 = vpop.permute.xlu0 %1300 }
  0xdf   : > { %v1597_v37 = vmax.f32 %v1549_v33, 0.0  ;;  %v1596_v38 = vmax.f32 %v1548_v34, 0.0  ;;  %v1497_v39 = vmul.f32 %v20846_v51, %v1306_v35  ;;  %v1496_v40 = vmul.f32 %v20846_v51, %v1301_v36 }
  0xe1   : > { %1646 = vst.msk [vmem:[#allocation2 + $0x58] sm:$0xff] %vm1634_vm0, %v1597_v37  ;;  %1645 = vst.msk [vmem:[#allocation2 + $0x50] sm:$0xff] %vm1634_vm0, %v1596_v38  ;;  %v1551_v41 = vadd.f32 %v20851_v52, %v1497_v39  ;;  %v1550_v42 = vadd.f32 %v20851_v52, %v1496_v40 }
  0xe2   : > { %v1316_v43 = vpop.permute.xlu1 %1315  ;;  %v1311_v44 = vpop.permute.xlu0 %1310 }
  0xe3   : > { %v1599_v45 = vmax.f32 %v1551_v41, 0.0  ;;  %v1598_v46 = vmax.f32 %v1550_v42, 0.0  ;;  %v1499_v47 = vmul.f32 %v20846_v51, %v1316_v43  ;;  %v1498_v48 = vmul.f32 %v20846_v51, %v1311_v44 }
  0xe5   : > { %1648 = vst.msk [vmem:[#allocation2 + $0x68] sm:$0xff] %vm1634_vm0, %v1599_v45  ;;  %1647 = vst.msk [vmem:[#allocation2 + $0x60] sm:$0xff] %vm1634_vm0, %v1598_v46  ;;  %v1553_v49 = vadd.f32 %v20851_v52, %v1499_v47  ;;  %v1552_v50 = vadd.f32 %v20851_v52, %v1498_v48 }
  0xe6   : > { %v1326_v53 = vpop.permute.xlu1 %1325  ;;  %v1321_v54 = vpop.permute.xlu0 %1320 }
  0xe7   : > { %v1601_v55 = vmax.f32 %v1553_v49, 0.0  ;;  %v1600_v56 = vmax.f32 %v1552_v50, 0.0  ;;  %v1501_v57 = vmul.f32 %v20846_v51, %v1326_v53  ;;  %v1500_v58 = vmul.f32 %v20846_v51, %v1321_v54 }
  0xe9   : > { %1650 = vst.msk [vmem:[#allocation2 + $0x78] sm:$0xff] %vm1634_vm0, %v1601_v55  ;;  %1649 = vst.msk [vmem:[#allocation2 + $0x70] sm:$0xff] %vm1634_vm0, %v1600_v56  ;;  %v1555_v59 = vadd.f32 %v20851_v52, %v1501_v57  ;;  %v1554_v60 = vadd.f32 %v20851_v52, %v1500_v58 }
  0xea   : > { %v1336_v61 = vpop.permute.xlu1 %1335  ;;  %v1331_v62 = vpop.permute.xlu0 %1330 }
  0xeb   : > { %v1603_v63 = vmax.f32 %v1555_v59, 0.0  ;;  %v1602_v0 = vmax.f32 %v1554_v60, 0.0  ;;  %v1503_v1 = vmul.f32 %v20846_v51, %v1336_v61  ;;  %v1502_v2 = vmul.f32 %v20846_v51, %v1331_v62 }
  0xed   : > { %1652 = vst.msk [vmem:[#allocation2 + $0x88] sm:$0xff] %vm1634_vm0, %v1603_v63  ;;  %1651 = vst.msk [vmem:[#allocation2 + $0x80] sm:$0xff] %vm1634_vm0, %v1602_v0  ;;  %v1557_v3 = vadd.f32 %v20851_v52, %v1503_v1  ;;  %v1556_v4 = vadd.f32 %v20851_v52, %v1502_v2 }
  0xee   : > { %v1346_v5 = vpop.permute.xlu1 %1345  ;;  %v1341_v6 = vpop.permute.xlu0 %1340 }
  0xef   : > { %v1605_v7 = vmax.f32 %v1557_v3, 0.0  ;;  %v1604_v8 = vmax.f32 %v1556_v4, 0.0  ;;  %v1505_v9 = vmul.f32 %v20846_v51, %v1346_v5  ;;  %v1504_v10 = vmul.f32 %v20846_v51, %v1341_v6 }
  0xf1   : > { %1654 = vst.msk [vmem:[#allocation2 + $0x98] sm:$0xff] %vm1634_vm0, %v1605_v7  ;;  %1653 = vst.msk [vmem:[#allocation2 + $0x90] sm:$0xff] %vm1634_vm0, %v1604_v8  ;;  %v1559_v11 = vadd.f32 %v20851_v52, %v1505_v9  ;;  %v1558_v12 = vadd.f32 %v20851_v52, %v1504_v10 }
  0xf2   : > { %v1356_v13 = vpop.permute.xlu1 %1355  ;;  %v1351_v14 = vpop.permute.xlu0 %1350 }
  0xf3   : > { %v1607_v15 = vmax.f32 %v1559_v11, 0.0  ;;  %v1606_v16 = vmax.f32 %v1558_v12, 0.0  ;;  %v1507_v17 = vmul.f32 %v20846_v51, %v1356_v13  ;;  %v1506_v18 = vmul.f32 %v20846_v51, %v1351_v14 }
  0xf5   : > { %1656 = vst.msk [vmem:[#allocation2 + $0xa8] sm:$0xff] %vm1634_vm0, %v1607_v15  ;;  %1655 = vst.msk [vmem:[#allocation2 + $0xa0] sm:$0xff] %vm1634_vm0, %v1606_v16  ;;  %v1561_v19 = vadd.f32 %v20851_v52, %v1507_v17  ;;  %v1560_v20 = vadd.f32 %v20851_v52, %v1506_v18 }
  0xf6   : > { %v1366_v21 = vpop.permute.xlu1 %1365  ;;  %v1361_v22 = vpop.permute.xlu0 %1360 }
  0xf7   : > { %v1609_v23 = vmax.f32 %v1561_v19, 0.0  ;;  %v1608_v24 = vmax.f32 %v1560_v20, 0.0  ;;  %v1509_v25 = vmul.f32 %v20846_v51, %v1366_v21  ;;  %v1508_v26 = vmul.f32 %v20846_v51, %v1361_v22 }
  0xf9   : > { %1658 = vst.msk [vmem:[#allocation2 + $0xb8] sm:$0xff] %vm1634_vm0, %v1609_v23  ;;  %1657 = vst.msk [vmem:[#allocation2 + $0xb0] sm:$0xff] %vm1634_vm0, %v1608_v24  ;;  %v1563_v27 = vadd.f32 %v20851_v52, %v1509_v25  ;;  %v1562_v28 = vadd.f32 %v20851_v52, %v1508_v26 }
  0xfa   : > { %v1376_v29 = vpop.permute.xlu1 %1375  ;;  %v1371_v30 = vpop.permute.xlu0 %1370 }
  0xfb   : > { %v1611_v31 = vmax.f32 %v1563_v27, 0.0  ;;  %v1610_v32 = vmax.f32 %v1562_v28, 0.0  ;;  %v1511_v33 = vmul.f32 %v20846_v51, %v1376_v29  ;;  %v1510_v34 = vmul.f32 %v20846_v51, %v1371_v30 }
  0xfd   : > { %1660 = vst.msk [vmem:[#allocation2 + $0xc8] sm:$0xff] %vm1634_vm0, %v1611_v31  ;;  %1659 = vst.msk [vmem:[#allocation2 + $0xc0] sm:$0xff] %vm1634_vm0, %v1610_v32  ;;  %v1565_v35 = vadd.f32 %v20851_v52, %v1511_v33  ;;  %v1564_v36 = vadd.f32 %v20851_v52, %v1510_v34 }
  0xfe   : > { %v1386_v37 = vpop.permute.xlu1 %1385  ;;  %v1381_v38 = vpop.permute.xlu0 %1380 }
  0xff   : > { %v1613_v39 = vmax.f32 %v1565_v35, 0.0  ;;  %v1612_v40 = vmax.f32 %v1564_v36, 0.0  ;;  %v1513_v41 = vmul.f32 %v20846_v51, %v1386_v37  ;;  %v1512_v42 = vmul.f32 %v20846_v51, %v1381_v38 }
 0x101   : > { %1662 = vst.msk [vmem:[#allocation2 + $0xd8] sm:$0xff] %vm1634_vm0, %v1613_v39  ;;  %1661 = vst.msk [vmem:[#allocation2 + $0xd0] sm:$0xff] %vm1634_vm0, %v1612_v40  ;;  %v1567_v43 = vadd.f32 %v20851_v52, %v1513_v41  ;;  %v1566_v44 = vadd.f32 %v20851_v52, %v1512_v42 }
 0x102   : > { %v1396_v45 = vpop.permute.xlu1 %1395  ;;  %v1391_v46 = vpop.permute.xlu0 %1390 }
 0x103   : > { %v1615_v47 = vmax.f32 %v1567_v43, 0.0  ;;  %v1614_v48 = vmax.f32 %v1566_v44, 0.0  ;;  %v1515_v49 = vmul.f32 %v20846_v51, %v1396_v45  ;;  %v1514_v50 = vmul.f32 %v20846_v51, %v1391_v46 }
 0x105   : > { %1664 = vst.msk [vmem:[#allocation2 + $0xe8] sm:$0xff] %vm1634_vm0, %v1615_v47  ;;  %1663 = vst.msk [vmem:[#allocation2 + $0xe0] sm:$0xff] %vm1634_vm0, %v1614_v48  ;;  %v1569_v53 = vadd.f32 %v20851_v52, %v1515_v49  ;;  %v1568_v54 = vadd.f32 %v20851_v52, %v1514_v50 }
 0x106   : > { %v1406_v55 = vpop.permute.xlu1 %1405  ;;  %v1401_v56 = vpop.permute.xlu0 %1400 }
 0x107   : > { %v1617_v57 = vmax.f32 %v1569_v53, 0.0  ;;  %v1616_v58 = vmax.f32 %v1568_v54, 0.0  ;;  %v1517_v59 = vmul.f32 %v20846_v51, %v1406_v55  ;;  %v1516_v60 = vmul.f32 %v20846_v51, %v1401_v56 }
 0x109   : > { %1666 = vst.msk [vmem:[#allocation2 + $0xf8] sm:$0xff] %vm1634_vm0, %v1617_v57  ;;  %1665 = vst.msk [vmem:[#allocation2 + $0xf0] sm:$0xff] %vm1634_vm0, %v1616_v58  ;;  %v1571_v61 = vadd.f32 %v20851_v52, %v1517_v59  ;;  %v1570_v62 = vadd.f32 %v20851_v52, %v1516_v60 }
 0x10a   : > { %v1416_v63 = vpop.permute.xlu1 %1415  ;;  %v1411_v0 = vpop.permute.xlu0 %1410 }
 0x10b   : > { %v1619_v1 = vmax.f32 %v1571_v61, 0.0  ;;  %v1618_v2 = vmax.f32 %v1570_v62, 0.0  ;;  %v1519_v3 = vmul.f32 %v20846_v51, %v1416_v63  ;;  %v1518_v4 = vmul.f32 %v20846_v51, %v1411_v0 }
 0x10d   : > { %1668 = vst.msk [vmem:[#allocation2 + $0x108] sm:$0xff] %vm1634_vm0, %v1619_v1  ;;  %1667 = vst.msk [vmem:[#allocation2 + $0x100] sm:$0xff] %vm1634_vm0, %v1618_v2  ;;  %v1573_v5 = vadd.f32 %v20851_v52, %v1519_v3  ;;  %v1572_v6 = vadd.f32 %v20851_v52, %v1518_v4 }
 0x10e   : > { %v1426_v7 = vpop.permute.xlu1 %1425  ;;  %v1421_v8 = vpop.permute.xlu0 %1420 }
 0x10f   : > { %v1621_v9 = vmax.f32 %v1573_v5, 0.0  ;;  %v1620_v10 = vmax.f32 %v1572_v6, 0.0  ;;  %v1521_v11 = vmul.f32 %v20846_v51, %v1426_v7  ;;  %v1520_v12 = vmul.f32 %v20846_v51, %v1421_v8 }
 0x111   : > { %1670 = vst.msk [vmem:[#allocation2 + $0x118] sm:$0xff] %vm1634_vm0, %v1621_v9  ;;  %1669 = vst.msk [vmem:[#allocation2 + $0x110] sm:$0xff] %vm1634_vm0, %v1620_v10  ;;  %v1575_v13 = vadd.f32 %v20851_v52, %v1521_v11  ;;  %v1574_v14 = vadd.f32 %v20851_v52, %v1520_v12 }
 0x112   : > { %v1436_v15 = vpop.permute.xlu1 %1435  ;;  %v1431_v16 = vpop.permute.xlu0 %1430 }
 0x113   : > { %v1623_v17 = vmax.f32 %v1575_v13, 0.0  ;;  %v1622_v18 = vmax.f32 %v1574_v14, 0.0  ;;  %v1523_v19 = vmul.f32 %v20846_v51, %v1436_v15  ;;  %v1522_v20 = vmul.f32 %v20846_v51, %v1431_v16 }
 0x115   : > { %1672 = vst.msk [vmem:[#allocation2 + $0x128] sm:$0xff] %vm1634_vm0, %v1623_v17  ;;  %1671 = vst.msk [vmem:[#allocation2 + $0x120] sm:$0xff] %vm1634_vm0, %v1622_v18  ;;  %v1577_v21 = vadd.f32 %v20851_v52, %v1523_v19  ;;  %v1576_v22 = vadd.f32 %v20851_v52, %v1522_v20 }
 0x116   : > { %v1446_v23 = vpop.permute.xlu1 %1445  ;;  %v1441_v24 = vpop.permute.xlu0 %1440 }
 0x117   : > { %v1625_v25 = vmax.f32 %v1577_v21, 0.0  ;;  %v1624_v26 = vmax.f32 %v1576_v22, 0.0  ;;  %v1525_v27 = vmul.f32 %v20846_v51, %v1446_v23  ;;  %v1524_v28 = vmul.f32 %v20846_v51, %v1441_v24 }
 0x119   : > { %1674 = vst.msk [vmem:[#allocation2 + $0x138] sm:$0xff] %vm1634_vm0, %v1625_v25  ;;  %1673 = vst.msk [vmem:[#allocation2 + $0x130] sm:$0xff] %vm1634_vm0, %v1624_v26  ;;  %v1579_v29 = vadd.f32 %v20851_v52, %v1525_v27  ;;  %v1578_v30 = vadd.f32 %v20851_v52, %v1524_v28 }
 0x11a   : > { %v1456_v31 = vpop.permute.xlu1 %1455  ;;  %v1451_v32 = vpop.permute.xlu0 %1450 }
 0x11b   : > { %v1627_v33 = vmax.f32 %v1579_v29, 0.0  ;;  %v1626_v34 = vmax.f32 %v1578_v30, 0.0  ;;  %v1527_v35 = vmul.f32 %v20846_v51, %v1456_v31  ;;  %v1526_v36 = vmul.f32 %v20846_v51, %v1451_v32 }
 0x11d   : > { %1676 = vst.msk [vmem:[#allocation2 + $0x148] sm:$0xff] %vm1634_vm0, %v1627_v33  ;;  %1675 = vst.msk [vmem:[#allocation2 + $0x140] sm:$0xff] %vm1634_vm0, %v1626_v34  ;;  %v1581_v37 = vadd.f32 %v20851_v52, %v1527_v35  ;;  %v1580_v38 = vadd.f32 %v20851_v52, %v1526_v36 }
 0x11e   : > { %v1466_v39 = vpop.permute.xlu1 %1465  ;;  %v1461_v40 = vpop.permute.xlu0 %1460 }
 0x11f   : > { %v1629_v41 = vmax.f32 %v1581_v37, 0.0  ;;  %v1628_v42 = vmax.f32 %v1580_v38, 0.0  ;;  %v1529_v43 = vmul.f32 %v20846_v51, %v1466_v39  ;;  %v1528_v44 = vmul.f32 %v20846_v51, %v1461_v40 }
 0x121   : > { %1678 = vst.msk [vmem:[#allocation2 + $0x158] sm:$0xff] %vm1634_vm0, %v1629_v41  ;;  %1677 = vst.msk [vmem:[#allocation2 + $0x150] sm:$0xff] %vm1634_vm0, %v1628_v42  ;;  %v1583_v45 = vadd.f32 %v20851_v52, %v1529_v43  ;;  %v1582_v46 = vadd.f32 %v20851_v52, %v1528_v44 }
 0x122   : > { %v1476_v47 = vpop.permute.xlu1 %1475  ;;  %v1471_v48 = vpop.permute.xlu0 %1470 }
 0x123   : > { %v1631_v49 = vmax.f32 %v1583_v45, 0.0  ;;  %v1630_v50 = vmax.f32 %v1582_v46, 0.0  ;;  %v1531_v53 = vmul.f32 %v20846_v51, %v1476_v47  ;;  %v1530_v54 = vmul.f32 %v20846_v51, %v1471_v48 }
 0x125   : > { %1680 = vst.msk [vmem:[#allocation2 + $0x168] sm:$0xff] %vm1634_vm0, %v1631_v49  ;;  %1679 = vst.msk [vmem:[#allocation2 + $0x160] sm:$0xff] %vm1634_vm0, %v1630_v50  ;;  %v1585_v55 = vadd.f32 %v20851_v52, %v1531_v53  ;;  %v1584_v56 = vadd.f32 %v20851_v52, %v1530_v54 }
 0x127   : > { %v1633_v57 = vmax.f32 %v1585_v55, 0.0  ;;  %v1632_v58 = vmax.f32 %v1584_v56, 0.0 }
 0x129   : > { %1682 = vst.msk [vmem:[#allocation2 + $0x178] sm:$0xff] %vm1634_vm0, %v1633_v57  ;;  %1681 = vst.msk [vmem:[#allocation2 + $0x170] sm:$0xff] %vm1634_vm0, %v1632_v58 }
 0x12a PF: > { %s26358_s1 = sld [smem:[#allocation14_spill]]  ;;  %s26359_s14 = sld [smem:[#allocation12_spill]]  ;;  %v1898_v52 = vld [vmem:[%s20478_s8] sm:$0xff]  ;;  %vm1772_vm1 = vcmask 261120   ;;  %v1899_v61 = vld [vmem:[%s20478_s8 + $0x8] sm:$0xff]  ;;  %v1900_v2 = vld [vmem:[%s20478_s8 + $0x10] sm:$0xff]  ;;  %v25982_v40 = vlaneseq }
 0x12b   : > { %s26360_s27 = sld [smem:[#allocation13_spill]]  ;;  %v19313_v0 = vpack.c.bf16 %v1899_v61, %v1898_v52  ;;  %v1901_v3 = vld [vmem:[%s20478_s8 + $0x18] sm:$0xff]  ;;  %v2029_v7 = vld [vmem:[%s20487_s3] sm:$0xff]  ;;  %v2030_v8 = vld [vmem:[%s20487_s3 + $0x8] sm:$0xff]  ;;  %v20279_v12 = vmov 0.0|0.0   ;;  %s26361_s8 = sld [smem:[#allocation11_spill]] }
 0x12c   : > { %v19317_v5 = vpack.c.bf16 %v1901_v3, %v1900_v2  ;;  %v19322_v13 = vpack.c.bf16 %v2030_v8, %v2029_v7  ;;  %v2031_v15 = vld [vmem:[%s20487_s3 + $0x10] sm:$0xff]  ;;  %v2032_v16 = vld [vmem:[%s20487_s3 + $0x18] sm:$0xff]  ;;  %v25995_v24 = vmov 0.0   ;;  %vm20281_vm2 = vmmov 0   ;;  %v2708_v26 = vld [vmem:[%s20496_s7] sm:$0xff]  ;;  %s26362_s18 = sld [smem:[#allocation157_spill]]  ;;  %s26368_s20 = scalar_lea.vmem %s25954_s13, %s20446_s6 }
 0x12d   : > { %19314 = vmatprep.subr.bf16.mxu1 %v19313_v0  ;;  %v19325_v20 = vpack.c.bf16 %v2032_v16, %v2031_v15  ;;  %v2709_v27 = vld [vmem:[%s20496_s7 + $0x8] sm:$0xff]  ;;  %v2710_v29 = vld [vmem:[%s20496_s7 + $0x10] sm:$0xff]  ;;  %v2711_v30 = vld [vmem:[%s20496_s7 + $0x18] sm:$0xff]  ;;  %vm3870_vm3 = vcmask 64512   ;;  %v20282_v38 = vmov 1966171168   ;;  %s26424_s24 = scalar_lea.vmem %s25960_s19, %s20446_s6 }
 0x12e   : > { %19316 = vmatpush3.bf16.msra.mxu1 %v19313_v0  ;;  %v19327_v28 = vpack.c.bf16 %v2709_v27, %v2708_v26  ;;  %v19331_v31 = vpack.c.bf16 %v2711_v30, %v2710_v29  ;;  %v3867_v32 = vld [vmem:[%s20523_s4] sm:$0xff]  ;;  %v3868_v34 = vld [vmem:[%s20523_s4 + $0x8] sm:$0xff]  ;;  %v3869_v36 = vld [vmem:[%s20523_s4 + $0x10] sm:$0xff]  ;;  %v2128_v39 = vunpack.c.l.s4 %v20282_v38  ;;  %s26364_s28 = sld [smem:[#allocation159_spill]]  ;;  %v21078_v45 = vshrl.u32 %v25982_v40, 7  ;;  %s20283_s12 = smov 96  }
 0x12f   : > { %19318 = vmatprep.subr.bf16.mxu1 %v19317_v5  ;;  %v3864_v33 = vld [vmem:[%s20518_s29] sm:$0xff]  ;;  %v3865_v35 = vld [vmem:[%s20518_s29 + $0x8] sm:$0xff]  ;;  %v3866_v37 = vld [vmem:[%s20518_s29 + $0x10] sm:$0xff]  ;;  %vm8531_vm4 = vcmask 785408  }
 0x130   : > { %v1761_v51 = vld [vmem:[%s26358_s1] sm:$0xff]  ;;  %v1762_v59 = vld [vmem:[%s26358_s1 + $0x8] sm:$0xff]  ;;  %v1763_v62 = vld [vmem:[%s26358_s1 + $0x10] sm:$0xff]  ;;  %v2129_v44 = vunpack.c.0.s8 %v2128_v39  ;;  %26366 = vst [vmem:[#allocation16_spill] sm:$0xff] %v21078_v45  ;;  %v21091_v3 = vsub.s32 0, %v21078_v45 }
 0x131   : > { %v19305_v60 = vpack.c.bf16 %v1762_v59, %v1761_v51  ;;  %v1764_v63 = vld [vmem:[%s26358_s1 + $0x18] sm:$0xff]  ;;  %v1755_v4 = vld [vmem:[%s26359_s14] sm:$0xff]  ;;  %v1756_v9 = vld [vmem:[%s26359_s14 + $0x8] sm:$0xff]  ;;  %s26425_s1 = sld [smem:[#allocation15_spill]] }
 0x132   : > { %v19309_v1 = vpack.c.bf16 %v1764_v63, %v1763_v62  ;;  %17749 = vmatprep.mubr.msk.f32.mxu0 %vm1772_vm1, %v1755_v4  ;;  %v1892_v6 = vld [vmem:[%s26360_s27] sm:$0xff]  ;;  %19320 = vmatpush3.bf16.msra.mxu1 %v19317_v5  ;;  %v1893_v10 = vld [vmem:[%s26360_s27 + $0x8] sm:$0xff]  ;;  %v1757_v11 = vld [vmem:[%s26359_s14 + $0x10] sm:$0xff]  ;;  %s26363_s11 = scalar_lea.vmem %s26362_s18, %s20446_s6  ;;  %v21085_v57 = vsub.s32 %v2129_v44, %v21078_v45  ;;  %26367 = vst [vmem:[#allocation17_spill] sm:$0xff] %v21091_v3 }
 0x133   : > { %19306 = vmatprep.subr.bf16.mxu0 %v19305_v60  ;;  %17766 = vmatprep.mubr.msk.f32.mxu1 %vm1772_vm1, %v1892_v6  ;;  %v1894_v14 = vld [vmem:[%s26360_s27 + $0x10] sm:$0xff]  ;;  %v1758_v17 = vld [vmem:[%s26359_s14 + $0x18] sm:$0xff]  ;;  %v1759_v19 = vld [vmem:[%s26359_s14 + $0x20] sm:$0xff] }
 0x134   : > { %19308 = vmatpush3.bf16.msra.mxu0 %v19305_v60  ;;  %v1895_v18 = vld [vmem:[%s26360_s27 + $0x18] sm:$0xff]  ;;  %v1896_v21 = vld [vmem:[%s26360_s27 + $0x20] sm:$0xff]  ;;  %v1760_v22 = vld [vmem:[%s26359_s14 + $0x28] sm:$0xff]  ;;  %19328 = vmatprep.subr.bf16.mxu1 %v19327_v28  ;;  %s26365_s0 = scalar_lea.vmem %s26364_s28, %s20446_s6  ;;  %s26659_s14 = scalar_lea.vmem %s25963_s22, %s20446_s6 }
 0x135   : > { %19310 = vmatprep.subr.bf16.mxu0 %v19309_v1  ;;  %17767 = vmatmul.mubr.msk.f32.vlgmr.msra.gmra.mrb[0].mxu1 %vm1772_vm1, %v1893_v10  ;;  %v1897_v23 = vld [vmem:[%s26360_s27 + $0x28] sm:$0xff]  ;;  %v2028_v25 = vld [vmem:[%s26361_s8] sm:$0xff]  ;;  %s26895_s6 = sld [smem:[#allocation10_spill]] }
 0x136   : > { %17769 = vmatprep.mubr.msk.f32.mxu1 %vm1772_vm1, %v1894_v14  ;;  %19330 = vmatpush3.bf16.msra.mxu1 %v19327_v28  ;;  %v21065_v41 = vld [vmem:[%s26363_s11] ss:$0 sm:$0xff] }
 0x137   : > { %19332 = vmatprep.subr.bf16.mxu1 %v19331_v31  ;;  %v21073_v42 = vld [vmem:[%s26365_s0] ss:$0 sm:$0xff] }
 0x138   : > { %19312 = vmatpush3.bf16.msra.mxu0 %v19309_v1  ;;  %v15954_v44 = vld [vmem:[%s26368_s20] ss:$0 sm:$0xff] }
 0x139   : > { %19321 = vmatprep.subr.bf16.mxu0 %v20279_v12  ;;  %17770 = vmatmul.mubr.msk.f32.gmra.mrb[2].mxu1 %vm1772_vm1, %v1895_v18 }
 0x13a   : > { %17772 = vmatprep.mubr.msk.f32.mxu1 %vm1772_vm1, %v1896_v21  ;;  %19334 = vmatpush3.bf16.msra.mxu1 %v19331_v31 }
 0x13b   : > { %17750 = vmatmul.mubr.msk.f32.vlgmr.msra.gmra.mrb[0].mxu0 %vm1772_vm1, %v1756_v9  ;;  %17986 = vmatprep.subr.mxu1 %v25995_v24  ;;  %p16779_p5 = scmp.ne.s32.totalorder %s26895_s6, 3 }
 0x13c   : > { %17752 = vmatprep.mubr.msk.f32.mxu0 %vm1772_vm1, %v1757_v11  ;;  %19323 = vmatpush3.bf16.msra.mxu0 %v19322_v13  ;;  %s26896_s3 = sld [smem:[#allocation151_spill]] (!%p16779_p5)  ;;  %vm14580_vm5 = vcmask (!%p16779_p5), 1041409   ;;  %vm14582_vm6 = vcmask (!%p16779_p5), 1042434   ;;  %vm14584_vm7 = vcmask (!%p16779_p5), 1043459   ;;  %vm14612_vm8 = vcmask (!%p16779_p5), 60416   ;;  %s26900_s11 = sld [smem:[#allocation170_spill]] (!%p16779_p5) }
 0x13d   : > { %19324 = vmatprep.subr.bf16.mxu0 %v20279_v12  ;;  %17773 = vmatmul.mubr.msk.f32.gmra.mrb[4].mxu1 %vm1772_vm1, %v1897_v23  ;;  %vm14586_vm13 = vcmask (!%p16779_p5), 1044484   ;;  %vm14588_vm14 = vcmask (!%p16779_p5), 1045509   ;;  %vm14590_vm15 = vcmask (!%p16779_p5), 1046534   ;;  %vm14592_vm0 = vcmask (!%p16779_p5), 1047559  }
 0x13f   : > { %17753 = vmatmul.mubr.msk.f32.gmra.mrb[2].mxu0 %vm1772_vm1, %v1758_v17 }
 0x140   : > { %17755 = vmatprep.mubr.msk.f32.mxu0 %vm1772_vm1, %v1759_v19  ;;  %19326 = vmatpush3.bf16.msra.mxu0 %v19325_v20 }
 0x141   : > { %17866 = vmatprep.subr.mxu0 %v25995_v24 }
 0x143   : > { %17756 = vmatmul.mubr.msk.f32.gmra.mrb[4].mxu0 %vm1772_vm1, %v1760_v22 }
 0x144   : > { %17783 = vmatprep.mubr.msk.f32.mxu0 %vm20281_vm2, %v25995_v24 }
 0x147   : > { %17784 = vmatmul.mubr.msk.f32.vlgmr.msra.gmra.mrb[6].mxu0 %vm1772_vm1, %v2028_v25 }
 0x148   : > { %17868 = vmatprep.mubr.msk.f32.mxu0 %vm20281_vm2, %v25995_v24  ;;  %17867 = vmatpush3.msra.mxu0 %v3867_v32 }
 0x149   : > { %17871 = vmatprep.subr.mxu0 %v25995_v24 }
 0x14b   : > { %17869 = vmatmul.mubr.msk.f32.vlgmr.msra.gmra.mrb[8].mxu0 %vm3870_vm3, %v3864_v33 }
 0x14c   : > { %17872 = vmatpush3.msra.mxu0 %v3868_v34  ;;  %17873 = vmatprep.mubr.msk.f32.mxu0 %vm20281_vm2, %v25995_v24 }
 0x14d   : > { %17876 = vmatprep.subr.mxu0 %v25995_v24 }
 0x14f   : > { %17874 = vmatmul.mubr.msk.f32.vlgmr.msra.gmra.mrb[10].mxu0 %vm3870_vm3, %v3865_v35 }
 0x150   : > { %17877 = vmatpush3.msra.mxu0 %v3869_v36  ;;  %17878 = vmatprep.mubr.msk.f32.mxu0 %vm20281_vm2, %v25995_v24 }
 0x151   : > { %17881 = vmatprep.subr.mxu0 %v25995_v24 }
 0x153   : > { %17879 = vmatmul.mubr.msk.f32.vlgmr.msra.gmra.mrb[12].mxu0 %vm3870_vm3, %v3866_v37 }
 0x154   : > { %17883 = vmatprep.mubr.msk.f32.mxu0 %vm20281_vm2, %v25995_v24 }
 0x208   : > { %v17768_v47 = vpop.f32.mrb[0].mxu1 }
 0x209   : > { %v1999_v49 = vadd.f32 %v17768_v47, %v21073_v42  ;;  %v1993_v53 = vpop.f32.mrb[1].mxu1 }
 0x20a   : > { %v1994_v55 = vadd.f32 %v21073_v42, %v1993_v53 }
 0x20b   : > { %v2023_v56 = vmax.f32 %v1999_v49, 0.0 }
 0x20c   : > { %v2022_v59 = vmax.f32 %v1994_v55, 0.0  ;;  %v17771_v60 = vpop.f32.mrb[2].mxu1 }
 0x20d   : > { %v2009_v63 = vadd.f32 %v17771_v60, %v21073_v42  ;;  %v2003_v1 = vpop.f32.mrb[3].mxu1 }
 0x20e   : > { %v17751_v43 = vpop.f32.mrb[0].mxu0  ;;  %v2004_v5 = vadd.f32 %v21073_v42, %v2003_v1 }
 0x20f   : > { %v1863_v46 = vadd.f32 %v17751_v43, %v21065_v41  ;;  %v1857_v48 = vpop.f32.mrb[1].mxu0  ;;  %v2025_v8 = vmax.f32 %v2009_v63, 0.0 }
 0x210   : > { %v1858_v50 = vadd.f32 %v21065_v41, %v1857_v48  ;;  %v2024_v13 = vmax.f32 %v2004_v5, 0.0  ;;  %v17774_v15 = vpop.f32.mrb[4].mxu1 }
 0x211   : > { %v1887_v54 = vmax.f32 %v1863_v46, 0.0  ;;  %v2013_v21 = vpop.f32.mrb[5].mxu1  ;;  %v2019_v43 = vadd.f32 %v17774_v15, %v21073_v42 }
 0x212   : > { %v1886_v58 = vmax.f32 %v1858_v50, 0.0  ;;  %v17754_v51 = vpop.f32.mrb[2].mxu0  ;;  %v2014_v55 = vadd.f32 %v21073_v42, %v2013_v21 }
 0x213   : > { %v1873_v52 = vadd.f32 %v17754_v51, %v21065_v41  ;;  %v1867_v61 = vpop.f32.mrb[3].mxu0  ;;  %v2115_v62 = vadd.f32 %v2023_v56, %v1887_v54  ;;  %v2027_v53 = vmax.f32 %v2019_v43, 0.0 }
 0x214   : > { %v1868_v0 = vadd.f32 %v21065_v41, %v1867_v61  ;;  %v2114_v2 = vadd.f32 %v2022_v59, %v1886_v58  ;;  %v2026_v61 = vmax.f32 %v2014_v55, 0.0 }
 0x215   : > { %v1889_v4 = vmax.f32 %v1873_v52, 0.0  ;;  %v2175_v6 = vcombine.high %v2115_v62, %v2115_v62  ;;  %v21095_v7 = vrot.slane %v2115_v62, %v21085_v57 }
 0x216   : > { %v1888_v9 = vmax.f32 %v1868_v0, 0.0  ;;  %v17757_v10 = vpop.f32.mrb[4].mxu0  ;;  %v2126_v11 = vcombine.high %v2114_v2, %v2114_v2  ;;  %v2133_v12 = vrot.slane %v2114_v2, %v21085_v57 }
 0x217   : > { %v1883_v14 = vadd.f32 %v17757_v10, %v21065_v41  ;;  %v1877_v16 = vpop.f32.mrb[5].mxu0  ;;  %v21100_v17 = vrot.slane %v2175_v6, %v21085_v57  ;;  %v2190_v18 = vcombine.high %v21095_v7, %v21095_v7  ;;  %v21106_v19 = vrot.slane %v21095_v7, %v21085_v57 }
 0x218   : > { %v2117_v20 = vadd.f32 %v2025_v8, %v1889_v4  ;;  %v2140_v22 = vrot.slane %v2126_v11, %v21085_v57  ;;  %v2141_v23 = vcombine.high %v2133_v12, %v2133_v12  ;;  %v2149_v25 = vrot.slane %v2133_v12, %v21085_v57 }
 0x219   : > { %v2116_v26 = vadd.f32 %v2024_v13, %v1888_v9  ;;  %v2191_v27 = vcombine.high %v21100_v17, %v21100_v17  ;;  %v1891_v30 = vmax.f32 %v1883_v14, 0.0  ;;  %v1878_v54 = vadd.f32 %v21065_v41, %v1877_v16 }
 0x21a   : > { %v2273_v28 = vcombine.high %v2117_v20, %v2117_v20  ;;  %v21113_v29 = vrot.slane %v2117_v20, %v21085_v57  ;;  %v2109_v31 = vpop.f32.mrb[6].mxu0  ;;  %v2142_v32 = vcombine.high %v2140_v22, %v2140_v22  ;;  %v2163_v33 = vrot.slane %v2141_v23, %v21085_v57 }
 0x21b   : > { %v2224_v34 = vcombine.high %v2116_v26, %v2116_v26  ;;  %v21117_v35 = vrot.slane %v2116_v26, %v21085_v57  ;;  %v17785_v36 = vpop.f32.mrb[7].mxu0  ;;  %v2110_v58 = vadd.f32 %v15954_v44, %v2109_v31  ;;  %v2423_v51 = vrot.slane %v2149_v25, %v21091_v3 }
 0x21c   : > { %v21120_v37 = vrot.slane %v2273_v28, %v21085_v57  ;;  %v2288_v38 = vcombine.high %v21113_v29, %v21113_v29  ;;  %v21126_v39 = vrot.slane %v21113_v29, %v21085_v57  ;;  %v2427_v46 = vrot.slane %v2163_v33, %v21091_v3 }
 0x21d   : > { %v21136_v47 = vrot.slane %v2224_v34, %v21085_v57  ;;  %v2239_v48 = vcombine.high %v21117_v35, %v21117_v35  ;;  %v21142_v49 = vrot.slane %v21117_v35, %v21085_v57  ;;  %v2171_v59 = vcombine.high %v2149_v25, %v2149_v25 }
 0x21e   : > { %v2289_v50 = vcombine.high %v21120_v37, %v21120_v37  ;;  %v2119_v52 = vadd.f32 %v2027_v53, %v1891_v30  ;;  %v1890_v60 = vmax.f32 %v1878_v54, 0.0  ;;  %v2173_v62 = vcombine.high %v2163_v33, %v2163_v33 }
 0x21f   : > { %v2240_v56 = vcombine.high %v21136_v47, %v21136_v47  ;;  %v21151_v63 = vmax.f32 %v2110_v58, 0.0  ;;  %v2431_v0 = vrot.slane %v2171_v59, %v21091_v3  ;;  %v2156_v1 = vrot.slane %v2140_v22, %v21085_v57 }
 0x220   : > { %v2170_v41 = vrot.slane %v2142_v32, %v21085_v57  ;;  %v2371_v42 = vcombine.high %v2119_v52, %v2119_v52  ;;  %v21157_v2 = vrot.slane %v2119_v52, %v21085_v57  ;;  %v2118_v4 = vadd.f32 %v2026_v61, %v1890_v60 }
 0x221   : > { %v2435_v5 = vrot.slane %v2173_v62, %v21091_v3  ;;  %v2661_v6 = vadd.f32 %v2427_v46, %v21151_v63  ;;  %v2660_v8 = vadd.f32 %v2423_v51, %v21151_v63  ;;  %v2662_v9 = vadd.f32 %v2431_v0, %v21151_v63 }
 0x222   : > { %v2439_v10 = vrot.slane %v2156_v1, %v21091_v3  ;;  %v21165_v11 = vrot.slane %v2371_v42, %v21085_v57  ;;  %v2386_v12 = vcombine.high %v21157_v2, %v21157_v2  ;;  %v21171_v13 = vrot.slane %v21157_v2, %v21085_v57 }
 0x223   : > { %v2322_v14 = vcombine.high %v2118_v4, %v2118_v4  ;;  %v21174_v15 = vrot.slane %v2118_v4, %v21085_v57  ;;  %17794 = vmatprep.mubr.msk.f32.mxu1 %vm1772_vm1, %v2660_v8  ;;  %v2663_v16 = vadd.f32 %v2435_v5, %v21151_v63  ;;  %v2443_v21 = vrot.slane %v2170_v41, %v21091_v3 }
 0x224   : > { %v2664_v20 = vadd.f32 %v2439_v10, %v21151_v63  ;;  %v2387_v22 = vcombine.high %v21165_v11, %v21165_v11  ;;  %17795 = vmatmul.mubr.msk.f32.vlgmr.msra.gmra.mrb[6].mxu1 %vm1772_vm1, %v2661_v6  ;;  %v2172_v25 = vcombine.high %v2156_v1, %v2156_v1  ;;  %v2174_v26 = vcombine.high %v2170_v41, %v2170_v41 }
 0x225   : > { %v21183_v23 = vrot.slane %v2322_v14, %v21085_v57  ;;  %v2337_v28 = vcombine.high %v21174_v15, %v21174_v15  ;;  %v21190_v30 = vrot.slane %v21174_v15, %v21085_v57  ;;  %17797 = vmatprep.mubr.msk.f32.mxu1 %vm1772_vm1, %v2662_v9  ;;  %v2665_v31 = vadd.f32 %v2443_v21, %v21151_v63 }
 0x226   : > { %v2455_v32 = vrot.slane %v21106_v19, %v21091_v3  ;;  %v2447_v34 = vrot.slane %v2172_v25, %v21091_v3  ;;  %v2451_v36 = vrot.slane %v2174_v26, %v21091_v3  ;;  %v2212_v43 = vrot.slane %v2190_v18, %v21085_v57 }
 0x227   : > { %v2338_v33 = vcombine.high %v21183_v23, %v21183_v23  ;;  %v2220_v46 = vcombine.high %v21106_v19, %v21106_v19  ;;  %v2205_v53 = vrot.slane %v21100_v17, %v21085_v57  ;;  %v2219_v54 = vrot.slane %v2191_v27, %v21085_v57 }
 0x228   : > { %v2668_v44 = vadd.f32 %v2455_v32, %v21151_v63  ;;  %17798 = vmatmul.mubr.msk.f32.gmra.mrb[8].mxu1 %vm1772_vm1, %v2663_v16  ;;  %v2666_v55 = vadd.f32 %v2447_v34, %v21151_v63  ;;  %v2667_v7 = vadd.f32 %v2451_v36, %v21151_v63  ;;  %v2459_v18 = vrot.slane %v2212_v43, %v21091_v3 }
 0x229   : > { %v2222_v58 = vcombine.high %v2212_v43, %v2212_v43  ;;  %17800 = vmatprep.mubr.msk.f32.mxu1 %vm1772_vm1, %v2664_v20  ;;  %v2463_v19 = vrot.slane %v2220_v46, %v21091_v3  ;;  %v2471_v51 = vrot.slane %v2205_v53, %v21091_v3  ;;  %v2475_v59 = vrot.slane %v2219_v54, %v21091_v3 }
 0x22a   : > { %v2221_v52 = vcombine.high %v2205_v53, %v2205_v53  ;;  %v2669_v17 = vadd.f32 %v2459_v18, %v21151_v63  ;;  %v2223_v60 = vcombine.high %v2219_v54, %v2219_v54  ;;  %v2487_v61 = vrot.slane %v21142_v49, %v21091_v3 }
 0x22b   : > { %v2467_v27 = vrot.slane %v2222_v58, %v21091_v3  ;;  %v2670_v62 = vadd.f32 %v2463_v19, %v21151_v63  ;;  %v2672_v0 = vadd.f32 %v2471_v51, %v21151_v63  ;;  %v21228_v1 = vadd.f32 %v2475_v59, %v21151_v63 }
 0x22c   : > { %v2479_v41 = vrot.slane %v2221_v52, %v21091_v3  ;;  %17801 = vmatmul.mubr.msk.f32.gmra.mrb[10].mxu1 %vm1772_vm1, %v2665_v31  ;;  %v2483_v4 = vrot.slane %v2223_v60, %v21091_v3  ;;  %v21235_v5 = vadd.f32 %v2487_v61, %v21151_v63  ;;  %v2261_v6 = vrot.slane %v2239_v48, %v21085_v57 }
 0x22d   : > { %v2671_v42 = vadd.f32 %v2467_v27, %v21151_v63  ;;  %17803 = vmatprep.mubr.msk.f32.mxu1 %vm1772_vm1, %v2666_v55  ;;  %v2269_v9 = vcombine.high %v21142_v49, %v21142_v49  ;;  %v2254_v10 = vrot.slane %v21136_v47, %v21085_v57  ;;  %v2268_v14 = vrot.slane %v2240_v56, %v21085_v57 }
 0x22e   : > { %v21243_v8 = vadd.f32 %v2479_v41, %v21151_v63  ;;  %v21254_v16 = vadd.f32 %v2483_v4, %v21151_v63  ;;  %v2491_v35 = vrot.slane %v2261_v6, %v21091_v3  ;;  %v2271_v48 = vcombine.high %v2261_v6, %v2261_v6 }
 0x22f   : > { %v2519_v20 = vrot.slane %v21126_v39, %v21091_v3  ;;  %v2495_v21 = vrot.slane %v2269_v9, %v21091_v3  ;;  %v2503_v49 = vrot.slane %v2254_v10, %v21091_v3  ;;  %v2507_v25 = vrot.slane %v2268_v14, %v21091_v3 }
 0x230   : > { %v2270_v26 = vcombine.high %v2254_v10, %v2254_v10  ;;  %17804 = vmatmul.mubr.msk.f32.gmra.mrb[12].mxu1 %vm1772_vm1, %v2667_v7  ;;  %v21264_v47 = vadd.f32 %v2491_v35, %v21151_v63  ;;  %v2499_v56 = vrot.slane %v2271_v48, %v21091_v3  ;;  %v2272_v31 = vcombine.high %v2268_v14, %v2268_v14 }
 0x231   : > { %v21268_v32 = vadd.f32 %v2519_v20, %v21151_v63  ;;  %17806 = vmatprep.mubr.msk.f32.mxu1 %vm1772_vm1, %v2668_v44  ;;  %v21272_v34 = vadd.f32 %v2495_v21, %v21151_v63  ;;  %v21275_v36 = vadd.f32 %v2503_v49, %v21151_v63  ;;  %v21278_v43 = vadd.f32 %v2507_v25, %v21151_v63 }
 0x232   : > { %v2511_v46 = vrot.slane %v2270_v26, %v21091_v3  ;;  %v21282_v53 = vadd.f32 %v2499_v56, %v21151_v63  ;;  %v2515_v54 = vrot.slane %v2272_v31, %v21091_v3  ;;  %v2310_v44 = vrot.slane %v2288_v38, %v21085_v57 }
 0x233   : > { %v2318_v55 = vcombine.high %v21126_v39, %v21126_v39  ;;  %v2303_v18 = vrot.slane %v21120_v37, %v21085_v57  ;;  %v2317_v58 = vrot.slane %v2289_v50, %v21085_v57  ;;  %v2551_v19 = vrot.slane %v21190_v30, %v21091_v3 }
 0x234   : > { %v21292_v7 = vadd.f32 %v2511_v46, %v21151_v63  ;;  %17807 = vmatmul.mubr.msk.f32.gmra.mrb[14].mxu1 %vm1772_vm1, %v2669_v17  ;;  %v21304_v29 = vadd.f32 %v2515_v54, %v21151_v63  ;;  %v2523_v38 = vrot.slane %v2310_v44, %v21091_v3  ;;  %v2320_v51 = vcombine.high %v2310_v44, %v2310_v44 }
 0x235   : > { %v2527_v39 = vrot.slane %v2318_v55, %v21091_v3  ;;  %17809 = vmatprep.mubr.msk.f32.mxu1 %vm1772_vm1, %v2670_v62  ;;  %v2535_v59 = vrot.slane %v2303_v18, %v21091_v3  ;;  %v2539_v37 = vrot.slane %v2317_v58, %v21091_v3  ;;  %v2319_v50 = vcombine.high %v2303_v18, %v2303_v18 }
 0x236   : > { %v2321_v52 = vcombine.high %v2317_v58, %v2317_v58  ;;  %v21312_v27 = vadd.f32 %v2523_v38, %v21151_v63  ;;  %v2531_v60 = vrot.slane %v2320_v51, %v21091_v3  ;;  %v21319_v61 = vadd.f32 %v2551_v19, %v21151_v63 }
 0x237   : > { %v21315_v17 = vadd.f32 %v2527_v39, %v21151_v63  ;;  %v21322_v41 = vadd.f32 %v2535_v59, %v21151_v63  ;;  %v21325_v62 = vadd.f32 %v2539_v37, %v21151_v63  ;;  %v2543_v4 = vrot.slane %v2319_v50, %v21091_v3 }
 0x238   : > { %v2547_v6 = vrot.slane %v2321_v52, %v21091_v3  ;;  %17810 = vmatmul.mubr.msk.f32.gmra.mrb[16].mxu1 %vm1772_vm1, %v2671_v42  ;;  %v2687_v9 = vadd.f32 %v2531_v60, %v21151_v63  ;;  %v2359_v10 = vrot.slane %v2337_v28, %v21085_v57  ;;  %v2367_v14 = vcombine.high %v21190_v30, %v21190_v30 }
 0x239   : > { %v2352_v35 = vrot.slane %v21183_v23, %v21085_v57  ;;  %17812 = vmatprep.mubr.msk.f32.mxu1 %vm1772_vm1, %v2672_v0  ;;  %v2690_v48 = vadd.f32 %v2543_v4, %v21151_v63  ;;  %v2366_v42 = vrot.slane %v2338_v33, %v21085_v57  ;;  %v2583_v15 = vrot.slane %v21171_v13, %v21091_v3 }
 0x23a   : > { %v2691_v20 = vadd.f32 %v2547_v6, %v21151_v63  ;;  %v2555_v28 = vrot.slane %v2359_v10, %v21091_v3  ;;  %v2559_v30 = vrot.slane %v2367_v14, %v21091_v3  ;;  %v2369_v21 = vcombine.high %v2359_v10, %v2359_v10 }
 0x23b   : > { %v2567_v49 = vrot.slane %v2352_v35, %v21091_v3  ;;  %v2571_v0 = vrot.slane %v2366_v42, %v21091_v3  ;;  %v2368_v25 = vcombine.high %v2352_v35, %v2352_v35  ;;  %v2370_v26 = vcombine.high %v2366_v42, %v2366_v42 }
 0x23c   : > { %v2700_v56 = vadd.f32 %v2583_v15, %v21151_v63  ;;  %17813 = vmatmul.mubr.msk.f32.gmra.mrb[18].mxu1 %vm1772_vm1, %v21228_v1  ;;  %v2693_v23 = vadd.f32 %v2555_v28, %v21151_v63  ;;  %v2694_v33 = vadd.f32 %v2559_v30, %v21151_v63  ;;  %v2563_v31 = vrot.slane %v2369_v21, %v21091_v3 }
 0x23d   : > { %v2696_v46 = vadd.f32 %v2567_v49, %v21151_v63  ;;  %17815 = vmatprep.mubr.msk.f32.mxu1 %vm1772_vm1, %v21243_v8  ;;  %v2697_v54 = vadd.f32 %v2571_v0, %v21151_v63  ;;  %v2575_v44 = vrot.slane %v2368_v25, %v21091_v3  ;;  %v2579_v55 = vrot.slane %v2370_v26, %v21091_v3 }
 0x23e   : > { %v2408_v1 = vrot.slane %v2386_v12, %v21085_v57  ;;  %v2695_v18 = vadd.f32 %v2563_v31, %v21151_v63  ;;  %v2416_v58 = vcombine.high %v21171_v13, %v21171_v13  ;;  %v2401_v19 = vrot.slane %v21165_v11, %v21085_v57 }
 0x23f   : > { %v2415_v8 = vrot.slane %v2387_v22, %v21085_v57  ;;  %v2698_v38 = vadd.f32 %v2575_v44, %v21151_v63  ;;  %v2699_v39 = vadd.f32 %v2579_v55, %v21151_v63 }
 0x240   : > { %v2587_v2 = vrot.slane %v2408_v1, %v21091_v3  ;;  %v2418_v12 = vcombine.high %v2408_v1, %v2408_v1  ;;  %17816 = vmatmul.mubr.msk.f32.gmra.mrb[20].mxu1 %vm1772_vm1, %v21254_v16  ;;  %v2591_v13 = vrot.slane %v2416_v58, %v21091_v3  ;;  %v2599_v51 = vrot.slane %v2401_v19, %v21091_v3 }
 0x241   : > { %v2603_v59 = vrot.slane %v2415_v8, %v21091_v3  ;;  %v2417_v37 = vcombine.high %v2401_v19, %v2401_v19  ;;  %17818 = vmatprep.mubr.msk.f32.mxu1 %vm1772_vm1, %v21235_v5  ;;  %v2419_v22 = vcombine.high %v2415_v8, %v2415_v8 }
 0x242   : > { %v2701_v57 = vadd.f32 %v2587_v2, %v21151_v63  ;;  %v2595_v11 = vrot.slane %v2418_v12, %v21091_v3  ;;  %v2702_v50 = vadd.f32 %v2591_v13, %v21151_v63  ;;  %v2704_v52 = vadd.f32 %v2599_v51, %v21151_v63 }
 0x243   : > { %v2705_v16 = vadd.f32 %v2603_v59, %v21151_v63  ;;  %v2607_v60 = vrot.slane %v2417_v37, %v21091_v3  ;;  %v2611_v6 = vrot.slane %v2419_v22, %v21091_v3 }
 0x244   : > { %v2703_v4 = vadd.f32 %v2595_v11, %v21151_v63  ;;  %17819 = vmatmul.mubr.msk.f32.gmra.mrb[22].mxu1 %vm1772_vm1, %v21264_v47 }
 0x245   : > { %v2706_v5 = vadd.f32 %v2607_v60, %v21151_v63  ;;  %17821 = vmatprep.mubr.msk.f32.mxu1 %vm1772_vm1, %v21272_v34  ;;  %v2707_v10 = vadd.f32 %v2611_v6, %v21151_v63  ;;  %v3940_v63 = vpop.f32.mrb[8].mxu0 }
 0x246   : > { %v3944_v47 = vmax.f32 %v3940_v63, 0.0 }
 0x248   : > { %17822 = vmatmul.mubr.msk.f32.gmra.mrb[24].mxu1 %vm1772_vm1, %v21282_v53 }
 0x249   : > { %17824 = vmatprep.mubr.msk.f32.mxu1 %vm1772_vm1, %v21275_v36 }
 0x24c   : > { %17825 = vmatmul.mubr.msk.f32.gmra.mrb[26].mxu1 %vm1772_vm1, %v21278_v43 }
 0x24d   : > { %17827 = vmatprep.mubr.msk.f32.mxu1 %vm1772_vm1, %v21292_v7  ;;  %v21444_v7 = vld [vmem:[%s20502_s5] ss:$0 sm:$0xff] }
 0x250   : > { %17828 = vmatmul.mubr.msk.f32.gmra.mrb[28].mxu1 %vm1772_vm1, %v21304_v29 }
 0x251   : > { %17830 = vmatprep.mubr.msk.f32.mxu1 %vm1772_vm1, %v21268_v32  ;;  %v17870_v32 = vpop.f32.mrb[9].mxu0 }
 0x252   : > { %v4015_v34 = vpop.f32.mrb[10].mxu0 }
 0x253   : > { %v4019_v36 = vmax.f32 %v4015_v34, 0.0  ;;  %v17875_v43 = vpop.f32.mrb[11].mxu0 }
 0x254   : > { %17831 = vmatmul.mubr.msk.f32.gmra.mrb[30].mxu1 %vm1772_vm1, %v21312_v27 }
 0x255   : > { %17833 = vmatprep.mubr.msk.f32.mxu1 %vm1772_vm1, %v21315_v17  ;;  %v4020_v53 = vadd.f32 %v4019_v36, %v3944_v47 }
 0x258   : > { %17834 = vmatmul.mubr.msk.f32.gmra.mrb[32].mxu1 %vm1772_vm1, %v2687_v9 }
 0x259   : > { %17836 = vmatprep.mubr.msk.f32.mxu1 %vm1772_vm1, %v21322_v41 }
 0x25c   : > { %17837 = vmatmul.mubr.msk.f32.gmra.mrb[34].mxu1 %vm1772_vm1, %v21325_v62 }
 0x25d   : > { %17839 = vmatprep.mubr.msk.f32.mxu1 %vm1772_vm1, %v2690_v48 }
 0x260   : > { %17840 = vmatmul.mubr.msk.f32.gmra.mrb[36].mxu1 %vm1772_vm1, %v2691_v20 }
 0x261   : > { %17842 = vmatprep.mubr.msk.f32.mxu1 %vm1772_vm1, %v21319_v61 }
 0x264   : > { %17843 = vmatmul.mubr.msk.f32.gmra.mrb[38].mxu1 %vm1772_vm1, %v2693_v23 }
 0x265   : > { %17845 = vmatprep.mubr.msk.f32.mxu1 %vm1772_vm1, %v2694_v33 }
 0x268   : > { %17846 = vmatmul.mubr.msk.f32.gmra.mrb[40].mxu1 %vm1772_vm1, %v2695_v18 }
 0x269   : > { %17848 = vmatprep.mubr.msk.f32.mxu1 %vm1772_vm1, %v2696_v46 }
 0x26c   : > { %17849 = vmatmul.mubr.msk.f32.gmra.mrb[42].mxu1 %vm1772_vm1, %v2697_v54 }
 0x26d   : > { %17851 = vmatprep.mubr.msk.f32.mxu1 %vm1772_vm1, %v2698_v38 }
 0x270   : > { %17852 = vmatmul.mubr.msk.f32.gmra.mrb[44].mxu1 %vm1772_vm1, %v2699_v39  ;;  %v4090_v39 = vpop.f32.mrb[12].mxu0 }
 0x271   : > { %17854 = vmatprep.mubr.msk.f32.mxu1 %vm1772_vm1, %v2700_v56  ;;  %v4094_v51 = vmax.f32 %v4090_v39, 0.0  ;;  %v17880_v59 = vpop.f32.mrb[13].mxu0 }
 0x274   : > { %17855 = vmatmul.mubr.msk.f32.gmra.mrb[46].mxu1 %vm1772_vm1, %v2701_v57 }
 0x275   : > { %17857 = vmatprep.mubr.msk.f32.mxu1 %vm1772_vm1, %v2702_v50 }
 0x278   : > { %17858 = vmatmul.mubr.msk.f32.gmra.mrb[48].mxu1 %vm1772_vm1, %v2703_v4 }
 0x279   : > { %17860 = vmatprep.mubr.msk.f32.mxu1 %vm1772_vm1, %v2704_v52  ;;  %v21492_v52 = vadd.f32 %v4094_v51, %v4020_v53 }
 0x27c   : > { %17861 = vmatmul.mubr.msk.f32.gmra.mrb[50].mxu1 %vm1772_vm1, %v2705_v16 }
 0x27d   : > { %17863 = vmatprep.mubr.msk.f32.mxu1 %vm1772_vm1, %v2706_v5 }
 0x280   : > { %17864 = vmatmul.mubr.msk.f32.gmra.mrb[52].mxu1 %vm1772_vm1, %v2707_v10 }
 0x281   : > { %17988 = vmatprep.mubr.msk.f32.mxu1 %vm20281_vm2, %v25995_v24 }
 0x2f7   : > { %v17796_v29 = vpop.f32.mrb[6].mxu1 }
 0x2f8   : > { %v21447_v27 = vadd.f32 %v17796_v29, %v21444_v7  ;;  %v2929_v17 = vpop.f32.mrb[7].mxu1 }
 0x2f9   : > { %v21450_v61 = vadd.f32 %v21444_v7, %v2929_v17 }
 0x2fa   : > { %v16006_v41 = vmul.f32 -1.442695, %v21447_v27 }
 0x2fb   : > { %v16005_v62 = vmul.f32 -1.442695, %v21450_v61  ;;  %v17799_v9 = vpop.f32.mrb[8].mxu1 }
 0x2fc   : > { %19808 = vpow2.f32 %v16006_v41  ;;  %v21455_v14 = vadd.f32 %v17799_v9, %v21444_v7  ;;  %v2939_v35 = vpop.f32.mrb[9].mxu1 }
 0x2fd   : > { %19810 = vpow2.f32 %v16005_v62  ;;  %v21458_v48 = vadd.f32 %v21444_v7, %v2939_v35 }
 0x2fe   : > { %v16008_v20 = vmul.f32 -1.442695, %v21455_v14 }
 0x2ff   : > { %v16007_v42 = vmul.f32 -1.442695, %v21458_v48  ;;  %v17802_v15 = vpop.f32.mrb[10].mxu1 }
 0x300   : > { %19812 = vpow2.f32 %v16008_v20  ;;  %v21463_v28 = vadd.f32 %v17802_v15, %v21444_v7  ;;  %v2949_v30 = vpop.f32.mrb[11].mxu1 }
 0x301   : > { %19814 = vpow2.f32 %v16007_v42  ;;  %v21466_v21 = vadd.f32 %v21444_v7, %v2949_v30 }
 0x302   : > { %v16010_v49 = vmul.f32 -1.442695, %v21463_v28 }
 0x303   : > { %v16009_v0 = vmul.f32 -1.442695, %v21466_v21  ;;  %v17805_v25 = vpop.f32.mrb[12].mxu1 }
 0x304   : > { %19816 = vpow2.f32 %v16010_v49  ;;  %v21471_v26 = vadd.f32 %v17805_v25, %v21444_v7  ;;  %v2959_v56 = vpop.f32.mrb[13].mxu1 }
 0x305   : > { %19818 = vpow2.f32 %v16009_v0  ;;  %v21474_v23 = vadd.f32 %v21444_v7, %v2959_v56 }
 0x306   : > { %v19809_v33 = vpop.eup %19808  ;;  %v16012_v31 = vmul.f32 -1.442695, %v21471_v26 }
 0x307   : > { %v19811_v46 = vpop.eup %19810  ;;  %v16011_v54 = vmul.f32 -1.442695, %v21474_v23  ;;  %v17808_v44 = vpop.f32.mrb[14].mxu1  ;;  %v3313_v58 = vadd.f32 1.0, %v19809_v33 }
 0x308   : > { %v3312_v55 = vadd.f32 1.0, %v19811_v46  ;;  %19820 = vpow2.f32 %v16012_v31  ;;  %v21479_v1 = vadd.f32 %v17808_v44, %v21444_v7  ;;  %v2969_v18 = vpop.f32.mrb[15].mxu1 }
 0x309   : > { %v21482_v19 = vadd.f32 %v21444_v7, %v2969_v18 }
 0x30a   : > { %v19813_v8 = vpop.eup %19812  ;;  %19822 = vrcp.f32 %v3312_v55  ;;  %v16014_v38 = vmul.f32 -1.442695, %v21479_v1 }
 0x30b   : > { %v19815_v2 = vpop.eup %19814  ;;  %19824 = vpow2.f32 %v16011_v54  ;;  %v16013_v12 = vmul.f32 -1.442695, %v21482_v19  ;;  %v17811_v13 = vpop.f32.mrb[16].mxu1  ;;  %v3315_v22 = vadd.f32 1.0, %v19813_v8 }
 0x30c   : > { %v3314_v37 = vadd.f32 1.0, %v19815_v2  ;;  %19826 = vpow2.f32 %v16014_v38  ;;  %v21487_v57 = vadd.f32 %v17811_v13, %v21444_v7  ;;  %v2979_v11 = vpop.f32.mrb[17].mxu1 }
 0x30d   : > { %19828 = vrcp.f32 %v3313_v58  ;;  %v21490_v50 = vadd.f32 %v21444_v7, %v2979_v11 }
 0x30e   : > { %v19817_v16 = vpop.eup %19816  ;;  %19830 = vrcp.f32 %v3314_v37  ;;  %v16016_v60 = vmul.f32 -1.442695, %v21487_v57 }
 0x30f   : > { %v19819_v4 = vpop.eup %19818  ;;  %19832 = vpow2.f32 %v16013_v12  ;;  %v16015_v6 = vmul.f32 -1.442695, %v21490_v50  ;;  %v17814_v5 = vpop.f32.mrb[18].mxu1  ;;  %v3317_v32 = vadd.f32 1.0, %v19817_v16 }
 0x310   : > { %v3316_v10 = vadd.f32 1.0, %v19819_v4  ;;  %19834 = vpow2.f32 %v16016_v60  ;;  %v21497_v63 = vadd.f32 %v17814_v5, %v21444_v7  ;;  %v2989_v47 = vpop.f32.mrb[19].mxu1 }
 0x311   : > { %19836 = vrcp.f32 %v3315_v22  ;;  %v21500_v34 = vadd.f32 %v21444_v7, %v2989_v47 }
 0x312   : > { %v19821_v36 = vpop.eup %19820  ;;  %19838 = vrcp.f32 %v3316_v10  ;;  %v16018_v43 = vmul.f32 -1.442695, %v21497_v63 }
 0x313   : > { %v3319_v53 = vadd.f32 1.0, %v19821_v36  ;;  %19840 = vpow2.f32 %v16015_v6  ;;  %v16017_v29 = vmul.f32 -1.442695, %v21500_v34  ;;  %v17817_v17 = vpop.f32.mrb[20].mxu1 }
 0x314   : > { %v19823_v41 = vpop.eup %19822  ;;  %19842 = vpow2.f32 %v16018_v43  ;;  %v21505_v62 = vadd.f32 %v17817_v17, %v21444_v7  ;;  %v2999_v9 = vpop.f32.mrb[21].mxu1 }
 0x315   : > { %v19825_v35 = vpop.eup %19824  ;;  %19844 = vrcp.f32 %v3317_v32  ;;  %v21508_v20 = vadd.f32 %v21444_v7, %v2999_v9  ;;  %3504 = vrot.lane.b32.xlu0 %v19823_v41, %s20283_s12 }
 0x316   : > { %v19827_v42 = vpop.eup %19826  ;;  %v3318_v15 = vadd.f32 1.0, %v19825_v35  ;;  %19846 = vpow2.f32 %v16017_v29  ;;  %v16020_v30 = vmul.f32 -1.442695, %v21505_v62 }
 0x317   : > { %v19829_v49 = vpop.eup %19828  ;;  %19848 = vrcp.f32 %v3319_v53  ;;  %v3321_v0 = vadd.f32 1.0, %v19827_v42  ;;  %v16019_v25 = vmul.f32 -1.442695, %v21508_v20  ;;  %v17820_v56 = vpop.f32.mrb[22].mxu1 }
 0x318   : > { %v19831_v33 = vpop.eup %19830  ;;  %19850 = vrcp.f32 %v3318_v15  ;;  %v21514_v31 = vadd.f32 %v17820_v56, %v21444_v7  ;;  %v3009_v46 = vpop.f32.mrb[23].mxu1 }
 0x319   : > { %v19833_v54 = vpop.eup %19832  ;;  %19852 = vrcp.f32 %v3321_v0  ;;  %v21517_v44 = vadd.f32 %v21444_v7, %v3009_v46  ;;  %3506 = vrot.lane.b32.xlu0 %v19829_v49, %s20283_s12  ;;  %3508 = vrot.lane.b32.xlu1 %v19831_v33, %s20283_s12 }
 0x31a   : > { %v19835_v55 = vpop.eup %19834  ;;  %v3320_v18 = vadd.f32 1.0, %v19833_v54  ;;  %19854 = vpow2.f32 %v16020_v30  ;;  %v16022_v58 = vmul.f32 -1.442695, %v21514_v31 }
 0x31b   : > { %v19837_v8 = vpop.eup %19836  ;;  %v3323_v38 = vadd.f32 1.0, %v19835_v55  ;;  %19856 = vpow2.f32 %v16019_v25  ;;  %v16021_v39 = vmul.f32 -1.442695, %v21517_v44  ;;  %v17823_v2 = vpop.f32.mrb[24].mxu1 }
 0x31c   : > { %v19839_v12 = vpop.eup %19838  ;;  %19858 = vrcp.f32 %v3320_v18  ;;  %v21524_v13 = vadd.f32 %v17823_v2, %v21444_v7  ;;  %v3019_v51 = vpop.f32.mrb[25].mxu1 }
 0x31d   : > { %v19841_v59 = vpop.eup %19840  ;;  %19860 = vrcp.f32 %v3323_v38  ;;  %v21527_v37 = vadd.f32 %v21444_v7, %v3019_v51  ;;  %3510 = vrot.lane.b32.xlu1 %v19837_v8, %s20283_s12  ;;  %3512 = vrot.lane.b32.xlu0 %v19839_v12, %s20283_s12 }
 0x31e   : > { %v19843_v11 = vpop.eup %19842  ;;  %v3322_v22 = vadd.f32 1.0, %v19841_v59  ;;  %19862 = vpow2.f32 %v16022_v58  ;;  %v16024_v16 = vmul.f32 -1.442695, %v21524_v13 }
 0x31f   : > { %v19845_v60 = vpop.eup %19844  ;;  %v3325_v4 = vadd.f32 1.0, %v19843_v11  ;;  %19864 = vpow2.f32 %v16021_v39  ;;  %v17826_v6 = vpop.f32.mrb[26].mxu1  ;;  %v16023_v10 = vmul.f32 -1.442695, %v21527_v37 }
 0x320   : > { %v19847_v5 = vpop.eup %19846  ;;  %19866 = vrcp.f32 %v3322_v22  ;;  %v21534_v47 = vadd.f32 %v17826_v6, %v21444_v7  ;;  %v3029_v32 = vpop.f32.mrb[27].mxu1 }
 0x321   : > { %v19849_v36 = vpop.eup %19848  ;;  %19868 = vrcp.f32 %v3325_v4  ;;  %v3324_v43 = vadd.f32 1.0, %v19847_v5  ;;  %v21537_v53 = vadd.f32 %v21444_v7, %v3029_v32  ;;  %3514 = vrot.lane.b32.xlu1 %v19845_v60, %s20283_s12 }
 0x322   : > { %v19851_v29 = vpop.eup %19850  ;;  %19870 = vpow2.f32 %v16024_v16  ;;  %v16026_v17 = vmul.f32 -1.442695, %v21534_v47 }
 0x323   : > { %v19853_v41 = vpop.eup %19852  ;;  %19872 = vrcp.f32 %v3324_v43  ;;  %v16025_v9 = vmul.f32 -1.442695, %v21537_v53  ;;  %3516 = vrot.lane.b32.xlu0 %v19851_v29, %s20283_s12  ;;  %v17829_v35 = vpop.f32.mrb[28].mxu1 }
 0x324   : > { %v19855_v42 = vpop.eup %19854  ;;  %19874 = vpow2.f32 %v16023_v10  ;;  %v21544_v15 = vadd.f32 %v17829_v35, %v21444_v7  ;;  %v3039_v30 = vpop.f32.mrb[29].mxu1 }
 0x325   : > { %v19857_v49 = vpop.eup %19856  ;;  %v3327_v0 = vadd.f32 1.0, %v19855_v42  ;;  %19876 = vpow2.f32 %v16026_v17  ;;  %v21547_v25 = vadd.f32 %v21444_v7, %v3039_v30  ;;  %3518 = vrot.lane.b32.xlu1 %v19849_v36, %s20283_s12 }
 0x326   : > { %v19859_v56 = vpop.eup %19858  ;;  %v3326_v33 = vadd.f32 1.0, %v19857_v49  ;;  %19878 = vpow2.f32 %v16025_v9  ;;  %v16028_v46 = vmul.f32 -1.442695, %v21544_v15 }
 0x327   : > { %v19861_v54 = vpop.eup %19860  ;;  %19880 = vrcp.f32 %v3327_v0  ;;  %v16027_v55 = vmul.f32 -1.442695, %v21547_v25  ;;  %3520 = vrot.lane.b32.xlu0 %v19859_v56, %s20283_s12  ;;  %v21553_v18 = vpop.f32.mrb[30].mxu1 }
 0x328   : > { %v19863_v58 = vpop.eup %19862  ;;  %19882 = vrcp.f32 %v3326_v33  ;;  %v21555_v8 = vpop.f32.mrb[31].mxu1 }
 0x329   : > { %v19865_v7 = vpop.eup %19864  ;;  %19884 = vpow2.f32 %v16028_v46  ;;  %3522 = vrot.lane.b32.xlu1 %v19853_v41, %s20283_s12  ;;  %v3329_v39 = vadd.f32 1.0, %v19863_v58 }
 0x32a   : > { %v19867_v38 = vpop.eup %19866  ;;  %v3328_v2 = vadd.f32 1.0, %v19865_v7  ;;  %19886 = vpow2.f32 %v16027_v55 }
 0x32b   : > { %v19869_v12 = vpop.eup %19868  ;;  %3524 = vrot.lane.b32.xlu0 %v19867_v38, %s20283_s12  ;;  %v21559_v51 = vpop.f32.mrb[32].mxu1 }
 0x32c   : > { %v19871_v59 = vpop.eup %19870  ;;  %19888 = vrcp.f32 %v3328_v2  ;;  %v21561_v11 = vpop.f32.mrb[33].mxu1 }
 0x32d   : > { %v19873_v22 = vpop.eup %19872  ;;  %3526 = vrot.lane.b32.xlu1 %v19861_v54, %s20283_s12  ;;  %19890 = vrcp.f32 %v3329_v39  ;;  %v3331_v60 = vadd.f32 1.0, %v19871_v59 }
 0x32e   : > { %v19875_v16 = vpop.eup %19874 }
 0x32f   : > { %v19877_v4 = vpop.eup %19876  ;;  %v3330_v6 = vadd.f32 1.0, %v19875_v16  ;;  %3528 = vrot.lane.b32.xlu0 %v19873_v22, %s20283_s12  ;;  %v21565_v5 = vpop.f32.mrb[34].mxu1 }
 0x330   : > { %v19879_v10 = vpop.eup %19878  ;;  %v21567_v32 = vpop.f32.mrb[35].mxu1  ;;  %v3333_v17 = vadd.f32 1.0, %v19877_v4 }
 0x331   : > { %v19881_v36 = vpop.eup %19880  ;;  %19892 = vrcp.f32 %v3330_v6  ;;  %v3332_v43 = vadd.f32 1.0, %v19879_v10  ;;  %3530 = vrot.lane.b32.xlu1 %v19869_v12, %s20283_s12 }
 0x332   : > { %v19883_v29 = vpop.eup %19882  ;;  %19894 = vrcp.f32 %v3331_v60 }
 0x333   : > { %v19885_v41 = vpop.eup %19884  ;;  %19896 = vrcp.f32 %v3332_v43  ;;  %3532 = vrot.lane.b32.xlu0 %v19883_v29, %s20283_s12  ;;  %v21571_v9 = vpop.f32.mrb[36].mxu1 }
 0x334   : > { %v19887_v35 = vpop.eup %19886  ;;  %v21573_v42 = vpop.f32.mrb[37].mxu1  ;;  %19898 = vrcp.f32 %v3333_v17  ;;  %v3335_v0 = vadd.f32 1.0, %v19885_v41 }
 0x335   : > { %v3334_v30 = vadd.f32 1.0, %v19887_v35  ;;  %3534 = vrot.lane.b32.xlu1 %v19881_v36, %s20283_s12  ;;  %v3768_v35 = vld [vmem:[#allocation2] sm:$0xff] }
 0x336   : > { %v19889_v49 = vpop.eup %19888 }
 0x337   : > { %19900 = vrcp.f32 %v3334_v30  ;;  %3536 = vrot.lane.b32.xlu0 %v19889_v49, %s20283_s12  ;;  %v21577_v56 = vpop.f32.mrb[38].mxu1  ;;  %v19891_v33 = vpop.eup %19890 }
 0x338   : > { %v21579_v46 = vpop.f32.mrb[39].mxu1  ;;  %19902 = vrcp.f32 %v3335_v0 }
 0x339   : > { %3538 = vrot.lane.b32.xlu1 %v19891_v33, %s20283_s12  ;;  %v3769_v33 = vld [vmem:[#allocation2 + $0x8] sm:$0xff] }
 0x33b   : > { %v19893_v54 = vpop.eup %19892  ;;  %v21582_v55 = vpop.f32.mrb[40].mxu1 }
 0x33c   : > { %v19895_v58 = vpop.eup %19894  ;;  %3540 = vrot.lane.b32.xlu0 %v19893_v54, %s20283_s12  ;;  %v21585_v7 = vpop.f32.mrb[41].mxu1 }
 0x33d   : > { %v19897_v38 = vpop.eup %19896  ;;  %3542 = vrot.lane.b32.xlu1 %v19895_v58, %s20283_s12 }
 0x33e   : > { %v19899_v2 = vpop.eup %19898 }
 0x33f   : > { %v21588_v39 = vpop.f32.mrb[42].mxu1 }
 0x340   : > { %3544 = vrot.lane.b32.xlu0 %v19897_v38, %s20283_s12  ;;  %v21591_v12 = vpop.f32.mrb[43].mxu1 }
 0x341   : > { %v19901_v59 = vpop.eup %19900  ;;  %3546 = vrot.lane.b32.xlu1 %v19899_v2, %s20283_s12 }
 0x342   : > { %v19903_v16 = vpop.eup %19902 }
 0x343   : > { %v21594_v22 = vpop.f32.mrb[44].mxu1 }
 0x344   : > { %3548 = vrot.lane.b32.xlu0 %v19901_v59, %s20283_s12  ;;  %v21597_v60 = vpop.f32.mrb[45].mxu1  ;;  %v3770_v59 = vld [vmem:[#allocation2 + $0x10] sm:$0xff] }
 0x345   : > { %3550 = vrot.lane.b32.xlu1 %v19903_v16, %s20283_s12  ;;  %v3771_v16 = vld [vmem:[#allocation2 + $0x18] sm:$0xff] }
 0x347   : > { %v21600_v4 = vpop.f32.mrb[46].mxu1 }
 0x348   : > { %v21602_v6 = vpop.f32.mrb[47].mxu1 }
 0x34b   : > { %v21604_v10 = vpop.f32.mrb[48].mxu1 }
 0x34c   : > { %26369 = vst [vmem:[#allocation18_spill] sm:$0xff] %v21604_v10  ;;  %v21606_v36 = vpop.f32.mrb[49].mxu1 }
 0x34d   : > { %26370 = vst [vmem:[#allocation19_spill] sm:$0xff] %v21606_v36  ;;  %v3780_v36 = vld [vmem:[#allocation2 + $0x60] sm:$0xff] }
 0x34f   : > { %v21608_v43 = vpop.f32.mrb[50].mxu1 }
 0x350   : > { %26371 = vst [vmem:[#allocation20_spill] sm:$0xff] %v21608_v43  ;;  %v21610_v29 = vpop.f32.mrb[51].mxu1 }
 0x351   : > { %26372 = vst [vmem:[#allocation21_spill] sm:$0xff] %v21610_v29 }
 0x353   : > { %v21612_v17 = vpop.f32.mrb[52].mxu1 }
 0x354   : > { %26373 = vst [vmem:[#allocation22_spill] sm:$0xff] %v21612_v17  ;;  %v21614_v41 = vpop.f32.mrb[53].mxu1 }
 0x355   : > { %26374 = vst [vmem:[#allocation23_spill] sm:$0xff] %v21614_v41 }
 0x387   : > { %v3505_v30 = vpop.permute.xlu0 %3504 }
 0x388   : > { %v21617_v49 = vmul.f32 %v3505_v30, %v21450_v61 }
 0x38a   : > { %v21620_v0 = vsub.f32 %v3768_v35, %v21617_v49 }
 0x38b   : > { %v3507_v54 = vpop.permute.xlu0 %3506  ;;  %v3509_v58 = vpop.permute.xlu1 %3508 }
 0x38c   : > { %26375 = vst [vmem:[#allocation24_spill] sm:$0xff] %v21620_v0  ;;  %v21623_v38 = vmul.f32 %v3507_v54, %v21447_v27  ;;  %v21626_v2 = vmul.f32 %v3509_v58, %v21458_v48  ;;  %17882 = vmatpush3.msra.mxu0 %v21620_v0  ;;  %v3772_v58 = vld [vmem:[#allocation2 + $0x20] sm:$0xff] }
 0x38d   : > { %17884 = vmatmul.mubr.msk.f32.vlgmr.msra.gmra.mrb[14].mxu0 %vm3870_vm3, %v21492_v52  ;;  %17886 = vmatprep.subr.mxu0 %v25995_v24 }
 0x38e   : > { %v21633_v61 = vsub.f32 %v3769_v33, %v21623_v38  ;;  %17888 = vmatprep.mubr.msk.f32.mxu0 %vm20281_vm2, %v25995_v24  ;;  %v21638_v35 = vsub.f32 %v3770_v59, %v21626_v2 }
 0x38f   : > { %v3511_v27 = vpop.permute.xlu1 %3510  ;;  %v3513_v30 = vpop.permute.xlu0 %3512 }
 0x390   : > { %26376 = vst [vmem:[#allocation25_spill] sm:$0xff] %v21633_v61  ;;  %26377 = vst [vmem:[#allocation26_spill] sm:$0xff] %v21638_v35  ;;  %v21641_v48 = vmul.f32 %v3511_v27, %v21455_v14  ;;  %17887 = vmatpush3.msra.mxu0 %v21633_v61  ;;  %v21655_v14 = vmul.f32 %v3513_v30, %v21466_v21  ;;  %v3773_v21 = vld [vmem:[#allocation2 + $0x28] sm:$0xff] }
 0x391   : > { %17889 = vmatmul.mubr.msk.f32.vlgmr.msra.gmra.mrb[16].mxu0 %vm3870_vm3, %v21492_v52  ;;  %17891 = vmatprep.subr.mxu0 %v25995_v24 }
 0x392   : > { %v21648_v33 = vsub.f32 %v3771_v16, %v21641_v48  ;;  %17892 = vmatpush3.msra.mxu0 %v21638_v35  ;;  %17893 = vmatprep.mubr.msk.f32.mxu0 %vm20281_vm2, %v25995_v24  ;;  %v21664_v16 = vsub.f32 %v3772_v58, %v21655_v14 }
 0x393   : > { %v3515_v54 = vpop.permute.xlu1 %3514  ;;  %17896 = vmatprep.subr.mxu0 %v25995_v24 }
 0x394   : > { %26378 = vst [vmem:[#allocation27_spill] sm:$0xff] %v21648_v33  ;;  %26379 = vst [vmem:[#allocation28_spill] sm:$0xff] %v21664_v16  ;;  %v21667_v27 = vmul.f32 %v3515_v54, %v21463_v28  ;;  %v3774_v28 = vld [vmem:[#allocation2 + $0x30] sm:$0xff] }
 0x395   : > { %17894 = vmatmul.mubr.msk.f32.vlgmr.msra.gmra.mrb[18].mxu0 %vm3870_vm3, %v21492_v52  ;;  %v3517_v30 = vpop.permute.xlu0 %3516 }
 0x396   : > { %17897 = vmatpush3.msra.mxu0 %v21648_v33  ;;  %17898 = vmatprep.mubr.msk.f32.mxu0 %vm20281_vm2, %v25995_v24  ;;  %v21676_v45 = vsub.f32 %v3773_v21, %v21667_v27  ;;  %v21679_v58 = vmul.f32 %v3517_v30, %v21474_v23  ;;  %v3775_v23 = vld [vmem:[#allocation2 + $0x38] sm:$0xff] }
 0x397   : > { %v3519_v59 = vpop.permute.xlu1 %3518  ;;  %17901 = vmatprep.subr.mxu0 %v25995_v24 }
 0x398   : > { %26380 = vst [vmem:[#allocation29_spill] sm:$0xff] %v21676_v45  ;;  %v21688_v3 = vsub.f32 %v3774_v28, %v21679_v58  ;;  %v21691_v21 = vmul.f32 %v3519_v59, %v21471_v26  ;;  %v3776_v26 = vld [vmem:[#allocation2 + $0x40] sm:$0xff] }
 0x399   : > { %17899 = vmatmul.mubr.msk.f32.vlgmr.msra.gmra.mrb[20].mxu0 %vm3870_vm3, %v21492_v52  ;;  %v3521_v30 = vpop.permute.xlu0 %3520 }
 0x39a   : > { %17902 = vmatpush3.msra.mxu0 %v21664_v16  ;;  %17903 = vmatprep.mubr.msk.f32.mxu0 %vm20281_vm2, %v25995_v24  ;;  %26381 = vst [vmem:[#allocation30_spill] sm:$0xff] %v21688_v3  ;;  %v21700_v17 = vsub.f32 %v3775_v23, %v21691_v21  ;;  %v21703_v28 = vmul.f32 %v3521_v30, %v21482_v19  ;;  %v3777_v19 = vld [vmem:[#allocation2 + $0x48] sm:$0xff] }
 0x39b   : > { %v3523_v40 = vpop.permute.xlu1 %3522  ;;  %17906 = vmatprep.subr.mxu0 %v25995_v24 }
 0x39c   : > { %26382 = vst [vmem:[#allocation31_spill] sm:$0xff] %v21700_v17  ;;  %v21717_v23 = vmul.f32 %v3523_v40, %v21479_v1  ;;  %v3778_v1 = vld [vmem:[#allocation2 + $0x50] sm:$0xff] }
 0x39d   : > { %17904 = vmatmul.mubr.msk.f32.vlgmr.msra.gmra.mrb[22].mxu0 %vm3870_vm3, %v21492_v52  ;;  %v3525_v30 = vpop.permute.xlu0 %3524 }
 0x39e   : > { %17907 = vmatpush3.msra.mxu0 %v21676_v45  ;;  %17908 = vmatprep.mubr.msk.f32.mxu0 %vm20281_vm2, %v25995_v24  ;;  %v21731_v40 = vmul.f32 %v3525_v30, %v21490_v50  ;;  %v3779_v50 = vld [vmem:[#allocation2 + $0x58] sm:$0xff] }
 0x39f   : > { %v3527_v54 = vpop.permute.xlu1 %3526  ;;  %17911 = vmatprep.subr.mxu0 %v25995_v24 }
 0x3a1   : > { %17909 = vmatmul.mubr.msk.f32.vlgmr.msra.gmra.mrb[24].mxu0 %vm3870_vm3, %v21492_v52  ;;  %v3529_v30 = vpop.permute.xlu0 %3528 }
 0x3a2   : > { %17912 = vmatpush3.msra.mxu0 %v21688_v3  ;;  %17913 = vmatprep.mubr.msk.f32.mxu0 %vm20281_vm2, %v25995_v24  ;;  %v21714_v3 = vsub.f32 %v3776_v26, %v21703_v28  ;;  %v21728_v26 = vsub.f32 %v3777_v19, %v21717_v23  ;;  %v21745_v19 = vmul.f32 %v3527_v54, %v21487_v57 }
 0x3a3   : > { %v3531_v41 = vpop.permute.xlu1 %3530  ;;  %17916 = vmatprep.subr.mxu0 %v25995_v24  ;;  %v21757_v57 = vmul.f32 %v3529_v30, %v21500_v34 }
 0x3a4   : > { %26383 = vst [vmem:[#allocation32_spill] sm:$0xff] %v21714_v3  ;;  %26384 = vst [vmem:[#allocation33_spill] sm:$0xff] %v21728_v26 }
 0x3a5   : > { %17914 = vmatmul.mubr.msk.f32.vlgmr.msra.gmra.mrb[26].mxu0 %vm3870_vm3, %v21492_v52  ;;  %v21772_v34 = vsub.f32 %v3780_v36, %v21757_v57  ;;  %v3533_v30 = vpop.permute.xlu0 %3532 }
 0x3a6   : > { %17917 = vmatpush3.msra.mxu0 %v21700_v17  ;;  %17918 = vmatprep.mubr.msk.f32.mxu0 %vm20281_vm2, %v25995_v24  ;;  %v21742_v17 = vsub.f32 %v3778_v1, %v21731_v40  ;;  %v21754_v1 = vsub.f32 %v3779_v50, %v21745_v19  ;;  %v3791_v50 = vld [vmem:[#allocation2 + $0xb8] sm:$0xff] }
 0x3a7   : > { %v21710_v59 = vpop.permute.xlu1 %3534  ;;  %17921 = vmatprep.subr.mxu0 %v25995_v24  ;;  %26388 = vst [vmem:[#allocation37_spill] sm:$0xff] %v21772_v34 }
 0x3a8   : > { %26385 = vst [vmem:[#allocation34_spill] sm:$0xff] %v21742_v17  ;;  %26386 = vst [vmem:[#allocation35_spill] sm:$0xff] %v21754_v1 }
 0x3a9   : > { %17919 = vmatmul.mubr.msk.f32.vlgmr.msra.gmra.mrb[28].mxu0 %vm3870_vm3, %v21492_v52 }
 0x3aa   : > { %17922 = vmatpush3.msra.mxu0 %v21714_v3  ;;  %17923 = vmatprep.mubr.msk.f32.mxu0 %vm20281_vm2, %v25995_v24 }
 0x3ab   : > { %v21724_v29 = vpop.permute.xlu1 %3538  ;;  %17926 = vmatprep.subr.mxu0 %v25995_v24 }
 0x3ad   : > { %17924 = vmatmul.mubr.msk.f32.vlgmr.msra.gmra.mrb[30].mxu0 %vm3870_vm3, %v21492_v52 }
 0x3ae   : > { %17927 = vmatpush3.msra.mxu0 %v21728_v26  ;;  %17928 = vmatprep.mubr.msk.f32.mxu0 %vm20281_vm2, %v25995_v24  ;;  %v3789_v26 = vld [vmem:[#allocation2 + $0xa8] sm:$0xff] }
 0x3af   : > { %v21738_v3 = vpop.permute.xlu1 %3542  ;;  %17931 = vmatprep.subr.mxu0 %v25995_v24 }
 0x3b1   : > { %17929 = vmatmul.mubr.msk.f32.vlgmr.msra.gmra.mrb[32].mxu0 %vm3870_vm3, %v21492_v52 }
 0x3b2   : > { %17932 = vmatpush3.msra.mxu0 %v21742_v17  ;;  %17933 = vmatprep.mubr.msk.f32.mxu0 %vm20281_vm2, %v25995_v24 }
 0x3b3   : > { %v3547_v43 = vpop.permute.xlu1 %3546  ;;  %17936 = vmatprep.subr.mxu0 %v25995_v24 }
 0x3b4   : > { %v21760_v54 = vmul.f32 %v3547_v43, %v21534_v47  ;;  %v21775_v47 = vmul.f32 %v3531_v41, %v21497_v63  ;;  %v26390_v63 = vmov 0.0  }
 0x3b5   : > { %17934 = vmatmul.mubr.msk.f32.vlgmr.msra.gmra.mrb[34].mxu0 %vm3870_vm3, %v21492_v52 }
 0x3b6   : > { %v21765_v17 = vsub.f32 %v3789_v26, %v21760_v54  ;;  %17937 = vmatpush3.msra.mxu0 %v21754_v1  ;;  %17938 = vmatprep.mubr.msk.f32.mxu0 %vm20281_vm2, %v25995_v24  ;;  %v3781_v26 = vld [vmem:[#allocation2 + $0x68] sm:$0xff] }
 0x3b7   : > { %v3551_v10 = vpop.permute.xlu1 %3550  ;;  %17941 = vmatprep.subr.mxu0 %v25995_v24  ;;  %v3793_v24 = vld [vmem:[#allocation2 + $0xc8] sm:$0xff] }
 0x3b8   : > { %26387 = vst [vmem:[#allocation36_spill] sm:$0xff] %v21765_v17  ;;  %v21778_v43 = vmul.f32 %v3551_v10, %v21544_v15  ;;  %17987 = vmatpush3.msra.mxu1 %v21765_v17  ;;  %v21794_v15 = vsub.f32 %v3781_v26, %v21775_v47  ;;  %v21797_v10 = vmul.f32 %v3533_v30, %v21508_v20  ;;  %v3795_v26 = vld [vmem:[#allocation2 + $0xd8] sm:$0xff] }
 0x3b9   : > { %17939 = vmatmul.mubr.msk.f32.vlgmr.msra.gmra.mrb[36].mxu0 %vm3870_vm3, %v21492_v52  ;;  %17989 = vmatmul.mubr.msk.f32.vlgmr.msra.gmra.mrb[54].mxu1 %vm3870_vm3, %v21492_v52  ;;  %v21803_v41 = vsub.f32 %v3793_v24, %v21623_v38  ;;  %v21819_v20 = vmul.f32 %v21710_v59, %v21505_v62  ;;  %v21825_v38 = vsub.f32 %v3795_v26, %v21641_v48  ;;  %v3783_v30 = vld [vmem:[#allocation2 + $0x78] sm:$0xff]  ;;  %v3784_v26 = vld [vmem:[#allocation2 + $0x80] sm:$0xff] }
 0x3ba   : > { %v21786_v36 = vsub.f32 %v3791_v50, %v21778_v43  ;;  %17942 = vmatpush3.msra.mxu0 %v21772_v34  ;;  %17996 = vmatprep.subr.mxu1 %v26390_v63  ;;  %26391 = vst [vmem:[#allocation39_spill] sm:$0xff] %v21794_v15  ;;  %v3782_v50 = vld [vmem:[#allocation2 + $0x70] sm:$0xff] }
 0x3bb   : > { %17943 = vmatprep.mubr.msk.f32.mxu0 %vm20281_vm2, %v26390_v63  ;;  %17946 = vmatprep.subr.mxu0 %v26390_v63  ;;  %26392 = vst [vmem:[#allocation40_spill] sm:$0xff] %v21803_v41  ;;  %v21815_v24 = vsub.f32 %v3782_v50, %v21797_v10  ;;  %26394 = vst [vmem:[#allocation42_spill] sm:$0xff] %v21825_v38  ;;  %v3797_v50 = vld [vmem:[#allocation2 + $0xe8] sm:$0xff]  ;;  %v21837_v62 = vsub.f32 %v3783_v30, %v21819_v20 }
 0x3bc   : > { %26389 = vst [vmem:[#allocation38_spill] sm:$0xff] %v21786_v36  ;;  %17997 = vmatpush3.msra.mxu1 %v21786_v36  ;;  %17998 = vmatprep.mubr.msk.f32.mxu1 %vm20281_vm2, %v26390_v63  ;;  %v21846_v59 = vsub.f32 %v3797_v50, %v21667_v27  ;;  %v21862_v27 = vmul.f32 %v21724_v29, %v21514_v31  ;;  %v3785_v30 = vld [vmem:[#allocation2 + $0x88] sm:$0xff] }
 0x3bd   : > { %17944 = vmatmul.mubr.msk.f32.vlgmr.msra.gmra.mrb[38].mxu0 %vm3870_vm3, %v21492_v52  ;;  %17999 = vmatmul.mubr.msk.f32.vlgmr.msra.gmra.mrb[56].mxu1 %vm3870_vm3, %v21492_v52  ;;  %26393 = vst [vmem:[#allocation41_spill] sm:$0xff] %v21815_v24  ;;  %26395 = vst [vmem:[#allocation43_spill] sm:$0xff] %v21837_v62 }
 0x3be   : > { %17947 = vmatpush3.msra.mxu0 %v21794_v15  ;;  %18006 = vmatprep.subr.mxu1 %v26390_v63  ;;  %26396 = vst [vmem:[#allocation44_spill] sm:$0xff] %v21846_v59  ;;  %v21880_v31 = vsub.f32 %v3785_v30, %v21862_v27  ;;  %v3667_v30 = vmul.f32 %v21738_v3, %v21524_v13 }
 0x3bf   : > { %18007 = vmatpush3.msra.mxu1 %v21803_v41  ;;  %17948 = vmatprep.mubr.msk.f32.mxu0 %vm20281_vm2, %v26390_v63  ;;  %v3537_v41 = vpop.permute.xlu0 %3536 }
 0x3c0   : > { %17951 = vmatprep.subr.mxu0 %v26390_v63  ;;  %18008 = vmatprep.mubr.msk.f32.mxu1 %vm20281_vm2, %v26390_v63  ;;  %v21840_v48 = vmul.f32 %v3537_v41, %v21517_v44  ;;  %26399 = vst [vmem:[#allocation47_spill] sm:$0xff] %v21880_v31 }
 0x3c1   : > { %18016 = vmatprep.subr.mxu1 %v26390_v63  ;;  %17949 = vmatmul.mubr.msk.f32.vlgmr.msra.gmra.mrb[40].mxu0 %vm3870_vm3, %v21492_v52 }
 0x3c2   : > { %17952 = vmatpush3.msra.mxu0 %v21815_v24  ;;  %18009 = vmatmul.mubr.msk.f32.vlgmr.msra.gmra.mrb[58].mxu1 %vm3870_vm3, %v21492_v52  ;;  %v21858_v44 = vsub.f32 %v3784_v26, %v21840_v48  ;;  %v3801_v26 = vld [vmem:[#allocation2 + $0x108] sm:$0xff] }
 0x3c3   : > { %18017 = vmatpush3.msra.mxu1 %v21825_v38  ;;  %17953 = vmatprep.mubr.msk.f32.mxu0 %vm20281_vm2, %v26390_v63  ;;  %v3799_v38 = vld [vmem:[#allocation2 + $0xf8] sm:$0xff]  ;;  %v3541_v50 = vpop.permute.xlu0 %3540 }
 0x3c4   : > { %17956 = vmatprep.subr.mxu0 %v26390_v63  ;;  %18018 = vmatprep.mubr.msk.f32.mxu1 %vm20281_vm2, %v26390_v63  ;;  %26397 = vst [vmem:[#allocation45_spill] sm:$0xff] %v21858_v44  ;;  %v21868_v41 = vsub.f32 %v3799_v38, %v21691_v21  ;;  %v21883_v29 = vmul.f32 %v3541_v50, %v21527_v37  ;;  %v3786_v38 = vld [vmem:[#allocation2 + $0x90] sm:$0xff] }
 0x3c5   : > { %18026 = vmatprep.subr.mxu1 %v26390_v63  ;;  %17954 = vmatmul.mubr.msk.f32.vlgmr.msra.gmra.mrb[42].mxu0 %vm3870_vm3, %v21492_v52  ;;  %v21889_v21 = vsub.f32 %v3801_v26, %v21717_v23  ;;  %v3787_v26 = vld [vmem:[#allocation2 + $0x98] sm:$0xff] }
 0x3c6   : > { %17957 = vmatpush3.msra.mxu0 %v21837_v62  ;;  %18019 = vmatmul.mubr.msk.f32.vlgmr.msra.gmra.mrb[60].mxu1 %vm3870_vm3, %v21492_v52  ;;  %26398 = vst [vmem:[#allocation46_spill] sm:$0xff] %v21868_v41  ;;  %v21901_v23 = vsub.f32 %v3786_v38, %v21883_v29  ;;  %v21920_v3 = vsub.f32 %v3787_v26, %v3667_v30  ;;  %v3807_v26 = vld [vmem:[#allocation2 + $0x138] sm:$0xff] }
 0x3c7   : > { %18027 = vmatpush3.msra.mxu1 %v21846_v59  ;;  %17958 = vmatprep.mubr.msk.f32.mxu0 %vm20281_vm2, %v26390_v63  ;;  %26400 = vst [vmem:[#allocation48_spill] sm:$0xff] %v21889_v21  ;;  %v3545_v37 = vpop.permute.xlu0 %3544 }
 0x3c8   : > { %17961 = vmatprep.subr.mxu0 %v26390_v63  ;;  %18028 = vmatprep.mubr.msk.f32.mxu1 %vm20281_vm2, %v26390_v63  ;;  %26401 = vst [vmem:[#allocation49_spill] sm:$0xff] %v21901_v23  ;;  %26403 = vst [vmem:[#allocation51_spill] sm:$0xff] %v21920_v3  ;;  %v21923_v13 = vmul.f32 %v3545_v37, %v21537_v53  ;;  %v3790_v37 = vld [vmem:[#allocation2 + $0xb0] sm:$0xff] }
 0x3c9   : > { %18036 = vmatprep.subr.mxu1 %v26390_v63  ;;  %17959 = vmatmul.mubr.msk.f32.vlgmr.msra.gmra.mrb[44].mxu0 %vm3870_vm3, %v21492_v52 }
 0x3ca   : > { %17962 = vmatpush3.msra.mxu0 %v21858_v44  ;;  %18029 = vmatmul.mubr.msk.f32.vlgmr.msra.gmra.mrb[62].mxu1 %vm3870_vm3, %v21492_v52 }
 0x3cb   : > { %18037 = vmatpush3.msra.mxu1 %v21868_v41  ;;  %17963 = vmatprep.mubr.msk.f32.mxu0 %vm20281_vm2, %v26390_v63  ;;  %v3803_v41 = vld [vmem:[#allocation2 + $0x118] sm:$0xff]  ;;  %v3549_v38 = vpop.permute.xlu0 %3548 }
 0x3cc   : > { %17966 = vmatprep.subr.mxu0 %v26390_v63  ;;  %18038 = vmatprep.mubr.msk.f32.mxu1 %vm20281_vm2, %v26390_v63  ;;  %v21909_v50 = vsub.f32 %v3803_v41, %v21745_v19  ;;  %v3788_v41 = vld [vmem:[#allocation2 + $0xa0] sm:$0xff] }
 0x3cd   : > { %18046 = vmatprep.subr.mxu1 %v26390_v63  ;;  %17964 = vmatmul.mubr.msk.f32.vlgmr.msra.gmra.mrb[46].mxu0 %vm3870_vm3, %v21492_v52  ;;  %v21941_v53 = vsub.f32 %v3788_v41, %v21923_v13 }
 0x3ce   : > { %17967 = vmatpush3.msra.mxu0 %v21880_v31  ;;  %18039 = vmatmul.mubr.msk.f32.vlgmr.msra.gmra.mrb[64].mxu1 %vm3870_vm3, %v21492_v52  ;;  %26402 = vst [vmem:[#allocation50_spill] sm:$0xff] %v21909_v50 }
 0x3cf   : > { %18047 = vmatpush3.msra.mxu1 %v21889_v21  ;;  %17968 = vmatprep.mubr.msk.f32.mxu0 %vm20281_vm2, %v26390_v63  ;;  %v3805_v21 = vld [vmem:[#allocation2 + $0x128] sm:$0xff]  ;;  %26405 = vst [vmem:[#allocation53_spill] sm:$0xff] %v21941_v53 }
 0x3d0   : > { %17971 = vmatprep.subr.mxu0 %v26390_v63  ;;  %18048 = vmatprep.mubr.msk.f32.mxu1 %vm20281_vm2, %v26390_v63  ;;  %v21929_v19 = vsub.f32 %v3805_v21, %v21775_v47  ;;  %v21944_v47 = vmul.f32 %v3549_v38, %v21547_v25  ;;  %v21950_v21 = vsub.f32 %v3807_v26, %v21819_v20  ;;  %v3792_v20 = vld [vmem:[#allocation2 + $0xc0] sm:$0xff]  ;;  %v3811_v38 = vld [vmem:[#allocation2 + $0x158] sm:$0xff] }
 0x3d1   : > { %18056 = vmatprep.subr.mxu1 %v26390_v63  ;;  %17969 = vmatmul.mubr.msk.f32.vlgmr.msra.gmra.mrb[48].mxu0 %vm3870_vm3, %v21492_v52  ;;  %v21980_v26 = vsub.f32 %v3792_v20, %v21617_v49 }
 0x3d2   : > { %17972 = vmatpush3.msra.mxu0 %v21901_v23  ;;  %18049 = vmatmul.mubr.msk.f32.vlgmr.msra.gmra.mrb[66].mxu1 %vm3870_vm3, %v21492_v52  ;;  %26404 = vst [vmem:[#allocation52_spill] sm:$0xff] %v21929_v19  ;;  %26406 = vst [vmem:[#allocation54_spill] sm:$0xff] %v21950_v21  ;;  %v21962_v25 = vsub.f32 %v3790_v37, %v21944_v47  ;;  %v3813_v37 = vld [vmem:[#allocation2 + $0x168] sm:$0xff] }
 0x3d3   : > { %18057 = vmatpush3.msra.mxu1 %v21909_v50  ;;  %17973 = vmatprep.mubr.msk.f32.mxu0 %vm20281_vm2, %v26390_v63  ;;  %26409 = vst [vmem:[#allocation57_spill] sm:$0xff] %v21980_v26  ;;  %v22003_v20 = vsub.f32 %v3813_v37, %v21760_v54  ;;  %v7459_v54 = vld [vmem:[%s20508_s9] sm:$0xff]  ;;  %v3798_v37 = vld [vmem:[#allocation2 + $0xf0] sm:$0xff] }
 0x3d4   : > { %17976 = vmatprep.subr.mxu0 %v26390_v63  ;;  %18058 = vmatprep.mubr.msk.f32.mxu1 %vm20281_vm2, %v26390_v63  ;;  %26407 = vst [vmem:[#allocation55_spill] sm:$0xff] %v21962_v25 }
 0x3d5   : > { %18066 = vmatprep.subr.mxu1 %v26390_v63  ;;  %17974 = vmatmul.mubr.msk.f32.vlgmr.msra.gmra.mrb[50].mxu0 %vm3870_vm3, %v21492_v52  ;;  %26412 = vst [vmem:[#allocation60_spill] sm:$0xff] %v22003_v20 }
 0x3d6   : > { %17977 = vmatpush3.msra.mxu0 %v21920_v3  ;;  %18059 = vmatmul.mubr.msk.f32.vlgmr.msra.gmra.mrb[68].mxu1 %vm3870_vm3, %v21492_v52 }
 0x3d7   : > { %18067 = vmatpush3.msra.mxu1 %v21929_v19  ;;  %17978 = vmatprep.mubr.msk.f32.mxu0 %vm20281_vm2, %v26390_v63  ;;  %v3809_v19 = vld [vmem:[#allocation2 + $0x148] sm:$0xff] }
 0x3d8   : > { %17981 = vmatprep.subr.mxu0 %v26390_v63  ;;  %18068 = vmatprep.mubr.msk.f32.mxu1 %vm20281_vm2, %v26390_v63  ;;  %v21968_v41 = vsub.f32 %v3809_v19, %v21862_v27  ;;  %v3794_v27 = vld [vmem:[#allocation2 + $0xd0] sm:$0xff]  ;;  %v21985_v19 = vsub.f32 %v3811_v38, %v3667_v30  ;;  %v3796_v30 = vld [vmem:[#allocation2 + $0xe0] sm:$0xff]  ;;  %v3815_v38 = vld [vmem:[#allocation2 + $0x178] sm:$0xff] }
 0x3d9   : > { %18076 = vmatprep.subr.mxu1 %v26390_v63  ;;  %17979 = vmatmul.mubr.msk.f32.vlgmr.msra.gmra.mrb[52].mxu0 %vm3870_vm3, %v21492_v52  ;;  %v21997_v49 = vsub.f32 %v3794_v27, %v21626_v2  ;;  %v22015_v2 = vsub.f32 %v3796_v30, %v21655_v14  ;;  %v7460_v27 = vld [vmem:[%s20508_s9 + $0x8] sm:$0xff]  ;;  %v7461_v30 = vld [vmem:[%s20508_s9 + $0x10] sm:$0xff] }
 0x3da   : > { %17982 = vmatpush3.msra.mxu0 %v21941_v53  ;;  %18069 = vmatmul.mubr.msk.f32.vlgmr.msra.gmra.mrb[70].mxu1 %vm3870_vm3, %v21492_v52  ;;  %26408 = vst [vmem:[#allocation56_spill] sm:$0xff] %v21968_v41  ;;  %26410 = vst [vmem:[#allocation58_spill] sm:$0xff] %v21985_v19  ;;  %v22034_v14 = vpack.c.bf16 %v7460_v27, %v7459_v54  ;;  %v3802_v27 = vld [vmem:[#allocation2 + $0x110] sm:$0xff] }
 0x3db   : > { %18077 = vmatpush3.msra.mxu1 %v21950_v21  ;;  %17983 = vmatprep.mubr.msk.f32.mxu0 %vm20281_vm2, %v26390_v63  ;;  %26411 = vst [vmem:[#allocation59_spill] sm:$0xff] %v21997_v49  ;;  %26413 = vst [vmem:[#allocation61_spill] sm:$0xff] %v22015_v2 }
 0x3dc   : > { %17991 = vmatprep.subr.mxu0 %v26390_v63  ;;  %18078 = vmatprep.mubr.msk.f32.mxu1 %vm20281_vm2, %v26390_v63 }
 0x3dd   : > { %18086 = vmatprep.subr.mxu1 %v26390_v63  ;;  %17984 = vmatmul.mubr.msk.f32.vlgmr.msra.gmra.mrb[54].mxu0 %vm3870_vm3, %v21492_v52 }
 0x3de   : > { %17992 = vmatpush3.msra.mxu0 %v21962_v25  ;;  %18079 = vmatmul.mubr.msk.f32.vlgmr.msra.gmra.mrb[72].mxu1 %vm3870_vm3, %v21492_v52 }
 0x3df   : > { %18087 = vmatpush3.msra.mxu1 %v21968_v41  ;;  %17993 = vmatprep.mubr.msk.f32.mxu0 %vm20281_vm2, %v26390_v63 }
 0x3e0   : > { %18001 = vmatprep.subr.mxu0 %v26390_v63  ;;  %18088 = vmatprep.mubr.msk.f32.mxu1 %vm20281_vm2, %v26390_v63 }
 0x3e1   : > { %18096 = vmatprep.subr.mxu1 %v26390_v63  ;;  %17994 = vmatmul.mubr.msk.f32.vlgmr.msra.gmra.mrb[56].mxu0 %vm3870_vm3, %v21492_v52 }
 0x3e2   : > { %18002 = vmatpush3.msra.mxu0 %v21980_v26  ;;  %18089 = vmatmul.mubr.msk.f32.vlgmr.msra.gmra.mrb[74].mxu1 %vm3870_vm3, %v21492_v52 }
 0x3e3   : > { %18097 = vmatpush3.msra.mxu1 %v21985_v19  ;;  %18003 = vmatprep.mubr.msk.f32.mxu0 %vm20281_vm2, %v26390_v63  ;;  %v22023_v19 = vsub.f32 %v3815_v38, %v21778_v43  ;;  %v22037_v43 = vsub.f32 %v3798_v37, %v21679_v58  ;;  %v7462_v38 = vld [vmem:[%s20508_s9 + $0x18] sm:$0xff]  ;;  %v22064_v37 = vsub.f32 %v3802_v27, %v21731_v40  ;;  %v3810_v27 = vld [vmem:[#allocation2 + $0x150] sm:$0xff] }
 0x3e4   : > { %18011 = vmatprep.subr.mxu0 %v26390_v63  ;;  %18098 = vmatprep.mubr.msk.f32.mxu1 %vm20281_vm2, %v26390_v63  ;;  %v19339_v58 = vpack.c.bf16 %v7462_v38, %v7461_v30  ;;  %v3806_v30 = vld [vmem:[#allocation2 + $0x130] sm:$0xff]  ;;  %v3808_v38 = vld [vmem:[#allocation2 + $0x140] sm:$0xff] }
 0x3e5   : > { %18106 = vmatprep.subr.mxu1 %v26390_v63  ;;  %18004 = vmatmul.mubr.msk.f32.vlgmr.msra.gmra.mrb[58].mxu0 %vm3870_vm3, %v21492_v52  ;;  %26414 = vst [vmem:[#allocation62_spill] sm:$0xff] %v22023_v19  ;;  %26415 = vst [vmem:[#allocation63_spill] sm:$0xff] %v22037_v43  ;;  %v22082_v40 = vsub.f32 %v3806_v30, %v21797_v10  ;;  %v22100_v10 = vsub.f32 %v3810_v27, %v21883_v29  ;;  %v3814_v30 = vld [vmem:[#allocation2 + $0x170] sm:$0xff] }
 0x3e6   : > { %18012 = vmatpush3.msra.mxu0 %v21997_v49  ;;  %18099 = vmatmul.mubr.msk.f32.vlgmr.msra.gmra.mrb[76].mxu1 %vm3870_vm3, %v21492_v52  ;;  %26417 = vst [vmem:[#allocation65_spill] sm:$0xff] %v22064_v37  ;;  %v22118_v29 = vsub.f32 %v3814_v30, %v21944_v47 }
 0x3e7   : > { %18107 = vmatpush3.msra.mxu1 %v22003_v20  ;;  %18013 = vmatprep.mubr.msk.f32.mxu0 %vm20281_vm2, %v26390_v63  ;;  %v3800_v20 = vld [vmem:[#allocation2 + $0x100] sm:$0xff]  ;;  %26419 = vst [vmem:[#allocation67_spill] sm:$0xff] %v22082_v40  ;;  %26421 = vst [vmem:[#allocation69_spill] sm:$0xff] %v22100_v10 }
 0x3e8   : > { %18021 = vmatprep.subr.mxu0 %v26390_v63  ;;  %18108 = vmatprep.mubr.msk.f32.mxu1 %vm20281_vm2, %v26390_v63  ;;  %v22054_v54 = vsub.f32 %v3800_v20, %v21703_v28  ;;  %v3804_v28 = vld [vmem:[#allocation2 + $0x120] sm:$0xff]  ;;  %26423 = vst [vmem:[#allocation71_spill] sm:$0xff] %v22118_v29 }
 0x3e9   : > { %18116 = vmatprep.subr.mxu1 %v26390_v63  ;;  %18014 = vmatmul.mubr.msk.f32.vlgmr.msra.gmra.mrb[60].mxu0 %vm3870_vm3, %v21492_v52  ;;  %v22073_v20 = vsub.f32 %v3804_v28, %v21757_v57  ;;  %v22091_v57 = vsub.f32 %v3808_v38, %v21840_v48  ;;  %v3812_v28 = vld [vmem:[#allocation2 + $0x160] sm:$0xff] }
 0x3ea   : > { %18022 = vmatpush3.msra.mxu0 %v22015_v2  ;;  %18109 = vmatmul.mubr.msk.f32.vlgmr.msra.gmra.mrb[78].mxu1 %vm3870_vm3, %v21492_v52  ;;  %26416 = vst [vmem:[#allocation64_spill] sm:$0xff] %v22054_v54  ;;  %v22109_v48 = vsub.f32 %v3812_v28, %v21923_v13 }
 0x3eb   : > { %18117 = vmatpush3.msra.mxu1 %v22023_v19  ;;  %18023 = vmatprep.mubr.msk.f32.mxu0 %vm20281_vm2, %v26390_v63  ;;  %26418 = vst [vmem:[#allocation66_spill] sm:$0xff] %v22073_v20  ;;  %26420 = vst [vmem:[#allocation68_spill] sm:$0xff] %v22091_v57 }
 0x3ec   : > { %18031 = vmatprep.subr.mxu0 %v26390_v63  ;;  %18118 = vmatprep.mubr.msk.f32.mxu1 %vm20281_vm2, %v26390_v63  ;;  %26422 = vst [vmem:[#allocation70_spill] sm:$0xff] %v22109_v48 }
 0x3ed   : > { %18024 = vmatmul.mubr.msk.f32.vlgmr.msra.gmra.mrb[62].mxu0 %vm3870_vm3, %v21492_v52  ;;  %19583 = vmatprep.subr.bf16.mxu1 %v22034_v14 }
 0x3ee   : > { %18032 = vmatpush3.msra.mxu0 %v22037_v43  ;;  %18119 = vmatmul.mubr.msk.f32.vlgmr.msra.gmra.mrb[80].mxu1 %vm3870_vm3, %v21492_v52 }
 0x3ef   : > { %18033 = vmatprep.mubr.msk.f32.mxu0 %vm20281_vm2, %v26390_v63  ;;  %18041 = vmatprep.subr.mxu0 %v26390_v63 }
 0x3f0   : > { %19585 = vmatpush3.bf16.msra.mxu1 %v22034_v14 }
 0x3f1   : > { %18034 = vmatmul.mubr.msk.f32.vlgmr.msra.gmra.mrb[64].mxu0 %vm3870_vm3, %v21492_v52  ;;  %19584 = vmatprep.subr.bf16.mxu1 %v19339_v58 }
 0x3f2   : > { %18042 = vmatpush3.msra.mxu0 %v22054_v54  ;;  %18043 = vmatprep.mubr.msk.f32.mxu0 %vm20281_vm2, %v26390_v63 }
 0x3f3   : > { %18051 = vmatprep.subr.mxu0 %v26390_v63 }
 0x3f4   : > { %19586 = vmatpush3.bf16.msra.mxu1 %v19339_v58 }
 0x3f5   : > { %18044 = vmatmul.mubr.msk.f32.vlgmr.msra.gmra.mrb[66].mxu0 %vm3870_vm3, %v21492_v52 }
 0x3f6   : > { %18052 = vmatpush3.msra.mxu0 %v22064_v37  ;;  %18053 = vmatprep.mubr.msk.f32.mxu0 %vm20281_vm2, %v26390_v63 }
 0x3f7   : > { %18061 = vmatprep.subr.mxu0 %v26390_v63 }
 0x3f9   : > { %18054 = vmatmul.mubr.msk.f32.vlgmr.msra.gmra.mrb[68].mxu0 %vm3870_vm3, %v21492_v52 }
 0x3fa   : > { %18062 = vmatpush3.msra.mxu0 %v22073_v20  ;;  %18063 = vmatprep.mubr.msk.f32.mxu0 %vm20281_vm2, %v26390_v63 }
 0x3fb   : > { %18071 = vmatprep.subr.mxu0 %v26390_v63 }
 0x3fd   : > { %18064 = vmatmul.mubr.msk.f32.vlgmr.msra.gmra.mrb[70].mxu0 %vm3870_vm3, %v21492_v52 }
 0x3fe   : > { %18072 = vmatpush3.msra.mxu0 %v22082_v40  ;;  %18073 = vmatprep.mubr.msk.f32.mxu0 %vm20281_vm2, %v26390_v63 }
 0x3ff   : > { %18081 = vmatprep.subr.mxu0 %v26390_v63 }
 0x401   : > { %18074 = vmatmul.mubr.msk.f32.vlgmr.msra.gmra.mrb[72].mxu0 %vm3870_vm3, %v21492_v52 }
 0x402   : > { %18082 = vmatpush3.msra.mxu0 %v22091_v57  ;;  %18083 = vmatprep.mubr.msk.f32.mxu0 %vm20281_vm2, %v26390_v63 }
 0x403   : > { %18091 = vmatprep.subr.mxu0 %v26390_v63 }
 0x405   : > { %18084 = vmatmul.mubr.msk.f32.vlgmr.msra.gmra.mrb[74].mxu0 %vm3870_vm3, %v21492_v52 }
 0x406   : > { %18092 = vmatpush3.msra.mxu0 %v22100_v10  ;;  %18093 = vmatprep.mubr.msk.f32.mxu0 %vm20281_vm2, %v26390_v63 }
 0x407   : > { %18101 = vmatprep.subr.mxu0 %v26390_v63 }
 0x409   : > { %18094 = vmatmul.mubr.msk.f32.vlgmr.msra.gmra.mrb[76].mxu0 %vm3870_vm3, %v21492_v52 }
 0x40a   : > { %18102 = vmatpush3.msra.mxu0 %v22109_v48  ;;  %18103 = vmatprep.mubr.msk.f32.mxu0 %vm20281_vm2, %v26390_v63 }
 0x40b   : > { %18111 = vmatprep.subr.mxu0 %v26390_v63 }
 0x40d   : > { %18104 = vmatmul.mubr.msk.f32.vlgmr.msra.gmra.mrb[78].mxu0 %vm3870_vm3, %v21492_v52 }
 0x40e   : > { %18112 = vmatpush3.msra.mxu0 %v22118_v29  ;;  %18113 = vmatprep.mubr.msk.f32.mxu0 %vm20281_vm2, %v26390_v63 }
 0x40f   : > { %19336 = vmatprep.subr.bf16.mxu0 %v22034_v14 }
 0x411   : > { %18114 = vmatmul.mubr.msk.f32.vlgmr.msra.gmra.mrb[80].mxu0 %vm3870_vm3, %v21492_v52 }
 0x412   : > { %19338 = vmatpush3.bf16.msra.mxu0 %v22034_v14 }
 0x413   : > { %19340 = vmatprep.subr.bf16.mxu0 %v19339_v58 }
 0x416   : > { %19342 = vmatpush3.bf16.msra.mxu0 %v19339_v58 }
 0x460   : > { %v4165_v13 = vpop.f32.mrb[14].mxu0 }
 0x461   : > { %v17885_v47 = vpop.f32.mrb[15].mxu0  ;;  %18129 = vmatprep.mubr.msk.f32.mxu0 %vm1772_vm1, %v4165_v13 }
 0x464   : > { %v4235_v38 = vpop.f32.mrb[16].mxu0 }
 0x465   : > { %18130 = vmatmul.mubr.msk.f32.vlgmr.msra.gmra.mrb[82].mxu0 %vm1772_vm1, %v4235_v38  ;;  %v17890_v27 = vpop.f32.mrb[17].mxu0 }
 0x468   : > { %v4305_v28 = vpop.f32.mrb[18].mxu0 }
 0x469   : > { %v17895_v30 = vpop.f32.mrb[19].mxu0  ;;  %18132 = vmatprep.mubr.msk.f32.mxu0 %vm1772_vm1, %v4305_v28 }
 0x46c   : > { %v4375_v63 = vpop.f32.mrb[20].mxu0 }
 0x46d   : > { %18133 = vmatmul.mubr.msk.f32.gmra.mrb[84].mxu0 %vm1772_vm1, %v4375_v63  ;;  %v17900_v52 = vpop.f32.mrb[21].mxu0 }
 0x470   : > { %v4445_v29 = vpop.f32.mrb[22].mxu0 }
 0x471   : > { %v17905_v14 = vpop.f32.mrb[23].mxu0  ;;  %18135 = vmatprep.mubr.msk.f32.mxu0 %vm1772_vm1, %v4445_v29 }
 0x474   : > { %v4515_v58 = vpop.f32.mrb[24].mxu0 }
 0x475   : > { %v17910_v47 = vpop.f32.mrb[25].mxu0  ;;  %18136 = vmatmul.mubr.msk.f32.gmra.mrb[86].mxu0 %vm1772_vm1, %v4515_v58 }
 0x478   : > { %v4585_v13 = vpop.f32.mrb[26].mxu0 }
 0x479   : > { %v17915_v19 = vpop.f32.mrb[27].mxu0  ;;  %18138 = vmatprep.mubr.msk.f32.mxu0 %vm1772_vm1, %v4585_v13 }
 0x47c   : > { %v4655_v38 = vpop.f32.mrb[28].mxu0 }
 0x47d   : > { %v17920_v27 = vpop.f32.mrb[29].mxu0  ;;  %18139 = vmatmul.mubr.msk.f32.gmra.mrb[88].mxu0 %vm1772_vm1, %v4655_v38 }
 0x480   : > { %v4725_v28 = vpop.f32.mrb[30].mxu0 }
 0x481   : > { %v17925_v30 = vpop.f32.mrb[31].mxu0  ;;  %18141 = vmatprep.mubr.msk.f32.mxu0 %vm1772_vm1, %v4725_v28 }
 0x484   : > { %v4795_v63 = vpop.f32.mrb[32].mxu0 }
 0x485   : > { %v17930_v52 = vpop.f32.mrb[33].mxu0  ;;  %18142 = vmatmul.mubr.msk.f32.gmra.mrb[90].mxu0 %vm1772_vm1, %v4795_v63 }
 0x488   : > { %v4865_v29 = vpop.f32.mrb[34].mxu0 }
 0x489   : > { %v17935_v14 = vpop.f32.mrb[35].mxu0  ;;  %18144 = vmatprep.mubr.msk.f32.mxu0 %vm1772_vm1, %v4865_v29 }
 0x48c   : > { %v4935_v58 = vpop.f32.mrb[36].mxu0  ;;  %v5635_v19 = vpop.f32.mrb[54].mxu1 }
 0x48d   : > { %v17940_v47 = vpop.f32.mrb[37].mxu0  ;;  %v17990_v13 = vpop.f32.mrb[55].mxu1  ;;  %18145 = vmatmul.mubr.msk.f32.gmra.mrb[92].mxu0 %vm1772_vm1, %v4935_v58 }
 0x490   : > { %v5005_v27 = vpop.f32.mrb[38].mxu0  ;;  %v5775_v38 = vpop.f32.mrb[56].mxu1 }
 0x491   : > { %v17945_v48 = vpop.f32.mrb[39].mxu0  ;;  %v18000_v30 = vpop.f32.mrb[57].mxu1  ;;  %18147 = vmatprep.mubr.msk.f32.mxu0 %vm1772_vm1, %v5005_v27 }
 0x494   : > { %v5075_v28 = vpop.f32.mrb[40].mxu0 }
 0x495   : > { %v5915_v52 = vpop.f32.mrb[58].mxu1  ;;  %v17950_v10 = vpop.f32.mrb[41].mxu0  ;;  %18148 = vmatmul.mubr.msk.f32.gmra.mrb[94].mxu0 %vm1772_vm1, %v5075_v28 }
 0x496   : > { %v18010_v63 = vpop.f32.mrb[59].mxu1 }
 0x498   : > { %v5145_v14 = vpop.f32.mrb[42].mxu0 }
 0x499   : > { %v6055_v29 = vpop.f32.mrb[60].mxu1  ;;  %v17955_v57 = vpop.f32.mrb[43].mxu0  ;;  %18150 = vmatprep.mubr.msk.f32.mxu0 %vm1772_vm1, %v5145_v14 }
 0x49a   : > { %v18020_v47 = vpop.f32.mrb[61].mxu1 }
 0x49c   : > { %v5215_v13 = vpop.f32.mrb[44].mxu0 }
 0x49d   : > { %v6195_v58 = vpop.f32.mrb[62].mxu1  ;;  %v17960_v41 = vpop.f32.mrb[45].mxu0  ;;  %18151 = vmatmul.mubr.msk.f32.gmra.mrb[96].mxu0 %vm1772_vm1, %v5215_v13 }
 0x49e   : > { %v18030_v48 = vpop.f32.mrb[63].mxu1 }
 0x4a0   : > { %v5285_v30 = vpop.f32.mrb[46].mxu0 }
 0x4a1   : > { %v6335_v27 = vpop.f32.mrb[64].mxu1  ;;  %v17965_v40 = vpop.f32.mrb[47].mxu0  ;;  %18153 = vmatprep.mubr.msk.f32.mxu0 %vm1772_vm1, %v5285_v30 }
 0x4a2   : > { %v18040_v10 = vpop.f32.mrb[65].mxu1 }
 0x4a4   : > { %v5355_v28 = vpop.f32.mrb[48].mxu0 }
 0x4a5   : > { %v6475_v63 = vpop.f32.mrb[66].mxu1  ;;  %v17970_v21 = vpop.f32.mrb[49].mxu0  ;;  %18154 = vmatmul.mubr.msk.f32.gmra.mrb[98].mxu0 %vm1772_vm1, %v5355_v28 }
 0x4a6   : > { %v18050_v57 = vpop.f32.mrb[67].mxu1 }
 0x4a8   : > { %v5425_v14 = vpop.f32.mrb[50].mxu0 }
 0x4a9   : > { %v6615_v47 = vpop.f32.mrb[68].mxu1  ;;  %v17975_v20 = vpop.f32.mrb[51].mxu0  ;;  %18156 = vmatprep.mubr.msk.f32.mxu0 %vm1772_vm1, %v5425_v14 }
 0x4aa   : > { %v18060_v41 = vpop.f32.mrb[69].mxu1 }
 0x4ac   : > { %v5495_v13 = vpop.f32.mrb[52].mxu0 }
 0x4ad   : > { %v6755_v48 = vpop.f32.mrb[70].mxu1  ;;  %v17980_v37 = vpop.f32.mrb[53].mxu0  ;;  %18157 = vmatmul.mubr.msk.f32.gmra.mrb[100].mxu0 %vm1772_vm1, %v5495_v13 }
 0x4ae   : > { %v18070_v40 = vpop.f32.mrb[71].mxu1 }
 0x4b0   : > { %v5565_v30 = vpop.f32.mrb[54].mxu0 }
 0x4b1   : > { %v6895_v10 = vpop.f32.mrb[72].mxu1  ;;  %v17985_v50 = vpop.f32.mrb[55].mxu0  ;;  %18159 = vmatprep.mubr.msk.f32.mxu0 %vm1772_vm1, %v5565_v30 }
 0x4b2   : > { %v18080_v21 = vpop.f32.mrb[73].mxu1  ;;  %18160 = vmatmul.mubr.msk.f32.gmra.mrb[102].mxu0 %vm1772_vm1, %v5635_v19 }
 0x4b4   : > { %v5705_v28 = vpop.f32.mrb[56].mxu0 }
 0x4b5   : > { %v7035_v57 = vpop.f32.mrb[74].mxu1  ;;  %v17995_v20 = vpop.f32.mrb[57].mxu0  ;;  %18162 = vmatprep.mubr.msk.f32.mxu0 %vm1772_vm1, %v5705_v28 }
 0x4b6   : > { %v18090_v14 = vpop.f32.mrb[75].mxu1  ;;  %18163 = vmatmul.mubr.msk.f32.gmra.mrb[104].mxu0 %vm1772_vm1, %v5775_v38 }
 0x4b8   : > { %v5845_v37 = vpop.f32.mrb[58].mxu0 }
 0x4b9   : > { %v7175_v41 = vpop.f32.mrb[76].mxu1  ;;  %v18005_v13 = vpop.f32.mrb[59].mxu0  ;;  %18165 = vmatprep.mubr.msk.f32.mxu0 %vm1772_vm1, %v5845_v37 }
 0x4ba   : > { %v18100_v40 = vpop.f32.mrb[77].mxu1  ;;  %18166 = vmatmul.mubr.msk.f32.gmra.mrb[106].mxu0 %vm1772_vm1, %v5915_v52 }
 0x4bc   : > { %v5985_v50 = vpop.f32.mrb[60].mxu0 }
 0x4bd   : > { %v7315_v30 = vpop.f32.mrb[78].mxu1  ;;  %v18015_v21 = vpop.f32.mrb[61].mxu0  ;;  %18168 = vmatprep.mubr.msk.f32.mxu0 %vm1772_vm1, %v5985_v50 }
 0x4be   : > { %v18110_v19 = vpop.f32.mrb[79].mxu1  ;;  %18169 = vmatmul.mubr.msk.f32.gmra.mrb[108].mxu0 %vm1772_vm1, %v6055_v29 }
 0x4c0   : > { %v6125_v28 = vpop.f32.mrb[62].mxu0 }
 0x4c1   : > { %v7455_v20 = vpop.f32.mrb[80].mxu1  ;;  %v18025_v14 = vpop.f32.mrb[63].mxu0  ;;  %18171 = vmatprep.mubr.msk.f32.mxu0 %vm1772_vm1, %v6125_v28 }
 0x4c2   : > { %v18120_v38 = vpop.f32.mrb[81].mxu1  ;;  %18172 = vmatmul.mubr.msk.f32.gmra.mrb[110].mxu0 %vm1772_vm1, %v6195_v58 }
 0x4c4   : > { %v6265_v37 = vpop.f32.mrb[64].mxu0 }
 0x4c5   : > { %v18035_v13 = vpop.f32.mrb[65].mxu0  ;;  %18174 = vmatprep.mubr.msk.f32.mxu0 %vm1772_vm1, %v6265_v37 }
 0x4c6   : > { %18175 = vmatmul.mubr.msk.f32.gmra.mrb[112].mxu0 %vm1772_vm1, %v6335_v27 }
 0x4c8   : > { %v6405_v52 = vpop.f32.mrb[66].mxu0 }
 0x4c9   : > { %v18045_v40 = vpop.f32.mrb[67].mxu0  ;;  %18177 = vmatprep.mubr.msk.f32.mxu0 %vm1772_vm1, %v6405_v52 }
 0x4ca   : > { %18178 = vmatmul.mubr.msk.f32.gmra.mrb[114].mxu0 %vm1772_vm1, %v6475_v63 }
 0x4cc   : > { %v6545_v29 = vpop.f32.mrb[68].mxu0 }
 0x4cd   : > { %v18055_v50 = vpop.f32.mrb[69].mxu0  ;;  %18180 = vmatprep.mubr.msk.f32.mxu0 %vm1772_vm1, %v6545_v29 }
 0x4ce   : > { %18181 = vmatmul.mubr.msk.f32.gmra.mrb[116].mxu0 %vm1772_vm1, %v6615_v47 }
 0x4d0   : > { %v6685_v21 = vpop.f32.mrb[70].mxu0 }
 0x4d1   : > { %v18065_v58 = vpop.f32.mrb[71].mxu0  ;;  %18183 = vmatprep.mubr.msk.f32.mxu1 %vm1772_vm1, %v6685_v21 }
 0x4d2   : > { %18184 = vmatmul.mubr.msk.f32.vlgmr.msra.gmra.mrb[82].mxu1 %vm1772_vm1, %v6755_v48 }
 0x4d4   : > { %v6825_v19 = vpop.f32.mrb[72].mxu0 }
 0x4d5   : > { %v18075_v27 = vpop.f32.mrb[73].mxu0  ;;  %18186 = vmatprep.mubr.msk.f32.mxu1 %vm1772_vm1, %v6825_v19 }
 0x4d6   : > { %18187 = vmatmul.mubr.msk.f32.gmra.mrb[84].mxu1 %vm1772_vm1, %v6895_v10 }
 0x4d8   : > { %v6965_v28 = vpop.f32.mrb[74].mxu0 }
 0x4d9   : > { %v18085_v63 = vpop.f32.mrb[75].mxu0  ;;  %18189 = vmatprep.mubr.msk.f32.mxu1 %vm1772_vm1, %v6965_v28 }
 0x4da   : > { %18190 = vmatmul.mubr.msk.f32.gmra.mrb[86].mxu1 %vm1772_vm1, %v7035_v57  ;;  %v22182_v57 = vld [vmem:[%s26424_s24] ss:$0 sm:$0xff]  ;;  %s26935_s24 = sld [smem:[#allocation169_spill]] (!%p16779_p5) }
 0x4dc   : > { %v7105_v47 = vpop.f32.mrb[76].mxu0 }
 0x4dd   : > { %v18095_v14 = vpop.f32.mrb[77].mxu0  ;;  %18192 = vmatprep.mubr.msk.f32.mxu1 %vm1772_vm1, %v7105_v47 }
 0x4de   : > { %18193 = vmatmul.mubr.msk.f32.gmra.mrb[88].mxu1 %vm1772_vm1, %v7175_v41 }
 0x4e0   : > { %v7245_v48 = vpop.f32.mrb[78].mxu0 }
 0x4e1   : > { %v18105_v38 = vpop.f32.mrb[79].mxu0  ;;  %18195 = vmatprep.mubr.msk.f32.mxu1 %vm1772_vm1, %v7245_v48 }
 0x4e2   : > { %18196 = vmatmul.mubr.msk.f32.gmra.mrb[90].mxu1 %vm1772_vm1, %v7315_v30 }
 0x4e4   : > { %v7385_v10 = vpop.f32.mrb[80].mxu0 }
 0x4e5   : > { %v18115_v37 = vpop.f32.mrb[81].mxu0  ;;  %18198 = vmatprep.mubr.msk.f32.mxu1 %vm1772_vm1, %v7385_v10 }
 0x4e6   : > { %18199 = vmatmul.mubr.msk.f32.gmra.mrb[92].mxu1 %vm1772_vm1, %v7455_v20 }
 0x538   : > { %v18131_v13 = vpop.f32.mrb[82].mxu0 }
 0x539   : > { %v22185_v41 = vadd.f32 %v18131_v13, %v22182_v57  ;;  %v7680_v52 = vpop.f32.mrb[83].mxu0 }
 0x53a   : > { %v22188_v40 = vadd.f32 %v22182_v57, %v7680_v52 }
 0x53b   : > { %v16154_v30 = vmul.f32 -1.442695, %v22185_v41 }
 0x53c   : > { %v16153_v29 = vmul.f32 -1.442695, %v22188_v40 }
 0x53d   : > { %19904 = vpow2.f32 %v16154_v30 }
 0x53e   : > { %19906 = vpow2.f32 %v16153_v29 }
 0x540   : > { %v18134_v20 = vpop.f32.mrb[84].mxu0 }
 0x541   : > { %v22193_v50 = vadd.f32 %v18134_v20, %v22182_v57  ;;  %v7690_v21 = vpop.f32.mrb[85].mxu0 }
 0x542   : > { %v22196_v58 = vadd.f32 %v22182_v57, %v7690_v21 }
 0x543   : > { %v16156_v19 = vmul.f32 -1.442695, %v22193_v50 }
 0x544   : > { %v16155_v27 = vmul.f32 -1.442695, %v22196_v58 }
 0x545   : > { %19908 = vpow2.f32 %v16156_v19 }
 0x546   : > { %19910 = vpow2.f32 %v16155_v27 }
 0x547   : > { %v19905_v28 = vpop.eup %19904 }
 0x548   : > { %v19907_v63 = vpop.eup %19906  ;;  %v8064_v47 = vadd.f32 1.0, %v19905_v28  ;;  %v18137_v14 = vpop.f32.mrb[86].mxu0 }
 0x549   : > { %v8063_v48 = vadd.f32 1.0, %v19907_v63  ;;  %v22201_v38 = vadd.f32 %v18137_v14, %v22182_v57  ;;  %v7700_v10 = vpop.f32.mrb[87].mxu0 }
 0x54a   : > { %19912 = vrcp.f32 %v8064_v47  ;;  %v22204_v37 = vadd.f32 %v22182_v57, %v7700_v10 }
 0x54b   : > { %19914 = vrcp.f32 %v8063_v48  ;;  %v16158_v13 = vmul.f32 -1.442695, %v22201_v38 }
 0x54c   : > { %v16157_v52 = vmul.f32 -1.442695, %v22204_v37 }
 0x54d   : > { %19916 = vpow2.f32 %v16158_v13 }
 0x54e   : > { %19918 = vpow2.f32 %v16157_v52 }
 0x54f   : > { %v19909_v30 = vpop.eup %19908 }
 0x550   : > { %v19911_v29 = vpop.eup %19910  ;;  %v8066_v20 = vadd.f32 1.0, %v19909_v30  ;;  %v18140_v21 = vpop.f32.mrb[88].mxu0 }
 0x551   : > { %v8065_v19 = vadd.f32 1.0, %v19911_v29  ;;  %v22209_v27 = vadd.f32 %v18140_v21, %v22182_v57  ;;  %v7710_v28 = vpop.f32.mrb[89].mxu0 }
 0x552   : > { %19920 = vrcp.f32 %v8066_v20  ;;  %v22212_v63 = vadd.f32 %v22182_v57, %v7710_v28 }
 0x553   : > { %19922 = vrcp.f32 %v8065_v19  ;;  %v16160_v47 = vmul.f32 -1.442695, %v22209_v27 }
 0x554   : > { %v19913_v14 = vpop.eup %19912  ;;  %v16159_v48 = vmul.f32 -1.442695, %v22212_v63 }
 0x555   : > { %v19915_v10 = vpop.eup %19914  ;;  %19924 = vpow2.f32 %v16160_v47  ;;  %8257 = vrot.lane.b32.xlu1 %v19913_v14, %s20283_s12 }
 0x556   : > { %19926 = vpow2.f32 %v16159_v48  ;;  %8255 = vrot.lane.b32.xlu0 %v19915_v10, %s20283_s12 }
 0x557   : > { %v19917_v13 = vpop.eup %19916 }
 0x558   : > { %v19919_v52 = vpop.eup %19918  ;;  %v8068_v30 = vadd.f32 1.0, %v19917_v13  ;;  %v18143_v29 = vpop.f32.mrb[90].mxu0 }
 0x559   : > { %v8067_v20 = vadd.f32 1.0, %v19919_v52  ;;  %v22219_v21 = vadd.f32 %v18143_v29, %v22182_v57  ;;  %v7720_v19 = vpop.f32.mrb[91].mxu0 }
 0x55a   : > { %19928 = vrcp.f32 %v8068_v30  ;;  %v22222_v28 = vadd.f32 %v22182_v57, %v7720_v19 }
 0x55b   : > { %19930 = vrcp.f32 %v8067_v20  ;;  %v16162_v47 = vmul.f32 -1.442695, %v22219_v21 }
 0x55c   : > { %v19921_v14 = vpop.eup %19920  ;;  %v16161_v48 = vmul.f32 -1.442695, %v22222_v28 }
 0x55d   : > { %v19923_v10 = vpop.eup %19922  ;;  %19932 = vpow2.f32 %v16162_v47  ;;  %8261 = vrot.lane.b32.xlu1 %v19921_v14, %s20283_s12 }
 0x55e   : > { %19934 = vpow2.f32 %v16161_v48  ;;  %8259 = vrot.lane.b32.xlu0 %v19923_v10, %s20283_s12 }
 0x55f   : > { %v19925_v13 = vpop.eup %19924 }
 0x560   : > { %v19927_v52 = vpop.eup %19926  ;;  %v8070_v29 = vadd.f32 1.0, %v19925_v13  ;;  %v18146_v30 = vpop.f32.mrb[92].mxu0 }
 0x561   : > { %v8069_v54 = vadd.f32 1.0, %v19927_v52  ;;  %v22229_v19 = vadd.f32 %v18146_v30, %v22182_v57  ;;  %v7730_v20 = vpop.f32.mrb[93].mxu0 }
 0x562   : > { %19936 = vrcp.f32 %v8070_v29  ;;  %v22232_v43 = vadd.f32 %v22182_v57, %v7730_v20 }
 0x563   : > { %19938 = vrcp.f32 %v8069_v54  ;;  %v16164_v47 = vmul.f32 -1.442695, %v22229_v19 }
 0x564   : > { %v19929_v14 = vpop.eup %19928  ;;  %v16163_v48 = vmul.f32 -1.442695, %v22232_v43 }
 0x565   : > { %v19931_v10 = vpop.eup %19930  ;;  %19940 = vpow2.f32 %v16164_v47  ;;  %8265 = vrot.lane.b32.xlu1 %v19929_v14, %s20283_s12 }
 0x566   : > { %19942 = vpow2.f32 %v16163_v48  ;;  %8263 = vrot.lane.b32.xlu0 %v19931_v10, %s20283_s12 }
 0x567   : > { %v19933_v13 = vpop.eup %19932 }
 0x568   : > { %v19935_v52 = vpop.eup %19934  ;;  %v8072_v30 = vadd.f32 1.0, %v19933_v13  ;;  %v18149_v29 = vpop.f32.mrb[94].mxu0 }
 0x569   : > { %v8071_v2 = vadd.f32 1.0, %v19935_v52  ;;  %v22239_v20 = vadd.f32 %v18149_v29, %v22182_v57  ;;  %v7740_v54 = vpop.f32.mrb[95].mxu0 }
 0x56a   : > { %19944 = vrcp.f32 %v8072_v30  ;;  %v22242_v59 = vadd.f32 %v22182_v57, %v7740_v54 }
 0x56b   : > { %19946 = vrcp.f32 %v8071_v2  ;;  %v16166_v47 = vmul.f32 -1.442695, %v22239_v20 }
 0x56c   : > { %v19937_v14 = vpop.eup %19936  ;;  %v16165_v48 = vmul.f32 -1.442695, %v22242_v59 }
 0x56d   : > { %v19939_v10 = vpop.eup %19938  ;;  %19948 = vpow2.f32 %v16166_v47  ;;  %8269 = vrot.lane.b32.xlu1 %v19937_v14, %s20283_s12 }
 0x56e   : > { %19950 = vpow2.f32 %v16165_v48  ;;  %8267 = vrot.lane.b32.xlu0 %v19939_v10, %s20283_s12 }
 0x56f   : > { %v19941_v13 = vpop.eup %19940 }
 0x570   : > { %v19943_v52 = vpop.eup %19942  ;;  %v8074_v29 = vadd.f32 1.0, %v19941_v13  ;;  %v18152_v30 = vpop.f32.mrb[96].mxu0 }
 0x571   : > { %v8073_v49 = vadd.f32 1.0, %v19943_v52  ;;  %v22249_v54 = vadd.f32 %v18152_v30, %v22182_v57  ;;  %v7750_v2 = vpop.f32.mrb[97].mxu0 }
 0x572   : > { %19952 = vrcp.f32 %v8074_v29  ;;  %v22252_v26 = vadd.f32 %v22182_v57, %v7750_v2 }
 0x573   : > { %19954 = vrcp.f32 %v8073_v49  ;;  %v16168_v47 = vmul.f32 -1.442695, %v22249_v54 }
 0x574   : > { %v19945_v14 = vpop.eup %19944  ;;  %v16167_v48 = vmul.f32 -1.442695, %v22252_v26 }
 0x575   : > { %v19947_v10 = vpop.eup %19946  ;;  %19956 = vpow2.f32 %v16168_v47  ;;  %8273 = vrot.lane.b32.xlu1 %v19945_v14, %s20283_s12  ;;  %v8495_v14 = vld [vmem:[%s26425_s1] sm:$0xff] }
 0x576   : > { %19958 = vpow2.f32 %v16167_v48  ;;  %8271 = vrot.lane.b32.xlu0 %v19947_v10, %s20283_s12  ;;  %18225 = vmatprep.mubr.msk.f32.mxu1 %vm8531_vm4, %v8495_v14 }
 0x577   : > { %v19949_v13 = vpop.eup %19948  ;;  %18381 = vmatprep.mubr.msk.f32.mxu0 %vm8531_vm4, %v8495_v14 }
 0x578   : > { %v19951_v52 = vpop.eup %19950  ;;  %v8076_v29 = vadd.f32 1.0, %v19949_v13  ;;  %v18155_v30 = vpop.f32.mrb[98].mxu0 }
 0x579   : > { %v8075_v2 = vadd.f32 1.0, %v19951_v52  ;;  %v22259_v49 = vadd.f32 %v18155_v30, %v22182_v57  ;;  %v7760_v25 = vpop.f32.mrb[99].mxu0 }
 0x57a   : > { %19960 = vrcp.f32 %v8076_v29  ;;  %v22262_v36 = vadd.f32 %v22182_v57, %v7760_v25 }
 0x57b   : > { %26426 = vst [vmem:[#allocation72_spill] sm:$0xff] %v22259_v49  ;;  %19962 = vrcp.f32 %v8075_v2  ;;  %v16170_v47 = vmul.f32 -1.442695, %v22259_v49 }
 0x57c   : > { %26427 = vst [vmem:[#allocation73_spill] sm:$0xff] %v22262_v36  ;;  %v19953_v48 = vpop.eup %19952  ;;  %v16169_v10 = vmul.f32 -1.442695, %v22262_v36 }
 0x57d   : > { %v19955_v13 = vpop.eup %19954  ;;  %19964 = vpow2.f32 %v16170_v47  ;;  %8277 = vrot.lane.b32.xlu1 %v19953_v48, %s20283_s12 }
 0x57e   : > { %19966 = vpow2.f32 %v16169_v10  ;;  %8275 = vrot.lane.b32.xlu0 %v19955_v13, %s20283_s12 }
 0x57f   : > { %v19957_v25 = vpop.eup %19956 }
 0x580   : > { %v19959_v52 = vpop.eup %19958  ;;  %v8078_v29 = vadd.f32 1.0, %v19957_v25  ;;  %v18158_v30 = vpop.f32.mrb[100].mxu0 }
 0x581   : > { %v8077_v2 = vadd.f32 1.0, %v19959_v52  ;;  %v22272_v53 = vadd.f32 %v18158_v30, %v22182_v57  ;;  %v7770_v17 = vpop.f32.mrb[101].mxu0 }
 0x582   : > { %19968 = vrcp.f32 %v8078_v29  ;;  %v22275_v23 = vadd.f32 %v22182_v57, %v7770_v17 }
 0x583   : > { %26428 = vst [vmem:[#allocation74_spill] sm:$0xff] %v22272_v53  ;;  %19970 = vrcp.f32 %v8077_v2  ;;  %v16172_v47 = vmul.f32 -1.442695, %v22272_v53 }
 0x584   : > { %26429 = vst [vmem:[#allocation75_spill] sm:$0xff] %v22275_v23  ;;  %v19961_v14 = vpop.eup %19960  ;;  %v16171_v48 = vmul.f32 -1.442695, %v22275_v23  ;;  %v22289_v23 = vld [vmem:[%s20502_s5] ss:$0 sm:$0xff] }
 0x585   : > { %v19963_v10 = vpop.eup %19962  ;;  %19972 = vpow2.f32 %v16172_v47  ;;  %8281 = vrot.lane.b32.xlu1 %v19961_v14, %s20283_s12  ;;  %v18161_v13 = vpop.f32.mrb[102].mxu0  ;;  %v22293_v47 = vadd.f32 %v22289_v23, %v21553_v18 }
 0x586   : > { %19974 = vpow2.f32 %v16171_v48  ;;  %v22281_v25 = vadd.f32 %v18161_v13, %v22182_v57  ;;  %v7780_v52 = vpop.f32.mrb[103].mxu0  ;;  %8279 = vrot.lane.b32.xlu0 %v19963_v10, %s20283_s12 }
 0x587   : > { %v19965_v17 = vpop.eup %19964  ;;  %v22285_v29 = vadd.f32 %v22182_v57, %v7780_v52  ;;  %26432 = vst [vmem:[#allocation78_spill] sm:$0xff] %v22293_v47  ;;  %v16030_v18 = vmul.f32 -1.442695, %v22293_v47 }
 0x588   : > { %26430 = vst [vmem:[#allocation76_spill] sm:$0xff] %v22281_v25  ;;  %v19967_v30 = vpop.eup %19966  ;;  %v8080_v2 = vadd.f32 1.0, %v19965_v17  ;;  %v16174_v3 = vmul.f32 -1.442695, %v22281_v25 }
 0x589   : > { %26431 = vst [vmem:[#allocation77_spill] sm:$0xff] %v22285_v29  ;;  %v8079_v14 = vadd.f32 1.0, %v19967_v30  ;;  %v16173_v48 = vmul.f32 -1.442695, %v22285_v29  ;;  %v18164_v13 = vpop.f32.mrb[104].mxu0 }
 0x58a   : > { %19976 = vrcp.f32 %v8080_v2  ;;  %v22297_v10 = vadd.f32 %v18164_v13, %v22182_v57  ;;  %v7790_v52 = vpop.f32.mrb[105].mxu0 }
 0x58b   : > { %19978 = vrcp.f32 %v8079_v14  ;;  %v22300_v17 = vadd.f32 %v22182_v57, %v7790_v52 }
 0x58c   : > { %26433 = vst [vmem:[#allocation79_spill] sm:$0xff] %v22297_v10  ;;  %v19969_v25 = vpop.eup %19968  ;;  %19980 = vpow2.f32 %v16174_v3  ;;  %v16176_v53 = vmul.f32 -1.442695, %v22297_v10 }
 0x58d   : > { %26434 = vst [vmem:[#allocation80_spill] sm:$0xff] %v22300_v17  ;;  %v19971_v44 = vpop.eup %19970  ;;  %19982 = vpow2.f32 %v16173_v48  ;;  %v16175_v30 = vmul.f32 -1.442695, %v22300_v17  ;;  %8285 = vrot.lane.b32.xlu1 %v19969_v25, %s20283_s12  ;;  %v18167_v2 = vpop.f32.mrb[106].mxu0  ;;  %v22315_v48 = vadd.f32 %v22289_v23, %v21555_v8 }
 0x58e   : > { %19984 = vpow2.f32 %v16176_v53  ;;  %v22307_v13 = vadd.f32 %v18167_v2, %v22182_v57  ;;  %v7800_v14 = vpop.f32.mrb[107].mxu0  ;;  %8283 = vrot.lane.b32.xlu0 %v19971_v44, %s20283_s12 }
 0x58f   : > { %v19973_v52 = vpop.eup %19972  ;;  %19986 = vpow2.f32 %v16175_v30  ;;  %v22311_v3 = vadd.f32 %v22182_v57, %v7800_v14  ;;  %26437 = vst [vmem:[#allocation83_spill] sm:$0xff] %v22315_v48  ;;  %v16029_v8 = vmul.f32 -1.442695, %v22315_v48 }
 0x590   : > { %26435 = vst [vmem:[#allocation81_spill] sm:$0xff] %v22307_v13  ;;  %v19975_v10 = vpop.eup %19974  ;;  %v8082_v47 = vadd.f32 1.0, %v19973_v52  ;;  %v16178_v25 = vmul.f32 -1.442695, %v22307_v13  ;;  %19988 = vpow2.f32 %v16030_v18 }
 0x591   : > { %26436 = vst [vmem:[#allocation82_spill] sm:$0xff] %v22311_v3  ;;  %v8081_v53 = vadd.f32 1.0, %v19975_v10  ;;  %v16177_v2 = vmul.f32 -1.442695, %v22311_v3  ;;  %v18170_v17 = vpop.f32.mrb[108].mxu0 }
 0x592   : > { %19990 = vrcp.f32 %v8082_v47  ;;  %v22320_v44 = vadd.f32 %v18170_v17, %v22182_v57  ;;  %v7810_v30 = vpop.f32.mrb[109].mxu0 }
 0x593   : > { %19992 = vrcp.f32 %v8081_v53  ;;  %v22323_v14 = vadd.f32 %v22182_v57, %v7810_v30 }
 0x594   : > { %26438 = vst [vmem:[#allocation84_spill] sm:$0xff] %v22320_v44  ;;  %v19977_v29 = vpop.eup %19976  ;;  %19994 = vpow2.f32 %v16178_v25  ;;  %v16180_v52 = vmul.f32 -1.442695, %v22320_v44 }
 0x595   : > { %26439 = vst [vmem:[#allocation85_spill] sm:$0xff] %v22323_v14  ;;  %v19979_v18 = vpop.eup %19978  ;;  %19996 = vpow2.f32 %v16177_v2  ;;  %v16179_v10 = vmul.f32 -1.442695, %v22323_v14  ;;  %8289 = vrot.lane.b32.xlu1 %v19977_v29, %s20283_s12  ;;  %v18173_v47 = vpop.f32.mrb[110].mxu0 }
 0x596   : > { %v19981_v17 = vpop.eup %19980  ;;  %19998 = vpow2.f32 %v16180_v52  ;;  %v22330_v53 = vadd.f32 %v18173_v47, %v22182_v57  ;;  %v7820_v30 = vpop.f32.mrb[111].mxu0  ;;  %8287 = vrot.lane.b32.xlu0 %v19979_v18, %s20283_s12 }
 0x597   : > { %v19983_v3 = vpop.eup %19982  ;;  %v8084_v48 = vadd.f32 1.0, %v19981_v17  ;;  %20000 = vpow2.f32 %v16179_v10  ;;  %v22334_v25 = vadd.f32 %v22182_v57, %v7820_v30 }
 0x598   : > { %26440 = vst [vmem:[#allocation86_spill] sm:$0xff] %v22330_v53  ;;  %v19985_v2 = vpop.eup %19984  ;;  %20002 = vpow2.f32 %v16029_v8  ;;  %v8083_v14 = vadd.f32 1.0, %v19983_v3  ;;  %v16182_v52 = vmul.f32 -1.442695, %v22330_v53 }
 0x599   : > { %26441 = vst [vmem:[#allocation87_spill] sm:$0xff] %v22334_v25  ;;  %v19987_v44 = vpop.eup %19986  ;;  %20004 = vrcp.f32 %v8084_v48  ;;  %v8086_v29 = vadd.f32 1.0, %v19985_v2  ;;  %v18176_v13 = vpop.f32.mrb[112].mxu0  ;;  %v16181_v31 = vmul.f32 -1.442695, %v22334_v25 }
 0x59a   : > { %20006 = vrcp.f32 %v8083_v14  ;;  %v8085_v47 = vadd.f32 1.0, %v19987_v44  ;;  %v22339_v18 = vadd.f32 %v18176_v13, %v22182_v57  ;;  %v7830_v10 = vpop.f32.mrb[113].mxu0  ;;  %v22341_v17 = vpop.eup %19988 }
 0x59b   : > { %20008 = vrcp.f32 %v8086_v29  ;;  %v22344_v8 = vadd.f32 %v22182_v57, %v7830_v10 }
 0x59c   : > { %26442 = vst [vmem:[#allocation88_spill] sm:$0xff] %v22339_v18  ;;  %v19991_v3 = vpop.eup %19990  ;;  %20010 = vrcp.f32 %v8085_v47  ;;  %v16184_v48 = vmul.f32 -1.442695, %v22339_v18 }
 0x59d   : > { %26443 = vst [vmem:[#allocation89_spill] sm:$0xff] %v22344_v8  ;;  %v19993_v30 = vpop.eup %19992  ;;  %20012 = vpow2.f32 %v16182_v52  ;;  %v16183_v44 = vmul.f32 -1.442695, %v22344_v8  ;;  %8293 = vrot.lane.b32.xlu1 %v19991_v3, %s20283_s12  ;;  %v18179_v14 = vpop.f32.mrb[114].mxu0  ;;  %v22358_v3 = vadd.f32 %v22289_v23, %v21559_v51 }
 0x59e   : > { %v19995_v13 = vpop.eup %19994  ;;  %20014 = vpow2.f32 %v16181_v31  ;;  %v22350_v2 = vadd.f32 %v18179_v14, %v22182_v57  ;;  %v7840_v29 = vpop.f32.mrb[115].mxu0  ;;  %8291 = vrot.lane.b32.xlu0 %v19993_v30, %s20283_s12 }
 0x59f   : > { %v19997_v10 = vpop.eup %19996  ;;  %v8088_v25 = vadd.f32 1.0, %v19995_v13  ;;  %20016 = vpow2.f32 %v16184_v48  ;;  %v22354_v47 = vadd.f32 %v22182_v57, %v7840_v29  ;;  %26446 = vst [vmem:[#allocation92_spill] sm:$0xff] %v22358_v3 }
 0x5a0   : > { %26444 = vst [vmem:[#allocation90_spill] sm:$0xff] %v22350_v2  ;;  %v19999_v52 = vpop.eup %19998  ;;  %v8087_v18 = vadd.f32 1.0, %v19997_v10  ;;  %20018 = vpow2.f32 %v16183_v44  ;;  %v16186_v14 = vmul.f32 -1.442695, %v22350_v2 }
 0x5a1   : > { %26445 = vst [vmem:[#allocation91_spill] sm:$0xff] %v22354_v47  ;;  %v20001_v8 = vpop.eup %20000  ;;  %20020 = vrcp.f32 %v8088_v25  ;;  %v8090_v31 = vadd.f32 1.0, %v19999_v52  ;;  %v18182_v53 = vpop.f32.mrb[116].mxu0  ;;  %v16185_v13 = vmul.f32 -1.442695, %v22354_v47 }
 0x5a2   : > { %v22361_v30 = vpop.eup %20002  ;;  %20022 = vrcp.f32 %v8087_v18  ;;  %v8089_v48 = vadd.f32 1.0, %v20001_v8  ;;  %v22365_v29 = vadd.f32 %v18182_v53, %v22182_v57  ;;  %v7850_v44 = vpop.f32.mrb[117].mxu0  ;;  %v16032_v18 = vmul.f32 -1.442695, %v22358_v3 }
 0x5a3   : > { %v20005_v10 = vpop.eup %20004  ;;  %20024 = vrcp.f32 %v8090_v31  ;;  %v22368_v51 = vadd.f32 %v22182_v57, %v7850_v44 }
 0x5a4   : > { %26447 = vst [vmem:[#allocation93_spill] sm:$0xff] %v22365_v29  ;;  %v20007_v25 = vpop.eup %20006  ;;  %20026 = vrcp.f32 %v8089_v48  ;;  %v16188_v52 = vmul.f32 -1.442695, %v22365_v29  ;;  %8297 = vrot.lane.b32.xlu1 %v20005_v10, %s20283_s12 }
 0x5a5   : > { %26448 = vst [vmem:[#allocation94_spill] sm:$0xff] %v22368_v51  ;;  %v20009_v2 = vpop.eup %20008  ;;  %20028 = vpow2.f32 %v16186_v14  ;;  %v16187_v8 = vmul.f32 -1.442695, %v22368_v51  ;;  %8295 = vrot.lane.b32.xlu0 %v20007_v25, %s20283_s12  ;;  %v18185_v53 = vpop.f32.mrb[82].mxu1 }
 0x5a6   : > { %v20011_v47 = vpop.eup %20010  ;;  %20030 = vpow2.f32 %v16185_v13  ;;  %v22376_v31 = vadd.f32 %v18185_v53, %v22182_v57  ;;  %v7860_v44 = vpop.f32.mrb[83].mxu1 }
 0x5a7   : > { %v20013_v48 = vpop.eup %20012  ;;  %20032 = vpow2.f32 %v16188_v52  ;;  %v22379_v29 = vadd.f32 %v22182_v57, %v7860_v44 }
 0x5a8   : > { %26449 = vst [vmem:[#allocation95_spill] sm:$0xff] %v22376_v31  ;;  %v20015_v10 = vpop.eup %20014  ;;  %v8092_v36 = vadd.f32 1.0, %v20013_v48  ;;  %20034 = vpow2.f32 %v16187_v8  ;;  %8301 = vrot.lane.b32.xlu1 %v20009_v2, %s20283_s12  ;;  %v16190_v51 = vmul.f32 -1.442695, %v22376_v31 }
 0x5a9   : > { %26450 = vst [vmem:[#allocation96_spill] sm:$0xff] %v22379_v29  ;;  %v20017_v14 = vpop.eup %20016  ;;  %20036 = vpow2.f32 %v16032_v18  ;;  %v8091_v25 = vadd.f32 1.0, %v20015_v10  ;;  %8299 = vrot.lane.b32.xlu0 %v20011_v47, %s20283_s12  ;;  %v18188_v13 = vpop.f32.mrb[84].mxu1  ;;  %v16189_v2 = vmul.f32 -1.442695, %v22379_v29 }
 0x5aa   : > { %v20019_v3 = vpop.eup %20018  ;;  %20038 = vrcp.f32 %v8092_v36  ;;  %v8094_v53 = vadd.f32 1.0, %v20017_v14  ;;  %v22385_v52 = vadd.f32 %v18188_v13, %v22182_v57  ;;  %v7870_v44 = vpop.f32.mrb[85].mxu1 }
 0x5ab   : > { %v20021_v49 = vpop.eup %20020  ;;  %20040 = vrcp.f32 %v8091_v25  ;;  %v8093_v8 = vadd.f32 1.0, %v20019_v3  ;;  %v22389_v18 = vadd.f32 %v22182_v57, %v7870_v44 }
 0x5ac   : > { %26451 = vst [vmem:[#allocation97_spill] sm:$0xff] %v22385_v52  ;;  %v20023_v48 = vpop.eup %20022  ;;  %20042 = vrcp.f32 %v8094_v53  ;;  %v16192_v47 = vmul.f32 -1.442695, %v22385_v52  ;;  %8305 = vrot.lane.b32.xlu1 %v20021_v49, %s20283_s12 }
 0x5ad   : > { %26452 = vst [vmem:[#allocation98_spill] sm:$0xff] %v22389_v18  ;;  %v20025_v36 = vpop.eup %20024  ;;  %20044 = vrcp.f32 %v8093_v8  ;;  %v16191_v10 = vmul.f32 -1.442695, %v22389_v18  ;;  %8303 = vrot.lane.b32.xlu0 %v20023_v48, %s20283_s12  ;;  %v18191_v14 = vpop.f32.mrb[86].mxu1 }
 0x5ae   : > { %v20027_v25 = vpop.eup %20026  ;;  %20046 = vpow2.f32 %v16190_v51  ;;  %v22396_v3 = vadd.f32 %v18191_v14, %v22182_v57  ;;  %v7880_v13 = vpop.f32.mrb[87].mxu1 }
 0x5af   : > { %v20029_v44 = vpop.eup %20028  ;;  %20048 = vpow2.f32 %v16189_v2  ;;  %v22399_v53 = vadd.f32 %v22182_v57, %v7880_v13 }
 0x5b0   : > { %v20031_v52 = vpop.eup %20030  ;;  %v8096_v49 = vadd.f32 1.0, %v20029_v44  ;;  %20050 = vpow2.f32 %v16192_v47  ;;  %8309 = vrot.lane.b32.xlu1 %v20025_v36, %s20283_s12  ;;  %v16194_v29 = vmul.f32 -1.442695, %v22396_v3 }
 0x5b1   : > { %26453 = vst [vmem:[#allocation99_spill] sm:$0xff] %v22399_v53  ;;  %v20033_v8 = vpop.eup %20032  ;;  %v8095_v18 = vadd.f32 1.0, %v20031_v52  ;;  %20052 = vpow2.f32 %v16191_v10  ;;  %8307 = vrot.lane.b32.xlu0 %v20027_v25, %s20283_s12  ;;  %v18194_v51 = vpop.f32.mrb[88].mxu1  ;;  %v16193_v36 = vmul.f32 -1.442695, %v22399_v53 }
 0x5b2   : > { %v20035_v48 = vpop.eup %20034  ;;  %20054 = vrcp.f32 %v8096_v49  ;;  %v8098_v14 = vadd.f32 1.0, %v20033_v8  ;;  %v22405_v2 = vadd.f32 %v18194_v51, %v22182_v57  ;;  %v7890_v13 = vpop.f32.mrb[89].mxu1 }
 0x5b3   : > { %v22407_v31 = vpop.eup %20036  ;;  %20056 = vrcp.f32 %v8095_v18  ;;  %v8097_v47 = vadd.f32 1.0, %v20035_v48  ;;  %v22411_v52 = vadd.f32 %v22182_v57, %v7890_v13 }
 0x5b4   : > { %26454 = vst [vmem:[#allocation100_spill] sm:$0xff] %v22405_v2  ;;  %v20039_v10 = vpop.eup %20038  ;;  %20058 = vrcp.f32 %v8098_v14  ;;  %v16196_v25 = vmul.f32 -1.442695, %v22405_v2 }
 0x5b5   : > { %26455 = vst [vmem:[#allocation101_spill] sm:$0xff] %v22411_v52  ;;  %v20041_v44 = vpop.eup %20040  ;;  %20060 = vrcp.f32 %v8097_v47  ;;  %v16195_v49 = vmul.f32 -1.442695, %v22411_v52  ;;  %8313 = vrot.lane.b32.xlu1 %v20039_v10, %s20283_s12  ;;  %v18197_v8 = vpop.f32.mrb[90].mxu1 }
 0x5b6   : > { %v20043_v51 = vpop.eup %20042  ;;  %20062 = vpow2.f32 %v16194_v29  ;;  %8311 = vrot.lane.b32.xlu0 %v20041_v44, %s20283_s12  ;;  %v22418_v18 = vadd.f32 %v18197_v8, %v22182_v57  ;;  %v7900_v48 = vpop.f32.mrb[91].mxu1  ;;  %v22427_v8 = vadd.f32 %v22289_v23, %v21561_v11 }
 0x5b7   : > { %v20045_v13 = vpop.eup %20044  ;;  %20064 = vpow2.f32 %v16193_v36  ;;  %v22421_v14 = vadd.f32 %v22182_v57, %v7900_v48 }
 0x5b8   : > { %26456 = vst [vmem:[#allocation102_spill] sm:$0xff] %v22418_v18  ;;  %v20047_v2 = vpop.eup %20046  ;;  %20066 = vpow2.f32 %v16196_v25  ;;  %v16198_v47 = vmul.f32 -1.442695, %v22418_v18 }
 0x5b9   : > { %v20049_v52 = vpop.eup %20048  ;;  %v8100_v10 = vadd.f32 1.0, %v20047_v2  ;;  %20068 = vpow2.f32 %v16195_v49  ;;  %8317 = vrot.lane.b32.xlu1 %v20043_v51, %s20283_s12  ;;  %v18200_v29 = vpop.f32.mrb[92].mxu1  ;;  %v16197_v49 = vmul.f32 -1.442695, %v22421_v14 }
 0x5ba   : > { %v20051_v44 = vpop.eup %20050  ;;  %v8099_v53 = vadd.f32 1.0, %v20049_v52  ;;  %20070 = vpow2.f32 %v16198_v47  ;;  %8315 = vrot.lane.b32.xlu0 %v20045_v13, %s20283_s12  ;;  %v22431_v36 = vadd.f32 %v18200_v29, %v22182_v57  ;;  %v7910_v25 = vpop.f32.mrb[93].mxu1 }
 0x5bb   : > { %v20053_v48 = vpop.eup %20052  ;;  %20072 = vrcp.f32 %v8100_v10  ;;  %v8102_v2 = vadd.f32 1.0, %v20051_v44  ;;  %v22435_v51 = vadd.f32 %v22182_v57, %v7910_v25  ;;  %v16031_v10 = vmul.f32 -1.442695, %v22427_v8 }
 0x5bc   : > { %v20055_v18 = vpop.eup %20054  ;;  %20074 = vrcp.f32 %v8099_v53  ;;  %v8101_v11 = vadd.f32 1.0, %v20053_v48  ;;  %v16200_v52 = vmul.f32 -1.442695, %v22431_v36  ;;  %v22444_v57 = vadd.f32 %v22289_v23, %v21565_v5 }
 0x5bd   : > { %v20057_v47 = vpop.eup %20056  ;;  %20076 = vrcp.f32 %v8102_v2  ;;  %v16199_v13 = vmul.f32 -1.442695, %v22435_v51  ;;  %8321 = vrot.lane.b32.xlu1 %v20055_v18, %s20283_s12  ;;  %v22448_v25 = vadd.f32 %v22289_v23, %v21567_v32 }
 0x5be   : > { %v20059_v29 = vpop.eup %20058  ;;  %20078 = vrcp.f32 %v8101_v11  ;;  %8319 = vrot.lane.b32.xlu0 %v20057_v47, %s20283_s12  ;;  %v16034_v5 = vmul.f32 -1.442695, %v22444_v57 }
 0x5bf   : > { %v20061_v44 = vpop.eup %20060  ;;  %20080 = vpow2.f32 %v16197_v49  ;;  %v22455_v49 = vadd.f32 %v22289_v23, %v21571_v9 }
 0x5c0   : > { %v20063_v53 = vpop.eup %20062  ;;  %20082 = vpow2.f32 %v16200_v52 }
 0x5c1   : > { %v20065_v48 = vpop.eup %20064  ;;  %v8104_v18 = vadd.f32 1.0, %v20063_v53  ;;  %20084 = vpow2.f32 %v16199_v13  ;;  %8325 = vrot.lane.b32.xlu1 %v20059_v29, %s20283_s12  ;;  %26457 = vst [vmem:[#allocation103_spill] sm:$0xff] %v22455_v49  ;;  %v16033_v53 = vmul.f32 -1.442695, %v22448_v25 }
 0x5c2   : > { %v20067_v2 = vpop.eup %20066  ;;  %20086 = vpow2.f32 %v16031_v10  ;;  %v8103_v11 = vadd.f32 1.0, %v20065_v48  ;;  %8323 = vrot.lane.b32.xlu0 %v20061_v44, %s20283_s12  ;;  %v22460_v44 = vadd.f32 %v22289_v23, %v21573_v42 }
 0x5c3   : > { %v20069_v47 = vpop.eup %20068  ;;  %20088 = vrcp.f32 %v8104_v18  ;;  %v8106_v32 = vadd.f32 1.0, %v20067_v2  ;;  %v16036_v18 = vmul.f32 -1.442695, %v22455_v49 }
 0x5c4   : > { %v20071_v52 = vpop.eup %20070  ;;  %20090 = vrcp.f32 %v8103_v11  ;;  %v8105_v13 = vadd.f32 1.0, %v20069_v47  ;;  %v22467_v47 = vadd.f32 %v22289_v23, %v21577_v56  ;;  %v22478_v56 = vadd.f32 %v22289_v23, %v21579_v46 }
 0x5c5   : > { %v20073_v29 = vpop.eup %20072  ;;  %20092 = vrcp.f32 %v8106_v32  ;;  %v8108_v10 = vadd.f32 1.0, %v20071_v52 }
 0x5c6   : > { %v20075_v48 = vpop.eup %20074  ;;  %20094 = vrcp.f32 %v8105_v13  ;;  %8329 = vrot.lane.b32.xlu1 %v20073_v29, %s20283_s12 }
 0x5c7   : > { %v20077_v9 = vpop.eup %20076  ;;  %20096 = vpow2.f32 %v16034_v5  ;;  %8327 = vrot.lane.b32.xlu0 %v20075_v48, %s20283_s12  ;;  %v8258_v2 = vpop.permute.xlu1 %8257  ;;  %v16035_v5 = vmul.f32 -1.442695, %v22460_v44 }
 0x5c8   : > { %v20079_v11 = vpop.eup %20078  ;;  %20098 = vpow2.f32 %v16033_v53  ;;  %v8400_v32 = vmul.f32 %v8258_v2, %v22185_v41  ;;  %v8256_v42 = vpop.permute.xlu0 %8255  ;;  %v16038_v2 = vmul.f32 -1.442695, %v22467_v47 }
 0x5c9   : > { %v20081_v52 = vpop.eup %20080  ;;  %20100 = vrcp.f32 %v8108_v10  ;;  %v8399_v13 = vmul.f32 %v8256_v42, %v22188_v40  ;;  %v3337_v42 = vadd.f32 1.0, %v22341_v17 }
 0x5ca   : > { %v20083_v29 = vpop.eup %20082  ;;  %v8107_v49 = vadd.f32 1.0, %v20081_v52  ;;  %8333 = vrot.lane.b32.xlu1 %v20077_v9, %s20283_s12  ;;  %v22474_v48 = vadd.f32 %v8400_v32, %v21633_v61  ;;  %20102 = vpow2.f32 %v16036_v18  ;;  %v22487_v9 = vadd.f32 %v22289_v23, %v21582_v55  ;;  %v26517_v61 = vld [vmem:[#allocation79_spill] sm:$0xff] }
 0x5cb   : > { %v20085_v53 = vpop.eup %20084  ;;  %v8110_v41 = vadd.f32 1.0, %v20083_v29  ;;  %8331 = vrot.lane.b32.xlu0 %v20079_v11, %s20283_s12  ;;  %v22482_v40 = vadd.f32 %v8399_v13, %v21620_v0  ;;  %v3336_v52 = vadd.f32 1.0, %v22361_v30  ;;  %v16037_v55 = vmul.f32 -1.442695, %v22478_v56 }
 0x5cc   : > { %26458 = vst [vmem:[#allocation104_spill] sm:$0xff] %v22474_v48  ;;  %v20087_v10 = vpop.eup %20086  ;;  %20104 = vrcp.f32 %v8107_v49  ;;  %v8109_v32 = vadd.f32 1.0, %v20085_v53  ;;  %v22499_v49 = vadd.f32 %v22289_v23, %v21585_v7  ;;  %v16040_v30 = vmul.f32 -1.442695, %v22487_v9 }
 0x5cd   : > { %26459 = vst [vmem:[#allocation105_spill] sm:$0xff] %v22482_v40  ;;  %v20089_v18 = vpop.eup %20088  ;;  %20106 = vrcp.f32 %v8110_v41  ;;  %v22492_v46 = vpack.c.bf16 %v22474_v48, %v22482_v40  ;;  %v22506_v53 = vadd.f32 %v22289_v23, %v21588_v39 }
 0x5ce   : > { %v20091_v11 = vpop.eup %20090  ;;  %20108 = vrcp.f32 %v8109_v32  ;;  %8337 = vrot.lane.b32.xlu1 %v20089_v18, %s20283_s12  ;;  %v3339_v32 = vadd.f32 1.0, %v22407_v31 }
 0x5cf   : > { %26460 = vst [vmem:[#allocation106_spill] sm:$0xff] %v22492_v46  ;;  %v20093_v13 = vpop.eup %20092  ;;  %20110 = vpow2.f32 %v16035_v5  ;;  %8335 = vrot.lane.b32.xlu0 %v20091_v11, %s20283_s12  ;;  %v8262_v17 = vpop.permute.xlu1 %8261  ;;  %19344 = vmatprep.subr.bf16.mxu1 %v22492_v46  ;;  %v16042_v31 = vmul.f32 -1.442695, %v22506_v53 }
 0x5d0   : > { %v20095_v29 = vpop.eup %20094  ;;  %20112 = vpow2.f32 %v16038_v2  ;;  %v8402_v5 = vmul.f32 %v8262_v17, %v22193_v50  ;;  %19346 = vmatpush3.bf16.msra.mxu1 %v22492_v46  ;;  %v8260_v41 = vpop.permute.xlu0 %8259  ;;  %v3338_v2 = vadd.f32 1.0, %v20087_v10  ;;  %v16039_v50 = vmul.f32 -1.442695, %v22499_v49  ;;  %v26553_v46 = vld [vmem:[#allocation91_spill] sm:$0xff] }
 0x5d1   : > { %v20097_v7 = vpop.eup %20096  ;;  %20114 = vrcp.f32 %v3337_v42  ;;  %v8401_v18 = vmul.f32 %v8260_v41, %v22196_v58  ;;  %v22519_v17 = vadd.f32 %v22289_v23, %v21591_v12  ;;  %v22528_v10 = vadd.f32 %v22289_v23, %v21594_v22 }
 0x5d2   : > { %v20099_v11 = vpop.eup %20098  ;;  %20116 = vrcp.f32 %v3336_v52  ;;  %8341 = vrot.lane.b32.xlu1 %v20093_v13, %s20283_s12  ;;  %v22514_v0 = vadd.f32 %v8402_v5, %v21648_v33  ;;  %v3341_v52 = vadd.f32 1.0, %v20097_v7  ;;  %v22538_v22 = vadd.f32 %v22289_v23, %v21597_v60  ;;  %v26478_v33 = vld [vmem:[#allocation22_spill] sm:$0xff] }
 0x5d3   : > { %v20101_v39 = vpop.eup %20100  ;;  %20118 = vpow2.f32 %v16037_v55  ;;  %8339 = vrot.lane.b32.xlu0 %v20095_v29, %s20283_s12  ;;  %v22523_v58 = vadd.f32 %v8401_v18, %v21638_v35  ;;  %v3340_v55 = vadd.f32 1.0, %v20099_v11  ;;  %v16044_v7 = vmul.f32 -1.442695, %v22528_v10  ;;  %v26469_v35 = vld [vmem:[#allocation20_spill] sm:$0xff] }
 0x5d4   : > { %26461 = vst [vmem:[#allocation107_spill] sm:$0xff] %v22514_v0  ;;  %20120 = vpow2.f32 %v16040_v30  ;;  %v20103_v42 = vpop.eup %20102  ;;  %v16041_v30 = vmul.f32 -1.442695, %v22519_v17 }
 0x5d5   : > { %26462 = vst [vmem:[#allocation108_spill] sm:$0xff] %v22523_v58  ;;  %20122 = vrcp.f32 %v3339_v32  ;;  %v22532_v13 = vpack.c.bf16 %v22514_v0, %v22523_v58 }
 0x5d6   : > { %v20105_v12 = vpop.eup %20104  ;;  %20124 = vrcp.f32 %v3338_v2  ;;  %8345 = vrot.lane.b32.xlu1 %v20101_v39, %s20283_s12  ;;  %v3343_v39 = vadd.f32 1.0, %v20103_v42 }
 0x5d7   : > { %26463 = vst [vmem:[#allocation109_spill] sm:$0xff] %v22532_v13  ;;  %v20107_v29 = vpop.eup %20106  ;;  %20126 = vpow2.f32 %v16039_v50  ;;  %8343 = vrot.lane.b32.xlu0 %v20105_v12, %s20283_s12  ;;  %v8266_v5 = vpop.permute.xlu1 %8265  ;;  %19348 = vmatprep.subr.bf16.mxu1 %v22532_v13  ;;  %v22548_v50 = vadd.f32 %v22289_v23, %v21600_v4  ;;  %v16043_v12 = vmul.f32 -1.442695, %v22538_v22 }
 0x5d8   : > { %v20109_v41 = vpop.eup %20108  ;;  %20128 = vpow2.f32 %v16042_v31  ;;  %v8404_v32 = vmul.f32 %v8266_v5, %v22201_v38  ;;  %19350 = vmatpush3.bf16.msra.mxu1 %v22532_v13  ;;  %v8264_v18 = vpop.permute.xlu0 %8263 }
 0x5d9   : > { %v20111_v11 = vpop.eup %20110  ;;  %20130 = vrcp.f32 %v3341_v52  ;;  %v8403_v2 = vmul.f32 %v8264_v18, %v22204_v37  ;;  %v22557_v52 = vadd.f32 %v22289_v23, %v21602_v6  ;;  %v26467_v6 = vld [vmem:[#allocation18_spill] sm:$0xff] }
 0x5da   : > { %v20113_v60 = vpop.eup %20112  ;;  %20132 = vrcp.f32 %v3340_v55  ;;  %8349 = vrot.lane.b32.xlu1 %v20107_v29, %s20283_s12  ;;  %v22552_v31 = vadd.f32 %v8404_v32, %v21676_v45  ;;  %v3342_v42 = vadd.f32 1.0, %v20111_v11  ;;  %v16046_v32 = vmul.f32 -1.442695, %v22548_v50  ;;  %v26468_v11 = vld [vmem:[#allocation19_spill] sm:$0xff] }
 0x5db   : > { %v20115_v38 = vpop.eup %20114  ;;  %20134 = vpow2.f32 %v16041_v30  ;;  %8347 = vrot.lane.b32.xlu0 %v20109_v41, %s20283_s12  ;;  %v22561_v37 = vadd.f32 %v8403_v2, %v21664_v16  ;;  %v3345_v29 = vadd.f32 1.0, %v20113_v60  ;;  %v22570_v18 = vadd.f32 %v22289_v23, %v26467_v6 }
 0x5dc   : > { %26464 = vst [vmem:[#allocation110_spill] sm:$0xff] %v22552_v31  ;;  %v20117_v4 = vpop.eup %20116  ;;  %20136 = vpow2.f32 %v16044_v7  ;;  %v16045_v7 = vmul.f32 -1.442695, %v22557_v52  ;;  %v22576_v2 = vadd.f32 %v22289_v23, %v26468_v11 }
 0x5dd   : > { %26465 = vst [vmem:[#allocation111_spill] sm:$0xff] %v22561_v37  ;;  %v20119_v55 = vpop.eup %20118  ;;  %v22565_v5 = vpack.c.bf16 %v22552_v31, %v22561_v37  ;;  %20138 = vrcp.f32 %v3343_v39  ;;  %v22586_v31 = vadd.f32 %v22289_v23, %v26469_v35 }
 0x5de   : > { %v20121_v30 = vpop.eup %20120  ;;  %3554 = vrot.lane.b32.xlu1 %v20115_v38, %s20283_s12  ;;  %20140 = vpow2.f32 %v16043_v12  ;;  %v3344_v16 = vadd.f32 1.0, %v20119_v55 }
 0x5df   : > { %26466 = vst [vmem:[#allocation112_spill] sm:$0xff] %v22565_v5  ;;  %v20123_v41 = vpop.eup %20122  ;;  %3552 = vrot.lane.b32.xlu0 %v20117_v4, %s20283_s12  ;;  %v8270_v60 = vpop.permute.xlu1 %8269  ;;  %19352 = vmatprep.subr.bf16.mxu1 %v22565_v5  ;;  %20142 = vrcp.f32 %v3342_v42  ;;  %v3347_v45 = vadd.f32 1.0, %v20121_v30  ;;  %v16048_v4 = vmul.f32 -1.442695, %v22570_v18  ;;  %26470 = vst [vmem:[#allocation18_spill] sm:$0xff] %v22586_v31  ;;  %v26471_v42 = vld [vmem:[#allocation31_spill] sm:$0xff] }
 0x5e0   : > { %v20125_v39 = vpop.eup %20124  ;;  %v8406_v6 = vmul.f32 %v8270_v60, %v22209_v27  ;;  %19354 = vmatpush3.bf16.msra.mxu1 %v22565_v5  ;;  %v8268_v38 = vpop.permute.xlu0 %8267  ;;  %20144 = vrcp.f32 %v3345_v29  ;;  %v16047_v29 = vmul.f32 -1.442695, %v22576_v2  ;;  %v26473_v30 = vld [vmem:[#allocation21_spill] sm:$0xff] }
 0x5e1   : > { %v20127_v12 = vpop.eup %20126  ;;  %v8405_v37 = vmul.f32 %v8268_v38, %v22212_v63  ;;  %20146 = vpow2.f32 %v16046_v32  ;;  %v22595_v63 = vadd.f32 %v22289_v23, %v26473_v30  ;;  %v26475_v32 = vld [vmem:[#allocation30_spill] sm:$0xff]  ;;  %v16050_v30 = vmul.f32 -1.442695, %v22586_v31  ;;  %v26546_v5 = vld [vmem:[#allocation89_spill] sm:$0xff] }
 0x5e2   : > { %v20129_v11 = vpop.eup %20128  ;;  %3558 = vrot.lane.b32.xlu1 %v20123_v41, %s20283_s12  ;;  %v22590_v27 = vadd.f32 %v8406_v6, %v26471_v42  ;;  %20148 = vpow2.f32 %v16045_v7  ;;  %v3346_v38 = vadd.f32 1.0, %v20127_v12  ;;  %v22999_v31 = vld [vmem:[%s26425_s1 + $0x110] sm:$0xff] }
 0x5e3   : > { %v20131_v55 = vpop.eup %20130  ;;  %26474 = vst [vmem:[#allocation20_spill] sm:$0xff] %v22595_v63  ;;  %3556 = vrot.lane.b32.xlu0 %v20125_v39, %s20283_s12  ;;  %v22599_v60 = vadd.f32 %v8405_v37, %v26475_v32  ;;  %20150 = vrcp.f32 %v3344_v16  ;;  %v3349_v6 = vadd.f32 1.0, %v20129_v11  ;;  %v22608_v39 = vadd.f32 %v22289_v23, %v26478_v33  ;;  %v26480_v37 = vld [vmem:[#allocation23_spill] sm:$0xff] }
 0x5e4   : > { %26472 = vst [vmem:[#allocation19_spill] sm:$0xff] %v22590_v27  ;;  %v20133_v35 = vpop.eup %20132  ;;  %20152 = vrcp.f32 %v3347_v45  ;;  %v16049_v16 = vmul.f32 -1.442695, %v22595_v63  ;;  %v22614_v45 = vadd.f32 %v22289_v23, %v26480_v37  ;;  %v26482_v37 = vld [vmem:[#allocation33_spill] sm:$0xff] }
 0x5e5   : > { %26476 = vst [vmem:[#allocation21_spill] sm:$0xff] %v22599_v60  ;;  %v20135_v41 = vpop.eup %20134  ;;  %v22603_v7 = vpack.c.bf16 %v22590_v27, %v22599_v60  ;;  %20154 = vpow2.f32 %v16048_v4  ;;  %26479 = vst [vmem:[#allocation22_spill] sm:$0xff] %v22608_v39 }
 0x5e6   : > { %v20137_v42 = vpop.eup %20136  ;;  %3562 = vrot.lane.b32.xlu1 %v20131_v55, %s20283_s12  ;;  %20156 = vpow2.f32 %v16047_v29  ;;  %26481 = vst [vmem:[#allocation23_spill] sm:$0xff] %v22614_v45  ;;  %v3348_v4 = vadd.f32 1.0, %v20135_v41  ;;  %v26484_v41 = vld [vmem:[#allocation32_spill] sm:$0xff] }
 0x5e7   : > { %26477 = vst [vmem:[#allocation113_spill] sm:$0xff] %v22603_v7  ;;  %3560 = vrot.lane.b32.xlu0 %v20133_v35, %s20283_s12  ;;  %v8274_v12 = vpop.permute.xlu1 %8273  ;;  %19356 = vmatprep.subr.bf16.mxu1 %v22603_v7  ;;  %v20139_v11 = vpop.eup %20138  ;;  %20158 = vrcp.f32 %v3346_v38  ;;  %v3351_v32 = vadd.f32 1.0, %v20137_v42  ;;  %v16052_v35 = vmul.f32 -1.442695, %v22608_v39  ;;  %v26561_v39 = vld [vmem:[#allocation94_spill] sm:$0xff] }
 0x5e8   : > { %v8408_v33 = vmul.f32 %v8274_v12, %v22219_v21  ;;  %19358 = vmatpush3.bf16.msra.mxu1 %v22603_v7  ;;  %v8272_v55 = vpop.permute.xlu0 %8271  ;;  %v20141_v29 = vpop.eup %20140  ;;  %20160 = vrcp.f32 %v3349_v6  ;;  %v16051_v21 = vmul.f32 -1.442695, %v22614_v45 }
 0x5e9   : > { %v8407_v60 = vmul.f32 %v8272_v55, %v22222_v28  ;;  %v20143_v23 = vpop.eup %20142  ;;  %20162 = vpow2.f32 %v16050_v30  ;;  %v3350_v28 = vadd.f32 1.0, %v20141_v29 }
 0x5ea   : > { %3566 = vrot.lane.b32.xlu1 %v20139_v11, %s20283_s12  ;;  %v22624_v27 = vadd.f32 %v8408_v33, %v26482_v37  ;;  %v20145_v38 = vpop.eup %20144  ;;  %20164 = vpow2.f32 %v16049_v16 }
 0x5eb   : > { %3564 = vrot.lane.b32.xlu0 %v20143_v23, %s20283_s12  ;;  %v22629_v6 = vadd.f32 %v8407_v60, %v26484_v41  ;;  %v20147_v42 = vpop.eup %20146  ;;  %20166 = vrcp.f32 %v3348_v4 }
 0x5ec   : > { %26483 = vst [vmem:[#allocation114_spill] sm:$0xff] %v22624_v27  ;;  %v20149_v30 = vpop.eup %20148  ;;  %20168 = vrcp.f32 %v3351_v32  ;;  %v3353_v33 = vadd.f32 1.0, %v20147_v42 }
 0x5ed   : > { %26485 = vst [vmem:[#allocation115_spill] sm:$0xff] %v22629_v6  ;;  %v22633_v12 = vpack.c.bf16 %v22624_v27, %v22629_v6  ;;  %v20151_v11 = vpop.eup %20150  ;;  %20170 = vpow2.f32 %v16052_v35  ;;  %v3352_v55 = vadd.f32 1.0, %v20149_v30 }
 0x5ee   : > { %3570 = vrot.lane.b32.xlu1 %v20145_v38, %s20283_s12  ;;  %v20153_v16 = vpop.eup %20152  ;;  %20172 = vpow2.f32 %v16051_v21 }
 0x5ef   : > { %26486 = vst [vmem:[#allocation116_spill] sm:$0xff] %v22633_v12  ;;  %3568 = vrot.lane.b32.xlu0 %v20151_v11, %s20283_s12  ;;  %v8278_v60 = vpop.permute.xlu1 %8277  ;;  %19360 = vmatprep.subr.bf16.mxu1 %v22633_v12  ;;  %v20155_v4 = vpop.eup %20154  ;;  %20174 = vrcp.f32 %v3350_v28  ;;  %v26488_v28 = vld [vmem:[#allocation34_spill] sm:$0xff] }
 0x5f0   : > { %v8410_v32 = vmul.f32 %v8278_v60, %v22229_v19  ;;  %19362 = vmatpush3.bf16.msra.mxu1 %v22633_v12  ;;  %v8276_v29 = vpop.permute.xlu0 %8275  ;;  %v20157_v23 = vpop.eup %20156  ;;  %20176 = vrcp.f32 %v3353_v33  ;;  %v3355_v11 = vadd.f32 1.0, %v20155_v4 }
 0x5f1   : > { %v8409_v35 = vmul.f32 %v8276_v29, %v22232_v43  ;;  %v20159_v38 = vpop.eup %20158  ;;  %20178 = vrcp.f32 %v3352_v55  ;;  %v3354_v60 = vadd.f32 1.0, %v20157_v23 }
 0x5f2   : > { %3574 = vrot.lane.b32.xlu1 %v20153_v16, %s20283_s12  ;;  %v22643_v21 = vadd.f32 %v8410_v32, %v21754_v1  ;;  %v20161_v42 = vpop.eup %20160  ;;  %20180 = vrcp.f32 %v3355_v11  ;;  %v26506_v1 = vld [vmem:[#allocation51_spill] sm:$0xff] }
 0x5f3   : > { %3572 = vrot.lane.b32.xlu0 %v20159_v38, %s20283_s12  ;;  %v22647_v30 = vadd.f32 %v8409_v35, %v26488_v28  ;;  %v20163_v19 = vpop.eup %20162  ;;  %20182 = vrcp.f32 %v3354_v60  ;;  %v22659_v38 = vld [vmem:[%s26425_s1 + $0x8] sm:$0xff] }
 0x5f4   : > { %26487 = vst [vmem:[#allocation117_spill] sm:$0xff] %v22643_v21  ;;  %v20165_v41 = vpop.eup %20164  ;;  %v3357_v4 = vadd.f32 1.0, %v20163_v19  ;;  %v22663_v19 = vld [vmem:[%s26425_s1 + $0x10] sm:$0xff] }
 0x5f5   : > { %26489 = vst [vmem:[#allocation118_spill] sm:$0xff] %v22647_v30  ;;  %v22651_v43 = vpack.c.bf16 %v22643_v21, %v22647_v30  ;;  %v20167_v16 = vpop.eup %20166  ;;  %v3356_v29 = vadd.f32 1.0, %v20165_v41  ;;  %v26508_v21 = vld [vmem:[#allocation49_spill] sm:$0xff] }
 0x5f6   : > { %3578 = vrot.lane.b32.xlu1 %v20161_v42, %s20283_s12  ;;  %v20169_v33 = vpop.eup %20168  ;;  %20184 = vrcp.f32 %v3357_v4 }
 0x5f7   : > { %26490 = vst [vmem:[#allocation119_spill] sm:$0xff] %v22651_v43  ;;  %3576 = vrot.lane.b32.xlu0 %v20167_v16, %s20283_s12  ;;  %v8282_v32 = vpop.permute.xlu1 %8281  ;;  %19364 = vmatprep.subr.bf16.mxu1 %v22651_v43  ;;  %v20171_v55 = vpop.eup %20170  ;;  %20186 = vrcp.f32 %v3356_v29 }
 0x5f8   : > { %v8412_v23 = vmul.f32 %v8282_v32, %v22239_v20  ;;  %19366 = vmatpush3.bf16.msra.mxu1 %v22651_v43  ;;  %v8280_v35 = vpop.permute.xlu0 %8279  ;;  %v20173_v42 = vpop.eup %20172  ;;  %v3359_v20 = vadd.f32 1.0, %v20171_v55  ;;  %v22685_v55 = vld [vmem:[%s26425_s1 + $0x20] sm:$0xff] }
 0x5f9   : > { %v8411_v11 = vmul.f32 %v8280_v35, %v22242_v59  ;;  %v20175_v16 = vpop.eup %20174  ;;  %v3358_v59 = vadd.f32 1.0, %v20173_v42  ;;  %v26540_v43 = vld [vmem:[#allocation87_spill] sm:$0xff] }
 0x5fa   : > { %3582 = vrot.lane.b32.xlu1 %v20169_v33, %s20283_s12  ;;  %v22667_v60 = vadd.f32 %v8412_v23, %v21794_v15  ;;  %v22678_v33 = vld [vmem:[%s26425_s1 + $0x18] sm:$0xff]  ;;  %v20177_v32 = vpop.eup %20176  ;;  %20188 = vrcp.f32 %v3359_v20 }
 0x5fb   : > { %3580 = vrot.lane.b32.xlu0 %v20175_v16, %s20283_s12  ;;  %v22671_v41 = vadd.f32 %v8411_v11, %v21772_v34  ;;  %18226 = vmatmul.mubr.msk.f32.vlgmr.msra.gmra.mrb[94].mxu1 %vm8531_vm4, %v22659_v38  ;;  %v20179_v23 = vpop.eup %20178  ;;  %20190 = vrcp.f32 %v3358_v59  ;;  %v22696_v11 = vld [vmem:[%s26425_s1 + $0x28] sm:$0xff] }
 0x5fc   : > { %26491 = vst [vmem:[#allocation120_spill] sm:$0xff] %v22667_v60  ;;  %18228 = vmatprep.mubr.msk.f32.mxu1 %vm8531_vm4, %v22663_v19  ;;  %v20181_v16 = vpop.eup %20180 }
 0x5fd   : > { %26492 = vst [vmem:[#allocation121_spill] sm:$0xff] %v22671_v41  ;;  %v22682_v4 = vpack.c.bf16 %v22667_v60, %v22671_v41  ;;  %v20183_v59 = vpop.eup %20182  ;;  %v26501_v41 = vld [vmem:[#allocation45_spill] sm:$0xff] }
 0x5fe   : > { %3586 = vrot.lane.b32.xlu1 %v20177_v32, %s20283_s12  ;;  %v22701_v32 = vld [vmem:[%s26425_s1 + $0x30] sm:$0xff] }
 0x5ff   : > { %26493 = vst [vmem:[#allocation122_spill] sm:$0xff] %v22682_v4  ;;  %3584 = vrot.lane.b32.xlu0 %v20179_v23, %s20283_s12  ;;  %v8286_v29 = vpop.permute.xlu1 %8285  ;;  %18229 = vmatmul.mubr.msk.f32.gmra.mrb[96].mxu1 %vm8531_vm4, %v22678_v33  ;;  %v22775_v60 = vld [vmem:[%s26425_s1 + $0x70] sm:$0xff] }
 0x600   : > { %v8414_v35 = vmul.f32 %v8286_v29, %v22249_v54  ;;  %19368 = vmatprep.subr.bf16.mxu1 %v22682_v4  ;;  %v8284_v42 = vpop.permute.xlu0 %8283  ;;  %18231 = vmatprep.mubr.msk.f32.mxu1 %vm8531_vm4, %v22685_v55  ;;  %v20185_v29 = vpop.eup %20184 }
 0x601   : > { %19370 = vmatpush3.bf16.msra.mxu1 %v22682_v4  ;;  %v8413_v20 = vmul.f32 %v8284_v42, %v22252_v26  ;;  %v22716_v26 = vld [vmem:[%s26425_s1 + $0x38] sm:$0xff]  ;;  %v22723_v42 = vld [vmem:[%s26425_s1 + $0x40] sm:$0xff] }
 0x602   : > { %3590 = vrot.lane.b32.xlu1 %v20181_v16, %s20283_s12  ;;  %v22705_v54 = vadd.f32 %v8414_v35, %v21837_v62  ;;  %v20187_v16 = vpop.eup %20186 }
 0x603   : > { %3588 = vrot.lane.b32.xlu0 %v20183_v59, %s20283_s12  ;;  %v22709_v23 = vadd.f32 %v8413_v20, %v21815_v24  ;;  %18232 = vmatmul.mubr.msk.f32.gmra.mrb[98].mxu1 %vm8531_vm4, %v22696_v11  ;;  %v26497_v59 = vld [vmem:[#allocation72_spill] sm:$0xff] }
 0x604   : > { %26494 = vst [vmem:[#allocation123_spill] sm:$0xff] %v22705_v54  ;;  %18234 = vmatprep.mubr.msk.f32.mxu1 %vm8531_vm4, %v22701_v32  ;;  %v20189_v34 = vpop.eup %20188 }
 0x605   : > { %26495 = vst [vmem:[#allocation124_spill] sm:$0xff] %v22709_v23  ;;  %v22720_v35 = vpack.c.bf16 %v22705_v54, %v22709_v23  ;;  %v22734_v23 = vld [vmem:[%s26425_s1 + $0x48] sm:$0xff]  ;;  %v22739_v54 = vld [vmem:[%s26425_s1 + $0x50] sm:$0xff]  ;;  %v20191_v15 = vpop.eup %20190 }
 0x606   : > { %3594 = vrot.lane.b32.xlu1 %v20185_v29, %s20283_s12  ;;  %v26498_v29 = vld [vmem:[#allocation73_spill] sm:$0xff] }
 0x607   : > { %26496 = vst [vmem:[#allocation125_spill] sm:$0xff] %v22720_v35  ;;  %3592 = vrot.lane.b32.xlu0 %v20187_v16, %s20283_s12  ;;  %v8290_v20 = vpop.permute.xlu1 %8289  ;;  %18235 = vmatmul.mubr.msk.f32.gmra.mrb[100].mxu1 %vm8531_vm4, %v22716_v26 }
 0x608   : > { %v8416_v24 = vmul.f32 %v8290_v20, %v26497_v59  ;;  %19372 = vmatprep.subr.bf16.mxu1 %v22720_v35  ;;  %v8288_v62 = vpop.permute.xlu0 %8287  ;;  %18237 = vmatprep.mubr.msk.f32.mxu1 %vm8531_vm4, %v22723_v42  ;;  %v26499_v20 = vld [vmem:[#allocation47_spill] sm:$0xff] }
 0x609   : > { %19374 = vmatpush3.bf16.msra.mxu1 %v22720_v35  ;;  %v8415_v16 = vmul.f32 %v8288_v62, %v26498_v29  ;;  %v22754_v62 = vld [vmem:[%s26425_s1 + $0x58] sm:$0xff] }
 0x60a   : > { %3598 = vrot.lane.b32.xlu1 %v20189_v34, %s20283_s12  ;;  %v22743_v59 = vadd.f32 %v8416_v24, %v26499_v20  ;;  %v22761_v24 = vld [vmem:[%s26425_s1 + $0x60] sm:$0xff]  ;;  %v26504_v29 = vld [vmem:[#allocation74_spill] sm:$0xff]  ;;  %v22771_v20 = vld [vmem:[%s26425_s1 + $0x68] sm:$0xff] }
 0x60b   : > { %3596 = vrot.lane.b32.xlu0 %v20191_v15, %s20283_s12  ;;  %v22747_v28 = vadd.f32 %v8415_v16, %v26501_v41  ;;  %18238 = vmatmul.mubr.msk.f32.gmra.mrb[102].mxu1 %vm8531_vm4, %v22734_v23 }
 0x60c   : > { %26500 = vst [vmem:[#allocation72_spill] sm:$0xff] %v22743_v59  ;;  %18240 = vmatprep.mubr.msk.f32.mxu1 %vm8531_vm4, %v22739_v54 }
 0x60d   : > { %26502 = vst [vmem:[#allocation73_spill] sm:$0xff] %v22747_v28  ;;  %v22758_v34 = vpack.c.bf16 %v22743_v59, %v22747_v28  ;;  %v26505_v28 = vld [vmem:[#allocation75_spill] sm:$0xff] }
 0x60f   : > { %26503 = vst [vmem:[#allocation126_spill] sm:$0xff] %v22758_v34  ;;  %v8294_v15 = vpop.permute.xlu1 %8293  ;;  %18241 = vmatmul.mubr.msk.f32.gmra.mrb[104].mxu1 %vm8531_vm4, %v22754_v62  ;;  %19376 = vmatprep.subr.bf16.mxu1 %v22758_v34 }
 0x610   : > { %v8418_v16 = vmul.f32 %v8294_v15, %v26504_v29  ;;  %19378 = vmatpush3.bf16.msra.mxu1 %v22758_v34  ;;  %v8292_v41 = vpop.permute.xlu0 %8291  ;;  %18243 = vmatprep.mubr.msk.f32.mxu1 %vm8531_vm4, %v22761_v24  ;;  %v22788_v15 = vld [vmem:[%s26425_s1 + $0x78] sm:$0xff] }
 0x611   : > { %v8417_v59 = vmul.f32 %v8292_v41, %v26505_v28  ;;  %v22795_v41 = vld [vmem:[%s26425_s1 + $0x80] sm:$0xff]  ;;  %v26525_v34 = vld [vmem:[#allocation82_spill] sm:$0xff] }
 0x612   : > { %v22778_v30 = vadd.f32 %v8418_v16, %v26506_v1  ;;  %v26511_v16 = vld [vmem:[#allocation76_spill] sm:$0xff] }
 0x613   : > { %v22781_v37 = vadd.f32 %v8417_v59, %v26508_v21  ;;  %18244 = vmatmul.mubr.msk.f32.gmra.mrb[106].mxu1 %vm8531_vm4, %v22771_v20  ;;  %v26512_v21 = vld [vmem:[#allocation77_spill] sm:$0xff] }
 0x614   : > { %26507 = vst [vmem:[#allocation74_spill] sm:$0xff] %v22778_v30  ;;  %18246 = vmatprep.mubr.msk.f32.mxu1 %vm8531_vm4, %v22775_v60 }
 0x615   : > { %26509 = vst [vmem:[#allocation75_spill] sm:$0xff] %v22781_v37  ;;  %v22792_v28 = vpack.c.bf16 %v22778_v30, %v22781_v37  ;;  %v22806_v37 = vld [vmem:[%s26425_s1 + $0x88] sm:$0xff] }
 0x616   : > { %v8298_v29 = vpop.permute.xlu1 %8297  ;;  %v26513_v30 = vld [vmem:[#allocation36_spill] sm:$0xff] }
 0x617   : > { %26510 = vst [vmem:[#allocation127_spill] sm:$0xff] %v22792_v28  ;;  %v8420_v1 = vmul.f32 %v8298_v29, %v26511_v16  ;;  %v8296_v59 = vpop.permute.xlu0 %8295  ;;  %18247 = vmatmul.mubr.msk.f32.gmra.mrb[108].mxu1 %vm8531_vm4, %v22788_v15  ;;  %19380 = vmatprep.subr.bf16.mxu1 %v22792_v28  ;;  %v22812_v29 = vld [vmem:[%s26425_s1 + $0x90] sm:$0xff] }
 0x618   : > { %v8419_v6 = vmul.f32 %v8296_v59, %v26512_v21  ;;  %19382 = vmatpush3.bf16.msra.mxu1 %v22792_v28  ;;  %18249 = vmatprep.mubr.msk.f32.mxu1 %vm8531_vm4, %v22795_v41  ;;  %v26515_v16 = vld [vmem:[#allocation53_spill] sm:$0xff]  ;;  %v26518_v59 = vld [vmem:[#allocation80_spill] sm:$0xff] }
 0x619   : > { %v22809_v27 = vadd.f32 %v8420_v1, %v26513_v30  ;;  %v26520_v1 = vld [vmem:[#allocation38_spill] sm:$0xff] }
 0x61a   : > { %v22815_v58 = vadd.f32 %v8419_v6, %v26515_v16  ;;  %v8302_v0 = vpop.permute.xlu1 %8301  ;;  %v22831_v16 = vld [vmem:[%s26425_s1 + $0x98] sm:$0xff] }
 0x61b   : > { %26514 = vst [vmem:[#allocation76_spill] sm:$0xff] %v22809_v27  ;;  %v8422_v40 = vmul.f32 %v8302_v0, %v26517_v61  ;;  %v8300_v21 = vpop.permute.xlu0 %8299  ;;  %18250 = vmatmul.mubr.msk.f32.gmra.mrb[110].mxu1 %vm8531_vm4, %v22806_v37  ;;  %v26522_v0 = vld [vmem:[#allocation55_spill] sm:$0xff] }
 0x61c   : > { %26516 = vst [vmem:[#allocation77_spill] sm:$0xff] %v22815_v58  ;;  %v8421_v48 = vmul.f32 %v8300_v21, %v26518_v59  ;;  %v22823_v28 = vpack.c.bf16 %v22809_v27, %v22815_v58  ;;  %18252 = vmatprep.mubr.msk.f32.mxu1 %vm8531_vm4, %v22812_v29  ;;  %v22838_v21 = vld [vmem:[%s26425_s1 + $0xa0] sm:$0xff]  ;;  %v26524_v59 = vld [vmem:[#allocation81_spill] sm:$0xff] }
 0x61d   : > { %v22828_v6 = vadd.f32 %v8422_v40, %v26520_v1  ;;  %v26527_v40 = vld [vmem:[#allocation40_spill] sm:$0xff] }
 0x61e   : > { %26519 = vst [vmem:[#allocation79_spill] sm:$0xff] %v22823_v28  ;;  %v22834_v61 = vadd.f32 %v8421_v48, %v26522_v0  ;;  %v8306_v30 = vpop.permute.xlu1 %8305  ;;  %19384 = vmatprep.subr.bf16.mxu1 %v22823_v28 }
 0x61f   : > { %26521 = vst [vmem:[#allocation80_spill] sm:$0xff] %v22828_v6  ;;  %v8424_v58 = vmul.f32 %v8306_v30, %v26524_v59  ;;  %19386 = vmatpush3.bf16.msra.mxu1 %v22823_v28  ;;  %v8304_v27 = vpop.permute.xlu0 %8303  ;;  %v22855_v30 = vld [vmem:[%s26425_s1 + $0xa8] sm:$0xff] }
 0x620   : > { %26523 = vst [vmem:[#allocation128_spill] sm:$0xff] %v22834_v61  ;;  %v8423_v35 = vmul.f32 %v8304_v27, %v26525_v34  ;;  %18253 = vmatmul.mubr.msk.f32.gmra.mrb[112].mxu1 %vm8531_vm4, %v22831_v16  ;;  %v22847_v48 = vpack.c.bf16 %v22828_v6, %v22834_v61  ;;  %v26529_v59 = vld [vmem:[#allocation57_spill] sm:$0xff]  ;;  %v26531_v61 = vld [vmem:[#allocation84_spill] sm:$0xff] }
 0x621   : > { %v22850_v0 = vadd.f32 %v8424_v58, %v26527_v40  ;;  %18255 = vmatprep.mubr.msk.f32.mxu1 %vm8531_vm4, %v22838_v21  ;;  %v22862_v34 = vld [vmem:[%s26425_s1 + $0xb0] sm:$0xff] }
 0x622   : > { %26526 = vst [vmem:[#allocation81_spill] sm:$0xff] %v22847_v48  ;;  %v22858_v1 = vadd.f32 %v8423_v35, %v26529_v59  ;;  %v8310_v27 = vpop.permute.xlu1 %8309  ;;  %19388 = vmatprep.subr.bf16.mxu1 %v22847_v48  ;;  %v26532_v40 = vld [vmem:[#allocation85_spill] sm:$0xff]  ;;  %v26534_v59 = vld [vmem:[#allocation42_spill] sm:$0xff] }
 0x623   : > { %26528 = vst [vmem:[#allocation82_spill] sm:$0xff] %v22850_v0  ;;  %v8426_v6 = vmul.f32 %v8310_v27, %v26531_v61  ;;  %19390 = vmatpush3.bf16.msra.mxu1 %v22847_v48  ;;  %v8308_v58 = vpop.permute.xlu0 %8307  ;;  %v22879_v61 = vld [vmem:[%s26425_s1 + $0xb8] sm:$0xff] }
 0x624   : > { %26530 = vst [vmem:[#allocation129_spill] sm:$0xff] %v22858_v1  ;;  %v8425_v28 = vmul.f32 %v8308_v58, %v26532_v40  ;;  %18256 = vmatmul.mubr.msk.f32.gmra.mrb[114].mxu1 %vm8531_vm4, %v22855_v30  ;;  %v22871_v35 = vpack.c.bf16 %v22850_v0, %v22858_v1  ;;  %v26536_v27 = vld [vmem:[#allocation59_spill] sm:$0xff]  ;;  %v26538_v1 = vld [vmem:[#allocation86_spill] sm:$0xff] }
 0x625   : > { %v22874_v4 = vadd.f32 %v8426_v6, %v26534_v59  ;;  %18258 = vmatprep.mubr.msk.f32.mxu1 %vm8531_vm4, %v22862_v34  ;;  %v22886_v40 = vld [vmem:[%s26425_s1 + $0xc0] sm:$0xff] }
 0x626   : > { %26533 = vst [vmem:[#allocation84_spill] sm:$0xff] %v22871_v35  ;;  %v22882_v48 = vadd.f32 %v8425_v28, %v26536_v27  ;;  %19392 = vmatprep.subr.bf16.mxu0 %v22871_v35  ;;  %v22900_v27 = vld [vmem:[%s26425_s1 + $0xc8] sm:$0xff] }
 0x627   : > { %26535 = vst [vmem:[#allocation85_spill] sm:$0xff] %v22874_v4  ;;  %v8314_v58 = vpop.permute.xlu1 %8313  ;;  %19394 = vmatpush3.bf16.msra.mxu0 %v22871_v35  ;;  %v26541_v35 = vld [vmem:[#allocation44_spill] sm:$0xff] }
 0x628   : > { %26537 = vst [vmem:[#allocation130_spill] sm:$0xff] %v22882_v48  ;;  %v8428_v0 = vmul.f32 %v8314_v58, %v26538_v1  ;;  %v8312_v6 = vpop.permute.xlu0 %8311  ;;  %18259 = vmatmul.mubr.msk.f32.gmra.mrb[116].mxu1 %vm8531_vm4, %v22879_v61  ;;  %v22894_v59 = vpack.c.bf16 %v22874_v4, %v22882_v48  ;;  %v22907_v1 = vld [vmem:[%s26425_s1 + $0xd0] sm:$0xff] }
 0x629   : > { %v8427_v28 = vmul.f32 %v8312_v6, %v26540_v43  ;;  %18261 = vmatprep.mubr.msk.f32.mxu1 %vm8531_vm4, %v22886_v40  ;;  %v26543_v58 = vld [vmem:[#allocation61_spill] sm:$0xff]  ;;  %v26545_v43 = vld [vmem:[#allocation88_spill] sm:$0xff] }
 0x62a   : > { %26539 = vst [vmem:[#allocation86_spill] sm:$0xff] %v22894_v59  ;;  %v22903_v12 = vadd.f32 %v8428_v0, %v26541_v35  ;;  %19396 = vmatprep.subr.bf16.mxu0 %v22894_v59 }
 0x62b   : > { %v22910_v7 = vadd.f32 %v8427_v28, %v26543_v58  ;;  %v8318_v48 = vpop.permute.xlu1 %8317  ;;  %19398 = vmatpush3.bf16.msra.mxu0 %v22894_v59  ;;  %v22924_v28 = vld [vmem:[%s26425_s1 + $0xd8] sm:$0xff] }
 0x62c   : > { %26542 = vst [vmem:[#allocation87_spill] sm:$0xff] %v22903_v12  ;;  %v8430_v6 = vmul.f32 %v8318_v48, %v26545_v43  ;;  %v8316_v4 = vpop.permute.xlu0 %8315  ;;  %18262 = vmatmul.mubr.msk.f32.gmra.mrb[118].mxu1 %vm8531_vm4, %v22900_v27  ;;  %v26548_v58 = vld [vmem:[#allocation46_spill] sm:$0xff]  ;;  %v22930_v48 = vld [vmem:[%s26425_s1 + $0xe0] sm:$0xff] }
 0x62d   : > { %26544 = vst [vmem:[#allocation131_spill] sm:$0xff] %v22910_v7  ;;  %v8429_v13 = vmul.f32 %v8316_v4, %v26546_v5  ;;  %v22919_v0 = vpack.c.bf16 %v22903_v12, %v22910_v7  ;;  %18264 = vmatprep.mubr.msk.f32.mxu1 %vm8531_vm4, %v22907_v1  ;;  %v26550_v43 = vld [vmem:[#allocation63_spill] sm:$0xff]  ;;  %v26552_v4 = vld [vmem:[#allocation90_spill] sm:$0xff] }
 0x62e   : > { %v22927_v35 = vadd.f32 %v8430_v6, %v26548_v58  ;;  %v26558_v58 = vld [vmem:[#allocation64_spill] sm:$0xff] }
 0x62f   : > { %26547 = vst [vmem:[#allocation88_spill] sm:$0xff] %v22919_v0  ;;  %v22933_v59 = vadd.f32 %v8429_v13, %v26550_v43  ;;  %v8322_v5 = vpop.permute.xlu1 %8321  ;;  %19400 = vmatprep.subr.bf16.mxu0 %v22919_v0  ;;  %v22948_v13 = vld [vmem:[%s26425_s1 + $0xe8] sm:$0xff]  ;;  %v22954_v43 = vld [vmem:[%s26425_s1 + $0xf0] sm:$0xff] }
 0x630   : > { %26549 = vst [vmem:[#allocation89_spill] sm:$0xff] %v22927_v35  ;;  %v8432_v7 = vmul.f32 %v8322_v5, %v26552_v4  ;;  %19402 = vmatpush3.bf16.msra.mxu0 %v22919_v0  ;;  %v8320_v12 = vpop.permute.xlu0 %8319  ;;  %18265 = vmatmul.mubr.msk.f32.gmra.mrb[120].mxu1 %vm8531_vm4, %v22924_v28  ;;  %v26555_v5 = vld [vmem:[#allocation48_spill] sm:$0xff]  ;;  %26557 = vst [vmem:[#allocation133_spill] sm:$0xff] %v22954_v43 }
 0x631   : > { %26551 = vst [vmem:[#allocation132_spill] sm:$0xff] %v22933_v59  ;;  %v8431_v45 = vmul.f32 %v8320_v12, %v26553_v46  ;;  %v22943_v6 = vpack.c.bf16 %v22927_v35, %v22933_v59  ;;  %18267 = vmatprep.mubr.msk.f32.mxu1 %vm8531_vm4, %v22930_v48  ;;  %v26560_v12 = vld [vmem:[#allocation93_spill] sm:$0xff] }
 0x632   : > { %v22951_v4 = vadd.f32 %v8432_v7, %v26555_v5 }
 0x633   : > { %26554 = vst [vmem:[#allocation90_spill] sm:$0xff] %v22943_v6  ;;  %v22957_v0 = vadd.f32 %v8431_v45, %v26558_v58  ;;  %v8326_v46 = vpop.permute.xlu1 %8325  ;;  %19404 = vmatprep.subr.bf16.mxu0 %v22943_v6  ;;  %v22972_v45 = vld [vmem:[%s26425_s1 + $0xf8] sm:$0xff]  ;;  %v22978_v58 = vld [vmem:[%s26425_s1 + $0x100] sm:$0xff] }
 0x634   : > { %26556 = vst [vmem:[#allocation91_spill] sm:$0xff] %v22951_v4  ;;  %v8434_v59 = vmul.f32 %v8326_v46, %v26560_v12  ;;  %19406 = vmatpush3.bf16.msra.mxu0 %v22943_v6  ;;  %v8324_v35 = vpop.permute.xlu0 %8323  ;;  %18268 = vmatmul.mubr.msk.f32.gmra.mrb[122].mxu1 %vm8531_vm4, %v22948_v13  ;;  %26563 = vst [vmem:[#allocation94_spill] sm:$0xff] %v22972_v45  ;;  %v26564_v46 = vld [vmem:[#allocation50_spill] sm:$0xff]  ;;  %v26566_v6 = vld [vmem:[#allocation65_spill] sm:$0xff] }
 0x635   : > { %26559 = vst [vmem:[#allocation134_spill] sm:$0xff] %v22957_v0  ;;  %v8433_v7 = vmul.f32 %v8324_v35, %v26561_v39  ;;  %v22967_v5 = vpack.c.bf16 %v22951_v4, %v22957_v0  ;;  %18270 = vmatprep.mubr.msk.f32.mxu1 %vm8531_vm4, %v22954_v43  ;;  %v26568_v35 = vld [vmem:[#allocation95_spill] sm:$0xff] }
 0x636   : > { %v22975_v12 = vadd.f32 %v8434_v59, %v26564_v46 }
 0x637   : > { %26562 = vst [vmem:[#allocation93_spill] sm:$0xff] %v22967_v5  ;;  %v22981_v63 = vadd.f32 %v8433_v7, %v26566_v6  ;;  %19408 = vmatprep.subr.bf16.mxu0 %v22967_v5  ;;  %v22995_v7 = vld [vmem:[%s26425_s1 + $0x108] sm:$0xff] }
 0x638   : > { %26565 = vst [vmem:[#allocation135_spill] sm:$0xff] %v22975_v12  ;;  %v8330_v39 = vpop.permute.xlu1 %8329  ;;  %19410 = vmatpush3.bf16.msra.mxu0 %v22967_v5  ;;  %18271 = vmatmul.mubr.msk.f32.gmra.mrb[124].mxu1 %vm8531_vm4, %v22972_v45  ;;  %26570 = vst [vmem:[#allocation137_spill] sm:$0xff] %v22995_v7  ;;  %v26571_v6 = vld [vmem:[#allocation96_spill] sm:$0xff] }
 0x639   : > { %26567 = vst [vmem:[#allocation136_spill] sm:$0xff] %v22981_v63  ;;  %v8436_v0 = vmul.f32 %v8330_v39, %v26568_v35  ;;  %v8328_v4 = vpop.permute.xlu0 %8327  ;;  %v22990_v59 = vpack.c.bf16 %v22975_v12, %v22981_v63  ;;  %18273 = vmatprep.mubr.msk.f32.mxu1 %vm8531_vm4, %v22978_v58  ;;  %v26572_v5 = vld [vmem:[#allocation52_spill] sm:$0xff]  ;;  %v26574_v39 = vld [vmem:[#allocation66_spill] sm:$0xff]  ;;  %v26576_v63 = vld [vmem:[#allocation97_spill] sm:$0xff] }
 0x63a   : > { %v8435_v46 = vmul.f32 %v8328_v4, %v26571_v6  ;;  %v26578_v4 = vld [vmem:[#allocation98_spill] sm:$0xff] }
 0x63b   : > { %26569 = vst [vmem:[#allocation95_spill] sm:$0xff] %v22990_v59  ;;  %v23002_v43 = vadd.f32 %v8436_v0, %v26572_v5  ;;  %19412 = vmatprep.subr.bf16.mxu0 %v22990_v59  ;;  %v23015_v0 = vld [vmem:[%s26425_s1 + $0x118] sm:$0xff] }
 0x63c   : > { %v23006_v35 = vadd.f32 %v8435_v46, %v26574_v39  ;;  %v8334_v45 = vpop.permute.xlu1 %8333  ;;  %19414 = vmatpush3.bf16.msra.mxu0 %v22990_v59  ;;  %18274 = vmatmul.mubr.msk.f32.gmra.mrb[126].mxu1 %vm8531_vm4, %v22995_v7  ;;  %26577 = vst [vmem:[#allocation97_spill] sm:$0xff] %v23015_v0  ;;  %v26580_v39 = vld [vmem:[#allocation54_spill] sm:$0xff]  ;;  %v26582_v7 = vld [vmem:[#allocation67_spill] sm:$0xff] }
 0x63d   : > { %26573 = vst [vmem:[#allocation96_spill] sm:$0xff] %v23002_v43  ;;  %v8438_v12 = vmul.f32 %v8334_v45, %v26576_v63  ;;  %v8332_v6 = vpop.permute.xlu0 %8331  ;;  %18276 = vmatprep.mubr.msk.f32.mxu1 %vm8531_vm4, %v22999_v31 }
 0x63e   : > { %26575 = vst [vmem:[#allocation138_spill] sm:$0xff] %v23006_v35  ;;  %v8437_v5 = vmul.f32 %v8332_v6, %v26578_v4  ;;  %v23020_v46 = vpack.c.bf16 %v23002_v43, %v23006_v35  ;;  %v23035_v35 = vld [vmem:[%s26425_s1] sm:$0xff] }
 0x63f   : > { %18382 = vmatmul.mubr.msk.f32.vlgmr.msra.gmra.mrb[118].mxu0 %vm8531_vm4, %v22659_v38  ;;  %v23025_v59 = vadd.f32 %v8438_v12, %v26580_v39  ;;  %26584 = vst [vmem:[#allocation141_spill] sm:$0xff] %v23035_v35  ;;  %v26585_v12 = vld [vmem:[#allocation99_spill] sm:$0xff]  ;;  %v26588_v43 = vld [vmem:[#allocation68_spill] sm:$0xff] }
 0x640   : > { %26579 = vst [vmem:[#allocation98_spill] sm:$0xff] %v23020_v46  ;;  %v23028_v63 = vadd.f32 %v8437_v5, %v26582_v7  ;;  %v8338_v45 = vpop.permute.xlu1 %8337  ;;  %19416 = vmatprep.subr.bf16.mxu1 %v23020_v46  ;;  %18277 = vmatmul.mubr.msk.f32.gmra.mrb[128].mxu1 %vm8531_vm4, %v23015_v0  ;;  %v26586_v7 = vld [vmem:[#allocation56_spill] sm:$0xff] }
 0x641   : > { %26581 = vst [vmem:[#allocation139_spill] sm:$0xff] %v23025_v59  ;;  %v8440_v6 = vmul.f32 %v8338_v45, %v22396_v3  ;;  %v8336_v4 = vpop.permute.xlu0 %8335  ;;  %18303 = vmatprep.mubr.msk.f32.mxu1 %vm8531_vm4, %v23035_v35  ;;  %18384 = vmatprep.mubr.msk.f32.mxu0 %vm8531_vm4, %v22663_v19 }
 0x642   : > { %26583 = vst [vmem:[#allocation140_spill] sm:$0xff] %v23028_v63  ;;  %v8439_v5 = vmul.f32 %v8336_v4, %v26585_v12  ;;  %v23054_v45 = vpack.c.bf16 %v23025_v59, %v23028_v63  ;;  %v26591_v4 = vld [vmem:[#allocation100_spill] sm:$0xff]  ;;  %v26595_v63 = vld [vmem:[#allocation69_spill] sm:$0xff] }
 0x643   : > { %18385 = vmatmul.mubr.msk.f32.gmra.mrb[120].mxu0 %vm8531_vm4, %v22678_v33  ;;  %v23045_v39 = vadd.f32 %v8440_v6, %v26586_v7  ;;  %v26592_v6 = vld [vmem:[#allocation101_spill] sm:$0xff] }
 0x644   : > { %v23048_v0 = vadd.f32 %v8439_v5, %v26588_v43  ;;  %v8342_v3 = vpop.permute.xlu1 %8341  ;;  %18304 = vmatmul.mubr.msk.f32.vlgmr.msra.gmra.mrb[130].mxu1 %vm8531_vm4, %v22659_v38  ;;  %26590 = vst [vmem:[#allocation143_spill] sm:$0xff] %v23054_v45  ;;  %18387 = vmatprep.mubr.msk.f32.mxu0 %vm8531_vm4, %v22685_v55  ;;  %v26593_v43 = vld [vmem:[#allocation58_spill] sm:$0xff] }
 0x645   : > { %26587 = vst [vmem:[#allocation99_spill] sm:$0xff] %v23045_v39  ;;  %v8442_v12 = vmul.f32 %v8342_v3, %v26591_v4  ;;  %v8340_v35 = vpop.permute.xlu0 %8339  ;;  %19418 = vmatpush3.bf16.msra.mxu1 %v23020_v46  ;;  %18306 = vmatprep.mubr.msk.f32.mxu1 %vm8531_vm4, %v22663_v19 }
 0x646   : > { %26589 = vst [vmem:[#allocation142_spill] sm:$0xff] %v23048_v0  ;;  %v8441_v5 = vmul.f32 %v8340_v35, %v26592_v6  ;;  %19420 = vmatprep.subr.bf16.mxu1 %v23054_v45  ;;  %v23076_v4 = vpack.c.bf16 %v23045_v39, %v23048_v0  ;;  %v26598_v35 = vld [vmem:[#allocation102_spill] sm:$0xff] }
 0x647   : > { %18388 = vmatmul.mubr.msk.f32.gmra.mrb[122].mxu0 %vm8531_vm4, %v22696_v11  ;;  %v23067_v7 = vadd.f32 %v8442_v12, %v26593_v43  ;;  %v26601_v43 = vld [vmem:[#allocation70_spill] sm:$0xff] }
 0x648   : > { %v23070_v59 = vadd.f32 %v8441_v5, %v26595_v63  ;;  %v8346_v3 = vpop.permute.xlu1 %8345  ;;  %18307 = vmatmul.mubr.msk.f32.gmra.mrb[132].mxu1 %vm8531_vm4, %v22678_v33  ;;  %26597 = vst [vmem:[#allocation144_spill] sm:$0xff] %v23076_v4  ;;  %18390 = vmatprep.mubr.msk.f32.mxu0 %vm8531_vm4, %v22701_v32  ;;  %v26599_v5 = vld [vmem:[#allocation60_spill] sm:$0xff] }
 0x649   : > { %26594 = vst [vmem:[#allocation100_spill] sm:$0xff] %v23067_v7  ;;  %v8444_v6 = vmul.f32 %v8346_v3, %v26598_v35  ;;  %v8344_v46 = vpop.permute.xlu0 %8343  ;;  %19422 = vmatpush3.bf16.msra.mxu1 %v23054_v45  ;;  %18309 = vmatprep.mubr.msk.f32.mxu1 %vm8531_vm4, %v22685_v55  ;;  %v3699_v45 = vld [vmem:[#allocation3 + $0x18] sm:$0xff] }
 0x64a   : > { %26596 = vst [vmem:[#allocation101_spill] sm:$0xff] %v23070_v59  ;;  %v8443_v12 = vmul.f32 %v8344_v46, %v22421_v14  ;;  %19424 = vmatprep.subr.bf16.mxu1 %v23076_v4  ;;  %v23098_v35 = vpack.c.bf16 %v23067_v7, %v23070_v59 }
 0x64b   : > { %18391 = vmatmul.mubr.msk.f32.gmra.mrb[124].mxu0 %vm8531_vm4, %v22716_v26  ;;  %v23089_v63 = vadd.f32 %v8444_v6, %v26599_v5  ;;  %v26605_v5 = vld [vmem:[#allocation71_spill] sm:$0xff] }
 0x64c   : > { %v23092_v0 = vadd.f32 %v8443_v12, %v26601_v43  ;;  %v8350_v3 = vpop.permute.xlu1 %8349  ;;  %18310 = vmatmul.mubr.msk.f32.gmra.mrb[134].mxu1 %vm8531_vm4, %v22696_v11  ;;  %18393 = vmatprep.mubr.msk.f32.mxu0 %vm8531_vm4, %v22723_v42  ;;  %v26603_v12 = vld [vmem:[#allocation62_spill] sm:$0xff] }
 0x64d   : > { %26600 = vst [vmem:[#allocation102_spill] sm:$0xff] %v23089_v63  ;;  %v8446_v14 = vmul.f32 %v8350_v3, %v22431_v36  ;;  %v8348_v46 = vpop.permute.xlu0 %8347  ;;  %19426 = vmatpush3.bf16.msra.mxu1 %v23076_v4  ;;  %18312 = vmatprep.mubr.msk.f32.mxu1 %vm8531_vm4, %v22701_v32  ;;  %v3697_v36 = vld [vmem:[#allocation3 + $0x8] sm:$0xff] }
 0x64e   : > { %26602 = vst [vmem:[#allocation145_spill] sm:$0xff] %v23092_v0  ;;  %v8445_v6 = vmul.f32 %v8348_v46, %v22435_v51  ;;  %19428 = vmatprep.subr.bf16.mxu1 %v23098_v35  ;;  %v23120_v51 = vpack.c.bf16 %v23089_v63, %v23092_v0  ;;  %v26607_v46 = vld [vmem:[#allocation78_spill] sm:$0xff]  ;;  %v9624_v0 = vld [vmem:[%s20543_s2 + $0x20] sm:$0xff]  ;;  %v9625_v63 = vld [vmem:[%s20543_s2 + $0x28] sm:$0xff] }
 0x64f   : > { %18394 = vmatmul.mubr.msk.f32.gmra.mrb[126].mxu0 %vm8531_vm4, %v22734_v23  ;;  %v23111_v43 = vadd.f32 %v8446_v14, %v26603_v12  ;;  %v3696_v12 = vld [vmem:[#allocation3] sm:$0xff] }
 0x650   : > { %v23114_v59 = vadd.f32 %v8445_v6, %v26605_v5  ;;  %v3555_v3 = vpop.permute.xlu1 %3554  ;;  %18313 = vmatmul.mubr.msk.f32.gmra.mrb[136].mxu1 %vm8531_vm4, %v22716_v26  ;;  %18396 = vmatprep.mubr.msk.f32.mxu0 %vm8531_vm4, %v22739_v54  ;;  %v26608_v6 = vld [vmem:[#allocation83_spill] sm:$0xff] }
 0x651   : > { %26604 = vst [vmem:[#allocation146_spill] sm:$0xff] %v23111_v43  ;;  %v3673_v14 = vmul.f32 %v3555_v3, %v26607_v46  ;;  %v3553_v7 = vpop.permute.xlu0 %3552  ;;  %19430 = vmatpush3.bf16.msra.mxu1 %v23098_v35  ;;  %18315 = vmatprep.mubr.msk.f32.mxu1 %vm8531_vm4, %v22723_v42 }
 0x652   : > { %26606 = vst [vmem:[#allocation147_spill] sm:$0xff] %v23114_v59  ;;  %v3672_v5 = vmul.f32 %v3553_v7, %v26608_v6  ;;  %19432 = vmatprep.subr.bf16.mxu1 %v23120_v51  ;;  %v23138_v46 = vpack.c.bf16 %v23111_v43, %v23114_v59  ;;  %v26609_v7 = vld [vmem:[#allocation92_spill] sm:$0xff]  ;;  %v12356_v43 = vld [vmem:[%s20548_s15 + $0x30] sm:$0xff] }
 0x653   : > { %v3721_v39 = vadd.f32 %v3697_v36, %v3673_v14  ;;  %18397 = vmatmul.mubr.msk.f32.gmra.mrb[128].mxu0 %vm8531_vm4, %v22754_v62  ;;  %v3698_v14 = vld [vmem:[#allocation3 + $0x10] sm:$0xff] }
 0x654   : > { %v3720_v4 = vadd.f32 %v3696_v12, %v3672_v5  ;;  %v3559_v3 = vpop.permute.xlu1 %3558  ;;  %18316 = vmatmul.mubr.msk.f32.gmra.mrb[138].mxu1 %vm8531_vm4, %v22734_v23  ;;  %18399 = vmatprep.mubr.msk.f32.mxu0 %vm8531_vm4, %v22761_v24  ;;  %v23150_v12 = vpack.c.bf16 %v9625_v63, %v9624_v0 }
 0x655   : > { %3745 = vst.msk [vmem:[#allocation3 + $0x8] sm:$0xff] %vm1772_vm1, %v3721_v39  ;;  %v3675_v36 = vmul.f32 %v3559_v3, %v26609_v7  ;;  %v3557_v6 = vpop.permute.xlu0 %3556  ;;  %19434 = vmatpush3.bf16.msra.mxu1 %v23120_v51  ;;  %18318 = vmatprep.mubr.msk.f32.mxu1 %vm8531_vm4, %v22739_v54  ;;  %v3701_v3 = vld [vmem:[#allocation3 + $0x28] sm:$0xff] }
 0x656   : > { %3744 = vst.msk [vmem:[#allocation3] sm:$0xff] %vm1772_vm1, %v3720_v4  ;;  %v3674_v5 = vmul.f32 %v3557_v6, %v22427_v8  ;;  %19436 = vmatprep.subr.bf16.mxu1 %v23138_v46  ;;  %v3700_v4 = vld [vmem:[#allocation3 + $0x20] sm:$0xff]  ;;  %v3702_v6 = vld [vmem:[#allocation3 + $0x30] sm:$0xff] }
 0x657   : > { %v3723_v59 = vadd.f32 %v3699_v45, %v3675_v36  ;;  %18400 = vmatmul.mubr.msk.f32.gmra.mrb[130].mxu0 %vm8531_vm4, %v22771_v20 }
 0x658   : > { %v3722_v39 = vadd.f32 %v3698_v14, %v3674_v5  ;;  %v3563_v7 = vpop.permute.xlu1 %3562  ;;  %18319 = vmatmul.mubr.msk.f32.gmra.mrb[140].mxu1 %vm8531_vm4, %v22754_v62  ;;  %18402 = vmatprep.mubr.msk.f32.mxu0 %vm8531_vm4, %v22775_v60 }
 0x659   : > { %3747 = vst.msk [vmem:[#allocation3 + $0x18] sm:$0xff] %vm1772_vm1, %v3723_v59  ;;  %v3677_v8 = vmul.f32 %v3563_v7, %v22444_v57  ;;  %v3561_v0 = vpop.permute.xlu0 %3560  ;;  %19438 = vmatpush3.bf16.msra.mxu1 %v23138_v46  ;;  %18321 = vmatprep.mubr.msk.f32.mxu1 %vm8531_vm4, %v22761_v24  ;;  %v3703_v59 = vld [vmem:[#allocation3 + $0x38] sm:$0xff]  ;;  %v9621_v7 = vld [vmem:[%s20543_s2 + $0x8] sm:$0xff] }
 0x65a   : > { %3746 = vst.msk [vmem:[#allocation3 + $0x10] sm:$0xff] %vm1772_vm1, %v3722_v39  ;;  %v3676_v63 = vmul.f32 %v3561_v0, %v22448_v25  ;;  %19440 = vmatprep.subr.bf16.mxu1 %v23150_v12  ;;  %v26610_v25 = vld [vmem:[#allocation103_spill] sm:$0xff] }
 0x65b   : > { %v3725_v45 = vadd.f32 %v3701_v3, %v3677_v8  ;;  %18403 = vmatmul.mubr.msk.f32.gmra.mrb[132].mxu0 %vm8531_vm4, %v22788_v15  ;;  %v9620_v3 = vld [vmem:[%s20543_s2] sm:$0xff] }
 0x65c   : > { %v3724_v57 = vadd.f32 %v3700_v4, %v3676_v63  ;;  %v3567_v36 = vpop.permute.xlu1 %3566  ;;  %18322 = vmatmul.mubr.msk.f32.gmra.mrb[142].mxu1 %vm8531_vm4, %v22771_v20  ;;  %18405 = vmatprep.mubr.msk.f32.mxu0 %vm8531_vm4, %v22795_v41  ;;  %v19447_v4 = vpack.c.bf16 %v9621_v7, %v9620_v3  ;;  %v3705_v63 = vld [vmem:[#allocation3 + $0x48] sm:$0xff]  ;;  %v9622_v3 = vld [vmem:[%s20543_s2 + $0x10] sm:$0xff]  ;;  %v9623_v7 = vld [vmem:[%s20543_s2 + $0x18] sm:$0xff] }
 0x65d   : > { %3749 = vst.msk [vmem:[#allocation3 + $0x28] sm:$0xff] %vm1772_vm1, %v3725_v45  ;;  %v3679_v14 = vmul.f32 %v3567_v36, %v26610_v25  ;;  %v3565_v5 = vpop.permute.xlu0 %3564  ;;  %18324 = vmatprep.mubr.msk.f32.mxu1 %vm8531_vm4, %v22775_v60 }
 0x65e   : > { %3748 = vst.msk [vmem:[#allocation3 + $0x20] sm:$0xff] %vm1772_vm1, %v3724_v57  ;;  %v3678_v39 = vmul.f32 %v3565_v5, %v22460_v44  ;;  %v3704_v57 = vld [vmem:[#allocation3 + $0x40] sm:$0xff]  ;;  %19448 = vmatprep.subr.bf16.mxu0 %v19447_v4 }
 0x65f   : > { %v3727_v8 = vadd.f32 %v3703_v59, %v3679_v14  ;;  %18406 = vmatmul.mubr.msk.f32.gmra.mrb[134].mxu0 %vm8531_vm4, %v22806_v37 }
 0x660   : > { %v3726_v0 = vadd.f32 %v3702_v6, %v3678_v39  ;;  %v3571_v45 = vpop.permute.xlu1 %3570  ;;  %18325 = vmatmul.mubr.msk.f32.gmra.mrb[144].mxu1 %vm8531_vm4, %v22788_v15  ;;  %18408 = vmatprep.mubr.msk.f32.mxu0 %vm8531_vm4, %v22812_v29  ;;  %v3707_v6 = vld [vmem:[#allocation3 + $0x58] sm:$0xff]  ;;  %v3706_v39 = vld [vmem:[#allocation3 + $0x50] sm:$0xff] }
 0x661   : > { %3751 = vst.msk [vmem:[#allocation3 + $0x38] sm:$0xff] %vm1772_vm1, %v3727_v8  ;;  %v3681_v44 = vmul.f32 %v3571_v45, %v22467_v47  ;;  %v3569_v36 = vpop.permute.xlu0 %3568  ;;  %18327 = vmatprep.mubr.msk.f32.mxu1 %vm8531_vm4, %v22795_v41  ;;  %19450 = vmatpush3.bf16.msra.mxu0 %v19447_v4  ;;  %v19451_v4 = vpack.c.bf16 %v9623_v7, %v9622_v3  ;;  %v3709_v45 = vld [vmem:[#allocation3 + $0x68] sm:$0xff] }
 0x662   : > { %3750 = vst.msk [vmem:[#allocation3 + $0x30] sm:$0xff] %vm1772_vm1, %v3726_v0  ;;  %v3680_v59 = vmul.f32 %v3569_v36, %v22478_v56  ;;  %v3713_v3 = vld [vmem:[#allocation3 + $0x88] sm:$0xff] }
 0x663   : > { %v3729_v25 = vadd.f32 %v3705_v63, %v3681_v44  ;;  %18409 = vmatmul.mubr.msk.f32.gmra.mrb[136].mxu0 %vm8531_vm4, %v22831_v16  ;;  %19452 = vmatprep.subr.bf16.mxu0 %v19451_v4 }
 0x664   : > { %v3728_v14 = vadd.f32 %v3704_v57, %v3680_v59  ;;  %v3575_v47 = vpop.permute.xlu1 %3574  ;;  %18328 = vmatmul.mubr.msk.f32.gmra.mrb[146].mxu1 %vm8531_vm4, %v22806_v37  ;;  %18411 = vmatprep.mubr.msk.f32.mxu0 %vm8531_vm4, %v22838_v21  ;;  %v3708_v57 = vld [vmem:[#allocation3 + $0x60] sm:$0xff] }
 0x665   : > { %3753 = vst.msk [vmem:[#allocation3 + $0x48] sm:$0xff] %vm1772_vm1, %v3729_v25  ;;  %v3683_v5 = vmul.f32 %v3575_v47, %v22487_v9  ;;  %v3573_v56 = vpop.permute.xlu0 %3572  ;;  %18330 = vmatprep.mubr.msk.f32.mxu1 %vm8531_vm4, %v22812_v29  ;;  %19454 = vmatpush3.bf16.msra.mxu0 %v19451_v4  ;;  %v3710_v47 = vld [vmem:[#allocation3 + $0x70] sm:$0xff] }
 0x666   : > { %3752 = vst.msk [vmem:[#allocation3 + $0x40] sm:$0xff] %vm1772_vm1, %v3728_v14  ;;  %v3682_v8 = vmul.f32 %v3573_v56, %v22499_v49  ;;  %v3711_v14 = vld [vmem:[#allocation3 + $0x78] sm:$0xff] }
 0x667   : > { %v3731_v0 = vadd.f32 %v3707_v6, %v3683_v5  ;;  %18412 = vmatmul.mubr.msk.f32.gmra.mrb[138].mxu0 %vm8531_vm4, %v22855_v30 }
 0x668   : > { %v3730_v63 = vadd.f32 %v3706_v39, %v3682_v8  ;;  %v3579_v44 = vpop.permute.xlu1 %3578  ;;  %18331 = vmatmul.mubr.msk.f32.gmra.mrb[148].mxu1 %vm8531_vm4, %v22831_v16  ;;  %18414 = vmatprep.mubr.msk.f32.mxu0 %vm8531_vm4, %v22862_v34  ;;  %v3712_v8 = vld [vmem:[#allocation3 + $0x80] sm:$0xff] }
 0x669   : > { %3755 = vst.msk [vmem:[#allocation3 + $0x58] sm:$0xff] %vm1772_vm1, %v3731_v0  ;;  %v3685_v9 = vmul.f32 %v3579_v44, %v22506_v53  ;;  %v3577_v49 = vpop.permute.xlu0 %3576  ;;  %18333 = vmatprep.mubr.msk.f32.mxu1 %vm8531_vm4, %v22838_v21 }
 0x66a   : > { %3754 = vst.msk [vmem:[#allocation3 + $0x50] sm:$0xff] %vm1772_vm1, %v3730_v63  ;;  %v3684_v36 = vmul.f32 %v3577_v49, %v22519_v17 }
 0x66b   : > { %v3733_v59 = vadd.f32 %v3709_v45, %v3685_v9  ;;  %18415 = vmatmul.mubr.msk.f32.gmra.mrb[140].mxu0 %vm8531_vm4, %v22879_v61  ;;  %v3715_v45 = vld [vmem:[#allocation3 + $0x98] sm:$0xff]  ;;  %v3714_v9 = vld [vmem:[#allocation3 + $0x90] sm:$0xff] }
 0x66c   : > { %v3732_v25 = vadd.f32 %v3708_v57, %v3684_v36  ;;  %v3583_v6 = vpop.permute.xlu1 %3582  ;;  %18334 = vmatmul.mubr.msk.f32.gmra.mrb[150].mxu1 %vm8531_vm4, %v22855_v30  ;;  %18417 = vmatprep.mubr.msk.f32.mxu0 %vm8531_vm4, %v22886_v40 }
 0x66d   : > { %3757 = vst.msk [vmem:[#allocation3 + $0x68] sm:$0xff] %vm1772_vm1, %v3733_v59  ;;  %v3687_v53 = vmul.f32 %v3583_v6, %v22528_v10  ;;  %v3581_v17 = vpop.permute.xlu0 %3580  ;;  %18336 = vmatprep.mubr.msk.f32.mxu1 %vm8531_vm4, %v22862_v34  ;;  %v3717_v59 = vld [vmem:[#allocation3 + $0xa8] sm:$0xff] }
 0x66e   : > { %3756 = vst.msk [vmem:[#allocation3 + $0x60] sm:$0xff] %vm1772_vm1, %v3732_v25  ;;  %v3686_v5 = vmul.f32 %v3581_v17, %v22538_v22 }
 0x66f   : > { %v3735_v39 = vadd.f32 %v3711_v14, %v3687_v53  ;;  %18418 = vmatmul.mubr.msk.f32.gmra.mrb[142].mxu0 %vm8531_vm4, %v22900_v27  ;;  %v26612_v14 = vld [vmem:[#allocation18_spill] sm:$0xff]  ;;  %v3716_v53 = vld [vmem:[#allocation3 + $0xa0] sm:$0xff] }
 0x670   : > { %v3734_v56 = vadd.f32 %v3710_v47, %v3686_v5  ;;  %v3587_v7 = vpop.permute.xlu1 %3586  ;;  %18337 = vmatmul.mubr.msk.f32.gmra.mrb[152].mxu1 %vm8531_vm4, %v22879_v61  ;;  %18420 = vmatprep.mubr.msk.f32.mxu0 %vm8531_vm4, %v22907_v1 }
 0x671   : > { %3759 = vst.msk [vmem:[#allocation3 + $0x78] sm:$0xff] %vm1772_vm1, %v3735_v39  ;;  %v3689_v10 = vmul.f32 %v3587_v7, %v22548_v50  ;;  %v3585_v4 = vpop.permute.xlu0 %3584  ;;  %18339 = vmatprep.mubr.msk.f32.mxu1 %vm8531_vm4, %v22886_v40  ;;  %v26614_v39 = vld [vmem:[#allocation94_spill] sm:$0xff] }
 0x672   : > { %3758 = vst.msk [vmem:[#allocation3 + $0x70] sm:$0xff] %vm1772_vm1, %v3734_v56  ;;  %v3688_v22 = vmul.f32 %v3585_v4, %v22557_v52  ;;  %v3718_v4 = vld [vmem:[#allocation3 + $0xb0] sm:$0xff] }
 0x673   : > { %v3737_v0 = vadd.f32 %v3713_v3, %v3689_v10  ;;  %18421 = vmatmul.mubr.msk.f32.gmra.mrb[144].mxu0 %vm8531_vm4, %v22924_v28  ;;  %v3719_v3 = vld [vmem:[#allocation3 + $0xb8] sm:$0xff] }
 0x674   : > { %v3736_v63 = vadd.f32 %v3712_v8, %v3688_v22  ;;  %v3591_v44 = vpop.permute.xlu1 %3590  ;;  %18340 = vmatmul.mubr.msk.f32.gmra.mrb[154].mxu1 %vm8531_vm4, %v22900_v27  ;;  %18423 = vmatprep.mubr.msk.f32.mxu0 %vm8531_vm4, %v22930_v48  ;;  %v26615_v10 = vld [vmem:[#allocation22_spill] sm:$0xff] }
 0x675   : > { %3761 = vst.msk [vmem:[#allocation3 + $0x88] sm:$0xff] %vm1772_vm1, %v3737_v0  ;;  %v3691_v50 = vmul.f32 %v3591_v44, %v22570_v18  ;;  %v3589_v57 = vpop.permute.xlu0 %3588  ;;  %18342 = vmatprep.mubr.msk.f32.mxu1 %vm8531_vm4, %v22907_v1  ;;  %v26611_v18 = vld [vmem:[#allocation133_spill] sm:$0xff]  ;;  %v26616_v0 = vld [vmem:[#allocation23_spill] sm:$0xff] }
 0x676   : > { %3760 = vst.msk [vmem:[#allocation3 + $0x80] sm:$0xff] %vm1772_vm1, %v3736_v63  ;;  %v3690_v52 = vmul.f32 %v3589_v57, %v22576_v2  ;;  %v26613_v2 = vld [vmem:[#allocation20_spill] sm:$0xff]  ;;  %v26617_v44 = vld [vmem:[#allocation137_spill] sm:$0xff] }
 0x677   : > { %v3739_v49 = vadd.f32 %v3715_v45, %v3691_v50  ;;  %18424 = vmatmul.mubr.msk.f32.gmra.mrb[146].mxu0 %vm8531_vm4, %v22948_v13  ;;  %v9626_v57 = vld [vmem:[%s20543_s2 + $0x30] sm:$0xff] }
 0x678   : > { %v3738_v36 = vadd.f32 %v3714_v9, %v3690_v52  ;;  %v3595_v25 = vpop.permute.xlu1 %3594  ;;  %18343 = vmatmul.mubr.msk.f32.gmra.mrb[156].mxu1 %vm8531_vm4, %v22924_v28  ;;  %18426 = vmatprep.mubr.msk.f32.mxu0 %vm8531_vm4, %v26611_v18  ;;  %v26618_v9 = vld [vmem:[#allocation97_spill] sm:$0xff]  ;;  %v9627_v52 = vld [vmem:[%s20543_s2 + $0x38] sm:$0xff] }
 0x679   : > { %3763 = vst.msk [vmem:[#allocation3 + $0x98] sm:$0xff] %vm1772_vm1, %v3739_v49  ;;  %v3693_v6 = vmul.f32 %v3595_v25, %v26612_v14  ;;  %v3593_v47 = vpop.permute.xlu0 %3592  ;;  %18345 = vmatprep.mubr.msk.f32.mxu1 %vm8531_vm4, %v22930_v48  ;;  %v26619_v49 = vld [vmem:[#allocation141_spill] sm:$0xff]  ;;  %v26625_v25 = vld [vmem:[#allocation119_spill] sm:$0xff] }
 0x67a   : > { %3762 = vst.msk [vmem:[#allocation3 + $0x90] sm:$0xff] %vm1772_vm1, %v3738_v36  ;;  %v3692_v17 = vmul.f32 %v3593_v47, %v26613_v2  ;;  %v19443_v36 = vpack.c.bf16 %v9627_v52, %v9626_v57 }
 0x67b   : > { %v3741_v5 = vadd.f32 %v3717_v59, %v3693_v6  ;;  %18427 = vmatmul.mubr.msk.f32.gmra.mrb[148].mxu0 %vm8531_vm4, %v26614_v39  ;;  %v26620_v59 = vld [vmem:[#allocation106_spill] sm:$0xff] }
 0x67c   : > { %v3740_v56 = vadd.f32 %v3716_v53, %v3692_v17  ;;  %v3599_v7 = vpop.permute.xlu1 %3598  ;;  %18346 = vmatmul.mubr.msk.f32.gmra.mrb[158].mxu1 %vm8531_vm4, %v22948_v13  ;;  %18429 = vmatprep.mubr.msk.f32.mxu0 %vm8531_vm4, %v22978_v58  ;;  %v26626_v6 = vld [vmem:[#allocation122_spill] sm:$0xff] }
 0x67d   : > { %3765 = vst.msk [vmem:[#allocation3 + $0xa8] sm:$0xff] %vm1772_vm1, %v3741_v5  ;;  %v3695_v8 = vmul.f32 %v3599_v7, %v26615_v10  ;;  %v3597_v22 = vpop.permute.xlu0 %3596  ;;  %18348 = vmatprep.mubr.msk.f32.mxu1 %vm8531_vm4, %v26611_v18 }
 0x67e   : > { %3764 = vst.msk [vmem:[#allocation3 + $0xa0] sm:$0xff] %vm1772_vm1, %v3740_v56  ;;  %v3694_v63 = vmul.f32 %v3597_v22, %v26616_v0 }
 0x67f   : > { %v3743_v45 = vadd.f32 %v3719_v3, %v3695_v8  ;;  %18430 = vmatmul.mubr.msk.f32.gmra.mrb[150].mxu0 %vm8531_vm4, %v26617_v44 }
 0x680   : > { %v3742_v50 = vadd.f32 %v3718_v4, %v3694_v63  ;;  %18349 = vmatmul.mubr.msk.f32.gmra.mrb[160].mxu1 %vm8531_vm4, %v26614_v39  ;;  %18432 = vmatprep.mubr.msk.f32.mxu0 %vm8531_vm4, %v22999_v31 }
 0x681   : > { %3767 = vst.msk [vmem:[#allocation3 + $0xb8] sm:$0xff] %vm1772_vm1, %v3743_v45  ;;  %18351 = vmatprep.mubr.msk.f32.mxu1 %vm8531_vm4, %v22978_v58 }
 0x682   : > { %3766 = vst.msk [vmem:[#allocation3 + $0xb0] sm:$0xff] %vm1772_vm1, %v3742_v50 }
 0x683   : > { %18433 = vmatmul.mubr.msk.f32.gmra.mrb[152].mxu0 %vm8531_vm4, %v26618_v9 }
 0x684   : > { %18352 = vmatmul.mubr.msk.f32.gmra.mrb[162].mxu1 %vm8531_vm4, %v26617_v44 }
 0x685   : > { %18354 = vmatprep.mubr.msk.f32.mxu1 %vm8531_vm4, %v22999_v31 }
 0x688   : > { %18355 = vmatmul.mubr.msk.f32.gmra.mrb[164].mxu1 %vm8531_vm4, %v26618_v9 }
 0x689   : > { %18459 = vmatprep.mubr.msk.f32.mxu1 %vm8531_vm4, %v26619_v49 }
 0x68c   : > { %18460 = vmatmul.mubr.msk.f32.vlgmr.msra.gmra.mrb[166].mxu1 %vm8531_vm4, %v22659_v38 }
 0x68d   : > { %19442 = vmatpush3.bf16.msra.mxu1 %v23150_v12  ;;  %18462 = vmatprep.mubr.msk.f32.mxu1 %vm8531_vm4, %v22663_v19 }
 0x68e   : > { %19444 = vmatprep.subr.bf16.mxu1 %v19443_v36 }
 0x690   : > { %18463 = vmatmul.mubr.msk.f32.gmra.mrb[168].mxu1 %vm8531_vm4, %v22678_v33 }
 0x691   : > { %19446 = vmatpush3.bf16.msra.mxu1 %v19443_v36  ;;  %18465 = vmatprep.mubr.msk.f32.mxu1 %vm8531_vm4, %v22685_v55 }
 0x692   : > { %19464 = vmatprep.subr.bf16.mxu1 %v26620_v59 }
 0x694   : > { %18466 = vmatmul.mubr.msk.f32.gmra.mrb[170].mxu1 %vm8531_vm4, %v22696_v11 }
 0x695   : > { %18468 = vmatprep.mubr.msk.f32.mxu1 %vm8531_vm4, %v22701_v32 }
 0x698   : > { %18469 = vmatmul.mubr.msk.f32.gmra.mrb[172].mxu1 %vm8531_vm4, %v22716_v26 }
 0x699   : > { %18471 = vmatprep.mubr.msk.f32.mxu1 %vm8531_vm4, %v22723_v42 }
 0x69c   : > { %18472 = vmatmul.mubr.msk.f32.gmra.mrb[174].mxu1 %vm8531_vm4, %v22734_v23 }
 0x69d   : > { %18474 = vmatprep.mubr.msk.f32.mxu1 %vm8531_vm4, %v22739_v54 }
 0x6a0   : > { %18475 = vmatmul.mubr.msk.f32.gmra.mrb[176].mxu1 %vm8531_vm4, %v22754_v62 }
 0x6a1   : > { %18477 = vmatprep.mubr.msk.f32.mxu1 %vm8531_vm4, %v22761_v24  ;;  %v26621_v24 = vld [vmem:[#allocation109_spill] sm:$0xff] }
 0x6a4   : > { %18478 = vmatmul.mubr.msk.f32.gmra.mrb[178].mxu1 %vm8531_vm4, %v22771_v20 }
 0x6a5   : > { %18480 = vmatprep.mubr.msk.f32.mxu1 %vm8531_vm4, %v22775_v60 }
 0x6a8   : > { %18481 = vmatmul.mubr.msk.f32.gmra.mrb[180].mxu1 %vm8531_vm4, %v22788_v15 }
 0x6a9   : > { %18483 = vmatprep.mubr.msk.f32.mxu1 %vm8531_vm4, %v22795_v41 }
 0x6ac   : > { %18484 = vmatmul.mubr.msk.f32.gmra.mrb[182].mxu1 %vm8531_vm4, %v22806_v37 }
 0x6ad   : > { %18486 = vmatprep.mubr.msk.f32.mxu1 %vm8531_vm4, %v22812_v29  ;;  %v26622_v29 = vld [vmem:[#allocation112_spill] sm:$0xff] }
 0x6b0   : > { %18487 = vmatmul.mubr.msk.f32.gmra.mrb[184].mxu1 %vm8531_vm4, %v22831_v16 }
 0x6b1   : > { %18489 = vmatprep.mubr.msk.f32.mxu1 %vm8531_vm4, %v22838_v21  ;;  %v9628_v21 = vld [vmem:[%s20543_s2 + $0x40] sm:$0xff] }
 0x6b4   : > { %18490 = vmatmul.mubr.msk.f32.gmra.mrb[186].mxu1 %vm8531_vm4, %v22855_v30  ;;  %v9629_v30 = vld [vmem:[%s20543_s2 + $0x48] sm:$0xff] }
 0x6b5   : > { %18492 = vmatprep.mubr.msk.f32.mxu1 %vm8531_vm4, %v22862_v34  ;;  %v26623_v34 = vld [vmem:[#allocation113_spill] sm:$0xff] }
 0x6b8   : > { %18493 = vmatmul.mubr.msk.f32.gmra.mrb[188].mxu1 %vm8531_vm4, %v22879_v61 }
 0x6b9   : > { %18495 = vmatprep.mubr.msk.f32.mxu1 %vm8531_vm4, %v22886_v40 }
 0x6bc   : > { %18496 = vmatmul.mubr.msk.f32.gmra.mrb[190].mxu1 %vm8531_vm4, %v22900_v27  ;;  %v19455_v27 = vpack.c.bf16 %v9629_v30, %v9628_v21 }
 0x6bd   : > { %18498 = vmatprep.mubr.msk.f32.mxu1 %vm8531_vm4, %v22907_v1  ;;  %v9630_v1 = vld [vmem:[%s20543_s2 + $0x50] sm:$0xff] }
 0x6be   : > { %19456 = vmatprep.subr.bf16.mxu0 %v19455_v27 }
 0x6c0   : > { %18499 = vmatmul.mubr.msk.f32.gmra.mrb[192].mxu1 %vm8531_vm4, %v22924_v28  ;;  %v26624_v28 = vld [vmem:[#allocation116_spill] sm:$0xff] }
 0x6c1   : > { %18501 = vmatprep.mubr.msk.f32.mxu1 %vm8531_vm4, %v22930_v48 }
 0x6c4   : > { %18502 = vmatmul.mubr.msk.f32.gmra.mrb[194].mxu1 %vm8531_vm4, %v22948_v13 }
 0x6c5   : > { %18504 = vmatprep.mubr.msk.f32.mxu1 %vm8531_vm4, %v26611_v18 }
 0x6c8   : > { %18505 = vmatmul.mubr.msk.f32.gmra.mrb[196].mxu1 %vm8531_vm4, %v26614_v39 }
 0x6c9   : > { %18507 = vmatprep.mubr.msk.f32.mxu1 %vm8531_vm4, %v22978_v58  ;;  %v9631_v58 = vld [vmem:[%s20543_s2 + $0x58] sm:$0xff] }
 0x6ca   : > { %v19459_v13 = vpack.c.bf16 %v9631_v58, %v9630_v1 }
 0x6cc   : > { %18508 = vmatmul.mubr.msk.f32.gmra.mrb[198].mxu1 %vm8531_vm4, %v26617_v44 }
 0x6cd   : > { %18510 = vmatprep.mubr.msk.f32.mxu1 %vm8531_vm4, %v22999_v31 }
 0x6ce   : > { %v18227_v37 = vpop.f32.mrb[94].mxu1 }
 0x6cf   : > { %v8706_v38 = vpop.f32.mrb[95].mxu1 }
 0x6d0   : > { %18511 = vmatmul.mubr.msk.f32.gmra.mrb[200].mxu1 %vm8531_vm4, %v26618_v9  ;;  %18601 = vmatprep.mubr.msk.f32.mxu0 %vm1772_vm1, %v8706_v38 }
 0x6d1   : > { %18602 = vmatmul.mubr.msk.f32.vlgmr.msra.gmra.mrb[154].mxu0 %vm1772_vm1, %v18227_v37 }
 0x6d2   : > { %v18230_v19 = vpop.f32.mrb[96].mxu1  ;;  %19458 = vmatpush3.bf16.msra.mxu0 %v19455_v27 }
 0x6d3   : > { %v8716_v60 = vpop.f32.mrb[97].mxu1  ;;  %19460 = vmatprep.subr.bf16.mxu0 %v19459_v13 }
 0x6d4   : > { %18604 = vmatprep.mubr.msk.f32.mxu0 %vm1772_vm1, %v8716_v60 }
 0x6d5   : > { %18605 = vmatmul.mubr.msk.f32.gmra.mrb[156].mxu0 %vm1772_vm1, %v18230_v19 }
 0x6d6   : > { %v18233_v33 = vpop.f32.mrb[98].mxu1  ;;  %19462 = vmatpush3.bf16.msra.mxu0 %v19459_v13 }
 0x6d7   : > { %v8726_v55 = vpop.f32.mrb[99].mxu1 }
 0x6d8   : > { %18607 = vmatprep.mubr.msk.f32.mxu0 %vm1772_vm1, %v8726_v55 }
 0x6d9   : > { %18608 = vmatmul.mubr.msk.f32.gmra.mrb[158].mxu0 %vm1772_vm1, %v18233_v33 }
 0x6da   : > { %v18236_v31 = vpop.f32.mrb[100].mxu1 }
 0x6db   : > { %v8736_v11 = vpop.f32.mrb[101].mxu1 }
 0x6dc   : > { %18610 = vmatprep.mubr.msk.f32.mxu0 %vm1772_vm1, %v8736_v11 }
 0x6dd   : > { %18611 = vmatmul.mubr.msk.f32.gmra.mrb[160].mxu0 %vm1772_vm1, %v18236_v31 }
 0x6de   : > { %v18239_v32 = vpop.f32.mrb[102].mxu1 }
 0x6df   : > { %v8746_v54 = vpop.f32.mrb[103].mxu1 }
 0x6e0   : > { %18613 = vmatprep.mubr.msk.f32.mxu0 %vm1772_vm1, %v8746_v54 }
 0x6e1   : > { %18614 = vmatmul.mubr.msk.f32.gmra.mrb[162].mxu0 %vm1772_vm1, %v18239_v32 }
 0x6e2   : > { %v18242_v23 = vpop.f32.mrb[104].mxu1 }
 0x6e3   : > { %v8756_v26 = vpop.f32.mrb[105].mxu1 }
 0x6e4   : > { %18616 = vmatprep.mubr.msk.f32.mxu0 %vm1772_vm1, %v8756_v26 }
 0x6e5   : > { %18617 = vmatmul.mubr.msk.f32.gmra.mrb[164].mxu0 %vm1772_vm1, %v18242_v23 }
 0x6e6   : > { %v18245_v42 = vpop.f32.mrb[106].mxu1 }
 0x6e7   : > { %v8766_v20 = vpop.f32.mrb[107].mxu1 }
 0x6e8   : > { %18521 = vmatprep.mubr.msk.f32.mxu1 %vm1772_vm1, %v8766_v20 }
 0x6e9   : > { %18522 = vmatmul.mubr.msk.f32.vlgmr.msra.gmra.mrb[202].mxu1 %vm1772_vm1, %v18245_v42 }
 0x6ea   : > { %19466 = vmatpush3.bf16.msra.mxu1 %v26620_v59  ;;  %v18248_v62 = vpop.f32.mrb[108].mxu1 }
 0x6eb   : > { %19468 = vmatprep.subr.bf16.mxu1 %v26621_v24  ;;  %v8776_v15 = vpop.f32.mrb[109].mxu1 }
 0x6ec   : > { %18524 = vmatprep.mubr.msk.f32.mxu1 %vm1772_vm1, %v8776_v15 }
 0x6ed   : > { %18525 = vmatmul.mubr.msk.f32.gmra.mrb[204].mxu1 %vm1772_vm1, %v18248_v62 }
 0x6ee   : > { %19470 = vmatpush3.bf16.msra.mxu1 %v26621_v24  ;;  %v18251_v41 = vpop.f32.mrb[110].mxu1 }
 0x6ef   : > { %19472 = vmatprep.subr.bf16.mxu1 %v26622_v29  ;;  %v8786_v16 = vpop.f32.mrb[111].mxu1 }
 0x6f0   : > { %18527 = vmatprep.mubr.msk.f32.mxu1 %vm1772_vm1, %v8786_v16 }
 0x6f1   : > { %18528 = vmatmul.mubr.msk.f32.gmra.mrb[206].mxu1 %vm1772_vm1, %v18251_v41 }
 0x6f2   : > { %19474 = vmatpush3.bf16.msra.mxu1 %v26622_v29 }
 0x6f3   : > { %19476 = vmatprep.subr.bf16.mxu1 %v26623_v34  ;;  %v18254_v61 = vpop.f32.mrb[112].mxu1 }
 0x6f4   : > { %v8796_v40 = vpop.f32.mrb[113].mxu1 }
 0x6f5   : > { %18530 = vmatprep.mubr.msk.f32.mxu1 %vm1772_vm1, %v8796_v40 }
 0x6f6   : > { %19478 = vmatpush3.bf16.msra.mxu1 %v26623_v34 }
 0x6f7   : > { %19480 = vmatprep.subr.bf16.mxu1 %v26624_v28  ;;  %18531 = vmatmul.mubr.msk.f32.gmra.mrb[208].mxu1 %vm1772_vm1, %v18254_v61  ;;  %v18257_v48 = vpop.f32.mrb[114].mxu1 }
 0x6f8   : > { %v8806_v12 = vpop.f32.mrb[115].mxu1 }
 0x6f9   : > { %18533 = vmatprep.mubr.msk.f32.mxu1 %vm1772_vm1, %v8806_v12 }
 0x6fa   : > { %19482 = vmatpush3.bf16.msra.mxu1 %v26624_v28 }
 0x6fb   : > { %19484 = vmatprep.subr.bf16.mxu1 %v26625_v25  ;;  %18534 = vmatmul.mubr.msk.f32.gmra.mrb[210].mxu1 %vm1772_vm1, %v18257_v48  ;;  %v18260_v18 = vpop.f32.mrb[116].mxu1 }
 0x6fc   : > { %v8816_v14 = vpop.f32.mrb[117].mxu1 }
 0x6fd   : > { %18536 = vmatprep.mubr.msk.f32.mxu1 %vm1772_vm1, %v8816_v14 }
 0x6fe   : > { %19486 = vmatpush3.bf16.msra.mxu1 %v26625_v25 }
 0x6ff   : > { %19488 = vmatprep.subr.bf16.mxu1 %v26626_v6  ;;  %18537 = vmatmul.mubr.msk.f32.gmra.mrb[212].mxu1 %vm1772_vm1, %v18260_v18  ;;  %v23412_v53 = vpop.f32.mrb[118].mxu1 }
 0x700   : > { %v23414_v47 = vpop.f32.mrb[119].mxu1 }
 0x703   : > { %v23416_v2 = vpop.f32.mrb[120].mxu1 }
 0x704   : > { %v23418_v17 = vpop.f32.mrb[121].mxu1 }
 0x707   : > { %v23420_v5 = vpop.f32.mrb[122].mxu1 }
 0x708   : > { %v23422_v39 = vpop.f32.mrb[123].mxu1 }
 0x70b   : > { %v23424_v56 = vpop.f32.mrb[124].mxu1 }
 0x70c   : > { %v23426_v3 = vpop.f32.mrb[125].mxu1 }
 0x70f   : > { %v23428_v7 = vpop.f32.mrb[126].mxu1 }
 0x710   : > { %v23430_v10 = vpop.f32.mrb[127].mxu1 }
 0x712   : > { %v18383_v8 = vpop.f32.mrb[118].mxu0 }
 0x713   : > { %v23432_v4 = vpop.f32.mrb[128].mxu1  ;;  %v9196_v22 = vpop.f32.mrb[119].mxu0 }
 0x714   : > { %v23434_v0 = vpop.f32.mrb[129].mxu1 }
 0x716   : > { %v18386_v63 = vpop.f32.mrb[120].mxu0 }
 0x717   : > { %v18305_v45 = vpop.f32.mrb[130].mxu1  ;;  %v9206_v44 = vpop.f32.mrb[121].mxu0 }
 0x718   : > { %v8951_v50 = vpop.f32.mrb[131].mxu1 }
 0x719   : > { %18619 = vmatprep.mubr.msk.f32.mxu0 %vm1772_vm1, %v8951_v50 }
 0x71a   : > { %18620 = vmatmul.mubr.msk.f32.gmra.mrb[166].mxu0 %vm1772_vm1, %v18305_v45  ;;  %v18389_v9 = vpop.f32.mrb[122].mxu0 }
 0x71b   : > { %v18308_v57 = vpop.f32.mrb[132].mxu1  ;;  %v9216_v52 = vpop.f32.mrb[123].mxu0 }
 0x71c   : > { %v8961_v49 = vpop.f32.mrb[133].mxu1 }
 0x71d   : > { %18622 = vmatprep.mubr.msk.f32.mxu0 %vm1772_vm1, %v8961_v49 }
 0x71e   : > { %18623 = vmatmul.mubr.msk.f32.gmra.mrb[168].mxu0 %vm1772_vm1, %v18308_v57  ;;  %v18392_v36 = vpop.f32.mrb[124].mxu0 }
 0x71f   : > { %v18311_v59 = vpop.f32.mrb[134].mxu1  ;;  %v9226_v37 = vpop.f32.mrb[125].mxu0 }
 0x720   : > { %v8971_v38 = vpop.f32.mrb[135].mxu1 }
 0x721   : > { %18625 = vmatprep.mubr.msk.f32.mxu0 %vm1772_vm1, %v8971_v38 }
 0x722   : > { %18626 = vmatmul.mubr.msk.f32.gmra.mrb[170].mxu0 %vm1772_vm1, %v18311_v59  ;;  %v18395_v19 = vpop.f32.mrb[126].mxu0 }
 0x723   : > { %v18314_v60 = vpop.f32.mrb[136].mxu1  ;;  %v9236_v33 = vpop.f32.mrb[127].mxu0 }
 0x724   : > { %v8981_v55 = vpop.f32.mrb[137].mxu1 }
 0x725   : > { %18628 = vmatprep.mubr.msk.f32.mxu0 %vm1772_vm1, %v8981_v55 }
 0x726   : > { %18629 = vmatmul.mubr.msk.f32.gmra.mrb[172].mxu0 %vm1772_vm1, %v18314_v60  ;;  %v18398_v31 = vpop.f32.mrb[128].mxu0 }
 0x727   : > { %v18317_v11 = vpop.f32.mrb[138].mxu1  ;;  %v9246_v32 = vpop.f32.mrb[129].mxu0 }
 0x728   : > { %v8991_v54 = vpop.f32.mrb[139].mxu1 }
 0x729   : > { %18631 = vmatprep.mubr.msk.f32.mxu0 %vm1772_vm1, %v8991_v54 }
 0x72a   : > { %18632 = vmatmul.mubr.msk.f32.gmra.mrb[174].mxu0 %vm1772_vm1, %v18317_v11  ;;  %v18401_v23 = vpop.f32.mrb[130].mxu0 }
 0x72b   : > { %v18320_v26 = vpop.f32.mrb[140].mxu1  ;;  %v9256_v42 = vpop.f32.mrb[131].mxu0 }
 0x72c   : > { %v9001_v20 = vpop.f32.mrb[141].mxu1 }
 0x72d   : > { %18634 = vmatprep.mubr.msk.f32.mxu0 %vm1772_vm1, %v9001_v20 }
 0x72e   : > { %18635 = vmatmul.mubr.msk.f32.gmra.mrb[176].mxu0 %vm1772_vm1, %v18320_v26  ;;  %v18404_v62 = vpop.f32.mrb[132].mxu0 }
 0x72f   : > { %v18323_v24 = vpop.f32.mrb[142].mxu1  ;;  %18637 = vmatprep.mubr.msk.f32.mxu0 %vm1772_vm1, %v9196_v22  ;;  %v9266_v15 = vpop.f32.mrb[133].mxu0 }
 0x730   : > { %v9011_v41 = vpop.f32.mrb[143].mxu1 }
 0x731   : > { %18539 = vmatprep.mubr.msk.f32.mxu1 %vm1772_vm1, %v9011_v41 }
 0x732   : > { %18540 = vmatmul.mubr.msk.f32.gmra.mrb[214].mxu1 %vm1772_vm1, %v18323_v24  ;;  %18638 = vmatmul.mubr.msk.f32.gmra.mrb[178].mxu0 %vm1772_vm1, %v18383_v8  ;;  %v18407_v29 = vpop.f32.mrb[134].mxu0 }
 0x733   : > { %v18326_v16 = vpop.f32.mrb[144].mxu1  ;;  %18640 = vmatprep.mubr.msk.f32.mxu0 %vm1772_vm1, %v9206_v44  ;;  %v9276_v21 = vpop.f32.mrb[135].mxu0 }
 0x734   : > { %v9021_v30 = vpop.f32.mrb[145].mxu1 }
 0x735   : > { %18542 = vmatprep.mubr.msk.f32.mxu1 %vm1772_vm1, %v9021_v30 }
 0x736   : > { %18543 = vmatmul.mubr.msk.f32.gmra.mrb[216].mxu1 %vm1772_vm1, %v18326_v16  ;;  %18641 = vmatmul.mubr.msk.f32.gmra.mrb[180].mxu0 %vm1772_vm1, %v18386_v63  ;;  %v18410_v34 = vpop.f32.mrb[136].mxu0 }
 0x737   : > { %v18329_v61 = vpop.f32.mrb[146].mxu1  ;;  %18643 = vmatprep.mubr.msk.f32.mxu0 %vm1772_vm1, %v9216_v52  ;;  %v9286_v27 = vpop.f32.mrb[137].mxu0 }
 0x738   : > { %v9031_v40 = vpop.f32.mrb[147].mxu1 }
 0x739   : > { %18545 = vmatprep.mubr.msk.f32.mxu1 %vm1772_vm1, %v9031_v40 }
 0x73a   : > { %18546 = vmatmul.mubr.msk.f32.gmra.mrb[218].mxu1 %vm1772_vm1, %v18329_v61  ;;  %18644 = vmatmul.mubr.msk.f32.gmra.mrb[182].mxu0 %vm1772_vm1, %v18389_v9  ;;  %v18413_v1 = vpop.f32.mrb[138].mxu0 }
 0x73b   : > { %v18332_v58 = vpop.f32.mrb[148].mxu1  ;;  %18646 = vmatprep.mubr.msk.f32.mxu0 %vm1772_vm1, %v9226_v37  ;;  %v9296_v28 = vpop.f32.mrb[139].mxu0 }
 0x73c   : > { %v9041_v48 = vpop.f32.mrb[149].mxu1 }
 0x73d   : > { %18548 = vmatprep.mubr.msk.f32.mxu1 %vm1772_vm1, %v9041_v48 }
 0x73e   : > { %18549 = vmatmul.mubr.msk.f32.gmra.mrb[220].mxu1 %vm1772_vm1, %v18332_v58  ;;  %18647 = vmatmul.mubr.msk.f32.gmra.mrb[184].mxu0 %vm1772_vm1, %v18392_v36  ;;  %v18416_v13 = vpop.f32.mrb[140].mxu0 }
 0x73f   : > { %v18335_v12 = vpop.f32.mrb[150].mxu1  ;;  %18649 = vmatprep.mubr.msk.f32.mxu0 %vm1772_vm1, %v9236_v33  ;;  %v9306_v25 = vpop.f32.mrb[141].mxu0 }
 0x740   : > { %v9051_v18 = vpop.f32.mrb[151].mxu1 }
 0x741   : > { %18551 = vmatprep.mubr.msk.f32.mxu1 %vm1772_vm1, %v9051_v18 }
 0x742   : > { %18552 = vmatmul.mubr.msk.f32.gmra.mrb[222].mxu1 %vm1772_vm1, %v18335_v12  ;;  %18650 = vmatmul.mubr.msk.f32.gmra.mrb[186].mxu0 %vm1772_vm1, %v18395_v19  ;;  %v23468_v14 = vpop.f32.mrb[142].mxu0 }
 0x743   : > { %v18338_v8 = vpop.f32.mrb[152].mxu1  ;;  %18652 = vmatprep.mubr.msk.f32.mxu0 %vm1772_vm1, %v9246_v32  ;;  %v23471_v22 = vpop.f32.mrb[143].mxu0 }
 0x744   : > { %v9061_v63 = vpop.f32.mrb[153].mxu1 }
 0x745   : > { %18554 = vmatprep.mubr.msk.f32.mxu1 %vm1772_vm1, %v9061_v63 }
 0x746   : > { %18555 = vmatmul.mubr.msk.f32.gmra.mrb[224].mxu1 %vm1772_vm1, %v18338_v8  ;;  %18653 = vmatmul.mubr.msk.f32.gmra.mrb[188].mxu0 %vm1772_vm1, %v18398_v31  ;;  %v23476_v45 = vpop.f32.mrb[144].mxu0  ;;  %v23615_v8 = vld [vmem:[%s20538_s10 + $0x20] sm:$0xff] }
 0x747   : > { %v23478_v44 = vpop.f32.mrb[154].mxu1  ;;  %18557 = vmatprep.mubr.msk.f32.mxu1 %vm1772_vm1, %v9256_v42  ;;  %v23481_v50 = vpop.f32.mrb[145].mxu0 }
 0x748   : > { %v23483_v9 = vpop.f32.mrb[155].mxu1 }
 0x74a   : > { %18558 = vmatmul.mubr.msk.f32.gmra.mrb[226].mxu1 %vm1772_vm1, %v18401_v23  ;;  %v23486_v57 = vpop.f32.mrb[146].mxu0 }
 0x74b   : > { %v23488_v52 = vpop.f32.mrb[156].mxu1  ;;  %18560 = vmatprep.mubr.msk.f32.mxu1 %vm1772_vm1, %v9266_v15  ;;  %v23491_v49 = vpop.f32.mrb[147].mxu0 }
 0x74c   : > { %v23493_v36 = vpop.f32.mrb[157].mxu1 }
 0x74e   : > { %18561 = vmatmul.mubr.msk.f32.gmra.mrb[228].mxu1 %vm1772_vm1, %v18404_v62  ;;  %v23496_v59 = vpop.f32.mrb[148].mxu0 }
 0x74f   : > { %v23498_v37 = vpop.f32.mrb[158].mxu1  ;;  %18563 = vmatprep.mubr.msk.f32.mxu1 %vm1772_vm1, %v9276_v21  ;;  %v23501_v38 = vpop.f32.mrb[149].mxu0 }
 0x750   : > { %v23503_v19 = vpop.f32.mrb[159].mxu1 }
 0x752   : > { %18564 = vmatmul.mubr.msk.f32.gmra.mrb[230].mxu1 %vm1772_vm1, %v18407_v29  ;;  %v23506_v60 = vpop.f32.mrb[150].mxu0 }
 0x753   : > { %v23508_v33 = vpop.f32.mrb[160].mxu1  ;;  %18566 = vmatprep.mubr.msk.f32.mxu1 %vm1772_vm1, %v9286_v27  ;;  %v23511_v55 = vpop.f32.mrb[151].mxu0 }
 0x754   : > { %v23513_v31 = vpop.f32.mrb[161].mxu1 }
 0x756   : > { %18567 = vmatmul.mubr.msk.f32.gmra.mrb[232].mxu1 %vm1772_vm1, %v18410_v34  ;;  %v23516_v11 = vpop.f32.mrb[152].mxu0 }
 0x757   : > { %v23518_v32 = vpop.f32.mrb[162].mxu1  ;;  %18569 = vmatprep.mubr.msk.f32.mxu1 %vm1772_vm1, %v9296_v28  ;;  %v23521_v54 = vpop.f32.mrb[153].mxu0 }
 0x758   : > { %v23523_v23 = vpop.f32.mrb[163].mxu1 }
 0x75a   : > { %18570 = vmatmul.mubr.msk.f32.gmra.mrb[234].mxu1 %vm1772_vm1, %v18413_v1 }
 0x75b   : > { %v23526_v26 = vpop.f32.mrb[164].mxu1  ;;  %18572 = vmatprep.mubr.msk.f32.mxu1 %vm1772_vm1, %v9306_v25  ;;  %v26627_v25 = vld [vmem:[#allocation125_spill] sm:$0xff] }
 0x75c   : > { %v23529_v42 = vpop.f32.mrb[165].mxu1 }
 0x75e   : > { %18573 = vmatmul.mubr.msk.f32.gmra.mrb[236].mxu1 %vm1772_vm1, %v18416_v13  ;;  %v23595_v13 = vld [vmem:[%s20538_s10 + $0x10] sm:$0xff] }
 0x75f   : > { %v18461_v20 = vpop.f32.mrb[166].mxu1 }
 0x760   : > { %v9441_v62 = vpop.f32.mrb[167].mxu1 }
 0x761   : > { %18655 = vmatprep.mubr.msk.f32.mxu0 %vm1772_vm1, %v9441_v62 }
 0x762   : > { %18656 = vmatmul.mubr.msk.f32.gmra.mrb[190].mxu0 %vm1772_vm1, %v18461_v20  ;;  %v26629_v20 = vld [vmem:[#allocation127_spill] sm:$0xff] }
 0x763   : > { %v18464_v24 = vpop.f32.mrb[168].mxu1 }
 0x764   : > { %v9451_v15 = vpop.f32.mrb[169].mxu1 }
 0x765   : > { %18658 = vmatprep.mubr.msk.f32.mxu0 %vm1772_vm1, %v9451_v15  ;;  %v26630_v15 = vld [vmem:[#allocation79_spill] sm:$0xff] }
 0x766   : > { %18659 = vmatmul.mubr.msk.f32.gmra.mrb[192].mxu0 %vm1772_vm1, %v18464_v24 }
 0x767   : > { %v18467_v41 = vpop.f32.mrb[170].mxu1 }
 0x768   : > { %v9461_v29 = vpop.f32.mrb[171].mxu1 }
 0x769   : > { %18661 = vmatprep.mubr.msk.f32.mxu0 %vm1772_vm1, %v9461_v29 }
 0x76a   : > { %18662 = vmatmul.mubr.msk.f32.gmra.mrb[194].mxu0 %vm1772_vm1, %v18467_v41 }
 0x76b   : > { %v18470_v16 = vpop.f32.mrb[172].mxu1 }
 0x76c   : > { %v9471_v21 = vpop.f32.mrb[173].mxu1 }
 0x76d   : > { %18664 = vmatprep.mubr.msk.f32.mxu0 %vm1772_vm1, %v9471_v21  ;;  %v23695_v21 = vld [vmem:[%s20538_s10 + $0x60] sm:$0xff] }
 0x76e   : > { %18665 = vmatmul.mubr.msk.f32.gmra.mrb[196].mxu0 %vm1772_vm1, %v18470_v16  ;;  %v26631_v16 = vld [vmem:[#allocation81_spill] sm:$0xff] }
 0x76f   : > { %v18473_v30 = vpop.f32.mrb[174].mxu1 }
 0x770   : > { %v9481_v34 = vpop.f32.mrb[175].mxu1 }
 0x771   : > { %18667 = vmatprep.mubr.msk.f32.mxu0 %vm1772_vm1, %v9481_v34  ;;  %v23711_v34 = vld [vmem:[%s20538_s10 + $0x70] sm:$0xff] }
 0x772   : > { %18668 = vmatmul.mubr.msk.f32.gmra.mrb[198].mxu0 %vm1772_vm1, %v18473_v30  ;;  %v26632_v30 = vld [vmem:[#allocation84_spill] sm:$0xff] }
 0x773   : > { %v18476_v61 = vpop.f32.mrb[176].mxu1 }
 0x774   : > { %v9491_v27 = vpop.f32.mrb[177].mxu1 }
 0x775   : > { %18670 = vmatprep.mubr.msk.f32.mxu0 %vm1772_vm1, %v9491_v27 }
 0x776   : > { %18671 = vmatmul.mubr.msk.f32.gmra.mrb[200].mxu0 %vm1772_vm1, %v18476_v61 }
 0x777   : > { %v18479_v40 = vpop.f32.mrb[178].mxu1  ;;  %18681 = vmatprep.mubr.msk.f32.mxu0 %vm1772_vm1, %v23414_v47 }
 0x778   : > { %v9501_v1 = vpop.f32.mrb[179].mxu1 }
 0x779   : > { %18575 = vmatprep.mubr.msk.f32.mxu1 %vm1772_vm1, %v9501_v1 }
 0x77a   : > { %18576 = vmatmul.mubr.msk.f32.gmra.mrb[238].mxu1 %vm1772_vm1, %v18479_v40  ;;  %18682 = vmatmul.mubr.msk.f32.vlgmr.msra.gmra.mrb[154].mxu0 %vm1772_vm1, %v23412_v53 }
 0x77b   : > { %v18482_v58 = vpop.f32.mrb[180].mxu1  ;;  %18684 = vmatprep.mubr.msk.f32.mxu0 %vm1772_vm1, %v23418_v17 }
 0x77c   : > { %v9511_v28 = vpop.f32.mrb[181].mxu1 }
 0x77d   : > { %18578 = vmatprep.mubr.msk.f32.mxu1 %vm1772_vm1, %v9511_v28 }
 0x77e   : > { %18579 = vmatmul.mubr.msk.f32.gmra.mrb[240].mxu1 %vm1772_vm1, %v18482_v58  ;;  %18685 = vmatmul.mubr.msk.f32.gmra.mrb[156].mxu0 %vm1772_vm1, %v23416_v2  ;;  %v23817_v58 = vld [vmem:[%s20538_s10 + $0xe0] sm:$0xff] }
 0x77f   : > { %v18485_v47 = vpop.f32.mrb[182].mxu1  ;;  %18687 = vmatprep.mubr.msk.f32.mxu0 %vm1772_vm1, %v23422_v39 }
 0x780   : > { %v9521_v48 = vpop.f32.mrb[183].mxu1 }
 0x781   : > { %18581 = vmatprep.mubr.msk.f32.mxu1 %vm1772_vm1, %v9521_v48  ;;  %v23832_v48 = vld [vmem:[%s20538_s10 + $0xe8] sm:$0xff] }
 0x782   : > { %18582 = vmatmul.mubr.msk.f32.gmra.mrb[242].mxu1 %vm1772_vm1, %v18485_v47  ;;  %18688 = vmatmul.mubr.msk.f32.gmra.mrb[158].mxu0 %vm1772_vm1, %v23420_v5 }
 0x783   : > { %v18488_v53 = vpop.f32.mrb[184].mxu1  ;;  %18690 = vmatprep.mubr.msk.f32.mxu0 %vm1772_vm1, %v23426_v3  ;;  %v23577_v3 = vld [vmem:[%s20538_s10] sm:$0xff] }
 0x784   : > { %v9531_v17 = vpop.f32.mrb[185].mxu1 }
 0x785   : > { %18584 = vmatprep.mubr.msk.f32.mxu1 %vm1772_vm1, %v9531_v17 }
 0x786   : > { %18585 = vmatmul.mubr.msk.f32.gmra.mrb[244].mxu1 %vm1772_vm1, %v18488_v53  ;;  %18691 = vmatmul.mubr.msk.f32.gmra.mrb[160].mxu0 %vm1772_vm1, %v23424_v56  ;;  %v23835_v53 = vld [vmem:[%s20538_s10 + $0xf0] sm:$0xff] }
 0x787   : > { %v18491_v2 = vpop.f32.mrb[186].mxu1  ;;  %18693 = vmatprep.mubr.msk.f32.mxu0 %vm1772_vm1, %v23430_v10 }
 0x788   : > { %v9541_v39 = vpop.f32.mrb[187].mxu1 }
 0x789   : > { %18587 = vmatprep.mubr.msk.f32.mxu1 %vm1772_vm1, %v9541_v39 }
 0x78a   : > { %18588 = vmatmul.mubr.msk.f32.gmra.mrb[246].mxu1 %vm1772_vm1, %v18491_v2  ;;  %18694 = vmatmul.mubr.msk.f32.gmra.mrb[162].mxu0 %vm1772_vm1, %v23428_v7  ;;  %v23588_v7 = vld [vmem:[%s20538_s10 + $0x8] sm:$0xff]  ;;  %v23848_v2 = vld [vmem:[%s20538_s10 + $0xf8] sm:$0xff] }
 0x78b   : > { %v18494_v5 = vpop.f32.mrb[188].mxu1  ;;  %18696 = vmatprep.mubr.msk.f32.mxu0 %vm1772_vm1, %v23434_v0 }
 0x78c   : > { %v9551_v56 = vpop.f32.mrb[189].mxu1 }
 0x78d   : > { %18590 = vmatprep.mubr.msk.f32.mxu1 %vm1772_vm1, %v9551_v56 }
 0x78e   : > { %18591 = vmatmul.mubr.msk.f32.gmra.mrb[248].mxu1 %vm1772_vm1, %v18494_v5  ;;  %18697 = vmatmul.mubr.msk.f32.gmra.mrb[164].mxu0 %vm1772_vm1, %v23432_v4  ;;  %v23605_v4 = vld [vmem:[%s20538_s10 + $0x18] sm:$0xff]  ;;  %v23853_v5 = vld [vmem:[%s20538_s10 + $0x100] sm:$0xff] }
 0x78f   : > { %18699 = vmatprep.mubr.msk.f32.mxu0 %vm1772_vm1, %v23483_v9  ;;  %18777 = vmatprep.mubr.msk.f32.mxu1 %vm8531_vm4, %v23577_v3  ;;  %v23590_v10 = vpop.f32.mrb[190].mxu1 }
 0x790   : > { %v23592_v0 = vpop.f32.mrb[191].mxu1 }
 0x792   : > { %18700 = vmatmul.mubr.msk.f32.gmra.mrb[166].mxu0 %vm1772_vm1, %v23478_v44  ;;  %18778 = vmatmul.mubr.msk.f32.vlgmr.msra.gmra.mrb[250].mxu1 %vm8531_vm4, %v23588_v7  ;;  %v26628_v44 = vld [vmem:[#allocation126_spill] sm:$0xff] }
 0x793   : > { %19490 = vmatpush3.bf16.msra.mxu1 %v26626_v6  ;;  %18702 = vmatprep.mubr.msk.f32.mxu0 %vm1772_vm1, %v23493_v36  ;;  %v23607_v12 = vpop.f32.mrb[192].mxu1  ;;  %v23625_v6 = vld [vmem:[%s20538_s10 + $0x28] sm:$0xff]  ;;  %v23645_v36 = vld [vmem:[%s20538_s10 + $0x38] sm:$0xff] }
 0x794   : > { %19492 = vmatprep.subr.bf16.mxu1 %v26627_v25  ;;  %18780 = vmatprep.mubr.msk.f32.mxu1 %vm8531_vm4, %v23595_v13  ;;  %v23612_v18 = vpop.f32.mrb[193].mxu1 }
 0x796   : > { %18703 = vmatmul.mubr.msk.f32.gmra.mrb[168].mxu0 %vm1772_vm1, %v23488_v52  ;;  %18781 = vmatmul.mubr.msk.f32.gmra.mrb[252].mxu1 %vm8531_vm4, %v23605_v4  ;;  %v23635_v52 = vld [vmem:[%s20538_s10 + $0x30] sm:$0xff] }
 0x797   : > { %19494 = vmatpush3.bf16.msra.mxu1 %v26627_v25  ;;  %18705 = vmatprep.mubr.msk.f32.mxu0 %vm1772_vm1, %v23503_v19  ;;  %v23627_v63 = vpop.f32.mrb[194].mxu1 }
 0x798   : > { %19496 = vmatprep.subr.bf16.mxu1 %v26628_v44  ;;  %18783 = vmatprep.mubr.msk.f32.mxu1 %vm8531_vm4, %v23615_v8  ;;  %v23632_v9 = vpop.f32.mrb[195].mxu1 }
 0x79a   : > { %18706 = vmatmul.mubr.msk.f32.gmra.mrb[170].mxu0 %vm1772_vm1, %v23498_v37  ;;  %18784 = vmatmul.mubr.msk.f32.gmra.mrb[254].mxu1 %vm8531_vm4, %v23625_v6  ;;  %v23655_v37 = vld [vmem:[%s20538_s10 + $0x40] sm:$0xff] }
 0x79b   : > { %19498 = vmatpush3.bf16.msra.mxu1 %v26628_v44  ;;  %18708 = vmatprep.mubr.msk.f32.mxu0 %vm1772_vm1, %v23513_v31  ;;  %v23647_v19 = vpop.f32.mrb[196].mxu1  ;;  %v23665_v31 = vld [vmem:[%s20538_s10 + $0x48] sm:$0xff]  ;;  %v26636_v44 = vld [vmem:[#allocation86_spill] sm:$0xff] }
 0x79c   : > { %19500 = vmatprep.subr.bf16.mxu1 %v26629_v20  ;;  %18786 = vmatprep.mubr.msk.f32.mxu1 %vm8531_vm4, %v23635_v52  ;;  %v23652_v62 = vpop.f32.mrb[197].mxu1 }
 0x79e   : > { %18709 = vmatmul.mubr.msk.f32.gmra.mrb[172].mxu0 %vm1772_vm1, %v23508_v33  ;;  %18787 = vmatmul.mubr.msk.f32.gmra.mrb[0].mxu1 %vm8531_vm4, %v23645_v36  ;;  %v23675_v33 = vld [vmem:[%s20538_s10 + $0x50] sm:$0xff] }
 0x79f   : > { %19502 = vmatpush3.bf16.msra.mxu1 %v26629_v20  ;;  %18711 = vmatprep.mubr.msk.f32.mxu0 %vm1772_vm1, %v23523_v23  ;;  %v23667_v24 = vpop.f32.mrb[198].mxu1  ;;  %v23685_v23 = vld [vmem:[%s20538_s10 + $0x58] sm:$0xff]  ;;  %v26639_v20 = vld [vmem:[#allocation93_spill] sm:$0xff] }
 0x7a0   : > { %19504 = vmatprep.subr.bf16.mxu1 %v26630_v15  ;;  %18789 = vmatprep.mubr.msk.f32.mxu1 %vm8531_vm4, %v23655_v37  ;;  %v23672_v41 = vpop.f32.mrb[199].mxu1 }
 0x7a2   : > { %18712 = vmatmul.mubr.msk.f32.gmra.mrb[174].mxu0 %vm1772_vm1, %v23518_v32  ;;  %18790 = vmatmul.mubr.msk.f32.gmra.mrb[2].mxu1 %vm8531_vm4, %v23665_v31 }
 0x7a3   : > { %19506 = vmatpush3.bf16.msra.mxu1 %v26630_v15  ;;  %18714 = vmatprep.mubr.msk.f32.mxu0 %vm1772_vm1, %v23529_v42  ;;  %v23687_v29 = vpop.f32.mrb[200].mxu1  ;;  %v23705_v42 = vld [vmem:[%s20538_s10 + $0x68] sm:$0xff] }
 0x7a4   : > { %19508 = vmatprep.subr.bf16.mxu1 %v26631_v16  ;;  %18792 = vmatprep.mubr.msk.f32.mxu1 %vm8531_vm4, %v23675_v33  ;;  %v23692_v32 = vpop.f32.mrb[201].mxu1 }
 0x7a6   : > { %18715 = vmatmul.mubr.msk.f32.gmra.mrb[176].mxu0 %vm1772_vm1, %v23526_v26  ;;  %18793 = vmatmul.mubr.msk.f32.gmra.mrb[4].mxu1 %vm8531_vm4, %v23685_v23  ;;  %v23725_v26 = vld [vmem:[%s20538_s10 + $0x80] sm:$0xff] }
 0x7a7   : > { %19510 = vmatpush3.bf16.msra.mxu1 %v26631_v16  ;;  %18717 = vmatprep.mubr.msk.f32.mxu0 %vm1772_vm1, %v23471_v22  ;;  %v23722_v22 = vld [vmem:[%s20538_s10 + $0x78] sm:$0xff] }
 0x7a8   : > { %19512 = vmatprep.subr.bf16.mxu1 %v26632_v30  ;;  %18795 = vmatprep.mubr.msk.f32.mxu1 %vm8531_vm4, %v23695_v21 }
 0x7aa   : > { %18718 = vmatmul.mubr.msk.f32.gmra.mrb[178].mxu0 %vm1772_vm1, %v23468_v14  ;;  %18796 = vmatmul.mubr.msk.f32.gmra.mrb[6].mxu1 %vm8531_vm4, %v23705_v42  ;;  %v23736_v14 = vld [vmem:[%s20538_s10 + $0x88] sm:$0xff] }
 0x7ab   : > { %18720 = vmatprep.mubr.msk.f32.mxu0 %vm1772_vm1, %v23481_v50  ;;  %18798 = vmatprep.mubr.msk.f32.mxu1 %vm8531_vm4, %v23711_v34  ;;  %v23739_v50 = vld [vmem:[%s20538_s10 + $0x90] sm:$0xff] }
 0x7ac   : > { %26633 = vst [vmem:[#allocation78_spill] sm:$0xff] %v23739_v50 }
 0x7ae   : > { %18721 = vmatmul.mubr.msk.f32.gmra.mrb[180].mxu0 %vm1772_vm1, %v23476_v45  ;;  %18799 = vmatmul.mubr.msk.f32.gmra.mrb[8].mxu1 %vm8531_vm4, %v23722_v22  ;;  %v23750_v45 = vld [vmem:[%s20538_s10 + $0x98] sm:$0xff] }
 0x7af   : > { %18723 = vmatprep.mubr.msk.f32.mxu0 %vm1772_vm1, %v23491_v49  ;;  %18801 = vmatprep.mubr.msk.f32.mxu1 %vm8531_vm4, %v23725_v26  ;;  %26634 = vst [vmem:[#allocation83_spill] sm:$0xff] %v23750_v45  ;;  %v23753_v49 = vld [vmem:[%s20538_s10 + $0xa0] sm:$0xff] }
 0x7b0   : > { %26635 = vst [vmem:[#allocation92_spill] sm:$0xff] %v23753_v49 }
 0x7b2   : > { %18724 = vmatmul.mubr.msk.f32.gmra.mrb[182].mxu0 %vm1772_vm1, %v23486_v57  ;;  %18802 = vmatmul.mubr.msk.f32.gmra.mrb[10].mxu1 %vm8531_vm4, %v23736_v14  ;;  %v23764_v57 = vld [vmem:[%s20538_s10 + $0xa8] sm:$0xff] }
 0x7b3   : > { %18726 = vmatprep.mubr.msk.f32.mxu0 %vm1772_vm1, %v23501_v38  ;;  %18804 = vmatprep.mubr.msk.f32.mxu1 %vm8531_vm4, %v23739_v50  ;;  %v23767_v38 = vld [vmem:[%s20538_s10 + $0xb0] sm:$0xff] }
 0x7b6   : > { %18727 = vmatmul.mubr.msk.f32.gmra.mrb[184].mxu0 %vm1772_vm1, %v23496_v59  ;;  %18805 = vmatmul.mubr.msk.f32.gmra.mrb[12].mxu1 %vm8531_vm4, %v23750_v45  ;;  %v23778_v59 = vld [vmem:[%s20538_s10 + $0xb8] sm:$0xff] }
 0x7b7   : > { %18729 = vmatprep.mubr.msk.f32.mxu0 %vm1772_vm1, %v23511_v55  ;;  %18807 = vmatprep.mubr.msk.f32.mxu1 %vm8531_vm4, %v23753_v49  ;;  %v23781_v55 = vld [vmem:[%s20538_s10 + $0xc0] sm:$0xff] }
 0x7ba   : > { %18730 = vmatmul.mubr.msk.f32.gmra.mrb[186].mxu0 %vm1772_vm1, %v23506_v60  ;;  %18808 = vmatmul.mubr.msk.f32.gmra.mrb[14].mxu1 %vm8531_vm4, %v23764_v57  ;;  %v23796_v60 = vld [vmem:[%s20538_s10 + $0xc8] sm:$0xff] }
 0x7bb   : > { %18732 = vmatprep.mubr.msk.f32.mxu0 %vm1772_vm1, %v23521_v54  ;;  %18810 = vmatprep.mubr.msk.f32.mxu1 %vm8531_vm4, %v23767_v38  ;;  %v23799_v54 = vld [vmem:[%s20538_s10 + $0xd0] sm:$0xff] }
 0x7bc   : > { %v23783_v61 = vpop.f32.mrb[202].mxu1 }
 0x7bd   : > { %v23785_v27 = vpop.f32.mrb[203].mxu1 }
 0x7be   : > { %18733 = vmatmul.mubr.msk.f32.gmra.mrb[188].mxu0 %vm1772_vm1, %v23516_v11  ;;  %18811 = vmatmul.mubr.msk.f32.gmra.mrb[16].mxu1 %vm8531_vm4, %v23778_v59  ;;  %v23814_v11 = vld [vmem:[%s20538_s10 + $0xd8] sm:$0xff] }
 0x7bf   : > { %18735 = vmatprep.mubr.msk.f32.mxu0 %vm1772_vm1, %v23592_v0  ;;  %18813 = vmatprep.mubr.msk.f32.mxu1 %vm8531_vm4, %v23781_v55 }
 0x7c0   : > { %v23801_v40 = vpop.f32.mrb[204].mxu1 }
 0x7c1   : > { %v23803_v1 = vpop.f32.mrb[205].mxu1 }
 0x7c2   : > { %18736 = vmatmul.mubr.msk.f32.gmra.mrb[190].mxu0 %vm1772_vm1, %v23590_v10  ;;  %18814 = vmatmul.mubr.msk.f32.gmra.mrb[18].mxu1 %vm8531_vm4, %v23796_v60  ;;  %v23866_v10 = vld [vmem:[%s20538_s10 + $0x108] sm:$0xff] }
 0x7c3   : > { %18738 = vmatprep.mubr.msk.f32.mxu0 %vm1772_vm1, %v23612_v18  ;;  %18816 = vmatprep.mubr.msk.f32.mxu1 %vm8531_vm4, %v23799_v54  ;;  %v23884_v18 = vld [vmem:[%s20538_s10 + $0x118] sm:$0xff] }
 0x7c4   : > { %v23819_v28 = vpop.f32.mrb[206].mxu1 }
 0x7c5   : > { %v23821_v47 = vpop.f32.mrb[207].mxu1 }
 0x7c6   : > { %18739 = vmatmul.mubr.msk.f32.gmra.mrb[192].mxu0 %vm1772_vm1, %v23607_v12  ;;  %18817 = vmatmul.mubr.msk.f32.gmra.mrb[20].mxu1 %vm8531_vm4, %v23814_v11  ;;  %v23871_v12 = vld [vmem:[%s20538_s10 + $0x110] sm:$0xff] }
 0x7c7   : > { %18741 = vmatprep.mubr.msk.f32.mxu0 %vm1772_vm1, %v23632_v9  ;;  %18819 = vmatprep.mubr.msk.f32.mxu1 %vm8531_vm4, %v23817_v58  ;;  %v26637_v9 = vld [vmem:[#allocation88_spill] sm:$0xff] }
 0x7ca   : > { %18742 = vmatmul.mubr.msk.f32.gmra.mrb[194].mxu0 %vm1772_vm1, %v23627_v63  ;;  %18820 = vmatmul.mubr.msk.f32.gmra.mrb[22].mxu1 %vm8531_vm4, %v23832_v48  ;;  %v23841_v17 = vpop.f32.mrb[208].mxu1 }
 0x7cb   : > { %18744 = vmatprep.mubr.msk.f32.mxu0 %vm1772_vm1, %v23652_v62  ;;  %18822 = vmatprep.mubr.msk.f32.mxu1 %vm8531_vm4, %v23835_v53  ;;  %v23850_v39 = vpop.f32.mrb[209].mxu1  ;;  %v26640_v62 = vld [vmem:[#allocation95_spill] sm:$0xff] }
 0x7ce   : > { %18745 = vmatmul.mubr.msk.f32.gmra.mrb[196].mxu0 %vm1772_vm1, %v23647_v19  ;;  %18823 = vmatmul.mubr.msk.f32.gmra.mrb[24].mxu1 %vm8531_vm4, %v23848_v2  ;;  %v23859_v56 = vpop.f32.mrb[210].mxu1  ;;  %v26638_v19 = vld [vmem:[#allocation90_spill] sm:$0xff] }
 0x7cf   : > { %18747 = vmatprep.mubr.msk.f32.mxu0 %vm1772_vm1, %v23672_v41  ;;  %18825 = vmatprep.mubr.msk.f32.mxu1 %vm8531_vm4, %v23853_v5  ;;  %v23868_v0 = vpop.f32.mrb[211].mxu1 }
 0x7d2   : > { %18748 = vmatmul.mubr.msk.f32.gmra.mrb[198].mxu0 %vm1772_vm1, %v23667_v24  ;;  %18826 = vmatmul.mubr.msk.f32.gmra.mrb[26].mxu1 %vm8531_vm4, %v23866_v10  ;;  %v23877_v25 = vpop.f32.mrb[212].mxu1  ;;  %v26641_v24 = vld [vmem:[#allocation98_spill] sm:$0xff] }
 0x7d3   : > { %18750 = vmatprep.mubr.msk.f32.mxu0 %vm1772_vm1, %v23692_v32  ;;  %18828 = vmatprep.mubr.msk.f32.mxu1 %vm8531_vm4, %v23871_v12  ;;  %v23886_v63 = vpop.f32.mrb[213].mxu1 }
 0x7d6   : > { %18751 = vmatmul.mubr.msk.f32.gmra.mrb[200].mxu0 %vm1772_vm1, %v23687_v29  ;;  %18829 = vmatmul.mubr.msk.f32.gmra.mrb[28].mxu1 %vm8531_vm4, %v23884_v18 }
 0x7d7   : > { %18855 = vmatprep.mubr.msk.f32.mxu1 %vm8531_vm4, %v23577_v3 }
 0x7da   : > { %18856 = vmatmul.mubr.msk.f32.vlgmr.msra.gmra.mrb[30].mxu1 %vm8531_vm4, %v23588_v7 }
 0x7db   : > { %19514 = vmatpush3.bf16.msra.mxu1 %v26632_v30  ;;  %18858 = vmatprep.mubr.msk.f32.mxu1 %vm8531_vm4, %v23595_v13 }
 0x7dc   : > { %19516 = vmatprep.subr.bf16.mxu1 %v26636_v44 }
 0x7de   : > { %18859 = vmatmul.mubr.msk.f32.gmra.mrb[32].mxu1 %vm8531_vm4, %v23605_v4 }
 0x7df   : > { %19518 = vmatpush3.bf16.msra.mxu1 %v26636_v44  ;;  %18861 = vmatprep.mubr.msk.f32.mxu1 %vm8531_vm4, %v23615_v8  ;;  %v12354_v44 = vld [vmem:[%s20548_s15 + $0x20] sm:$0xff] }
 0x7e0   : > { %19520 = vmatprep.subr.bf16.mxu1 %v26637_v9 }
 0x7e2   : > { %18862 = vmatmul.mubr.msk.f32.gmra.mrb[34].mxu1 %vm8531_vm4, %v23625_v6 }
 0x7e3   : > { %19522 = vmatpush3.bf16.msra.mxu1 %v26637_v9  ;;  %18864 = vmatprep.mubr.msk.f32.mxu1 %vm8531_vm4, %v23635_v52  ;;  %v12355_v9 = vld [vmem:[%s20548_s15 + $0x28] sm:$0xff] }
 0x7e4   : > { %19524 = vmatprep.subr.bf16.mxu1 %v26638_v19 }
 0x7e6   : > { %18865 = vmatmul.mubr.msk.f32.gmra.mrb[36].mxu1 %vm8531_vm4, %v23645_v36 }
 0x7e7   : > { %19526 = vmatpush3.bf16.msra.mxu1 %v26638_v19  ;;  %18867 = vmatprep.mubr.msk.f32.mxu1 %vm8531_vm4, %v23655_v37  ;;  %v19559_v19 = vpack.c.bf16 %v12355_v9, %v12354_v44 }
 0x7e8   : > { %19528 = vmatprep.subr.bf16.mxu1 %v26639_v20 }
 0x7e9   : > { %19560 = vmatprep.subr.bf16.mxu0 %v19559_v19 }
 0x7ea   : > { %18868 = vmatmul.mubr.msk.f32.gmra.mrb[38].mxu1 %vm8531_vm4, %v23665_v31  ;;  %19562 = vmatpush3.bf16.msra.mxu0 %v19559_v19 }
 0x7eb   : > { %19530 = vmatpush3.bf16.msra.mxu1 %v26639_v20  ;;  %18870 = vmatprep.mubr.msk.f32.mxu1 %vm8531_vm4, %v23675_v33 }
 0x7ec   : > { %19532 = vmatprep.subr.bf16.mxu1 %v26640_v62 }
 0x7ee   : > { %18871 = vmatmul.mubr.msk.f32.gmra.mrb[40].mxu1 %vm8531_vm4, %v23685_v23 }
 0x7ef   : > { %19534 = vmatpush3.bf16.msra.mxu1 %v26640_v62  ;;  %18873 = vmatprep.mubr.msk.f32.mxu1 %vm8531_vm4, %v23695_v21 }
 0x7f0   : > { %19536 = vmatprep.subr.bf16.mxu1 %v26641_v24 }
 0x7f2   : > { %18874 = vmatmul.mubr.msk.f32.gmra.mrb[42].mxu1 %vm8531_vm4, %v23705_v42 }
 0x7f3   : > { %18876 = vmatprep.mubr.msk.f32.mxu1 %vm8531_vm4, %v23711_v34 }
 0x7f6   : > { %18877 = vmatmul.mubr.msk.f32.gmra.mrb[44].mxu1 %vm8531_vm4, %v23722_v22 }
 0x7f7   : > { %18879 = vmatprep.mubr.msk.f32.mxu1 %vm8531_vm4, %v23725_v26 }
 0x7fa   : > { %18880 = vmatmul.mubr.msk.f32.gmra.mrb[46].mxu1 %vm8531_vm4, %v23736_v14 }
 0x7fb   : > { %18882 = vmatprep.mubr.msk.f32.mxu1 %vm8531_vm4, %v23739_v50 }
 0x7fe   : > { %18883 = vmatmul.mubr.msk.f32.gmra.mrb[48].mxu1 %vm8531_vm4, %v23750_v45 }
 0x7ff   : > { %18885 = vmatprep.mubr.msk.f32.mxu1 %vm8531_vm4, %v23753_v49 }
 0x802   : > { %18886 = vmatmul.mubr.msk.f32.gmra.mrb[50].mxu1 %vm8531_vm4, %v23764_v57 }
 0x803   : > { %18888 = vmatprep.mubr.msk.f32.mxu1 %vm8531_vm4, %v23767_v38 }
 0x805   : > { %v23950_v15 = vpop.f32.mrb[214].mxu1 }
 0x806   : > { %18889 = vmatmul.mubr.msk.f32.gmra.mrb[52].mxu1 %vm8531_vm4, %v23778_v59  ;;  %v23954_v41 = vpop.f32.mrb[215].mxu1 }
 0x807   : > { %18891 = vmatprep.mubr.msk.f32.mxu1 %vm8531_vm4, %v23781_v55 }
 0x809   : > { %v23958_v29 = vpop.f32.mrb[216].mxu1 }
 0x80a   : > { %18892 = vmatmul.mubr.msk.f32.gmra.mrb[54].mxu1 %vm8531_vm4, %v23796_v60  ;;  %v23962_v16 = vpop.f32.mrb[217].mxu1 }
 0x80b   : > { %26642 = vst [vmem:[#allocation103_spill] sm:$0xff] %v23962_v16  ;;  %18894 = vmatprep.mubr.msk.f32.mxu1 %vm8531_vm4, %v23799_v54 }
 0x80d   : > { %v23966_v32 = vpop.f32.mrb[218].mxu1 }
 0x80e   : > { %26643 = vst [vmem:[#allocation133_spill] sm:$0xff] %v23966_v32  ;;  %18895 = vmatmul.mubr.msk.f32.gmra.mrb[56].mxu1 %vm8531_vm4, %v23814_v11  ;;  %v23970_v30 = vpop.f32.mrb[219].mxu1 }
 0x80f   : > { %26644 = vst [vmem:[#allocation18_spill] sm:$0xff] %v23970_v30  ;;  %18897 = vmatprep.mubr.msk.f32.mxu1 %vm8531_vm4, %v23817_v58  ;;  %v12357_v30 = vld [vmem:[%s20548_s15 + $0x38] sm:$0xff] }
 0x810   : > { %v19563_v32 = vpack.c.bf16 %v12357_v30, %v12356_v43 }
 0x811   : > { %v23976_v20 = vpop.f32.mrb[220].mxu1 }
 0x812   : > { %18898 = vmatmul.mubr.msk.f32.gmra.mrb[58].mxu1 %vm8531_vm4, %v23832_v48  ;;  %v23980_v62 = vpop.f32.mrb[221].mxu1  ;;  %19564 = vmatprep.subr.bf16.mxu0 %v19563_v32 }
 0x813   : > { %18900 = vmatprep.mubr.msk.f32.mxu1 %vm8531_vm4, %v23835_v53  ;;  %19566 = vmatpush3.bf16.msra.mxu0 %v19563_v32 }
 0x815   : > { %v23986_v16 = vpop.f32.mrb[222].mxu1 }
 0x816   : > { %18901 = vmatmul.mubr.msk.f32.gmra.mrb[60].mxu1 %vm8531_vm4, %v23848_v2  ;;  %v23990_v44 = vpop.f32.mrb[223].mxu1 }
 0x817   : > { %18903 = vmatprep.mubr.msk.f32.mxu1 %vm8531_vm4, %v23853_v5 }
 0x819   : > { %v23994_v9 = vpop.f32.mrb[224].mxu1 }
 0x81a   : > { %26645 = vst [vmem:[#allocation20_spill] sm:$0xff] %v23994_v9  ;;  %18904 = vmatmul.mubr.msk.f32.gmra.mrb[62].mxu1 %vm8531_vm4, %v23866_v10  ;;  %v23998_v19 = vpop.f32.mrb[225].mxu1 }
 0x81b   : > { %26646 = vst [vmem:[#allocation94_spill] sm:$0xff] %v23998_v19  ;;  %18906 = vmatprep.mubr.msk.f32.mxu1 %vm8531_vm4, %v23871_v12 }
 0x81d   : > { %v24002_v43 = vpop.f32.mrb[226].mxu1 }
 0x81e   : > { %26647 = vst [vmem:[#allocation22_spill] sm:$0xff] %v24002_v43  ;;  %18907 = vmatmul.mubr.msk.f32.gmra.mrb[64].mxu1 %vm8531_vm4, %v23884_v18  ;;  %v24006_v30 = vpop.f32.mrb[227].mxu1  ;;  %v26651_v43 = vld [vmem:[#allocation143_spill] sm:$0xff] }
 0x81f   : > { %26648 = vst [vmem:[#allocation23_spill] sm:$0xff] %v24006_v30  ;;  %18933 = vmatprep.mubr.msk.f32.mxu1 %vm8531_vm4, %v23577_v3 }
 0x821   : > { %v24010_v32 = vpop.f32.mrb[228].mxu1 }
 0x822   : > { %26649 = vst [vmem:[#allocation137_spill] sm:$0xff] %v24010_v32  ;;  %18934 = vmatmul.mubr.msk.f32.vlgmr.msra.gmra.mrb[66].mxu1 %vm8531_vm4, %v23588_v7  ;;  %v24014_v9 = vpop.f32.mrb[229].mxu1 }
 0x823   : > { %26650 = vst [vmem:[#allocation97_spill] sm:$0xff] %v24014_v9  ;;  %19538 = vmatpush3.bf16.msra.mxu1 %v26641_v24  ;;  %18936 = vmatprep.mubr.msk.f32.mxu1 %vm8531_vm4, %v23595_v13  ;;  %v26653_v9 = vld [vmem:[#allocation144_spill] sm:$0xff] }
 0x824   : > { %19540 = vmatprep.subr.bf16.mxu1 %v26651_v43 }
 0x825   : > { %v24020_v19 = vpop.f32.mrb[230].mxu1 }
 0x826   : > { %18937 = vmatmul.mubr.msk.f32.gmra.mrb[68].mxu1 %vm8531_vm4, %v23605_v4  ;;  %v24024_v30 = vpop.f32.mrb[231].mxu1 }
 0x827   : > { %26652 = vst [vmem:[#allocation141_spill] sm:$0xff] %v24024_v30  ;;  %19542 = vmatpush3.bf16.msra.mxu1 %v26651_v43  ;;  %18939 = vmatprep.mubr.msk.f32.mxu1 %vm8531_vm4, %v23615_v8 }
 0x828   : > { %19544 = vmatprep.subr.bf16.mxu1 %v26653_v9 }
 0x829   : > { %v24030_v24 = vpop.f32.mrb[232].mxu1 }
 0x82a   : > { %18940 = vmatmul.mubr.msk.f32.gmra.mrb[70].mxu1 %vm8531_vm4, %v23625_v6  ;;  %v24034_v32 = vpop.f32.mrb[233].mxu1 }
 0x82b   : > { %26654 = vst [vmem:[#allocation106_spill] sm:$0xff] %v24034_v32  ;;  %19546 = vmatpush3.bf16.msra.mxu1 %v26653_v9  ;;  %18942 = vmatprep.mubr.msk.f32.mxu1 %vm8531_vm4, %v23635_v52 }
 0x82c   : > { %19548 = vmatprep.subr.bf16.mxu1 %v23098_v35 }
 0x82d   : > { %v24040_v43 = vpop.f32.mrb[234].mxu1 }
 0x82e   : > { %26655 = vst [vmem:[#allocation109_spill] sm:$0xff] %v24040_v43  ;;  %18943 = vmatmul.mubr.msk.f32.gmra.mrb[72].mxu1 %vm8531_vm4, %v23645_v36  ;;  %v24044_v30 = vpop.f32.mrb[235].mxu1 }
 0x82f   : > { %26656 = vst [vmem:[#allocation112_spill] sm:$0xff] %v24044_v30  ;;  %19550 = vmatpush3.bf16.msra.mxu1 %v23098_v35  ;;  %18945 = vmatprep.mubr.msk.f32.mxu1 %vm8531_vm4, %v23655_v37 }
 0x830   : > { %19552 = vmatprep.subr.bf16.mxu1 %v23120_v51 }
 0x831   : > { %v24050_v9 = vpop.f32.mrb[236].mxu1 }
 0x832   : > { %26657 = vst [vmem:[#allocation113_spill] sm:$0xff] %v24050_v9  ;;  %18946 = vmatmul.mubr.msk.f32.gmra.mrb[74].mxu1 %vm8531_vm4, %v23665_v31  ;;  %v24054_v32 = vpop.f32.mrb[237].mxu1 }
 0x833   : > { %26658 = vst [vmem:[#allocation116_spill] sm:$0xff] %v24054_v32  ;;  %19554 = vmatpush3.bf16.msra.mxu1 %v23120_v51  ;;  %18948 = vmatprep.mubr.msk.f32.mxu1 %vm8531_vm4, %v23675_v33  ;;  %v24090_v51 = vld [vmem:[%s26659_s14] ss:$0 sm:$0xff] }
 0x834   : > { %19556 = vmatprep.subr.bf16.mxu1 %v23138_v46 }
 0x836   : > { %18949 = vmatmul.mubr.msk.f32.gmra.mrb[76].mxu1 %vm8531_vm4, %v23685_v23 }
 0x837   : > { %19558 = vmatpush3.bf16.msra.mxu1 %v23138_v46  ;;  %18951 = vmatprep.mubr.msk.f32.mxu1 %vm8531_vm4, %v23695_v21 }
 0x83a   : > { %18952 = vmatmul.mubr.msk.f32.gmra.mrb[78].mxu1 %vm8531_vm4, %v23705_v42 }
 0x83b   : > { %18954 = vmatprep.mubr.msk.f32.mxu1 %vm8531_vm4, %v23711_v34 }
 0x83e   : > { %18955 = vmatmul.mubr.msk.f32.gmra.mrb[80].mxu1 %vm8531_vm4, %v23722_v22 }
 0x83f   : > { %18957 = vmatprep.mubr.msk.f32.mxu1 %vm8531_vm4, %v23725_v26 }
 0x842   : > { %18958 = vmatmul.mubr.msk.f32.gmra.mrb[82].mxu1 %vm8531_vm4, %v23736_v14 }
 0x843   : > { %18960 = vmatprep.mubr.msk.f32.mxu1 %vm8531_vm4, %v23739_v50 }
 0x846   : > { %18961 = vmatmul.mubr.msk.f32.gmra.mrb[84].mxu1 %vm8531_vm4, %v23750_v45 }
 0x847   : > { %18963 = vmatprep.mubr.msk.f32.mxu1 %vm8531_vm4, %v23753_v49 }
 0x84a   : > { %18964 = vmatmul.mubr.msk.f32.gmra.mrb[86].mxu1 %vm8531_vm4, %v23764_v57 }
 0x84b   : > { %18966 = vmatprep.mubr.msk.f32.mxu1 %vm8531_vm4, %v23767_v38 }
 0x84d   : > { %v18683_v35 = vpop.f32.mrb[154].mxu0  ;;  %v24092_v46 = vpop.f32.mrb[238].mxu1 }
 0x84e   : > { %26660 = vst [vmem:[#allocation119_spill] sm:$0xff] %v24092_v46  ;;  %v19587_v32 = vadd.f32 %v18683_v35, %v23783_v61  ;;  %v10740_v9 = vpop.f32.mrb[155].mxu0  ;;  %18967 = vmatmul.mubr.msk.f32.gmra.mrb[88].mxu1 %vm8531_vm4, %v23778_v59  ;;  %v24097_v49 = vpop.f32.mrb[239].mxu1 }
 0x84f   : > { %26661 = vst [vmem:[#allocation122_spill] sm:$0xff] %v24097_v49  ;;  %v19588_v57 = vadd.f32 %v10740_v9, %v23785_v27  ;;  %18969 = vmatprep.mubr.msk.f32.mxu1 %vm8531_vm4, %v23781_v55  ;;  %v26664_v55 = vld [vmem:[#allocation104_spill] sm:$0xff] }
 0x850   : > { %v11035_v38 = vadd.f32 %v19587_v32, %v24090_v51 }
 0x851   : > { %v11034_v30 = vadd.f32 %v19588_v57, %v24090_v51  ;;  %v18686_v45 = vpop.f32.mrb[156].mxu0  ;;  %v24104_v43 = vpop.f32.mrb[240].mxu1 }
 0x852   : > { %26662 = vst [vmem:[#allocation125_spill] sm:$0xff] %v24104_v43  ;;  %v11083_v46 = vmax.f32 %v11035_v38, 0.0  ;;  %v19589_v61 = vadd.f32 %v18686_v45, %v23801_v40  ;;  %v10750_v35 = vpop.f32.mrb[157].mxu0  ;;  %18970 = vmatmul.mubr.msk.f32.gmra.mrb[90].mxu1 %vm8531_vm4, %v23796_v60  ;;  %v24109_v59 = vpop.f32.mrb[241].mxu1  ;;  %v26665_v43 = vld [vmem:[#allocation105_spill] sm:$0xff] }
 0x853   : > { %26663 = vst [vmem:[#allocation126_spill] sm:$0xff] %v24109_v59  ;;  %v11082_v27 = vmax.f32 %v11034_v30, 0.0  ;;  %v19590_v9 = vadd.f32 %v10750_v35, %v23803_v1  ;;  %18972 = vmatprep.mubr.msk.f32.mxu1 %vm8531_vm4, %v23799_v54 }
 0x854   : > { %v11131_v32 = vadd.f32 %v11083_v46, %v26664_v55  ;;  %v11037_v57 = vadd.f32 %v19589_v61, %v24090_v51 }
 0x855   : > { %v11130_v38 = vadd.f32 %v11082_v27, %v26665_v43  ;;  %v11036_v45 = vadd.f32 %v19590_v9, %v24090_v51  ;;  %v18689_v40 = vpop.f32.mrb[158].mxu0  ;;  %v24118_v49 = vpop.f32.mrb[242].mxu1  ;;  %v26668_v27 = vld [vmem:[#allocation25_spill] sm:$0xff] }
 0x856   : > { %26666 = vst [vmem:[#allocation127_spill] sm:$0xff] %v24118_v49  ;;  %v11179_v60 = vadd.f32 %v11131_v32, %v26664_v55  ;;  %v11085_v59 = vmax.f32 %v11037_v57, 0.0  ;;  %v19591_v30 = vadd.f32 %v18689_v40, %v23819_v28  ;;  %v10760_v1 = vpop.f32.mrb[159].mxu0  ;;  %18973 = vmatmul.mubr.msk.f32.gmra.mrb[92].mxu1 %vm8531_vm4, %v23814_v11  ;;  %v24124_v54 = vpop.f32.mrb[243].mxu1  ;;  %v26669_v32 = vld [vmem:[#allocation107_spill] sm:$0xff]  ;;  %v26670_v40 = vld [vmem:[#allocation24_spill] sm:$0xff] }
 0x857   : > { %26667 = vst [vmem:[#allocation79_spill] sm:$0xff] %v24124_v54  ;;  %v11178_v46 = vadd.f32 %v11130_v38, %v26665_v43  ;;  %v11084_v61 = vmax.f32 %v11036_v45, 0.0  ;;  %v19592_v35 = vadd.f32 %v10760_v1, %v23821_v47  ;;  %18975 = vmatprep.mubr.msk.f32.mxu1 %vm8531_vm4, %v23817_v58  ;;  %v26671_v49 = vld [vmem:[#allocation108_spill] sm:$0xff] }
 0x858   : > { %v14101_v9 = vsub.f32 %v26668_v27, %v11179_v60  ;;  %v11133_v57 = vadd.f32 %v11085_v59, %v26669_v32  ;;  %v11039_v28 = vadd.f32 %v19591_v30, %v24090_v51  ;;  %v26673_v27 = vld [vmem:[#allocation110_spill] sm:$0xff] }
 0x859   : > { %v14100_v55 = vsub.f32 %v26670_v40, %v11178_v46  ;;  %v11132_v11 = vadd.f32 %v11084_v61, %v26671_v49  ;;  %v11038_v54 = vadd.f32 %v19592_v35, %v24090_v51  ;;  %v18692_v50 = vpop.f32.mrb[160].mxu0  ;;  %v24136_v38 = vpop.f32.mrb[244].mxu1  ;;  %v26672_v61 = vld [vmem:[#allocation27_spill] sm:$0xff] }
 0x85a   : > { %14149 = vst.msk [vmem:[#allocation2 + $0x8] sm:$0xff] %vm1772_vm1, %v14101_v9  ;;  %v11181_v47 = vadd.f32 %v11133_v57, %v26669_v32  ;;  %v11087_v58 = vmax.f32 %v11039_v28, 0.0  ;;  %v19593_v45 = vadd.f32 %v18692_v50, %v23841_v17  ;;  %v10770_v60 = vpop.f32.mrb[161].mxu0  ;;  %18976 = vmatmul.mubr.msk.f32.gmra.mrb[94].mxu1 %vm8531_vm4, %v23832_v48  ;;  %v24143_v59 = vpop.f32.mrb[245].mxu1  ;;  %v26674_v9 = vld [vmem:[#allocation26_spill] sm:$0xff]  ;;  %v26675_v57 = vld [vmem:[#allocation111_spill] sm:$0xff] }
 0x85b   : > { %14148 = vst.msk [vmem:[#allocation2] sm:$0xff] %vm1772_vm1, %v14100_v55  ;;  %v11180_v30 = vadd.f32 %v11132_v11, %v26671_v49  ;;  %v11086_v1 = vmax.f32 %v11038_v54, 0.0  ;;  %v19594_v46 = vadd.f32 %v10770_v60, %v23850_v39  ;;  %18978 = vmatprep.mubr.msk.f32.mxu1 %vm8531_vm4, %v23835_v53 }
 0x85c   : > { %v14103_v35 = vsub.f32 %v26672_v61, %v11181_v47  ;;  %v11135_v50 = vadd.f32 %v11087_v58, %v26673_v27  ;;  %v11041_v17 = vadd.f32 %v19593_v45, %v24090_v51  ;;  %v26677_v61 = vld [vmem:[#allocation19_spill] sm:$0xff] }
 0x85d   : > { %v14102_v48 = vsub.f32 %v26674_v9, %v11180_v30  ;;  %v11134_v28 = vadd.f32 %v11086_v1, %v26675_v57  ;;  %v11040_v55 = vadd.f32 %v19594_v46, %v24090_v51  ;;  %v18695_v40 = vpop.f32.mrb[162].mxu0  ;;  %v24156_v11 = vpop.f32.mrb[246].mxu1  ;;  %v26676_v1 = vld [vmem:[#allocation29_spill] sm:$0xff] }
 0x85e   : > { %14151 = vst.msk [vmem:[#allocation2 + $0x18] sm:$0xff] %vm1772_vm1, %v14103_v35  ;;  %v11183_v39 = vadd.f32 %v11135_v50, %v26673_v27  ;;  %v11089_v53 = vmax.f32 %v11041_v17, 0.0  ;;  %v19595_v54 = vadd.f32 %v18695_v40, %v23859_v56  ;;  %v10780_v47 = vpop.f32.mrb[163].mxu0  ;;  %18979 = vmatmul.mubr.msk.f32.gmra.mrb[96].mxu1 %vm8531_vm4, %v23848_v2  ;;  %v24163_v58 = vpop.f32.mrb[247].mxu1  ;;  %v26678_v50 = vld [vmem:[#allocation28_spill] sm:$0xff]  ;;  %v26679_v17 = vld [vmem:[#allocation21_spill] sm:$0xff] }
 0x85f   : > { %14150 = vst.msk [vmem:[#allocation2 + $0x10] sm:$0xff] %vm1772_vm1, %v14102_v48  ;;  %v11182_v45 = vadd.f32 %v11134_v28, %v26675_v57  ;;  %v11088_v60 = vmax.f32 %v11040_v55, 0.0  ;;  %v19596_v30 = vadd.f32 %v10780_v47, %v23868_v0  ;;  %18981 = vmatprep.mubr.msk.f32.mxu1 %vm8531_vm4, %v23853_v5  ;;  %v12358_v57 = vld [vmem:[%s20548_s15 + $0x40] sm:$0xff]  ;;  %v12359_v27 = vld [vmem:[%s20548_s15 + $0x48] sm:$0xff] }
 0x860   : > { %v14105_v46 = vsub.f32 %v26676_v1, %v11183_v39  ;;  %v11137_v56 = vadd.f32 %v11089_v53, %v26677_v61  ;;  %v11043_v35 = vadd.f32 %v19595_v54, %v24090_v51  ;;  %v26681_v1 = vld [vmem:[#allocation114_spill] sm:$0xff]  ;;  %v24652_v32 = vpack.c.bf16 %v12359_v27, %v12358_v57 }
 0x861   : > { %v14104_v2 = vsub.f32 %v26678_v50, %v11182_v45  ;;  %v11136_v9 = vadd.f32 %v11088_v60, %v26679_v17  ;;  %v11042_v48 = vadd.f32 %v19596_v30, %v24090_v51  ;;  %v18698_v40 = vpop.f32.mrb[164].mxu0  ;;  %v24176_v28 = vpop.f32.mrb[248].mxu1  ;;  %v26680_v60 = vld [vmem:[#allocation31_spill] sm:$0xff] }
 0x862   : > { %14153 = vst.msk [vmem:[#allocation2 + $0x28] sm:$0xff] %vm1772_vm1, %v14105_v46  ;;  %v11185_v0 = vadd.f32 %v11137_v56, %v26677_v61  ;;  %v11091_v5 = vmax.f32 %v11043_v35, 0.0  ;;  %v19597_v55 = vadd.f32 %v18698_v40, %v23877_v25  ;;  %v10790_v39 = vpop.f32.mrb[165].mxu0  ;;  %18982 = vmatmul.mubr.msk.f32.gmra.mrb[98].mxu1 %vm8531_vm4, %v23866_v10  ;;  %v24183_v53 = vpop.f32.mrb[249].mxu1  ;;  %v26682_v56 = vld [vmem:[#allocation30_spill] sm:$0xff]  ;;  %v26683_v35 = vld [vmem:[#allocation115_spill] sm:$0xff] }
 0x863   : > { %14152 = vst.msk [vmem:[#allocation2 + $0x20] sm:$0xff] %vm1772_vm1, %v14104_v2  ;;  %v11184_v54 = vadd.f32 %v11136_v9, %v26679_v17  ;;  %v11090_v47 = vmax.f32 %v11042_v48, 0.0  ;;  %v19598_v45 = vadd.f32 %v10790_v39, %v23886_v63  ;;  %18984 = vmatprep.mubr.msk.f32.mxu1 %vm8531_vm4, %v23871_v12 }
 0x864   : > { %v14107_v30 = vsub.f32 %v26680_v60, %v11185_v0  ;;  %v11139_v25 = vadd.f32 %v11091_v5, %v26681_v1  ;;  %v11045_v46 = vadd.f32 %v19597_v55, %v24090_v51  ;;  %v26685_v60 = vld [vmem:[#allocation117_spill] sm:$0xff] }
 0x865   : > { %v14106_v10 = vsub.f32 %v26682_v56, %v11184_v54  ;;  %v11138_v50 = vadd.f32 %v11090_v47, %v26683_v35  ;;  %v11044_v2 = vadd.f32 %v19598_v45, %v24090_v51  ;;  %v18701_v40 = vpop.f32.mrb[166].mxu0  ;;  %v24196_v9 = vpop.f32.mrb[250].mxu1  ;;  %v26684_v47 = vld [vmem:[#allocation33_spill] sm:$0xff] }
 0x866   : > { %14155 = vst.msk [vmem:[#allocation2 + $0x38] sm:$0xff] %vm1772_vm1, %v14107_v30  ;;  %v11187_v63 = vadd.f32 %v11139_v25, %v26681_v1  ;;  %v11093_v12 = vmax.f32 %v11045_v46, 0.0  ;;  %v19599_v48 = vadd.f32 %v18701_v40, %v23950_v15  ;;  %v10800_v0 = vpop.f32.mrb[167].mxu0  ;;  %18985 = vmatmul.mubr.msk.f32.gmra.mrb[100].mxu1 %vm8531_vm4, %v23884_v18  ;;  %v24203_v5 = vpop.f32.mrb[251].mxu1  ;;  %v26686_v25 = vld [vmem:[#allocation32_spill] sm:$0xff]  ;;  %v26687_v46 = vld [vmem:[#allocation118_spill] sm:$0xff] }
 0x867   : > { %14154 = vst.msk [vmem:[#allocation2 + $0x30] sm:$0xff] %vm1772_vm1, %v14106_v10  ;;  %v11186_v55 = vadd.f32 %v11138_v50, %v26683_v35  ;;  %v11092_v39 = vmax.f32 %v11044_v2, 0.0  ;;  %v19600_v54 = vadd.f32 %v10800_v0, %v23954_v41  ;;  %19011 = vmatprep.mubr.msk.f32.mxu1 %vm8531_vm4, %v23577_v3 }
 0x868   : > { %v14109_v45 = vsub.f32 %v26684_v47, %v11187_v63  ;;  %v11141_v15 = vadd.f32 %v11093_v12, %v26685_v60  ;;  %v11047_v30 = vadd.f32 %v19599_v48, %v24090_v51 }
 0x869   : > { %v14108_v18 = vsub.f32 %v26686_v25, %v11186_v55  ;;  %v11140_v56 = vadd.f32 %v11092_v39, %v26687_v46  ;;  %v11046_v10 = vadd.f32 %v19600_v54, %v24090_v51  ;;  %v18704_v40 = vpop.f32.mrb[168].mxu0  ;;  %v24216_v50 = vpop.f32.mrb[252].mxu1  ;;  %v26688_v55 = vld [vmem:[#allocation103_spill] sm:$0xff]  ;;  %v26692_v25 = vld [vmem:[#allocation121_spill] sm:$0xff] }
 0x86a   : > { %14157 = vst.msk [vmem:[#allocation2 + $0x48] sm:$0xff] %vm1772_vm1, %v14109_v45  ;;  %v11189_v41 = vadd.f32 %v11141_v15, %v26685_v60  ;;  %v11095_v3 = vmax.f32 %v11047_v30, 0.0  ;;  %v19601_v2 = vadd.f32 %v18704_v40, %v23958_v29  ;;  %v10810_v63 = vpop.f32.mrb[169].mxu0  ;;  %19012 = vmatmul.mubr.msk.f32.vlgmr.msra.gmra.mrb[102].mxu1 %vm8531_vm4, %v23588_v7  ;;  %v24223_v12 = vpop.f32.mrb[253].mxu1  ;;  %v26689_v54 = vld [vmem:[#allocation35_spill] sm:$0xff]  ;;  %v26690_v45 = vld [vmem:[#allocation120_spill] sm:$0xff] }
 0x86b   : > { %14156 = vst.msk [vmem:[#allocation2 + $0x40] sm:$0xff] %vm1772_vm1, %v14108_v18  ;;  %v11188_v48 = vadd.f32 %v11140_v56, %v26687_v46  ;;  %v11094_v0 = vmax.f32 %v11046_v10, 0.0  ;;  %v19602_v39 = vadd.f32 %v10810_v63, %v26688_v55  ;;  %19014 = vmatprep.mubr.msk.f32.mxu1 %vm8531_vm4, %v23595_v13  ;;  %v26691_v30 = vld [vmem:[#allocation34_spill] sm:$0xff]  ;;  %v26693_v63 = vld [vmem:[#allocation133_spill] sm:$0xff] }
 0x86c   : > { %v14111_v47 = vsub.f32 %v26689_v54, %v11189_v41  ;;  %v11143_v29 = vadd.f32 %v11095_v3, %v26690_v45  ;;  %v11049_v15 = vadd.f32 %v19601_v2, %v24090_v51  ;;  %v26695_v54 = vld [vmem:[#allocation39_spill] sm:$0xff] }
 0x86d   : > { %v14110_v7 = vsub.f32 %v26691_v30, %v11188_v48  ;;  %v11142_v40 = vadd.f32 %v11094_v0, %v26692_v25  ;;  %v11048_v18 = vadd.f32 %v19602_v39, %v24090_v51  ;;  %v18707_v60 = vpop.f32.mrb[170].mxu0  ;;  %v24236_v56 = vpop.f32.mrb[254].mxu1  ;;  %v26694_v0 = vld [vmem:[#allocation18_spill] sm:$0xff]  ;;  %v26697_v30 = vld [vmem:[#allocation37_spill] sm:$0xff] }
 0x86e   : > { %14159 = vst.msk [vmem:[#allocation2 + $0x58] sm:$0xff] %vm1772_vm1, %v14111_v47  ;;  %v11191_v10 = vadd.f32 %v11143_v29, %v26690_v45  ;;  %v11097_v13 = vmax.f32 %v11049_v15, 0.0  ;;  %v19603_v41 = vadd.f32 %v18707_v60, %v26693_v63  ;;  %v10820_v55 = vpop.f32.mrb[171].mxu0  ;;  %19015 = vmatmul.mubr.msk.f32.gmra.mrb[104].mxu1 %vm8531_vm4, %v23605_v4  ;;  %v24243_v3 = vpop.f32.mrb[255].mxu1  ;;  %v26696_v29 = vld [vmem:[#allocation123_spill] sm:$0xff]  ;;  %v26698_v63 = vld [vmem:[#allocation124_spill] sm:$0xff] }
 0x86f   : > { %14158 = vst.msk [vmem:[#allocation2 + $0x50] sm:$0xff] %vm1772_vm1, %v14110_v7  ;;  %v11190_v2 = vadd.f32 %v11142_v40, %v26692_v25  ;;  %v11096_v48 = vmax.f32 %v11048_v18, 0.0  ;;  %v19604_v39 = vadd.f32 %v10820_v55, %v26694_v0  ;;  %19017 = vmatprep.mubr.msk.f32.mxu1 %vm8531_vm4, %v23615_v8  ;;  %v26699_v0 = vld [vmem:[#allocation43_spill] sm:$0xff] }
 0x870   : > { %v14113_v47 = vsub.f32 %v26695_v54, %v11191_v10  ;;  %v11145_v60 = vadd.f32 %v11097_v13, %v26696_v29  ;;  %v11051_v15 = vadd.f32 %v19603_v41, %v24090_v51  ;;  %v26700_v54 = vld [vmem:[#allocation72_spill] sm:$0xff] }
 0x871   : > { %v14112_v4 = vsub.f32 %v26697_v30, %v11190_v2  ;;  %v11144_v45 = vadd.f32 %v11096_v48, %v26698_v63  ;;  %v11050_v7 = vadd.f32 %v19604_v39, %v24090_v51  ;;  %v18710_v46 = vpop.f32.mrb[172].mxu0  ;;  %v24256_v40 = vpop.f32.mrb[0].mxu1 }
 0x872   : > { %14161 = vst.msk [vmem:[#allocation2 + $0x68] sm:$0xff] %vm1772_vm1, %v14113_v47  ;;  %v11193_v18 = vadd.f32 %v11145_v60, %v26696_v29  ;;  %v11099_v8 = vmax.f32 %v11051_v15, 0.0  ;;  %v19605_v10 = vadd.f32 %v18710_v46, %v23976_v20  ;;  %v10830_v55 = vpop.f32.mrb[173].mxu0  ;;  %19018 = vmatmul.mubr.msk.f32.gmra.mrb[106].mxu1 %vm8531_vm4, %v23625_v6  ;;  %v24263_v13 = vpop.f32.mrb[1].mxu1  ;;  %v26701_v47 = vld [vmem:[#allocation41_spill] sm:$0xff] }
 0x873   : > { %14160 = vst.msk [vmem:[#allocation2 + $0x60] sm:$0xff] %vm1772_vm1, %v14112_v4  ;;  %v11192_v41 = vadd.f32 %v11144_v45, %v26698_v63  ;;  %v11098_v2 = vmax.f32 %v11050_v7, 0.0  ;;  %v19606_v48 = vadd.f32 %v10830_v55, %v23980_v62  ;;  %19020 = vmatprep.mubr.msk.f32.mxu1 %vm8531_vm4, %v23635_v52  ;;  %v26702_v60 = vld [vmem:[#allocation73_spill] sm:$0xff] }
 0x874   : > { %v14115_v39 = vsub.f32 %v26699_v0, %v11193_v18  ;;  %v11147_v20 = vadd.f32 %v11099_v8, %v26700_v54  ;;  %v11053_v46 = vadd.f32 %v19605_v10, %v24090_v51  ;;  %v26704_v0 = vld [vmem:[#allocation74_spill] sm:$0xff] }
 0x875   : > { %v14114_v6 = vsub.f32 %v26701_v47, %v11192_v41  ;;  %v11146_v15 = vadd.f32 %v11098_v2, %v26702_v60  ;;  %v11052_v30 = vadd.f32 %v19606_v48, %v24090_v51  ;;  %v18713_v4 = vpop.f32.mrb[174].mxu0  ;;  %v24276_v45 = vpop.f32.mrb[2].mxu1  ;;  %v26703_v2 = vld [vmem:[#allocation47_spill] sm:$0xff] }
 0x876   : > { %14163 = vst.msk [vmem:[#allocation2 + $0x78] sm:$0xff] %vm1772_vm1, %v14115_v39  ;;  %v11195_v62 = vadd.f32 %v11147_v20, %v26700_v54  ;;  %v11101_v52 = vmax.f32 %v11053_v46, 0.0  ;;  %v19607_v7 = vadd.f32 %v18713_v4, %v23986_v16  ;;  %v10840_v18 = vpop.f32.mrb[175].mxu0  ;;  %19021 = vmatmul.mubr.msk.f32.gmra.mrb[108].mxu1 %vm8531_vm4, %v23645_v36  ;;  %v24283_v8 = vpop.f32.mrb[3].mxu1  ;;  %v26705_v20 = vld [vmem:[#allocation45_spill] sm:$0xff]  ;;  %v26706_v46 = vld [vmem:[#allocation75_spill] sm:$0xff] }
 0x877   : > { %14162 = vst.msk [vmem:[#allocation2 + $0x70] sm:$0xff] %vm1772_vm1, %v14114_v6  ;;  %v11194_v10 = vadd.f32 %v11146_v15, %v26702_v60  ;;  %v11100_v55 = vmax.f32 %v11052_v30, 0.0  ;;  %v19608_v41 = vadd.f32 %v10840_v18, %v23990_v44  ;;  %19023 = vmatprep.mubr.msk.f32.mxu1 %vm8531_vm4, %v23655_v37  ;;  %v26707_v30 = vld [vmem:[#allocation20_spill] sm:$0xff] }
 0x878   : > { %v14117_v48 = vsub.f32 %v26703_v2, %v11195_v62  ;;  %v11149_v16 = vadd.f32 %v11101_v52, %v26704_v0  ;;  %v11055_v39 = vadd.f32 %v19607_v7, %v24090_v51  ;;  %v26709_v2 = vld [vmem:[#allocation51_spill] sm:$0xff] }
 0x879   : > { %v14116_v36 = vsub.f32 %v26705_v20, %v11194_v10  ;;  %v11148_v47 = vadd.f32 %v11100_v55, %v26706_v46  ;;  %v11054_v6 = vadd.f32 %v19608_v41, %v24090_v51  ;;  %v18716_v4 = vpop.f32.mrb[176].mxu0  ;;  %v24296_v15 = vpop.f32.mrb[4].mxu1  ;;  %v26708_v55 = vld [vmem:[#allocation94_spill] sm:$0xff] }
 0x87a   : > { %14165 = vst.msk [vmem:[#allocation2 + $0x88] sm:$0xff] %vm1772_vm1, %v14117_v48  ;;  %v11197_v44 = vadd.f32 %v11149_v16, %v26704_v0  ;;  %v11103_v37 = vmax.f32 %v11055_v39, 0.0  ;;  %v19609_v62 = vadd.f32 %v18716_v4, %v26707_v30  ;;  %v10850_v18 = vpop.f32.mrb[177].mxu0  ;;  %19024 = vmatmul.mubr.msk.f32.gmra.mrb[110].mxu1 %vm8531_vm4, %v23665_v31  ;;  %v24303_v52 = vpop.f32.mrb[5].mxu1  ;;  %v26710_v16 = vld [vmem:[#allocation76_spill] sm:$0xff]  ;;  %v26711_v4 = vld [vmem:[#allocation49_spill] sm:$0xff] }
 0x87b   : > { %14164 = vst.msk [vmem:[#allocation2 + $0x80] sm:$0xff] %vm1772_vm1, %v14116_v36  ;;  %v11196_v7 = vadd.f32 %v11148_v47, %v26706_v46  ;;  %v11102_v10 = vmax.f32 %v11054_v6, 0.0  ;;  %v19610_v41 = vadd.f32 %v10850_v18, %v26708_v55  ;;  %19026 = vmatprep.mubr.msk.f32.mxu1 %vm8531_vm4, %v23675_v33  ;;  %v26712_v30 = vld [vmem:[#allocation77_spill] sm:$0xff]  ;;  %v26713_v33 = vld [vmem:[#allocation22_spill] sm:$0xff] }
 0x87c   : > { %v14119_v48 = vsub.f32 %v26709_v2, %v11197_v44  ;;  %v11151_v39 = vadd.f32 %v11103_v37, %v26710_v16  ;;  %v11057_v20 = vadd.f32 %v19609_v62, %v24090_v51  ;;  %v26715_v2 = vld [vmem:[#allocation36_spill] sm:$0xff] }
 0x87d   : > { %v14118_v31 = vsub.f32 %v26711_v4, %v11196_v7  ;;  %v11150_v0 = vadd.f32 %v11102_v10, %v26712_v30  ;;  %v11056_v36 = vadd.f32 %v19610_v41, %v24090_v51  ;;  %v18719_v60 = vpop.f32.mrb[178].mxu0  ;;  %v18797_v47 = vpop.f32.mrb[6].mxu1  ;;  %v26714_v10 = vld [vmem:[#allocation23_spill] sm:$0xff] }
 0x87e   : > { %14167 = vst.msk [vmem:[#allocation2 + $0x98] sm:$0xff] %vm1772_vm1, %v14119_v48  ;;  %v11199_v6 = vadd.f32 %v11151_v39, %v26710_v16  ;;  %v11105_v18 = vmax.f32 %v11057_v20, 0.0  ;;  %v19611_v55 = vadd.f32 %v18719_v60, %v26713_v33  ;;  %v10860_v44 = vpop.f32.mrb[179].mxu0  ;;  %19027 = vmatmul.mubr.msk.f32.gmra.mrb[112].mxu1 %vm8531_vm4, %v23685_v23  ;;  %v11496_v37 = vpop.f32.mrb[7].mxu1  ;;  %v26716_v60 = vld [vmem:[#allocation80_spill] sm:$0xff]  ;;  %v26717_v23 = vld [vmem:[#allocation53_spill] sm:$0xff] }
 0x87f   : > { %14166 = vst.msk [vmem:[#allocation2 + $0x90] sm:$0xff] %vm1772_vm1, %v14118_v31  ;;  %v11198_v62 = vadd.f32 %v11150_v0, %v26712_v30  ;;  %v11104_v7 = vmax.f32 %v11056_v36, 0.0  ;;  %v19612_v41 = vadd.f32 %v10860_v44, %v26714_v10  ;;  %19029 = vmatprep.mubr.msk.f32.mxu1 %vm8531_vm4, %v23695_v21  ;;  %19073 = vmatprep.mubr.msk.f32.mxu0 %vm1772_vm1, %v11496_v37  ;;  %v26718_v31 = vld [vmem:[#allocation128_spill] sm:$0xff] }
 0x880   : > { %v14121_v48 = vsub.f32 %v26715_v2, %v11199_v6  ;;  %v11153_v39 = vadd.f32 %v11105_v18, %v26716_v60  ;;  %v11059_v20 = vadd.f32 %v19611_v55, %v24090_v51  ;;  %19074 = vmatmul.mubr.msk.f32.vlgmr.msra.gmra.mrb[202].mxu0 %vm1772_vm1, %v18797_v47  ;;  %v26719_v6 = vld [vmem:[#allocation137_spill] sm:$0xff]  ;;  %v26721_v2 = vld [vmem:[#allocation38_spill] sm:$0xff] }
 0x881   : > { %v14120_v4 = vsub.f32 %v26717_v23, %v11198_v62  ;;  %v11152_v0 = vadd.f32 %v11104_v7, %v26718_v31  ;;  %v11058_v36 = vadd.f32 %v19612_v41, %v24090_v51  ;;  %v18722_v33 = vpop.f32.mrb[180].mxu0  ;;  %v18800_v44 = vpop.f32.mrb[8].mxu1  ;;  %v26720_v7 = vld [vmem:[#allocation97_spill] sm:$0xff] }
 0x882   : > { %14169 = vst.msk [vmem:[#allocation2 + $0xa8] sm:$0xff] %vm1772_vm1, %v14121_v48  ;;  %v11201_v21 = vadd.f32 %v11153_v39, %v26716_v60  ;;  %v11107_v37 = vmax.f32 %v11059_v20, 0.0  ;;  %v19613_v10 = vadd.f32 %v18722_v33, %v26719_v6  ;;  %v10870_v18 = vpop.f32.mrb[181].mxu0  ;;  %19030 = vmatmul.mubr.msk.f32.gmra.mrb[114].mxu1 %vm8531_vm4, %v23705_v42  ;;  %v11506_v47 = vpop.f32.mrb[9].mxu1  ;;  %v26722_v39 = vld [vmem:[#allocation82_spill] sm:$0xff]  ;;  %v26723_v42 = vld [vmem:[#allocation55_spill] sm:$0xff] }
 0x883   : > { %14168 = vst.msk [vmem:[#allocation2 + $0xa0] sm:$0xff] %vm1772_vm1, %v14120_v4  ;;  %v11200_v55 = vadd.f32 %v11152_v0, %v26718_v31  ;;  %v11106_v62 = vmax.f32 %v11058_v36, 0.0  ;;  %v19614_v41 = vadd.f32 %v10870_v18, %v26720_v7  ;;  %19032 = vmatprep.mubr.msk.f32.mxu1 %vm8531_vm4, %v23711_v34  ;;  %19076 = vmatprep.mubr.msk.f32.mxu0 %vm1772_vm1, %v11506_v47  ;;  %v26724_v33 = vld [vmem:[#allocation129_spill] sm:$0xff] }
 0x884   : > { %v14123_v48 = vsub.f32 %v26721_v2, %v11201_v21  ;;  %v11155_v20 = vadd.f32 %v11107_v37, %v26722_v39  ;;  %v11061_v23 = vadd.f32 %v19613_v10, %v24090_v51  ;;  %19077 = vmatmul.mubr.msk.f32.gmra.mrb[204].mxu0 %vm1772_vm1, %v18800_v44 }
 0x885   : > { %v14122_v4 = vsub.f32 %v26723_v42, %v11200_v55  ;;  %v11154_v0 = vadd.f32 %v11106_v62, %v26724_v33  ;;  %v11060_v36 = vadd.f32 %v19614_v41, %v24090_v51  ;;  %v18725_v6 = vpop.f32.mrb[182].mxu0  ;;  %v18803_v18 = vpop.f32.mrb[10].mxu1  ;;  %v26725_v62 = vld [vmem:[#allocation141_spill] sm:$0xff]  ;;  %v26726_v41 = vld [vmem:[#allocation40_spill] sm:$0xff]  ;;  %v26729_v42 = vld [vmem:[#allocation130_spill] sm:$0xff] }
 0x886   : > { %14171 = vst.msk [vmem:[#allocation2 + $0xb8] sm:$0xff] %vm1772_vm1, %v14123_v48  ;;  %v11203_v34 = vadd.f32 %v11155_v20, %v26722_v39  ;;  %v11109_v47 = vmax.f32 %v11061_v23, 0.0  ;;  %v19615_v21 = vadd.f32 %v18725_v6, %v24020_v19  ;;  %v10880_v37 = vpop.f32.mrb[183].mxu0  ;;  %19033 = vmatmul.mubr.msk.f32.gmra.mrb[116].mxu1 %vm8531_vm4, %v23722_v22  ;;  %v11516_v44 = vpop.f32.mrb[11].mxu1  ;;  %v26727_v19 = vld [vmem:[#allocation85_spill] sm:$0xff] }
 0x887   : > { %14170 = vst.msk [vmem:[#allocation2 + $0xb0] sm:$0xff] %vm1772_vm1, %v14122_v4  ;;  %v11202_v10 = vadd.f32 %v11154_v0, %v26724_v33  ;;  %v11108_v55 = vmax.f32 %v11060_v36, 0.0  ;;  %v19616_v7 = vadd.f32 %v10880_v37, %v26725_v62  ;;  %19035 = vmatprep.mubr.msk.f32.mxu1 %vm8531_vm4, %v23725_v26  ;;  %19079 = vmatprep.mubr.msk.f32.mxu0 %vm1772_vm1, %v11516_v44  ;;  %v26728_v22 = vld [vmem:[#allocation57_spill] sm:$0xff]  ;;  %v26731_v62 = vld [vmem:[#allocation78_spill] sm:$0xff] }
 0x888   : > { %v14125_v2 = vsub.f32 %v26726_v41, %v11203_v34  ;;  %v11157_v48 = vadd.f32 %v11109_v47, %v26727_v19  ;;  %v11063_v20 = vadd.f32 %v19615_v21, %v24090_v51  ;;  %19080 = vmatmul.mubr.msk.f32.gmra.mrb[206].mxu0 %vm1772_vm1, %v18803_v18 }
 0x889   : > { %v14124_v23 = vsub.f32 %v26728_v22, %v11202_v10  ;;  %v11156_v4 = vadd.f32 %v11108_v55, %v26729_v42  ;;  %v11062_v0 = vadd.f32 %v19616_v7, %v24090_v51  ;;  %v18728_v36 = vpop.f32.mrb[184].mxu0  ;;  %v18806_v6 = vpop.f32.mrb[12].mxu1  ;;  %v26730_v10 = vld [vmem:[#allocation106_spill] sm:$0xff]  ;;  %v26735_v22 = vld [vmem:[#allocation131_spill] sm:$0xff] }
 0x88a   : > { %14173 = vst.msk [vmem:[#allocation2 + $0xc8] sm:$0xff] %vm1772_vm1, %v14125_v2  ;;  %v11205_v26 = vadd.f32 %v11157_v48, %v26727_v19  ;;  %v11111_v37 = vmax.f32 %v11063_v20, 0.0  ;;  %v19617_v34 = vadd.f32 %v18728_v36, %v24030_v24  ;;  %v10890_v47 = vpop.f32.mrb[185].mxu0  ;;  %19036 = vmatmul.mubr.msk.f32.gmra.mrb[118].mxu1 %vm8531_vm4, %v23736_v14  ;;  %v11526_v18 = vpop.f32.mrb[13].mxu1  ;;  %v26732_v7 = vld [vmem:[#allocation42_spill] sm:$0xff]  ;;  %v26733_v24 = vld [vmem:[#allocation87_spill] sm:$0xff] }
 0x88b   : > { %14172 = vst.msk [vmem:[#allocation2 + $0xc0] sm:$0xff] %vm1772_vm1, %v14124_v23  ;;  %v11204_v21 = vadd.f32 %v11156_v4, %v26729_v42  ;;  %v11110_v44 = vmax.f32 %v11062_v0, 0.0  ;;  %v19618_v55 = vadd.f32 %v10890_v47, %v26730_v10  ;;  %19038 = vmatprep.mubr.msk.f32.mxu1 %vm8531_vm4, %v26731_v62  ;;  %19082 = vmatprep.mubr.msk.f32.mxu0 %vm1772_vm1, %v11526_v18  ;;  %v26734_v14 = vld [vmem:[#allocation59_spill] sm:$0xff]  ;;  %v20195_v19 = vld [vmem:[%s20538_s10 + $0xb0] sm:$0xff] }
 0x88c   : > { %v14127_v41 = vsub.f32 %v26732_v7, %v11205_v26  ;;  %v11159_v2 = vadd.f32 %v11111_v37, %v26733_v24  ;;  %v11065_v48 = vadd.f32 %v19617_v34, %v24090_v51  ;;  %19083 = vmatmul.mubr.msk.f32.gmra.mrb[208].mxu0 %vm1772_vm1, %v18806_v6  ;;  %v26736_v26 = vld [vmem:[#allocation109_spill] sm:$0xff]  ;;  %v26737_v62 = vld [vmem:[#allocation83_spill] sm:$0xff]  ;;  %v26739_v7 = vld [vmem:[#allocation92_spill] sm:$0xff] }
 0x88d   : > { %v14126_v20 = vsub.f32 %v26734_v14, %v11204_v21  ;;  %v11158_v23 = vadd.f32 %v11110_v44, %v26735_v22  ;;  %v11064_v4 = vadd.f32 %v19618_v55, %v24090_v51  ;;  %v18731_v0 = vpop.f32.mrb[186].mxu0  ;;  %v18809_v36 = vpop.f32.mrb[14].mxu1  ;;  %v26738_v44 = vld [vmem:[#allocation112_spill] sm:$0xff] }
 0x88e   : > { %14175 = vst.msk [vmem:[#allocation2 + $0xd8] sm:$0xff] %vm1772_vm1, %v14127_v41  ;;  %v11207_v47 = vadd.f32 %v11159_v2, %v26733_v24  ;;  %v11113_v18 = vmax.f32 %v11065_v48, 0.0  ;;  %v19619_v10 = vadd.f32 %v18731_v0, %v26736_v26  ;;  %v10900_v37 = vpop.f32.mrb[187].mxu0  ;;  %19039 = vmatmul.mubr.msk.f32.gmra.mrb[120].mxu1 %vm8531_vm4, %v26737_v62  ;;  %v11536_v6 = vpop.f32.mrb[15].mxu1  ;;  %v26740_v41 = vld [vmem:[#allocation44_spill] sm:$0xff]  ;;  %v26741_v48 = vld [vmem:[#allocation89_spill] sm:$0xff] }
 0x88f   : > { %14174 = vst.msk [vmem:[#allocation2 + $0xd0] sm:$0xff] %vm1772_vm1, %v14126_v20  ;;  %v11206_v34 = vadd.f32 %v11158_v23, %v26735_v22  ;;  %v11112_v21 = vmax.f32 %v11064_v4, 0.0  ;;  %v19620_v55 = vadd.f32 %v10900_v37, %v26738_v44  ;;  %19041 = vmatprep.mubr.msk.f32.mxu1 %vm8531_vm4, %v26739_v7  ;;  %19085 = vmatprep.mubr.msk.f32.mxu0 %vm1772_vm1, %v11536_v6  ;;  %v26742_v20 = vld [vmem:[#allocation61_spill] sm:$0xff]  ;;  %v26743_v23 = vld [vmem:[#allocation132_spill] sm:$0xff] }
 0x890   : > { %v14129_v2 = vsub.f32 %v26740_v41, %v11207_v47  ;;  %v11161_v14 = vadd.f32 %v11113_v18, %v26741_v48  ;;  %v11067_v0 = vadd.f32 %v19619_v10, %v24090_v51  ;;  %19086 = vmatmul.mubr.msk.f32.gmra.mrb[210].mxu0 %vm1772_vm1, %v18809_v36  ;;  %v12350_v7 = vld [vmem:[%s20548_s15] sm:$0xff]  ;;  %v12351_v6 = vld [vmem:[%s20548_s15 + $0x8] sm:$0xff] }
 0x891   : > { %v14128_v26 = vsub.f32 %v26742_v20, %v11206_v34  ;;  %v11160_v4 = vadd.f32 %v11112_v21, %v26743_v23  ;;  %v11066_v37 = vadd.f32 %v19620_v55, %v24090_v51  ;;  %v18734_v62 = vpop.f32.mrb[188].mxu0  ;;  %v18812_v44 = vpop.f32.mrb[16].mxu1  ;;  %v26744_v41 = vld [vmem:[#allocation113_spill] sm:$0xff]  ;;  %v19567_v21 = vpack.c.bf16 %v12351_v6, %v12350_v7  ;;  %v26745_v24 = vld [vmem:[#allocation116_spill] sm:$0xff] }
 0x892   : > { %14177 = vst.msk [vmem:[#allocation2 + $0xe8] sm:$0xff] %vm1772_vm1, %v14129_v2  ;;  %v11209_v47 = vadd.f32 %v11161_v14, %v26741_v48  ;;  %v11115_v18 = vmax.f32 %v11067_v0, 0.0  ;;  %v19621_v10 = vadd.f32 %v18734_v62, %v26744_v41  ;;  %v10910_v22 = vpop.f32.mrb[189].mxu0  ;;  %v20194_v36 = vld [vmem:[%s20538_s10 + $0xa8] sm:$0xff]  ;;  %v11546_v34 = vpop.f32.mrb[17].mxu1  ;;  %v26746_v2 = vld [vmem:[#allocation46_spill] sm:$0xff] }
 0x893   : > { %19042 = vmatmul.mubr.msk.f32.gmra.mrb[122].mxu1 %vm8531_vm4, %v20194_v36  ;;  %14176 = vst.msk [vmem:[#allocation2 + $0xe0] sm:$0xff] %vm1772_vm1, %v14128_v26  ;;  %v11208_v55 = vadd.f32 %v11160_v4, %v26743_v23  ;;  %v11114_v20 = vmax.f32 %v11066_v37, 0.0  ;;  %v19622_v42 = vadd.f32 %v10910_v22, %v26745_v24  ;;  %19088 = vmatprep.mubr.msk.f32.mxu0 %vm1772_vm1, %v11546_v34  ;;  %v26747_v0 = vld [vmem:[#allocation91_spill] sm:$0xff]  ;;  %v26749_v37 = vld [vmem:[#allocation134_spill] sm:$0xff] }
 0x894   : > { %19044 = vmatprep.mubr.msk.f32.mxu1 %vm8531_vm4, %v20195_v19  ;;  %v14131_v14 = vsub.f32 %v26746_v2, %v11209_v47  ;;  %v11163_v62 = vadd.f32 %v11115_v18, %v26747_v0  ;;  %v11069_v41 = vadd.f32 %v19621_v10, %v24090_v51  ;;  %19089 = vmatmul.mubr.msk.f32.gmra.mrb[212].mxu0 %vm1772_vm1, %v18812_v44  ;;  %v26748_v26 = vld [vmem:[#allocation63_spill] sm:$0xff] }
 0x895   : > { %19568 = vmatprep.subr.bf16.mxu0 %v19567_v21  ;;  %v14130_v4 = vsub.f32 %v26748_v26, %v11208_v55  ;;  %v11162_v7 = vadd.f32 %v11114_v20, %v26749_v37  ;;  %v11068_v24 = vadd.f32 %v19622_v42, %v24090_v51  ;;  %v18737_v19 = vpop.f32.mrb[190].mxu0  ;;  %v24426_v22 = vpop.f32.mrb[18].mxu1  ;;  %v26750_v18 = vld [vmem:[#allocation119_spill] sm:$0xff]  ;;  %v26751_v20 = vld [vmem:[#allocation122_spill] sm:$0xff] }
 0x896   : > { %19570 = vmatpush3.bf16.msra.mxu0 %v19567_v21  ;;  %14179 = vst.msk [vmem:[#allocation2 + $0xf8] sm:$0xff] %vm1772_vm1, %v14131_v14  ;;  %v11211_v6 = vadd.f32 %v11163_v62, %v26747_v0  ;;  %v11117_v47 = vmax.f32 %v11069_v41, 0.0  ;;  %v19623_v10 = vadd.f32 %v18737_v19, %v26750_v18  ;;  %v10920_v44 = vpop.f32.mrb[191].mxu0  ;;  %v20196_v36 = vld [vmem:[%s20538_s10 + $0xb8] sm:$0xff]  ;;  %v24433_v34 = vpop.f32.mrb[19].mxu1  ;;  %v20197_v2 = vld [vmem:[%s20538_s10 + $0xc0] sm:$0xff] }
 0x897   : > { %19045 = vmatmul.mubr.msk.f32.gmra.mrb[124].mxu1 %vm8531_vm4, %v20196_v36  ;;  %14178 = vst.msk [vmem:[#allocation2 + $0xf0] sm:$0xff] %vm1772_vm1, %v14130_v4  ;;  %v11210_v42 = vadd.f32 %v11162_v7, %v26749_v37  ;;  %v11116_v55 = vmax.f32 %v11068_v24, 0.0  ;;  %v19624_v21 = vadd.f32 %v10920_v44, %v26751_v20  ;;  %v26752_v14 = vld [vmem:[#allocation48_spill] sm:$0xff]  ;;  %v26753_v41 = vld [vmem:[#allocation135_spill] sm:$0xff]  ;;  %v20199_v37 = vld [vmem:[%s20538_s10 + $0xd0] sm:$0xff] }
 0x898   : > { %19047 = vmatprep.mubr.msk.f32.mxu1 %vm8531_vm4, %v20197_v2  ;;  %v14133_v62 = vsub.f32 %v26752_v14, %v11211_v6  ;;  %v11165_v26 = vadd.f32 %v11117_v47, %v26753_v41  ;;  %v11071_v19 = vadd.f32 %v19623_v10, %v24090_v51  ;;  %v26754_v18 = vld [vmem:[#allocation64_spill] sm:$0xff]  ;;  %v26756_v6 = vld [vmem:[#allocation125_spill] sm:$0xff] }
 0x899   : > { %v14132_v36 = vsub.f32 %v26754_v18, %v11210_v42  ;;  %v26755_v0 = vld [vmem:[#allocation136_spill] sm:$0xff]  ;;  %v11070_v4 = vadd.f32 %v19624_v21, %v24090_v51  ;;  %v18740_v7 = vpop.f32.mrb[192].mxu0  ;;  %v24446_v24 = vpop.f32.mrb[20].mxu1  ;;  %v26757_v21 = vld [vmem:[#allocation126_spill] sm:$0xff] }
 0x89a   : > { %v11164_v23 = vadd.f32 %v11116_v55, %v26755_v0  ;;  %14181 = vst.msk [vmem:[#allocation2 + $0x108] sm:$0xff] %vm1772_vm1, %v14133_v62  ;;  %v11213_v44 = vadd.f32 %v11165_v26, %v26753_v41  ;;  %v11119_v20 = vmax.f32 %v11071_v19, 0.0  ;;  %v19625_v2 = vadd.f32 %v18740_v7, %v26756_v6  ;;  %v10930_v47 = vpop.f32.mrb[193].mxu0  ;;  %v24451_v14 = vpop.f32.mrb[21].mxu1  ;;  %v20198_v10 = vld [vmem:[%s20538_s10 + $0xc8] sm:$0xff]  ;;  %v26758_v62 = vld [vmem:[#allocation50_spill] sm:$0xff] }
 0x89b   : > { %19048 = vmatmul.mubr.msk.f32.gmra.mrb[126].mxu1 %vm8531_vm4, %v20198_v10  ;;  %14180 = vst.msk [vmem:[#allocation2 + $0x100] sm:$0xff] %vm1772_vm1, %v14132_v36  ;;  %v11118_v55 = vmax.f32 %v11070_v4, 0.0  ;;  %v19626_v18 = vadd.f32 %v10930_v47, %v26757_v21  ;;  %v26759_v19 = vld [vmem:[#allocation96_spill] sm:$0xff]  ;;  %v26760_v41 = vld [vmem:[#allocation65_spill] sm:$0xff]  ;;  %v26761_v10 = vld [vmem:[#allocation138_spill] sm:$0xff] }
 0x89c   : > { %v11212_v42 = vadd.f32 %v11164_v23, %v26755_v0  ;;  %19050 = vmatprep.mubr.msk.f32.mxu1 %vm8531_vm4, %v20199_v37  ;;  %v14135_v26 = vsub.f32 %v26758_v62, %v11213_v44  ;;  %v11167_v7 = vadd.f32 %v11119_v20, %v26759_v19  ;;  %v11073_v6 = vadd.f32 %v19625_v2, %v24090_v51  ;;  %v26762_v44 = vld [vmem:[#allocation127_spill] sm:$0xff] }
 0x89d   : > { %v11166_v33 = vadd.f32 %v11118_v55, %v26761_v10  ;;  %v11072_v23 = vadd.f32 %v19626_v18, %v24090_v51  ;;  %v18743_v36 = vpop.f32.mrb[194].mxu0  ;;  %v24466_v4 = vpop.f32.mrb[22].mxu1  ;;  %v20200_v2 = vld [vmem:[%s20538_s10 + $0xd8] sm:$0xff]  ;;  %v20201_v0 = vld [vmem:[%s20538_s10 + $0xe0] sm:$0xff] }
 0x89e   : > { %v14134_v48 = vsub.f32 %v26760_v41, %v11212_v42  ;;  %14183 = vst.msk [vmem:[#allocation2 + $0x118] sm:$0xff] %vm1772_vm1, %v14135_v26  ;;  %v11215_v37 = vadd.f32 %v11167_v7, %v26759_v19  ;;  %v11121_v47 = vmax.f32 %v11073_v6, 0.0  ;;  %v19627_v21 = vadd.f32 %v18743_v36, %v26762_v44  ;;  %v10940_v20 = vpop.f32.mrb[195].mxu0  ;;  %v24471_v62 = vpop.f32.mrb[23].mxu1  ;;  %v26763_v55 = vld [vmem:[#allocation79_spill] sm:$0xff]  ;;  %v26764_v26 = vld [vmem:[#allocation52_spill] sm:$0xff] }
 0x89f   : > { %19051 = vmatmul.mubr.msk.f32.gmra.mrb[128].mxu1 %vm8531_vm4, %v20200_v2  ;;  %v11214_v41 = vadd.f32 %v11166_v33, %v26761_v10  ;;  %v11120_v42 = vmax.f32 %v11072_v23, 0.0  ;;  %v19628_v18 = vadd.f32 %v10940_v20, %v26763_v55  ;;  %v26765_v6 = vld [vmem:[#allocation139_spill] sm:$0xff]  ;;  %v26766_v19 = vld [vmem:[#allocation66_spill] sm:$0xff]  ;;  %v26767_v2 = vld [vmem:[#allocation140_spill] sm:$0xff] }
 0x8a0   : > { %14182 = vst.msk [vmem:[#allocation2 + $0x110] sm:$0xff] %vm1772_vm1, %v14134_v48  ;;  %19053 = vmatprep.mubr.msk.f32.mxu1 %vm8531_vm4, %v20201_v0  ;;  %v14137_v7 = vsub.f32 %v26764_v26, %v11215_v37  ;;  %v11169_v36 = vadd.f32 %v11121_v47, %v26765_v6  ;;  %v11075_v44 = vadd.f32 %v19627_v21, %v24090_v51  ;;  %v20202_v21 = vld [vmem:[%s20538_s10 + $0xe8] sm:$0xff]  ;;  %v26770_v26 = vld [vmem:[#allocation54_spill] sm:$0xff] }
 0x8a1   : > { %v14136_v39 = vsub.f32 %v26766_v19, %v11214_v41  ;;  %v11168_v31 = vadd.f32 %v11120_v42, %v26767_v2  ;;  %v11074_v33 = vadd.f32 %v19628_v18, %v24090_v51  ;;  %v18746_v48 = vpop.f32.mrb[196].mxu0  ;;  %v24486_v23 = vpop.f32.mrb[24].mxu1  ;;  %v20203_v18 = vld [vmem:[%s20538_s10 + $0xf0] sm:$0xff] }
 0x8a2   : > { %26768 = vst [vmem:[#allocation81_spill] sm:$0xff] %v24486_v23  ;;  %14185 = vst.msk [vmem:[#allocation2 + $0x128] sm:$0xff] %vm1772_vm1, %v14137_v7  ;;  %v11217_v0 = vadd.f32 %v11169_v36, %v26765_v6  ;;  %v11123_v20 = vmax.f32 %v11075_v44, 0.0  ;;  %v19629_v37 = vadd.f32 %v18746_v48, %v24136_v38  ;;  %v10950_v47 = vpop.f32.mrb[197].mxu0  ;;  %v24491_v55 = vpop.f32.mrb[25].mxu1  ;;  %v26771_v38 = vld [vmem:[#allocation99_spill] sm:$0xff] }
 0x8a3   : > { %26769 = vst [vmem:[#allocation84_spill] sm:$0xff] %v24491_v55  ;;  %19054 = vmatmul.mubr.msk.f32.gmra.mrb[130].mxu1 %vm8531_vm4, %v20202_v21  ;;  %14184 = vst.msk [vmem:[#allocation2 + $0x120] sm:$0xff] %vm1772_vm1, %v14136_v39  ;;  %v11216_v19 = vadd.f32 %v11168_v31, %v26767_v2  ;;  %v11122_v41 = vmax.f32 %v11074_v33, 0.0  ;;  %v19630_v42 = vadd.f32 %v10950_v47, %v24143_v59  ;;  %v26772_v48 = vld [vmem:[#allocation67_spill] sm:$0xff]  ;;  %v26773_v21 = vld [vmem:[#allocation142_spill] sm:$0xff] }
 0x8a4   : > { %19056 = vmatprep.mubr.msk.f32.mxu1 %vm8531_vm4, %v20203_v18  ;;  %v14139_v7 = vsub.f32 %v26770_v26, %v11217_v0  ;;  %v11171_v36 = vadd.f32 %v11123_v20, %v26771_v38  ;;  %v11077_v44 = vadd.f32 %v19629_v37, %v24090_v51  ;;  %v20204_v37 = vld [vmem:[%s20538_s10 + $0xf8] sm:$0xff]  ;;  %v20205_v26 = vld [vmem:[%s20538_s10 + $0x100] sm:$0xff]  ;;  %v12360_v55 = vld [vmem:[%s20548_s15 + $0x50] sm:$0xff] }
 0x8a5   : > { %v14138_v6 = vsub.f32 %v26772_v48, %v11216_v19  ;;  %v11170_v10 = vadd.f32 %v11122_v41, %v26773_v21  ;;  %v11076_v31 = vadd.f32 %v19630_v42, %v24090_v51  ;;  %v18749_v39 = vpop.f32.mrb[198].mxu0  ;;  %v24506_v33 = vpop.f32.mrb[26].mxu1 }
 0x8a6   : > { %26774 = vst [vmem:[#allocation86_spill] sm:$0xff] %v24506_v33  ;;  %14187 = vst.msk [vmem:[#allocation2 + $0x138] sm:$0xff] %vm1772_vm1, %v14139_v7  ;;  %v11219_v59 = vadd.f32 %v11171_v36, %v26771_v38  ;;  %v11125_v47 = vmax.f32 %v11077_v44, 0.0  ;;  %v19631_v0 = vadd.f32 %v18749_v39, %v24156_v11  ;;  %v10960_v20 = vpop.f32.mrb[199].mxu0  ;;  %v24511_v18 = vpop.f32.mrb[27].mxu1  ;;  %v26776_v7 = vld [vmem:[#allocation56_spill] sm:$0xff] }
 0x8a7   : > { %26775 = vst [vmem:[#allocation88_spill] sm:$0xff] %v24511_v18  ;;  %19057 = vmatmul.mubr.msk.f32.gmra.mrb[132].mxu1 %vm8531_vm4, %v20204_v37  ;;  %14186 = vst.msk [vmem:[#allocation2 + $0x130] sm:$0xff] %vm1772_vm1, %v14138_v6  ;;  %v11218_v19 = vadd.f32 %v11170_v10, %v26773_v21  ;;  %v11124_v41 = vmax.f32 %v11076_v31, 0.0  ;;  %v19632_v42 = vadd.f32 %v10960_v20, %v24163_v58  ;;  %v26777_v11 = vld [vmem:[#allocation100_spill] sm:$0xff]  ;;  %v26779_v37 = vld [vmem:[#allocation101_spill] sm:$0xff] }
 0x8a8   : > { %19059 = vmatprep.mubr.msk.f32.mxu1 %vm8531_vm4, %v20205_v26  ;;  %v14141_v36 = vsub.f32 %v26776_v7, %v11219_v59  ;;  %v11173_v44 = vadd.f32 %v11125_v47, %v26777_v11  ;;  %v11079_v48 = vadd.f32 %v19631_v0, %v24090_v51  ;;  %v26778_v39 = vld [vmem:[#allocation68_spill] sm:$0xff]  ;;  %v20207_v7 = vld [vmem:[%s20538_s10 + $0x110] sm:$0xff] }
 0x8a9   : > { %v14140_v38 = vsub.f32 %v26778_v39, %v11218_v19  ;;  %v11172_v2 = vadd.f32 %v11124_v41, %v26779_v37  ;;  %v11078_v10 = vadd.f32 %v19632_v42, %v24090_v51  ;;  %v18752_v6 = vpop.f32.mrb[200].mxu0  ;;  %v24526_v31 = vpop.f32.mrb[28].mxu1  ;;  %v20206_v0 = vld [vmem:[%s20538_s10 + $0x108] sm:$0xff] }
 0x8aa   : > { %26780 = vst [vmem:[#allocation90_spill] sm:$0xff] %v24526_v31  ;;  %14189 = vst.msk [vmem:[#allocation2 + $0x148] sm:$0xff] %vm1772_vm1, %v14141_v36  ;;  %v11221_v58 = vadd.f32 %v11173_v44, %v26777_v11  ;;  %v11127_v20 = vmax.f32 %v11079_v48, 0.0  ;;  %v19633_v59 = vadd.f32 %v18752_v6, %v24176_v28  ;;  %v10970_v47 = vpop.f32.mrb[201].mxu0  ;;  %v24531_v26 = vpop.f32.mrb[29].mxu1  ;;  %v26782_v36 = vld [vmem:[#allocation58_spill] sm:$0xff] }
 0x8ab   : > { %26781 = vst [vmem:[#allocation93_spill] sm:$0xff] %v24531_v26  ;;  %19060 = vmatmul.mubr.msk.f32.gmra.mrb[134].mxu1 %vm8531_vm4, %v20206_v0  ;;  %14188 = vst.msk [vmem:[#allocation2 + $0x140] sm:$0xff] %vm1772_vm1, %v14140_v38  ;;  %v11220_v19 = vadd.f32 %v11172_v2, %v26779_v37  ;;  %v11126_v41 = vmax.f32 %v11078_v10, 0.0  ;;  %v19634_v42 = vadd.f32 %v10970_v47, %v24183_v53  ;;  %v26783_v28 = vld [vmem:[#allocation102_spill] sm:$0xff]  ;;  %v26784_v6 = vld [vmem:[#allocation69_spill] sm:$0xff] }
 0x8ac   : > { %19062 = vmatprep.mubr.msk.f32.mxu1 %vm8531_vm4, %v20207_v7  ;;  %v14143_v44 = vsub.f32 %v26782_v36, %v11221_v58  ;;  %v11175_v48 = vadd.f32 %v11127_v20, %v26783_v28  ;;  %v11081_v39 = vadd.f32 %v19633_v59, %v24090_v51  ;;  %v26785_v0 = vld [vmem:[#allocation145_spill] sm:$0xff]  ;;  %v20208_v58 = vld [vmem:[%s20538_s10 + $0x118] sm:$0xff] }
 0x8ad   : > { %v14142_v11 = vsub.f32 %v26784_v6, %v11220_v19  ;;  %v11174_v21 = vadd.f32 %v11126_v41, %v26785_v0  ;;  %v11080_v38 = vadd.f32 %v19634_v42, %v24090_v51  ;;  %v24546_v2 = vpop.f32.mrb[30].mxu1  ;;  %v26786_v19 = vld [vmem:[#allocation60_spill] sm:$0xff]  ;;  %v26787_v51 = vld [vmem:[#allocation146_spill] sm:$0xff] }
 0x8ae   : > { %14191 = vst.msk [vmem:[#allocation2 + $0x158] sm:$0xff] %vm1772_vm1, %v14143_v44  ;;  %v11223_v53 = vadd.f32 %v11175_v48, %v26783_v28  ;;  %v11129_v10 = vmax.f32 %v11081_v39, 0.0  ;;  %v24550_v47 = vpop.f32.mrb[31].mxu1  ;;  %v26788_v7 = vld [vmem:[#allocation70_spill] sm:$0xff]  ;;  %v26789_v44 = vld [vmem:[#allocation147_spill] sm:$0xff] }
 0x8af   : > { %19063 = vmatmul.mubr.msk.f32.gmra.mrb[136].mxu1 %vm8531_vm4, %v20208_v58  ;;  %14190 = vst.msk [vmem:[#allocation2 + $0x150] sm:$0xff] %vm1772_vm1, %v14142_v11  ;;  %v11222_v20 = vadd.f32 %v11174_v21, %v26785_v0  ;;  %v11128_v59 = vmax.f32 %v11080_v38, 0.0  ;;  %v26790_v11 = vld [vmem:[#allocation62_spill] sm:$0xff] }
 0x8b0   : > { %v14145_v41 = vsub.f32 %v26786_v19, %v11223_v53  ;;  %v11177_v42 = vadd.f32 %v11129_v10, %v26787_v51  ;;  %v26791_v53 = vld [vmem:[#allocation71_spill] sm:$0xff]  ;;  %v12352_v0 = vld [vmem:[%s20548_s15 + $0x10] sm:$0xff] }
 0x8b1   : > { %v14144_v36 = vsub.f32 %v26788_v7, %v11222_v20  ;;  %v11176_v6 = vadd.f32 %v11128_v59, %v26789_v44  ;;  %v24560_v48 = vpop.f32.mrb[32].mxu1  ;;  %v12353_v28 = vld [vmem:[%s20548_s15 + $0x18] sm:$0xff] }
 0x8b2   : > { %14193 = vst.msk [vmem:[#allocation2 + $0x168] sm:$0xff] %vm1772_vm1, %v14145_v41  ;;  %v11225_v39 = vadd.f32 %v11177_v42, %v26787_v51  ;;  %v24564_v58 = vpop.f32.mrb[33].mxu1 }
 0x8b3   : > { %14192 = vst.msk [vmem:[#allocation2 + $0x160] sm:$0xff] %vm1772_vm1, %v14144_v36  ;;  %v11224_v21 = vadd.f32 %v11176_v6, %v26789_v44 }
 0x8b4   : > { %v14147_v38 = vsub.f32 %v26790_v11, %v11225_v39 }
 0x8b5   : > { %v14146_v10 = vsub.f32 %v26791_v53, %v11224_v21  ;;  %v24570_v19 = vpop.f32.mrb[34].mxu1 }
 0x8b6   : > { %14195 = vst.msk [vmem:[#allocation2 + $0x178] sm:$0xff] %vm1772_vm1, %v14147_v38  ;;  %v24573_v20 = vpop.f32.mrb[35].mxu1 }
 0x8b7   : > { %14194 = vst.msk [vmem:[#allocation2 + $0x170] sm:$0xff] %vm1772_vm1, %v14146_v10 }
 0x8b9   : > { %v24576_v59 = vpop.f32.mrb[36].mxu1 }
 0x8ba   : > { %v24578_v41 = vpop.f32.mrb[37].mxu1 }
 0x8bd   : > { %v24580_v42 = vpop.f32.mrb[38].mxu1 }
 0x8be   : > { %v24582_v7 = vpop.f32.mrb[39].mxu1 }
 0x8c1   : > { %v24584_v36 = vpop.f32.mrb[40].mxu1 }
 0x8c2   : > { %v24586_v6 = vpop.f32.mrb[41].mxu1 }
 0x8c5   : > { %v18875_v39 = vpop.f32.mrb[42].mxu1 }
 0x8c6   : > { %v11741_v21 = vpop.f32.mrb[43].mxu1 }
 0x8c7   : > { %19091 = vmatprep.mubr.msk.f32.mxu0 %vm1772_vm1, %v11741_v21 }
 0x8c8   : > { %19092 = vmatmul.mubr.msk.f32.gmra.mrb[214].mxu0 %vm1772_vm1, %v18875_v39 }
 0x8c9   : > { %v18878_v11 = vpop.f32.mrb[44].mxu1 }
 0x8ca   : > { %v11751_v38 = vpop.f32.mrb[45].mxu1 }
 0x8cb   : > { %19094 = vmatprep.mubr.msk.f32.mxu0 %vm1772_vm1, %v11751_v38 }
 0x8cc   : > { %19095 = vmatmul.mubr.msk.f32.gmra.mrb[216].mxu0 %vm1772_vm1, %v18878_v11 }
 0x8cd   : > { %v18881_v53 = vpop.f32.mrb[46].mxu1 }
 0x8ce   : > { %v11761_v10 = vpop.f32.mrb[47].mxu1 }
 0x8cf   : > { %19097 = vmatprep.mubr.msk.f32.mxu0 %vm1772_vm1, %v11761_v10  ;;  %v19571_v10 = vpack.c.bf16 %v12353_v28, %v12352_v0 }
 0x8d0   : > { %19098 = vmatmul.mubr.msk.f32.gmra.mrb[218].mxu0 %vm1772_vm1, %v18881_v53 }
 0x8d1   : > { %v18884_v44 = vpop.f32.mrb[48].mxu1  ;;  %19572 = vmatprep.subr.bf16.mxu0 %v19571_v10 }
 0x8d2   : > { %v11771_v51 = vpop.f32.mrb[49].mxu1  ;;  %19574 = vmatpush3.bf16.msra.mxu0 %v19571_v10 }
 0x8d3   : > { %19100 = vmatprep.mubr.msk.f32.mxu0 %vm1772_vm1, %v11771_v51  ;;  %19576 = vmatprep.subr.bf16.mxu0 %v24652_v32 }
 0x8d4   : > { %19101 = vmatmul.mubr.msk.f32.gmra.mrb[220].mxu0 %vm1772_vm1, %v18884_v44 }
 0x8d5   : > { %v18887_v39 = vpop.f32.mrb[50].mxu1 }
 0x8d6   : > { %v11781_v21 = vpop.f32.mrb[51].mxu1 }
 0x8d7   : > { %19103 = vmatprep.mubr.msk.f32.mxu0 %vm1772_vm1, %v11781_v21 }
 0x8d8   : > { %19104 = vmatmul.mubr.msk.f32.gmra.mrb[222].mxu0 %vm1772_vm1, %v18887_v39 }
 0x8d9   : > { %v18890_v11 = vpop.f32.mrb[52].mxu1 }
 0x8da   : > { %v11791_v38 = vpop.f32.mrb[53].mxu1 }
 0x8db   : > { %19106 = vmatprep.mubr.msk.f32.mxu0 %vm1772_vm1, %v11791_v38 }
 0x8dc   : > { %19107 = vmatmul.mubr.msk.f32.gmra.mrb[224].mxu0 %vm1772_vm1, %v18890_v11 }
 0x8dd   : > { %v24602_v53 = vpop.f32.mrb[54].mxu1 }
 0x8de   : > { %26792 = vst [vmem:[#allocation95_spill] sm:$0xff] %v24602_v53  ;;  %v24604_v51 = vpop.f32.mrb[55].mxu1 }
 0x8df   : > { %26793 = vst [vmem:[#allocation98_spill] sm:$0xff] %v24604_v51 }
 0x8e1   : > { %v24606_v44 = vpop.f32.mrb[56].mxu1 }
 0x8e2   : > { %26794 = vst [vmem:[#allocation143_spill] sm:$0xff] %v24606_v44  ;;  %v24608_v21 = vpop.f32.mrb[57].mxu1 }
 0x8e3   : > { %26795 = vst [vmem:[#allocation144_spill] sm:$0xff] %v24608_v21 }
 0x8e5   : > { %v24610_v39 = vpop.f32.mrb[58].mxu1 }
 0x8e6   : > { %26796 = vst [vmem:[#allocation25_spill] sm:$0xff] %v24610_v39  ;;  %v24612_v37 = vpop.f32.mrb[59].mxu1 }
 0x8e7   : > { %26797 = vst [vmem:[#allocation24_spill] sm:$0xff] %v24612_v37 }
 0x8e9   : > { %v24614_v60 = vpop.f32.mrb[60].mxu1 }
 0x8ea   : > { %26798 = vst [vmem:[#allocation27_spill] sm:$0xff] %v24614_v60  ;;  %v24616_v38 = vpop.f32.mrb[61].mxu1 }
 0x8eb   : > { %26799 = vst [vmem:[#allocation26_spill] sm:$0xff] %v24616_v38 }
 0x8ed   : > { %v24618_v28 = vpop.f32.mrb[62].mxu1 }
 0x8ee   : > { %26800 = vst [vmem:[#allocation29_spill] sm:$0xff] %v24618_v28  ;;  %v24620_v0 = vpop.f32.mrb[63].mxu1 }
 0x8ef   : > { %26801 = vst [vmem:[#allocation28_spill] sm:$0xff] %v24620_v0 }
 0x8f1   : > { %v24622_v11 = vpop.f32.mrb[64].mxu1 }
 0x8f2   : > { %26802 = vst [vmem:[#allocation31_spill] sm:$0xff] %v24622_v11  ;;  %v24624_v10 = vpop.f32.mrb[65].mxu1 }
 0x8f3   : > { %26803 = vst [vmem:[#allocation30_spill] sm:$0xff] %v24624_v10 }
 0x8f5   : > { %v24626_v30 = vpop.f32.mrb[66].mxu1 }
 0x8f6   : > { %v24628_v16 = vpop.f32.mrb[67].mxu1 }
 0x8f9   : > { %v24630_v46 = vpop.f32.mrb[68].mxu1 }
 0x8fa   : > { %v24632_v54 = vpop.f32.mrb[69].mxu1 }
 0x8fd   : > { %v24634_v63 = vpop.f32.mrb[70].mxu1 }
 0x8fe   : > { %v24636_v29 = vpop.f32.mrb[71].mxu1 }
 0x901   : > { %v24638_v25 = vpop.f32.mrb[72].mxu1 }
 0x902   : > { %v24640_v35 = vpop.f32.mrb[73].mxu1 }
 0x905   : > { %v24642_v1 = vpop.f32.mrb[74].mxu1 }
 0x906   : > { %v24644_v17 = vpop.f32.mrb[75].mxu1 }
 0x909   : > { %v24646_v61 = vpop.f32.mrb[76].mxu1 }
 0x90a   : > { %v24650_v49 = vpop.f32.mrb[77].mxu1 }
 0x90d   : > { %v18953_v43 = vpop.f32.mrb[78].mxu1 }
 0x90e   : > { %v11986_v11 = vpop.f32.mrb[79].mxu1 }
 0x90f   : > { %19109 = vmatprep.mubr.msk.f32.mxu0 %vm1772_vm1, %v11986_v11 }
 0x910   : > { %19110 = vmatmul.mubr.msk.f32.gmra.mrb[226].mxu0 %vm1772_vm1, %v18953_v43 }
 0x911   : > { %v18956_v10 = vpop.f32.mrb[80].mxu1 }
 0x912   : > { %v11996_v28 = vpop.f32.mrb[81].mxu1 }
 0x913   : > { %19112 = vmatprep.mubr.msk.f32.mxu0 %vm1772_vm1, %v11996_v28 }
 0x914   : > { %19113 = vmatmul.mubr.msk.f32.gmra.mrb[228].mxu0 %vm1772_vm1, %v18956_v10 }
 0x915   : > { %v18959_v0 = vpop.f32.mrb[82].mxu1 }
 0x916   : > { %v12006_v60 = vpop.f32.mrb[83].mxu1 }
 0x917   : > { %19115 = vmatprep.mubr.msk.f32.mxu0 %vm1772_vm1, %v12006_v60 }
 0x918   : > { %19116 = vmatmul.mubr.msk.f32.gmra.mrb[230].mxu0 %vm1772_vm1, %v18959_v0 }
 0x919   : > { %v18962_v27 = vpop.f32.mrb[84].mxu1 }
 0x91a   : > { %v12016_v57 = vpop.f32.mrb[85].mxu1 }
 0x91b   : > { %19118 = vmatprep.mubr.msk.f32.mxu0 %vm1772_vm1, %v12016_v57 }
 0x91c   : > { %19119 = vmatmul.mubr.msk.f32.gmra.mrb[232].mxu0 %vm1772_vm1, %v18962_v27 }
 0x91d   : > { %v18965_v11 = vpop.f32.mrb[86].mxu1 }
 0x91e   : > { %v12026_v43 = vpop.f32.mrb[87].mxu1 }
 0x91f   : > { %19121 = vmatprep.mubr.msk.f32.mxu0 %vm1772_vm1, %v12026_v43 }
 0x920   : > { %19122 = vmatmul.mubr.msk.f32.gmra.mrb[234].mxu0 %vm1772_vm1, %v18965_v11 }
 0x921   : > { %v18968_v28 = vpop.f32.mrb[88].mxu1 }
 0x922   : > { %v12036_v10 = vpop.f32.mrb[89].mxu1 }
 0x923   : > { %19124 = vmatprep.mubr.msk.f32.mxu0 %vm1772_vm1, %v12036_v10 }
 0x924   : > { %19125 = vmatmul.mubr.msk.f32.gmra.mrb[236].mxu0 %vm1772_vm1, %v18968_v28 }
 0x925   : > { %v24667_v60 = vpop.f32.mrb[90].mxu1 }
 0x926   : > { %26804 = vst [vmem:[#allocation33_spill] sm:$0xff] %v24667_v60  ;;  %v24669_v0 = vpop.f32.mrb[91].mxu1 }
 0x927   : > { %26805 = vst [vmem:[#allocation32_spill] sm:$0xff] %v24669_v0 }
 0x929   : > { %v24671_v38 = vpop.f32.mrb[92].mxu1 }
 0x92a   : > { %26806 = vst [vmem:[#allocation103_spill] sm:$0xff] %v24671_v38  ;;  %v24673_v57 = vpop.f32.mrb[93].mxu1 }
 0x92b   : > { %26807 = vst [vmem:[#allocation35_spill] sm:$0xff] %v24673_v57 }
 0x92d   : > { %v24675_v27 = vpop.f32.mrb[94].mxu1 }
 0x92e   : > { %26808 = vst [vmem:[#allocation34_spill] sm:$0xff] %v24675_v27  ;;  %v24677_v39 = vpop.f32.mrb[95].mxu1 }
 0x92f   : > { %26809 = vst [vmem:[#allocation133_spill] sm:$0xff] %v24677_v39 }
 0x931   : > { %v24679_v43 = vpop.f32.mrb[96].mxu1 }
 0x932   : > { %26810 = vst [vmem:[#allocation18_spill] sm:$0xff] %v24679_v43  ;;  %v24681_v11 = vpop.f32.mrb[97].mxu1 }
 0x933   : > { %26811 = vst [vmem:[#allocation39_spill] sm:$0xff] %v24681_v11 }
 0x935   : > { %v24683_v37 = vpop.f32.mrb[98].mxu1 }
 0x936   : > { %26812 = vst [vmem:[#allocation37_spill] sm:$0xff] %v24683_v37  ;;  %v24685_v10 = vpop.f32.mrb[99].mxu1 }
 0x937   : > { %26813 = vst [vmem:[#allocation43_spill] sm:$0xff] %v24685_v10 }
 0x939   : > { %v24687_v28 = vpop.f32.mrb[100].mxu1 }
 0x93a   : > { %26814 = vst [vmem:[#allocation41_spill] sm:$0xff] %v24687_v28  ;;  %v24689_v60 = vpop.f32.mrb[101].mxu1 }
 0x93b   : > { %26815 = vst [vmem:[#allocation47_spill] sm:$0xff] %v24689_v60 }
 0x93d   : > { %v24691_v0 = vpop.f32.mrb[102].mxu1 }
 0x93e   : > { %v24693_v38 = vpop.f32.mrb[103].mxu1 }
 0x941   : > { %v24695_v57 = vpop.f32.mrb[104].mxu1 }
 0x942   : > { %v24697_v27 = vpop.f32.mrb[105].mxu1 }
 0x945   : > { %v24699_v39 = vpop.f32.mrb[106].mxu1 }
 0x946   : > { %v24701_v43 = vpop.f32.mrb[107].mxu1 }
 0x949   : > { %v24703_v11 = vpop.f32.mrb[108].mxu1 }
 0x94a   : > { %v24705_v37 = vpop.f32.mrb[109].mxu1 }
 0x94d   : > { %v24707_v10 = vpop.f32.mrb[110].mxu1 }
 0x94e   : > { %v24709_v28 = vpop.f32.mrb[111].mxu1 }
 0x951   : > { %v24711_v60 = vpop.f32.mrb[112].mxu1 }
 0x952   : > { %v24713_v44 = vpop.f32.mrb[113].mxu1 }
 0x955   : > { %v19031_v21 = vpop.f32.mrb[114].mxu1 }
 0x956   : > { %v12231_v53 = vpop.f32.mrb[115].mxu1 }
 0x957   : > { %19127 = vmatprep.mubr.msk.f32.mxu0 %vm1772_vm1, %v12231_v53 }
 0x958   : > { %19128 = vmatmul.mubr.msk.f32.gmra.mrb[238].mxu0 %vm1772_vm1, %v19031_v21 }
 0x959   : > { %v19034_v51 = vpop.f32.mrb[116].mxu1 }
 0x95a   : > { %v12241_v31 = vpop.f32.mrb[117].mxu1 }
 0x95b   : > { %19130 = vmatprep.mubr.msk.f32.mxu0 %vm1772_vm1, %v12241_v31 }
 0x95c   : > { %19131 = vmatmul.mubr.msk.f32.gmra.mrb[240].mxu0 %vm1772_vm1, %v19034_v51 }
 0x95d   : > { %v19037_v26 = vpop.f32.mrb[118].mxu1 }
 0x95e   : > { %v12251_v33 = vpop.f32.mrb[119].mxu1 }
 0x95f   : > { %19133 = vmatprep.mubr.msk.f32.mxu0 %vm1772_vm1, %v12251_v33  ;;  %v12361_v33 = vld [vmem:[%s20548_s15 + $0x58] sm:$0xff] }
 0x960   : > { %19134 = vmatmul.mubr.msk.f32.gmra.mrb[242].mxu0 %vm1772_vm1, %v19037_v26  ;;  %v26838_v26 = vld [vmem:[#allocation133_spill] sm:$0xff] }
 0x961   : > { %v19040_v18 = vpop.f32.mrb[120].mxu1 }
 0x962   : > { %v12261_v23 = vpop.f32.mrb[121].mxu1 }
 0x963   : > { %19136 = vmatprep.mubr.msk.f32.mxu0 %vm1772_vm1, %v12261_v23  ;;  %v19579_v23 = vpack.c.bf16 %v12361_v33, %v12360_v55  ;;  %v26835_v55 = vld [vmem:[#allocation33_spill] sm:$0xff] }
 0x964   : > { %19137 = vmatmul.mubr.msk.f32.gmra.mrb[244].mxu0 %vm1772_vm1, %v19040_v18  ;;  %v26836_v18 = vld [vmem:[#allocation35_spill] sm:$0xff] }
 0x966   : > { %v19043_v53 = vpop.f32.mrb[122].mxu1 }
 0x967   : > { %v12271_v21 = vpop.f32.mrb[123].mxu1 }
 0x968   : > { %19139 = vmatprep.mubr.msk.f32.mxu0 %vm1772_vm1, %v12271_v21  ;;  %v13956_v21 = vld [vmem:[#allocation4] sm:$0xff] }
 0x969   : > { %19140 = vmatmul.mubr.msk.f32.gmra.mrb[246].mxu0 %vm1772_vm1, %v19043_v53 }
 0x96a   : > { %v19046_v31 = vpop.f32.mrb[124].mxu1 }
 0x96b   : > { %v12281_v51 = vpop.f32.mrb[125].mxu1 }
 0x96c   : > { %19142 = vmatprep.mubr.msk.f32.mxu0 %vm1772_vm1, %v12281_v51 }
 0x96d   : > { %19143 = vmatmul.mubr.msk.f32.gmra.mrb[248].mxu0 %vm1772_vm1, %v19046_v31 }
 0x96e   : > { %19153 = vmatprep.mubr.msk.f32.mxu0 %vm1772_vm1, %v24203_v5 }
 0x971   : > { %19154 = vmatmul.mubr.msk.f32.vlgmr.msra.gmra.mrb[202].mxu0 %vm1772_vm1, %v24196_v9 }
 0x972   : > { %19156 = vmatprep.mubr.msk.f32.mxu0 %vm1772_vm1, %v24223_v12  ;;  %19578 = vmatpush3.bf16.msra.mxu0 %v24652_v32  ;;  %v24770_v32 = vpop.f32.mrb[126].mxu1 }
 0x973   : > { %19580 = vmatprep.subr.bf16.mxu0 %v19579_v23  ;;  %v24774_v9 = vpop.f32.mrb[127].mxu1 }
 0x974   : > { %v24778_v5 = vpop.f32.mrb[128].mxu1 }
 0x975   : > { %19157 = vmatmul.mubr.msk.f32.gmra.mrb[204].mxu0 %vm1772_vm1, %v24216_v50  ;;  %v24782_v50 = vpop.f32.mrb[129].mxu1 }
 0x976   : > { %19159 = vmatprep.mubr.msk.f32.mxu0 %vm1772_vm1, %v24243_v3  ;;  %19582 = vmatpush3.bf16.msra.mxu0 %v19579_v23  ;;  %v24786_v12 = vpop.f32.mrb[130].mxu1 }
 0x979   : > { %19160 = vmatmul.mubr.msk.f32.gmra.mrb[206].mxu0 %vm1772_vm1, %v24236_v56  ;;  %v24790_v56 = vpop.f32.mrb[131].mxu1 }
 0x97a   : > { %19162 = vmatprep.mubr.msk.f32.mxu0 %vm1772_vm1, %v24263_v13  ;;  %v24794_v3 = vpop.f32.mrb[132].mxu1 }
 0x97d   : > { %19163 = vmatmul.mubr.msk.f32.gmra.mrb[208].mxu0 %vm1772_vm1, %v24256_v40  ;;  %v24798_v40 = vpop.f32.mrb[133].mxu1 }
 0x97e   : > { %19165 = vmatprep.mubr.msk.f32.mxu0 %vm1772_vm1, %v24283_v8  ;;  %v24802_v13 = vpop.f32.mrb[134].mxu1 }
 0x981   : > { %19166 = vmatmul.mubr.msk.f32.gmra.mrb[210].mxu0 %vm1772_vm1, %v24276_v45  ;;  %v24806_v45 = vpop.f32.mrb[135].mxu1 }
 0x982   : > { %19168 = vmatprep.mubr.msk.f32.mxu0 %vm1772_vm1, %v24303_v52  ;;  %v24810_v8 = vpop.f32.mrb[136].mxu1  ;;  %v26826_v52 = vld [vmem:[#allocation24_spill] sm:$0xff] }
 0x985   : > { %19169 = vmatmul.mubr.msk.f32.gmra.mrb[212].mxu0 %vm1772_vm1, %v24296_v15  ;;  %v26825_v15 = vld [vmem:[#allocation143_spill] sm:$0xff] }
 0x986   : > { %19171 = vmatprep.mubr.msk.f32.mxu0 %vm1772_vm1, %v24550_v47  ;;  %v26840_v47 = vld [vmem:[#allocation39_spill] sm:$0xff] }
 0x989   : > { %19172 = vmatmul.mubr.msk.f32.gmra.mrb[214].mxu0 %vm1772_vm1, %v24546_v2  ;;  %v26839_v2 = vld [vmem:[#allocation34_spill] sm:$0xff] }
 0x98a   : > { %19174 = vmatprep.mubr.msk.f32.mxu0 %vm1772_vm1, %v24564_v58  ;;  %v26842_v58 = vld [vmem:[#allocation43_spill] sm:$0xff] }
 0x98d   : > { %19175 = vmatmul.mubr.msk.f32.gmra.mrb[216].mxu0 %vm1772_vm1, %v24560_v48  ;;  %v26841_v48 = vld [vmem:[#allocation18_spill] sm:$0xff] }
 0x98e   : > { %19177 = vmatprep.mubr.msk.f32.mxu0 %vm1772_vm1, %v24573_v20  ;;  %v26844_v20 = vld [vmem:[#allocation47_spill] sm:$0xff] }
 0x991   : > { %19178 = vmatmul.mubr.msk.f32.gmra.mrb[218].mxu0 %vm1772_vm1, %v24570_v19  ;;  %v26843_v19 = vld [vmem:[#allocation37_spill] sm:$0xff] }
 0x992   : > { %19180 = vmatprep.mubr.msk.f32.mxu0 %vm1772_vm1, %v24578_v41  ;;  %v24951_v41 = vld [vmem:[%s1183_s26] ss:$0 sm:$0xff] }
 0x995   : > { %19181 = vmatmul.mubr.msk.f32.gmra.mrb[220].mxu0 %vm1772_vm1, %v24576_v59  ;;  %v26845_v59 = vld [vmem:[#allocation41_spill] sm:$0xff] }
 0x996   : > { %19183 = vmatprep.mubr.msk.f32.mxu0 %vm1772_vm1, %v24582_v7 }
 0x999   : > { %19184 = vmatmul.mubr.msk.f32.gmra.mrb[222].mxu0 %vm1772_vm1, %v24580_v42 }
 0x99a   : > { %19186 = vmatprep.mubr.msk.f32.mxu0 %vm1772_vm1, %v24586_v6 }
 0x99d   : > { %19187 = vmatmul.mubr.msk.f32.gmra.mrb[224].mxu0 %vm1772_vm1, %v24584_v36 }
 0x99e   : > { %19189 = vmatprep.mubr.msk.f32.mxu0 %vm1772_vm1, %v24628_v16  ;;  %v26827_v16 = vld [vmem:[#allocation25_spill] sm:$0xff] }
 0x9a1   : > { %19190 = vmatmul.mubr.msk.f32.gmra.mrb[226].mxu0 %vm1772_vm1, %v24626_v30  ;;  %v26828_v30 = vld [vmem:[#allocation26_spill] sm:$0xff] }
 0x9a2   : > { %19192 = vmatprep.mubr.msk.f32.mxu0 %vm1772_vm1, %v24632_v54  ;;  %v24814_v54 = vpop.f32.mrb[137].mxu1 }
 0x9a5   : > { %19193 = vmatmul.mubr.msk.f32.gmra.mrb[228].mxu0 %vm1772_vm1, %v24630_v46  ;;  %v26824_v46 = vld [vmem:[#allocation144_spill] sm:$0xff] }
 0x9a6   : > { %19195 = vmatprep.mubr.msk.f32.mxu0 %vm1772_vm1, %v24636_v29  ;;  %v26822_v29 = vld [vmem:[#allocation98_spill] sm:$0xff] }
 0x9a9   : > { %19196 = vmatmul.mubr.msk.f32.gmra.mrb[230].mxu0 %vm1772_vm1, %v24634_v63  ;;  %v26823_v63 = vld [vmem:[#allocation95_spill] sm:$0xff] }
 0x9aa   : > { %19198 = vmatprep.mubr.msk.f32.mxu0 %vm1772_vm1, %v24640_v35  ;;  %v26820_v35 = vld [vmem:[#allocation93_spill] sm:$0xff] }
 0x9ad   : > { %19199 = vmatmul.mubr.msk.f32.gmra.mrb[232].mxu0 %vm1772_vm1, %v24638_v25  ;;  %v26821_v25 = vld [vmem:[#allocation90_spill] sm:$0xff] }
 0x9ae   : > { %19201 = vmatprep.mubr.msk.f32.mxu0 %vm1772_vm1, %v24644_v17  ;;  %v26818_v17 = vld [vmem:[#allocation88_spill] sm:$0xff] }
 0x9b1   : > { %19202 = vmatmul.mubr.msk.f32.gmra.mrb[234].mxu0 %vm1772_vm1, %v24642_v1  ;;  %v26819_v1 = vld [vmem:[#allocation86_spill] sm:$0xff] }
 0x9b2   : > { %19204 = vmatprep.mubr.msk.f32.mxu0 %vm1772_vm1, %v24650_v49  ;;  %v26816_v49 = vld [vmem:[#allocation84_spill] sm:$0xff] }
 0x9b5   : > { %19205 = vmatmul.mubr.msk.f32.gmra.mrb[236].mxu0 %vm1772_vm1, %v24646_v61  ;;  %v26817_v61 = vld [vmem:[#allocation81_spill] sm:$0xff] }
 0x9b6   : > { %19207 = vmatprep.mubr.msk.f32.mxu0 %vm1772_vm1, %v24693_v38 }
 0x9b9   : > { %19208 = vmatmul.mubr.msk.f32.gmra.mrb[238].mxu0 %vm1772_vm1, %v24691_v0 }
 0x9ba   : > { %19210 = vmatprep.mubr.msk.f32.mxu0 %vm1772_vm1, %v24697_v27 }
 0x9bd   : > { %19211 = vmatmul.mubr.msk.f32.gmra.mrb[240].mxu0 %vm1772_vm1, %v24695_v57 }
 0x9be   : > { %19213 = vmatprep.mubr.msk.f32.mxu0 %vm1772_vm1, %v24701_v43  ;;  %v13957_v43 = vld [vmem:[#allocation4 + $0x8] sm:$0xff] }
 0x9c1   : > { %19214 = vmatmul.mubr.msk.f32.gmra.mrb[242].mxu0 %vm1772_vm1, %v24699_v39 }
 0x9c2   : > { %19216 = vmatprep.mubr.msk.f32.mxu0 %vm1772_vm1, %v24705_v37  ;;  %v26837_v37 = vld [vmem:[#allocation103_spill] sm:$0xff] }
 0x9c5   : > { %19217 = vmatmul.mubr.msk.f32.gmra.mrb[244].mxu0 %vm1772_vm1, %v24703_v11  ;;  %v26848_v11 = vld [vmem:[#allocation105_spill] sm:$0xff] }
 0x9c6   : > { %19219 = vmatprep.mubr.msk.f32.mxu0 %vm1772_vm1, %v24709_v28 }
 0x9c9   : > { %19220 = vmatmul.mubr.msk.f32.gmra.mrb[246].mxu0 %vm1772_vm1, %v24707_v10 }
 0x9ca   : > { %19222 = vmatprep.mubr.msk.f32.mxu0 %vm1772_vm1, %v24713_v44 }
 0x9cd   : > { %19223 = vmatmul.mubr.msk.f32.gmra.mrb[248].mxu0 %vm1772_vm1, %v24711_v60  ;;  %v26847_v60 = vld [vmem:[#allocation104_spill] sm:$0xff] }
 0x9ce   : > { %19233 = vmatprep.mubr.msk.f32.mxu0 %vm1772_vm1, %v24433_v34  ;;  %v26830_v34 = vld [vmem:[#allocation28_spill] sm:$0xff] }
 0x9d1   : > { %19234 = vmatmul.mubr.msk.f32.vlgmr.msra.gmra.mrb[202].mxu0 %vm1772_vm1, %v24426_v22  ;;  %v26829_v22 = vld [vmem:[#allocation27_spill] sm:$0xff] }
 0x9d2   : > { %19236 = vmatprep.mubr.msk.f32.mxu0 %vm1772_vm1, %v24451_v14  ;;  %v26832_v14 = vld [vmem:[#allocation30_spill] sm:$0xff] }
 0x9d5   : > { %19237 = vmatmul.mubr.msk.f32.gmra.mrb[204].mxu0 %vm1772_vm1, %v24446_v24  ;;  %v26831_v24 = vld [vmem:[#allocation29_spill] sm:$0xff] }
 0x9d6   : > { %19239 = vmatprep.mubr.msk.f32.mxu0 %vm1772_vm1, %v24471_v62  ;;  %v26834_v62 = vld [vmem:[#allocation32_spill] sm:$0xff] }
 0x9d9   : > { %19240 = vmatmul.mubr.msk.f32.gmra.mrb[206].mxu0 %vm1772_vm1, %v24466_v4  ;;  %v26833_v4 = vld [vmem:[#allocation31_spill] sm:$0xff] }
 0x9da   : > { %19242 = vmatprep.mubr.msk.f32.mxu0 %vm1772_vm1, %v26816_v49 }
 0x9dd   : > { %19243 = vmatmul.mubr.msk.f32.gmra.mrb[208].mxu0 %vm1772_vm1, %v26817_v61 }
 0x9de   : > { %19245 = vmatprep.mubr.msk.f32.mxu0 %vm1772_vm1, %v26818_v17 }
 0x9e1   : > { %19246 = vmatmul.mubr.msk.f32.gmra.mrb[210].mxu0 %vm1772_vm1, %v26819_v1 }
 0x9e2   : > { %19248 = vmatprep.mubr.msk.f32.mxu0 %vm1772_vm1, %v26820_v35 }
 0x9e5   : > { %19249 = vmatmul.mubr.msk.f32.gmra.mrb[212].mxu0 %vm1772_vm1, %v26821_v25  ;;  %v26851_v25 = vld [vmem:[#allocation110_spill] sm:$0xff] }
 0x9e6   : > { %19251 = vmatprep.mubr.msk.f32.mxu0 %vm1772_vm1, %v26822_v29 }
 0x9e9   : > { %19252 = vmatmul.mubr.msk.f32.gmra.mrb[214].mxu0 %vm1772_vm1, %v26823_v63 }
 0x9ea   : > { %19254 = vmatprep.mubr.msk.f32.mxu0 %vm1772_vm1, %v26824_v46 }
 0x9ed   : > { %19255 = vmatmul.mubr.msk.f32.gmra.mrb[216].mxu0 %vm1772_vm1, %v26825_v15 }
 0x9ee   : > { %19257 = vmatprep.mubr.msk.f32.mxu0 %vm1772_vm1, %v26826_v52  ;;  %v13961_v52 = vld [vmem:[#allocation4 + $0x28] sm:$0xff] }
 0x9f1   : > { %19258 = vmatmul.mubr.msk.f32.gmra.mrb[218].mxu0 %vm1772_vm1, %v26827_v16  ;;  %v26852_v16 = vld [vmem:[#allocation111_spill] sm:$0xff] }
 0x9f2   : > { %19260 = vmatprep.mubr.msk.f32.mxu0 %vm1772_vm1, %v26828_v30 }
 0x9f5   : > { %19261 = vmatmul.mubr.msk.f32.gmra.mrb[220].mxu0 %vm1772_vm1, %v26829_v22 }
 0x9f6   : > { %19263 = vmatprep.mubr.msk.f32.mxu0 %vm1772_vm1, %v26830_v34 }
 0x9f9   : > { %19264 = vmatmul.mubr.msk.f32.gmra.mrb[222].mxu0 %vm1772_vm1, %v26831_v24  ;;  %v13960_v24 = vld [vmem:[#allocation4 + $0x20] sm:$0xff] }
 0x9fa   : > { %19266 = vmatprep.mubr.msk.f32.mxu0 %vm1772_vm1, %v26832_v14 }
 0x9fd   : > { %19267 = vmatmul.mubr.msk.f32.gmra.mrb[224].mxu0 %vm1772_vm1, %v26833_v4 }
 0x9fe   : > { %19269 = vmatprep.mubr.msk.f32.mxu0 %vm1772_vm1, %v26834_v62 }
 0xa01   : > { %19270 = vmatmul.mubr.msk.f32.gmra.mrb[226].mxu0 %vm1772_vm1, %v26835_v55 }
 0xa02   : > { %19272 = vmatprep.mubr.msk.f32.mxu0 %vm1772_vm1, %v26836_v18 }
 0xa05   : > { %19273 = vmatmul.mubr.msk.f32.gmra.mrb[228].mxu0 %vm1772_vm1, %v26837_v37  ;;  %v26853_v37 = vld [vmem:[#allocation19_spill] sm:$0xff] }
 0xa06   : > { %19275 = vmatprep.mubr.msk.f32.mxu0 %vm1772_vm1, %v26838_v26 }
 0xa09   : > { %19276 = vmatmul.mubr.msk.f32.gmra.mrb[230].mxu0 %vm1772_vm1, %v26839_v2 }
 0xa0a   : > { %19278 = vmatprep.mubr.msk.f32.mxu0 %vm1772_vm1, %v26840_v47 }
 0xa0d   : > { %19279 = vmatmul.mubr.msk.f32.gmra.mrb[232].mxu0 %vm1772_vm1, %v26841_v48 }
 0xa0e   : > { %19281 = vmatprep.mubr.msk.f32.mxu0 %vm1772_vm1, %v26842_v58  ;;  %v13963_v58 = vld [vmem:[#allocation4 + $0x38] sm:$0xff] }
 0xa11   : > { %19282 = vmatmul.mubr.msk.f32.gmra.mrb[234].mxu0 %vm1772_vm1, %v26843_v19  ;;  %v26854_v19 = vld [vmem:[#allocation21_spill] sm:$0xff] }
 0xa12   : > { %19284 = vmatprep.mubr.msk.f32.mxu0 %vm1772_vm1, %v26844_v20 }
 0xa15   : > { %19285 = vmatmul.mubr.msk.f32.gmra.mrb[236].mxu0 %vm1772_vm1, %v26845_v59 }
 0xa16   : > { %19287 = vmatprep.mubr.msk.f32.mxu0 %vm1772_vm1, %v24774_v9  ;;  %v26849_v9 = vld [vmem:[#allocation107_spill] sm:$0xff] }
 0xa19   : > { %19288 = vmatmul.mubr.msk.f32.gmra.mrb[238].mxu0 %vm1772_vm1, %v24770_v32 }
 0xa1a   : > { %19290 = vmatprep.mubr.msk.f32.mxu0 %vm1772_vm1, %v24782_v50 }
 0xa1d   : > { %19291 = vmatmul.mubr.msk.f32.gmra.mrb[240].mxu0 %vm1772_vm1, %v24778_v5 }
 0xa1e   : > { %19293 = vmatprep.mubr.msk.f32.mxu0 %vm1772_vm1, %v24790_v56 }
 0xa21   : > { %19294 = vmatmul.mubr.msk.f32.gmra.mrb[242].mxu0 %vm1772_vm1, %v24786_v12 }
 0xa22   : > { %19296 = vmatprep.mubr.msk.f32.mxu0 %vm1772_vm1, %v24798_v40  ;;  %v26850_v40 = vld [vmem:[#allocation108_spill] sm:$0xff] }
 0xa25   : > { %19297 = vmatmul.mubr.msk.f32.gmra.mrb[244].mxu0 %vm1772_vm1, %v24794_v3  ;;  %v13959_v3 = vld [vmem:[#allocation4 + $0x18] sm:$0xff] }
 0xa26   : > { %19299 = vmatprep.mubr.msk.f32.mxu0 %vm1772_vm1, %v24806_v45 }
 0xa29   : > { %19300 = vmatmul.mubr.msk.f32.gmra.mrb[246].mxu0 %vm1772_vm1, %v24802_v13 }
 0xa2a   : > { %19302 = vmatprep.mubr.msk.f32.mxu0 %vm1772_vm1, %v24814_v54  ;;  %v13958_v54 = vld [vmem:[#allocation4 + $0x10] sm:$0xff] }
 0xa2d   : > { %19303 = vmatmul.mubr.msk.f32.gmra.mrb[248].mxu0 %vm1772_vm1, %v24810_v8 }
 0xaa4   : > { %v19235_v42 = vpop.f32.mrb[202].mxu0 }
 0xaa5   : > { %v13765_v7 = vadd.f32 %v19235_v42, %v24951_v41  ;;  %v13470_v36 = vpop.f32.mrb[203].mxu0 }
 0xaa6   : > { %v13764_v6 = vadd.f32 %v24951_v41, %v13470_v36 }
 0xaa7   : > { %v13813_v44 = vmax.f32 %v13765_v7, 0.0  ;;  %v13962_v7 = vld [vmem:[#allocation4 + $0x30] sm:$0xff] }
 0xaa8   : > { %v13812_v39 = vmax.f32 %v13764_v6, 0.0  ;;  %v19238_v38 = vpop.f32.mrb[204].mxu0 }
 0xaa9   : > { %v13861_v0 = vadd.f32 %v13813_v44, %v26847_v60  ;;  %v13767_v57 = vadd.f32 %v19238_v38, %v24951_v41  ;;  %v13480_v27 = vpop.f32.mrb[205].mxu0 }
 0xaaa   : > { %v13860_v10 = vadd.f32 %v13812_v39, %v26848_v11  ;;  %v13766_v28 = vadd.f32 %v24951_v41, %v13480_v27 }
 0xaab   : > { %v13909_v53 = vadd.f32 %v13861_v0, %v26847_v60  ;;  %v13815_v31 = vmax.f32 %v13767_v57, 0.0  ;;  %v26855_v60 = vld [vmem:[#allocation114_spill] sm:$0xff] }
 0xaac   : > { %v13908_v51 = vadd.f32 %v13860_v10, %v26848_v11  ;;  %v13814_v33 = vmax.f32 %v13766_v28, 0.0  ;;  %v19241_v23 = vpop.f32.mrb[206].mxu0  ;;  %v13965_v11 = vld [vmem:[#allocation4 + $0x48] sm:$0xff]  ;;  %v26856_v10 = vld [vmem:[#allocation115_spill] sm:$0xff] }
 0xaad   : > { %v14005_v32 = vadd.f32 %v13957_v43, %v13909_v53  ;;  %v13863_v5 = vadd.f32 %v13815_v31, %v26849_v9  ;;  %v13769_v50 = vadd.f32 %v19241_v23, %v24951_v41  ;;  %v13490_v12 = vpop.f32.mrb[207].mxu0  ;;  %v13964_v31 = vld [vmem:[#allocation4 + $0x40] sm:$0xff] }
 0xaae   : > { %v14004_v56 = vadd.f32 %v13956_v21, %v13908_v51  ;;  %v13862_v13 = vadd.f32 %v13814_v33, %v26850_v40  ;;  %v13768_v45 = vadd.f32 %v24951_v41, %v13490_v12 }
 0xaaf   : > { %14053 = vst.msk [vmem:[#allocation4 + $0x8] sm:$0xff] %vm1772_vm1, %v14005_v32  ;;  %v13911_v8 = vadd.f32 %v13863_v5, %v26849_v9  ;;  %v13817_v49 = vmax.f32 %v13769_v50, 0.0  ;;  %v26857_v5 = vld [vmem:[#allocation117_spill] sm:$0xff] }
 0xab0   : > { %14052 = vst.msk [vmem:[#allocation4] sm:$0xff] %vm1772_vm1, %v14004_v56  ;;  %v13910_v61 = vadd.f32 %v13862_v13, %v26850_v40  ;;  %v13816_v17 = vmax.f32 %v13768_v45, 0.0  ;;  %v19244_v1 = vpop.f32.mrb[208].mxu0  ;;  %v13967_v40 = vld [vmem:[#allocation4 + $0x58] sm:$0xff] }
 0xab1   : > { %v14007_v35 = vadd.f32 %v13959_v3, %v13911_v8  ;;  %v13865_v29 = vadd.f32 %v13817_v49, %v26851_v25  ;;  %v13771_v63 = vadd.f32 %v19244_v1, %v24951_v41  ;;  %v13500_v46 = vpop.f32.mrb[209].mxu0  ;;  %v26858_v13 = vld [vmem:[#allocation118_spill] sm:$0xff] }
 0xab2   : > { %v14006_v15 = vadd.f32 %v13958_v54, %v13910_v61  ;;  %v13864_v30 = vadd.f32 %v13816_v17, %v26852_v16  ;;  %v13770_v22 = vadd.f32 %v24951_v41, %v13500_v46  ;;  %v13966_v49 = vld [vmem:[#allocation4 + $0x50] sm:$0xff] }
 0xab3   : > { %14055 = vst.msk [vmem:[#allocation4 + $0x18] sm:$0xff] %vm1772_vm1, %v14007_v35  ;;  %v13913_v34 = vadd.f32 %v13865_v29, %v26851_v25  ;;  %v13819_v14 = vmax.f32 %v13771_v63, 0.0  ;;  %v26859_v29 = vld [vmem:[#allocation120_spill] sm:$0xff] }
 0xab4   : > { %14054 = vst.msk [vmem:[#allocation4 + $0x10] sm:$0xff] %vm1772_vm1, %v14006_v15  ;;  %v13912_v4 = vadd.f32 %v13864_v30, %v26852_v16  ;;  %v13818_v62 = vmax.f32 %v13770_v22, 0.0  ;;  %v19247_v55 = vpop.f32.mrb[210].mxu0  ;;  %v13969_v16 = vld [vmem:[#allocation4 + $0x68] sm:$0xff] }
 0xab5   : > { %v14009_v18 = vadd.f32 %v13961_v52, %v13913_v34  ;;  %v13867_v26 = vadd.f32 %v13819_v14, %v26853_v37  ;;  %v13773_v2 = vadd.f32 %v19247_v55, %v24951_v41  ;;  %v13510_v47 = vpop.f32.mrb[211].mxu0  ;;  %v26860_v30 = vld [vmem:[#allocation121_spill] sm:$0xff]  ;;  %v13968_v14 = vld [vmem:[#allocation4 + $0x60] sm:$0xff] }
 0xab6   : > { %v14008_v48 = vadd.f32 %v13960_v24, %v13912_v4  ;;  %v13866_v20 = vadd.f32 %v13818_v62, %v26854_v19  ;;  %v13772_v59 = vadd.f32 %v24951_v41, %v13510_v47 }
 0xab7   : > { %14057 = vst.msk [vmem:[#allocation4 + $0x28] sm:$0xff] %vm1772_vm1, %v14009_v18  ;;  %v13915_v42 = vadd.f32 %v13867_v26, %v26853_v37  ;;  %v13821_v36 = vmax.f32 %v13773_v2, 0.0  ;;  %v26861_v26 = vld [vmem:[#allocation123_spill] sm:$0xff] }
 0xab8   : > { %14056 = vst.msk [vmem:[#allocation4 + $0x20] sm:$0xff] %vm1772_vm1, %v14008_v48  ;;  %v13914_v6 = vadd.f32 %v13866_v20, %v26854_v19  ;;  %v13820_v44 = vmax.f32 %v13772_v59, 0.0  ;;  %v19250_v39 = vpop.f32.mrb[212].mxu0  ;;  %v13971_v19 = vld [vmem:[#allocation4 + $0x78] sm:$0xff]  ;;  %v26862_v20 = vld [vmem:[#allocation124_spill] sm:$0xff] }
 0xab9   : > { %v14011_v38 = vadd.f32 %v13963_v58, %v13915_v42  ;;  %v13869_v0 = vadd.f32 %v13821_v36, %v26855_v60  ;;  %v13775_v57 = vadd.f32 %v19250_v39, %v24951_v41  ;;  %v13520_v27 = vpop.f32.mrb[213].mxu0  ;;  %v13970_v36 = vld [vmem:[#allocation4 + $0x70] sm:$0xff] }
 0xaba   : > { %v14010_v43 = vadd.f32 %v13962_v7, %v13914_v6  ;;  %v13868_v28 = vadd.f32 %v13820_v44, %v26856_v10  ;;  %v13774_v53 = vadd.f32 %v24951_v41, %v13520_v27 }
 0xabb   : > { %14059 = vst.msk [vmem:[#allocation4 + $0x38] sm:$0xff] %vm1772_vm1, %v14011_v38  ;;  %v13917_v21 = vadd.f32 %v13869_v0, %v26855_v60  ;;  %v13823_v51 = vmax.f32 %v13775_v57, 0.0  ;;  %v26863_v0 = vld [vmem:[#allocation72_spill] sm:$0xff] }
 0xabc   : > { %14058 = vst.msk [vmem:[#allocation4 + $0x30] sm:$0xff] %vm1772_vm1, %v14010_v43  ;;  %v13916_v33 = vadd.f32 %v13868_v28, %v26856_v10  ;;  %v13822_v23 = vmax.f32 %v13774_v53, 0.0  ;;  %v19253_v32 = vpop.f32.mrb[214].mxu0  ;;  %v13973_v10 = vld [vmem:[#allocation4 + $0x88] sm:$0xff] }
 0xabd   : > { %v14013_v9 = vadd.f32 %v13965_v11, %v13917_v21  ;;  %v13871_v50 = vadd.f32 %v13823_v51, %v26857_v5  ;;  %v13777_v12 = vadd.f32 %v19253_v32, %v24951_v41  ;;  %v13530_v56 = vpop.f32.mrb[215].mxu0  ;;  %v26864_v28 = vld [vmem:[#allocation73_spill] sm:$0xff]  ;;  %v13972_v51 = vld [vmem:[#allocation4 + $0x80] sm:$0xff] }
 0xabe   : > { %v14012_v3 = vadd.f32 %v13964_v31, %v13916_v33  ;;  %v13870_v45 = vadd.f32 %v13822_v23, %v26858_v13  ;;  %v13776_v8 = vadd.f32 %v24951_v41, %v13530_v56 }
 0xabf   : > { %14061 = vst.msk [vmem:[#allocation4 + $0x48] sm:$0xff] %vm1772_vm1, %v14013_v9  ;;  %v13919_v54 = vadd.f32 %v13871_v50, %v26857_v5  ;;  %v13825_v61 = vmax.f32 %v13777_v12, 0.0  ;;  %v26865_v50 = vld [vmem:[#allocation74_spill] sm:$0xff] }
 0xac0   : > { %14060 = vst.msk [vmem:[#allocation4 + $0x40] sm:$0xff] %vm1772_vm1, %v14012_v3  ;;  %v13918_v17 = vadd.f32 %v13870_v45, %v26858_v13  ;;  %v13824_v1 = vmax.f32 %v13776_v8, 0.0  ;;  %v19256_v35 = vpop.f32.mrb[216].mxu0  ;;  %v13975_v13 = vld [vmem:[#allocation4 + $0x98] sm:$0xff] }
 0xac1   : > { %v14015_v25 = vadd.f32 %v13967_v40, %v13919_v54  ;;  %v13873_v63 = vadd.f32 %v13825_v61, %v26859_v29  ;;  %v13779_v46 = vadd.f32 %v19256_v35, %v24951_v41  ;;  %v13540_v15 = vpop.f32.mrb[217].mxu0  ;;  %v26866_v45 = vld [vmem:[#allocation75_spill] sm:$0xff]  ;;  %v13974_v61 = vld [vmem:[#allocation4 + $0x90] sm:$0xff] }
 0xac2   : > { %v14014_v52 = vadd.f32 %v13966_v49, %v13918_v17  ;;  %v13872_v22 = vadd.f32 %v13824_v1, %v26860_v30  ;;  %v13778_v34 = vadd.f32 %v24951_v41, %v13540_v15 }
 0xac3   : > { %14063 = vst.msk [vmem:[#allocation4 + $0x58] sm:$0xff] %vm1772_vm1, %v14015_v25  ;;  %v13921_v24 = vadd.f32 %v13873_v63, %v26859_v29  ;;  %v13827_v4 = vmax.f32 %v13779_v46, 0.0  ;;  %v26867_v63 = vld [vmem:[#allocation76_spill] sm:$0xff] }
 0xac4   : > { %14062 = vst.msk [vmem:[#allocation4 + $0x50] sm:$0xff] %vm1772_vm1, %v14014_v52  ;;  %v13920_v62 = vadd.f32 %v13872_v22, %v26860_v30  ;;  %v13826_v55 = vmax.f32 %v13778_v34, 0.0  ;;  %v19259_v18 = vpop.f32.mrb[218].mxu0  ;;  %v13977_v30 = vld [vmem:[#allocation4 + $0xa8] sm:$0xff] }
 0xac5   : > { %v14017_v37 = vadd.f32 %v13969_v16, %v13921_v24  ;;  %v13875_v2 = vadd.f32 %v13827_v4, %v26861_v26  ;;  %v13781_v47 = vadd.f32 %v19259_v18, %v24951_v41  ;;  %v13550_v48 = vpop.f32.mrb[219].mxu0  ;;  %v26868_v22 = vld [vmem:[#allocation77_spill] sm:$0xff]  ;;  %v13976_v4 = vld [vmem:[#allocation4 + $0xa0] sm:$0xff] }
 0xac6   : > { %v14016_v58 = vadd.f32 %v13968_v14, %v13920_v62  ;;  %v13874_v59 = vadd.f32 %v13826_v55, %v26862_v20  ;;  %v13780_v42 = vadd.f32 %v24951_v41, %v13550_v48 }
 0xac7   : > { %14065 = vst.msk [vmem:[#allocation4 + $0x68] sm:$0xff] %vm1772_vm1, %v14017_v37  ;;  %v13923_v7 = vadd.f32 %v13875_v2, %v26861_v26  ;;  %v13829_v6 = vmax.f32 %v13781_v47, 0.0  ;;  %v26869_v2 = vld [vmem:[#allocation80_spill] sm:$0xff] }
 0xac8   : > { %14064 = vst.msk [vmem:[#allocation4 + $0x60] sm:$0xff] %vm1772_vm1, %v14016_v58  ;;  %v13922_v44 = vadd.f32 %v13874_v59, %v26862_v20  ;;  %v13828_v39 = vmax.f32 %v13780_v42, 0.0  ;;  %v19262_v38 = vpop.f32.mrb[220].mxu0  ;;  %v13979_v20 = vld [vmem:[#allocation4 + $0xb8] sm:$0xff]  ;;  %v26870_v59 = vld [vmem:[#allocation128_spill] sm:$0xff] }
 0xac9   : > { %v14019_v60 = vadd.f32 %v13971_v19, %v13923_v7  ;;  %v13877_v57 = vadd.f32 %v13829_v6, %v26863_v0  ;;  %v13783_v27 = vadd.f32 %v19262_v38, %v24951_v41  ;;  %v13560_v43 = vpop.f32.mrb[221].mxu0  ;;  %v13978_v6 = vld [vmem:[#allocation4 + $0xb0] sm:$0xff] }
 0xaca   : > { %v14018_v11 = vadd.f32 %v13970_v36, %v13922_v44  ;;  %v13876_v53 = vadd.f32 %v13828_v39, %v26864_v28  ;;  %v13782_v21 = vadd.f32 %v24951_v41, %v13560_v43 }
 0xacb   : > { %14067 = vst.msk [vmem:[#allocation4 + $0x78] sm:$0xff] %vm1772_vm1, %v14019_v60  ;;  %v13925_v31 = vadd.f32 %v13877_v57, %v26863_v0  ;;  %v13831_v33 = vmax.f32 %v13783_v27, 0.0  ;;  %v26871_v57 = vld [vmem:[#allocation82_spill] sm:$0xff] }
 0xacc   : > { %14066 = vst.msk [vmem:[#allocation4 + $0x70] sm:$0xff] %vm1772_vm1, %v14018_v11  ;;  %v13924_v23 = vadd.f32 %v13876_v53, %v26864_v28  ;;  %v13830_v32 = vmax.f32 %v13782_v21, 0.0  ;;  %v19265_v9 = vpop.f32.mrb[222].mxu0  ;;  %v13981_v28 = vld [vmem:[#allocation4 + $0xc8] sm:$0xff] }
 0xacd   : > { %v14021_v5 = vadd.f32 %v13973_v10, %v13925_v31  ;;  %v13879_v12 = vadd.f32 %v13831_v33, %v26865_v50  ;;  %v13785_v56 = vadd.f32 %v19265_v9, %v24951_v41  ;;  %v13570_v3 = vpop.f32.mrb[223].mxu0  ;;  %v26872_v53 = vld [vmem:[#allocation129_spill] sm:$0xff]  ;;  %v13980_v33 = vld [vmem:[#allocation4 + $0xc0] sm:$0xff] }
 0xace   : > { %v14020_v40 = vadd.f32 %v13972_v51, %v13924_v23  ;;  %v13878_v8 = vadd.f32 %v13830_v32, %v26866_v45  ;;  %v13784_v54 = vadd.f32 %v24951_v41, %v13570_v3 }
 0xacf   : > { %14069 = vst.msk [vmem:[#allocation4 + $0x88] sm:$0xff] %vm1772_vm1, %v14021_v5  ;;  %v13927_v49 = vadd.f32 %v13879_v12, %v26865_v50  ;;  %v13833_v17 = vmax.f32 %v13785_v56, 0.0  ;;  %v26873_v12 = vld [vmem:[#allocation85_spill] sm:$0xff] }
 0xad0   : > { %14068 = vst.msk [vmem:[#allocation4 + $0x80] sm:$0xff] %vm1772_vm1, %v14020_v40  ;;  %v13926_v1 = vadd.f32 %v13878_v8, %v26866_v45  ;;  %v13832_v35 = vmax.f32 %v13784_v54, 0.0  ;;  %v19268_v25 = vpop.f32.mrb[224].mxu0  ;;  %v13983_v45 = vld [vmem:[#allocation4 + $0xd8] sm:$0xff] }
 0xad1   : > { %v14023_v29 = vadd.f32 %v13975_v13, %v13927_v49  ;;  %v13881_v46 = vadd.f32 %v13833_v17, %v26867_v63  ;;  %v13787_v15 = vadd.f32 %v19268_v25, %v24951_v41  ;;  %v13580_v52 = vpop.f32.mrb[225].mxu0  ;;  %v26874_v8 = vld [vmem:[#allocation130_spill] sm:$0xff] }
 0xad2   : > { %v14022_v16 = vadd.f32 %v13974_v61, %v13926_v1  ;;  %v13880_v34 = vadd.f32 %v13832_v35, %v26868_v22  ;;  %v13786_v24 = vadd.f32 %v24951_v41, %v13580_v52  ;;  %v13982_v17 = vld [vmem:[#allocation4 + $0xd0] sm:$0xff] }
 0xad3   : > { %14071 = vst.msk [vmem:[#allocation4 + $0x98] sm:$0xff] %vm1772_vm1, %v14023_v29  ;;  %v13929_v14 = vadd.f32 %v13881_v46, %v26867_v63  ;;  %v13835_v62 = vmax.f32 %v13787_v15, 0.0  ;;  %v26875_v46 = vld [vmem:[#allocation87_spill] sm:$0xff] }
 0xad4   : > { %14070 = vst.msk [vmem:[#allocation4 + $0x90] sm:$0xff] %vm1772_vm1, %v14022_v16  ;;  %v13928_v55 = vadd.f32 %v13880_v34, %v26868_v22  ;;  %v13834_v18 = vmax.f32 %v13786_v24, 0.0  ;;  %v19271_v37 = vpop.f32.mrb[226].mxu0  ;;  %v13985_v22 = vld [vmem:[#allocation4 + $0xe8] sm:$0xff]  ;;  %v26876_v34 = vld [vmem:[#allocation131_spill] sm:$0xff] }
 0xad5   : > { %v14025_v26 = vadd.f32 %v13977_v30, %v13929_v14  ;;  %v13883_v47 = vadd.f32 %v13835_v62, %v26869_v2  ;;  %v13789_v48 = vadd.f32 %v19271_v37, %v24951_v41  ;;  %v13590_v58 = vpop.f32.mrb[227].mxu0  ;;  %v13984_v62 = vld [vmem:[#allocation4 + $0xe0] sm:$0xff] }
 0xad6   : > { %v14024_v19 = vadd.f32 %v13976_v4, %v13928_v55  ;;  %v13882_v42 = vadd.f32 %v13834_v18, %v26870_v59  ;;  %v13788_v7 = vadd.f32 %v24951_v41, %v13590_v58 }
 0xad7   : > { %14073 = vst.msk [vmem:[#allocation4 + $0xa8] sm:$0xff] %vm1772_vm1, %v14025_v26  ;;  %v13931_v36 = vadd.f32 %v13883_v47, %v26869_v2  ;;  %v13837_v44 = vmax.f32 %v13789_v48, 0.0  ;;  %v26877_v47 = vld [vmem:[#allocation89_spill] sm:$0xff] }
 0xad8   : > { %14072 = vst.msk [vmem:[#allocation4 + $0xa0] sm:$0xff] %vm1772_vm1, %v14024_v19  ;;  %v13930_v39 = vadd.f32 %v13882_v42, %v26870_v59  ;;  %v13836_v38 = vmax.f32 %v13788_v7, 0.0  ;;  %v19274_v60 = vpop.f32.mrb[228].mxu0  ;;  %v13987_v59 = vld [vmem:[#allocation4 + $0xf8] sm:$0xff]  ;;  %v26878_v42 = vld [vmem:[#allocation132_spill] sm:$0xff] }
 0xad9   : > { %v14027_v0 = vadd.f32 %v13979_v20, %v13931_v36  ;;  %v13885_v27 = vadd.f32 %v13837_v44, %v26871_v57  ;;  %v13791_v43 = vadd.f32 %v19274_v60, %v24951_v41  ;;  %v13600_v11 = vpop.f32.mrb[229].mxu0  ;;  %v13986_v44 = vld [vmem:[#allocation4 + $0xf0] sm:$0xff] }
 0xada   : > { %v14026_v10 = vadd.f32 %v13978_v6, %v13930_v39  ;;  %v13884_v21 = vadd.f32 %v13836_v38, %v26872_v53  ;;  %v13790_v31 = vadd.f32 %v24951_v41, %v13600_v11 }
 0xadb   : > { %14075 = vst.msk [vmem:[#allocation4 + $0xb8] sm:$0xff] %vm1772_vm1, %v14027_v0  ;;  %v13933_v51 = vadd.f32 %v13885_v27, %v26871_v57  ;;  %v13839_v23 = vmax.f32 %v13791_v43, 0.0  ;;  %v26879_v27 = vld [vmem:[#allocation91_spill] sm:$0xff] }
 0xadc   : > { %14074 = vst.msk [vmem:[#allocation4 + $0xb0] sm:$0xff] %vm1772_vm1, %v14026_v10  ;;  %v13932_v32 = vadd.f32 %v13884_v21, %v26872_v53  ;;  %v13838_v9 = vmax.f32 %v13790_v31, 0.0  ;;  %v19277_v5 = vpop.f32.mrb[230].mxu0  ;;  %v13989_v53 = vld [vmem:[#allocation4 + $0x108] sm:$0xff]  ;;  %v26880_v21 = vld [vmem:[#allocation134_spill] sm:$0xff] }
 0xadd   : > { %v14029_v50 = vadd.f32 %v13981_v28, %v13933_v51  ;;  %v13887_v56 = vadd.f32 %v13839_v23, %v26873_v12  ;;  %v13793_v3 = vadd.f32 %v19277_v5, %v24951_v41  ;;  %v13610_v40 = vpop.f32.mrb[231].mxu0  ;;  %v13988_v23 = vld [vmem:[#allocation4 + $0x100] sm:$0xff] }
 0xade   : > { %v14028_v13 = vadd.f32 %v13980_v33, %v13932_v32  ;;  %v13886_v54 = vadd.f32 %v13838_v9, %v26874_v8  ;;  %v13792_v49 = vadd.f32 %v24951_v41, %v13610_v40 }
 0xadf   : > { %14077 = vst.msk [vmem:[#allocation4 + $0xc8] sm:$0xff] %vm1772_vm1, %v14029_v50  ;;  %v13935_v61 = vadd.f32 %v13887_v56, %v26873_v12  ;;  %v13841_v1 = vmax.f32 %v13793_v3, 0.0  ;;  %v26881_v56 = vld [vmem:[#allocation135_spill] sm:$0xff] }
 0xae0   : > { %14076 = vst.msk [vmem:[#allocation4 + $0xc0] sm:$0xff] %vm1772_vm1, %v14028_v13  ;;  %v13934_v35 = vadd.f32 %v13886_v54, %v26874_v8  ;;  %v13840_v25 = vmax.f32 %v13792_v49, 0.0  ;;  %v19280_v29 = vpop.f32.mrb[232].mxu0  ;;  %v13991_v8 = vld [vmem:[#allocation4 + $0x118] sm:$0xff]  ;;  %v26882_v54 = vld [vmem:[#allocation136_spill] sm:$0xff] }
 0xae1   : > { %v14031_v63 = vadd.f32 %v13983_v45, %v13935_v61  ;;  %v13889_v15 = vadd.f32 %v13841_v1, %v26875_v46  ;;  %v13795_v52 = vadd.f32 %v19280_v29, %v24951_v41  ;;  %v13620_v16 = vpop.f32.mrb[233].mxu0  ;;  %v13990_v1 = vld [vmem:[#allocation4 + $0x110] sm:$0xff] }
 0xae2   : > { %v14030_v30 = vadd.f32 %v13982_v17, %v13934_v35  ;;  %v13888_v24 = vadd.f32 %v13840_v25, %v26876_v34  ;;  %v13794_v14 = vadd.f32 %v24951_v41, %v13620_v16 }
 0xae3   : > { %14079 = vst.msk [vmem:[#allocation4 + $0xd8] sm:$0xff] %vm1772_vm1, %v14031_v63  ;;  %v13937_v4 = vadd.f32 %v13889_v15, %v26875_v46  ;;  %v13843_v55 = vmax.f32 %v13795_v52, 0.0  ;;  %v26883_v15 = vld [vmem:[#allocation96_spill] sm:$0xff] }
 0xae4   : > { %14078 = vst.msk [vmem:[#allocation4 + $0xd0] sm:$0xff] %vm1772_vm1, %v14030_v30  ;;  %v13936_v18 = vadd.f32 %v13888_v24, %v26876_v34  ;;  %v13842_v37 = vmax.f32 %v13794_v14, 0.0  ;;  %v19283_v26 = vpop.f32.mrb[234].mxu0  ;;  %v13993_v34 = vld [vmem:[#allocation4 + $0x128] sm:$0xff]  ;;  %v26884_v24 = vld [vmem:[#allocation138_spill] sm:$0xff] }
 0xae5   : > { %v14033_v2 = vadd.f32 %v13985_v22, %v13937_v4  ;;  %v13891_v48 = vadd.f32 %v13843_v55, %v26877_v47  ;;  %v13797_v58 = vadd.f32 %v19283_v26, %v24951_v41  ;;  %v13630_v19 = vpop.f32.mrb[235].mxu0  ;;  %v13992_v55 = vld [vmem:[#allocation4 + $0x120] sm:$0xff] }
 0xae6   : > { %v14032_v20 = vadd.f32 %v13984_v62, %v13936_v18  ;;  %v13890_v7 = vadd.f32 %v13842_v37, %v26878_v42  ;;  %v13796_v36 = vadd.f32 %v24951_v41, %v13630_v19 }
 0xae7   : > { %14081 = vst.msk [vmem:[#allocation4 + $0xe8] sm:$0xff] %vm1772_vm1, %v14033_v2  ;;  %v13939_v6 = vadd.f32 %v13891_v48, %v26877_v47  ;;  %v13845_v39 = vmax.f32 %v13797_v58, 0.0  ;;  %v26885_v48 = vld [vmem:[#allocation139_spill] sm:$0xff] }
 0xae8   : > { %14080 = vst.msk [vmem:[#allocation4 + $0xe0] sm:$0xff] %vm1772_vm1, %v14032_v20  ;;  %v13938_v38 = vadd.f32 %v13890_v7, %v26878_v42  ;;  %v13844_v60 = vmax.f32 %v13796_v36, 0.0  ;;  %v19286_v0 = vpop.f32.mrb[236].mxu0  ;;  %v13995_v42 = vld [vmem:[#allocation4 + $0x138] sm:$0xff]  ;;  %v26886_v7 = vld [vmem:[#allocation140_spill] sm:$0xff] }
 0xae9   : > { %v14035_v57 = vadd.f32 %v13987_v59, %v13939_v6  ;;  %v13893_v43 = vadd.f32 %v13845_v39, %v26879_v27  ;;  %v13799_v11 = vadd.f32 %v19286_v0, %v24951_v41  ;;  %v13640_v10 = vpop.f32.mrb[237].mxu0  ;;  %v13994_v39 = vld [vmem:[#allocation4 + $0x130] sm:$0xff] }
 0xaea   : > { %v14034_v28 = vadd.f32 %v13986_v44, %v13938_v38  ;;  %v13892_v31 = vadd.f32 %v13844_v60, %v26880_v21  ;;  %v13798_v51 = vadd.f32 %v24951_v41, %v13640_v10 }
 0xaeb   : > { %14083 = vst.msk [vmem:[#allocation4 + $0xf8] sm:$0xff] %vm1772_vm1, %v14035_v57  ;;  %v13941_v33 = vadd.f32 %v13893_v43, %v26879_v27  ;;  %v13847_v32 = vmax.f32 %v13799_v11, 0.0  ;;  %v26887_v43 = vld [vmem:[#allocation99_spill] sm:$0xff] }
 0xaec   : > { %14082 = vst.msk [vmem:[#allocation4 + $0xf0] sm:$0xff] %vm1772_vm1, %v14034_v28  ;;  %v13940_v9 = vadd.f32 %v13892_v31, %v26880_v21  ;;  %v13846_v5 = vmax.f32 %v13798_v51, 0.0  ;;  %v19289_v50 = vpop.f32.mrb[238].mxu0  ;;  %v13997_v21 = vld [vmem:[#allocation4 + $0x148] sm:$0xff]  ;;  %v26888_v31 = vld [vmem:[#allocation142_spill] sm:$0xff] }
 0xaed   : > { %v14037_v12 = vadd.f32 %v13989_v53, %v13941_v33  ;;  %v13895_v3 = vadd.f32 %v13847_v32, %v26881_v56  ;;  %v13801_v40 = vadd.f32 %v19289_v50, %v24951_v41  ;;  %v13650_v13 = vpop.f32.mrb[239].mxu0  ;;  %v13996_v32 = vld [vmem:[#allocation4 + $0x140] sm:$0xff] }
 0xaee   : > { %v14036_v45 = vadd.f32 %v13988_v23, %v13940_v9  ;;  %v13894_v49 = vadd.f32 %v13846_v5, %v26882_v54  ;;  %v13800_v61 = vadd.f32 %v24951_v41, %v13650_v13 }
 0xaef   : > { %14085 = vst.msk [vmem:[#allocation4 + $0x108] sm:$0xff] %vm1772_vm1, %v14037_v12  ;;  %v13943_v17 = vadd.f32 %v13895_v3, %v26881_v56  ;;  %v13849_v35 = vmax.f32 %v13801_v40, 0.0  ;;  %v26889_v3 = vld [vmem:[#allocation100_spill] sm:$0xff] }
 0xaf0   : > { %14084 = vst.msk [vmem:[#allocation4 + $0x100] sm:$0xff] %vm1772_vm1, %v14036_v45  ;;  %v13942_v25 = vadd.f32 %v13894_v49, %v26882_v54  ;;  %v13848_v29 = vmax.f32 %v13800_v61, 0.0  ;;  %v19292_v63 = vpop.f32.mrb[240].mxu0  ;;  %v13999_v54 = vld [vmem:[#allocation4 + $0x158] sm:$0xff]  ;;  %v26890_v49 = vld [vmem:[#allocation101_spill] sm:$0xff] }
 0xaf1   : > { %v14039_v46 = vadd.f32 %v13991_v8, %v13943_v17  ;;  %v13897_v52 = vadd.f32 %v13849_v35, %v26883_v15  ;;  %v13803_v16 = vadd.f32 %v19292_v63, %v24951_v41  ;;  %v13660_v30 = vpop.f32.mrb[241].mxu0  ;;  %v13998_v35 = vld [vmem:[#allocation4 + $0x150] sm:$0xff] }
 0xaf2   : > { %v14038_v22 = vadd.f32 %v13990_v1, %v13942_v25  ;;  %v13896_v14 = vadd.f32 %v13848_v29, %v26884_v24  ;;  %v13802_v4 = vadd.f32 %v24951_v41, %v13660_v30 }
 0xaf3   : > { %14087 = vst.msk [vmem:[#allocation4 + $0x118] sm:$0xff] %vm1772_vm1, %v14039_v46  ;;  %v13945_v62 = vadd.f32 %v13897_v52, %v26883_v15  ;;  %v13851_v18 = vmax.f32 %v13803_v16, 0.0  ;;  %v26891_v52 = vld [vmem:[#allocation102_spill] sm:$0xff] }
 0xaf4   : > { %14086 = vst.msk [vmem:[#allocation4 + $0x110] sm:$0xff] %vm1772_vm1, %v14038_v22  ;;  %v13944_v37 = vadd.f32 %v13896_v14, %v26884_v24  ;;  %v13850_v26 = vmax.f32 %v13802_v4, 0.0  ;;  %v19295_v2 = vpop.f32.mrb[242].mxu0  ;;  %v14001_v24 = vld [vmem:[#allocation4 + $0x168] sm:$0xff] }
 0xaf5   : > { %v14041_v47 = vadd.f32 %v13993_v34, %v13945_v62  ;;  %v13899_v58 = vadd.f32 %v13851_v18, %v26885_v48  ;;  %v13805_v19 = vadd.f32 %v19295_v2, %v24951_v41  ;;  %v13670_v20 = vpop.f32.mrb[243].mxu0  ;;  %v26892_v14 = vld [vmem:[#allocation145_spill] sm:$0xff]  ;;  %v14000_v18 = vld [vmem:[#allocation4 + $0x160] sm:$0xff] }
 0xaf6   : > { %v14040_v59 = vadd.f32 %v13992_v55, %v13944_v37  ;;  %v13898_v36 = vadd.f32 %v13850_v26, %v26886_v7  ;;  %v13804_v6 = vadd.f32 %v24951_v41, %v13670_v20  ;;  %v14003_v20 = vld [vmem:[#allocation4 + $0x178] sm:$0xff] }
 0xaf7   : > { %14089 = vst.msk [vmem:[#allocation4 + $0x128] sm:$0xff] %vm1772_vm1, %v14041_v47  ;;  %v13947_v44 = vadd.f32 %v13899_v58, %v26885_v48  ;;  %v13853_v38 = vmax.f32 %v13805_v19, 0.0  ;;  %v26893_v48 = vld [vmem:[#allocation146_spill] sm:$0xff] }
 0xaf8   : > { %14088 = vst.msk [vmem:[#allocation4 + $0x120] sm:$0xff] %vm1772_vm1, %v14040_v59  ;;  %v13946_v60 = vadd.f32 %v13898_v36, %v26886_v7  ;;  %v13852_v0 = vmax.f32 %v13804_v6, 0.0  ;;  %v19298_v57 = vpop.f32.mrb[244].mxu0  ;;  %v26894_v59 = vld [vmem:[#allocation147_spill] sm:$0xff]  ;;  %v14002_v7 = vld [vmem:[#allocation4 + $0x170] sm:$0xff] }
 0xaf9   : > { %v14043_v27 = vadd.f32 %v13995_v42, %v13947_v44  ;;  %v13901_v11 = vadd.f32 %v13853_v38, %v26887_v43  ;;  %v13807_v10 = vadd.f32 %v19298_v57, %v24951_v41  ;;  %v13680_v28 = vpop.f32.mrb[245].mxu0  ;;  %v14205_v38 = vld [vmem:[#allocation3 + $0x10] sm:$0xff] (!%p16779_p5) }
 0xafa   : > { %v14042_v53 = vadd.f32 %v13994_v39, %v13946_v60  ;;  %v13900_v51 = vadd.f32 %v13852_v0, %v26888_v31  ;;  %v13806_v33 = vadd.f32 %v24951_v41, %v13680_v28  ;;  %v25149_v39 = vld [vmem:[%s26896_s3] ss:$0 sm:$0xff] (!%p16779_p5) }
 0xafb   : > { %14091 = vst.msk [vmem:[#allocation4 + $0x138] sm:$0xff] %vm1772_vm1, %v14043_v27  ;;  %v13949_v23 = vadd.f32 %v13901_v11, %v26887_v43  ;;  %v13855_v9 = vmax.f32 %v13807_v10, 0.0  ;;  %v14203_v60 = vld [vmem:[#allocation3] sm:$0xff] (!%p16779_p5)  ;;  %v14283_v0 = vmul.f32 (!%p16779_p5), %v25149_v39, %v14205_v38  ;;  %v14206_v27 = vld [vmem:[#allocation3 + $0x18] sm:$0xff] (!%p16779_p5)  ;;  %v14204_v43 = vld [vmem:[#allocation3 + $0x8] sm:$0xff] (!%p16779_p5)  ;;  %v20284_v11 = vmov (!%p16779_p5), 0  }
 0xafc   : > { %14090 = vst.msk [vmem:[#allocation4 + $0x130] sm:$0xff] %vm1772_vm1, %v14042_v53  ;;  %v13948_v5 = vadd.f32 %v13900_v51, %v26888_v31  ;;  %v13854_v50 = vmax.f32 %v13806_v33, 0.0  ;;  %v19301_v12 = vpop.f32.mrb[246].mxu0  ;;  %v14281_v57 = vmul.f32 (!%p16779_p5), %v25149_v39, %v14203_v60  ;;  %20209 = vset.pattern.permute.xlu0 (!%p16779_p5), %v20284_v11  ;;  %v14284_v10 = vmul.f32 (!%p16779_p5), %v25149_v39, %v14206_v27  ;;  %v14208_v53 = vld [vmem:[#allocation3 + $0x28] sm:$0xff] (!%p16779_p5)  ;;  %v14221_v27 = vld [vmem:[#allocation3 + $0x90] sm:$0xff] (!%p16779_p5) }
 0xafd   : > { %v14045_v56 = vadd.f32 %v13997_v21, %v13949_v23  ;;  %v13903_v40 = vadd.f32 %v13855_v9, %v26889_v3  ;;  %v13809_v13 = vadd.f32 %v19301_v12, %v24951_v41  ;;  %v13690_v45 = vpop.f32.mrb[247].mxu0  ;;  %v14282_v28 = vmul.f32 (!%p16779_p5), %v25149_v39, %v14204_v43  ;;  %v14207_v21 = vld [vmem:[#allocation3 + $0x20] sm:$0xff] (!%p16779_p5)  ;;  %v25218_v43 = vld [vmem:[#allocation4 + $0x50] sm:$0xff] (!%p16779_p5) }
 0xafe   : > { %v14044_v8 = vadd.f32 %v13996_v32, %v13948_v5  ;;  %v13902_v61 = vadd.f32 %v13854_v50, %v26890_v49  ;;  %v13808_v17 = vadd.f32 %v24951_v41, %v13690_v45  ;;  %v14311_v31 = vsel (!%p16779_p5), %vm1772_vm1, %v14283_v0, 0.0  ;;  %v14210_v5 = vld [vmem:[#allocation3 + $0x38] sm:$0xff] (!%p16779_p5)  ;;  %v14209_v50 = vld [vmem:[#allocation3 + $0x30] sm:$0xff] (!%p16779_p5)  ;;  %v14211_v45 = vld [vmem:[#allocation3 + $0x40] sm:$0xff] (!%p16779_p5) }
 0xaff   : > { %14093 = vst.msk [vmem:[#allocation4 + $0x148] sm:$0xff] %vm1772_vm1, %v14045_v56  ;;  %v13951_v1 = vadd.f32 %v13903_v40, %v26889_v3  ;;  %v13857_v25 = vmax.f32 %v13809_v13, 0.0  ;;  %v14305_v51 = vsel (!%p16779_p5), %vm1772_vm1, %v14281_v57, 0.0  ;;  %14312 = vadd.xlane.f32.xlu1 (!%p16779_p5), %v14311_v31  ;;  %v14314_v33 = vsel (!%p16779_p5), %vm1772_vm1, %v14284_v10, 0.0  ;;  %v14212_v13 = vld [vmem:[#allocation3 + $0x48] sm:$0xff] (!%p16779_p5)  ;;  %v14222_v57 = vld [vmem:[#allocation3 + $0x98] sm:$0xff] (!%p16779_p5) }
 0xb00   : > { %14092 = vst.msk [vmem:[#allocation4 + $0x140] sm:$0xff] %vm1772_vm1, %v14044_v8  ;;  %v13950_v29 = vadd.f32 %v13902_v61, %v26890_v49  ;;  %v13856_v63 = vmax.f32 %v13808_v17, 0.0  ;;  %v19304_v46 = vpop.f32.mrb[248].mxu0  ;;  %14306 = vadd.xlane.f32.xlu0 (!%p16779_p5), %v14305_v51  ;;  %v14308_v23 = vsel (!%p16779_p5), %vm1772_vm1, %v14282_v28, 0.0  ;;  %v14286_v32 = vmul.f32 (!%p16779_p5), %v25149_v39, %v14208_v53  ;;  %v25169_v17 = vld [vmem:[#allocation3 + $0x58] sm:$0xff] (!%p16779_p5)  ;;  %v14225_v10 = vld [vmem:[#allocation3 + $0xb0] sm:$0xff] (!%p16779_p5) }
 0xb01   : > { %v14047_v15 = vadd.f32 %v13999_v54, %v13951_v1  ;;  %v13905_v16 = vadd.f32 %v13857_v25, %v26891_v52  ;;  %v13811_v30 = vadd.f32 %v19304_v46, %v24951_v41  ;;  %v13700_v22 = vpop.f32.mrb[249].mxu0  ;;  %v14285_v9 = vmul.f32 (!%p16779_p5), %v25149_v39, %v14207_v21  ;;  %v14213_v1 = vld [vmem:[#allocation3 + $0x50] sm:$0xff] (!%p16779_p5)  ;;  %v14216_v46 = vld [vmem:[#allocation3 + $0x68] sm:$0xff] (!%p16779_p5) }
 0xb02   : > { %v14046_v34 = vadd.f32 %v13998_v35, %v13950_v29  ;;  %v13904_v4 = vadd.f32 %v13856_v63, %v26892_v14  ;;  %v13810_v62 = vadd.f32 %v24951_v41, %v13700_v22  ;;  %v14320_v12 = vsel (!%p16779_p5), %vm1772_vm1, %v14286_v32, 0.0  ;;  %v25224_v53 = vld [vmem:[#allocation4 + $0xb0] sm:$0xff] (!%p16779_p5)  ;;  %v25232_v32 = vld [vmem:[#allocation4 + $0x58] sm:$0xff] (!%p16779_p5) }
 0xb03   : > { %14095 = vst.msk [vmem:[#allocation4 + $0x158] sm:$0xff] %vm1772_vm1, %v14047_v15  ;;  %v13953_v55 = vadd.f32 %v13905_v16, %v26891_v52  ;;  %v13859_v37 = vmax.f32 %v13811_v30, 0.0  ;;  %14315 = vadd.xlane.f32.xlu1 (!%p16779_p5), %v14314_v33  ;;  %v14317_v56 = vsel (!%p16779_p5), %vm1772_vm1, %v14285_v9, 0.0  ;;  %v14288_v3 = vmul.f32 (!%p16779_p5), %v25149_v39, %v14210_v5  ;;  %v14217_v15 = vld [vmem:[#allocation3 + $0x70] sm:$0xff] (!%p16779_p5)  ;;  %v14215_v16 = vld [vmem:[#allocation3 + $0x60] sm:$0xff] (!%p16779_p5)  ;;  %v14218_v30 = vld [vmem:[#allocation3 + $0x78] sm:$0xff] (!%p16779_p5) }
 0xb04   : > { %14094 = vst.msk [vmem:[#allocation4 + $0x150] sm:$0xff] %vm1772_vm1, %v14046_v34  ;;  %v13952_v26 = vadd.f32 %v13904_v4, %v26892_v14  ;;  %v13858_v2 = vmax.f32 %v13810_v62, 0.0  ;;  %14309 = vadd.xlane.f32.xlu0 (!%p16779_p5), %v14308_v23  ;;  %v14287_v40 = vmul.f32 (!%p16779_p5), %v25149_v39, %v14209_v50  ;;  %v14290_v49 = vmul.f32 (!%p16779_p5), %v25149_v39, %v14212_v13  ;;  %v25176_v52 = vld [vmem:[#allocation4 + $0x70] sm:$0xff] (!%p16779_p5)  ;;  %v25181_v34 = vld [vmem:[#allocation4 + $0x78] sm:$0xff] (!%p16779_p5)  ;;  %v14223_v23 = vld [vmem:[#allocation3 + $0xa0] sm:$0xff] (!%p16779_p5) }
 0xb05   : > { %v14049_v47 = vadd.f32 %v14001_v24, %v13953_v55  ;;  %v13907_v58 = vadd.f32 %v13859_v37, %v26893_v48  ;;  %v14326_v8 = vsel (!%p16779_p5), %vm1772_vm1, %v14288_v3, 0.0  ;;  %v14289_v61 = vmul.f32 (!%p16779_p5), %v25149_v39, %v14211_v45  ;;  %v14220_v37 = vld [vmem:[#allocation3 + $0x88] sm:$0xff] (!%p16779_p5)  ;;  %v14226_v5 = vld [vmem:[#allocation3 + $0xb8] sm:$0xff] (!%p16779_p5) }
 0xb06   : > { %v14048_v19 = vadd.f32 %v14000_v18, %v13952_v26  ;;  %v13906_v42 = vadd.f32 %v13858_v2, %v26894_v59  ;;  %14199 = sbr.rel (%p16779_p5) target bundleno = 3350 (0xd16), region = 132  ;;  %v14323_v54 = vsel (!%p16779_p5), %vm1772_vm1, %v14287_v40, 0.0  ;;  %v14332_v35 = vsel (!%p16779_p5), %vm1772_vm1, %v14290_v49, 0.0  ;;  %v25190_v18 = vld [vmem:[#allocation4 + $0x40] sm:$0xff] (!%p16779_p5) }
 0xb07   : > { %14097 = vst.msk [vmem:[#allocation4 + $0x168] sm:$0xff] %vm1772_vm1, %v14049_v47  ;;  %v13955_v41 = vadd.f32 %v13907_v58, %v26893_v48  ;;  %14321 = vadd.xlane.f32.xlu1 (!%p16779_p5), %v14320_v12  ;;  %v14329_v25 = vsel (!%p16779_p5), %vm1772_vm1, %v14289_v61, 0.0  ;;  %v14292_v29 = vmul.f32 (!%p16779_p5), %v25149_v39, %v25169_v17  ;;  %v14291_v63 = vmul.f32 (!%p16779_p5), %v25149_v39, %v14213_v1  ;;  %v25239_v12 = vld [vmem:[#allocation4 + $0xb8] sm:$0xff] (!%p16779_p5)  ;;  %v14227_v61 = vld [vmem:[#allocation4] sm:$0xff] (!%p16779_p5) }
 0xb08   : > { %14096 = vst.msk [vmem:[#allocation4 + $0x160] sm:$0xff] %vm1772_vm1, %v14048_v19  ;;  %v13954_v36 = vadd.f32 %v13906_v42, %v26894_v59  ;;  %14318 = vadd.xlane.f32.xlu0 (!%p16779_p5), %v14317_v56  ;;  %v25179_v22 = vadd.f32 (!%p16779_p5), %v25176_v52, %v14217_v15  ;;  %v25184_v24 = vadd.f32 (!%p16779_p5), %v25181_v34, %v14218_v30  ;;  %v14219_v19 = vld [vmem:[#allocation3 + $0x80] sm:$0xff] (!%p16779_p5)  ;;  %v25201_v59 = vld [vmem:[#allocation4 + $0x88] sm:$0xff] (!%p16779_p5) }
 0xb09   : > { %v14051_v6 = vadd.f32 %v14003_v20, %v13955_v41  ;;  %v14338_v14 = vsel (!%p16779_p5), %vm1772_vm1, %v14292_v29, 0.0  ;;  %v14335_v4 = vsel (!%p16779_p5), %vm1772_vm1, %v14291_v63, 0.0  ;;  %v14294_v62 = vmul.f32 (!%p16779_p5), %v25149_v39, %v14216_v46  ;;  %v25199_v20 = vld [vmem:[#allocation4 + $0x80] sm:$0xff] (!%p16779_p5) }
 0xb0a   : > { %v14050_v44 = vadd.f32 %v14002_v7, %v13954_v36  ;;  %v14293_v55 = vmul.f32 (!%p16779_p5), %v25149_v39, %v14215_v16  ;;  %v25193_v26 = vadd.f32 (!%p16779_p5), %v25190_v18, %v14211_v45  ;;  %v14296_v48 = vmul.f32 (!%p16779_p5), %v25149_v39, %v14218_v30  ;;  %v14224_v7 = vld [vmem:[#allocation3 + $0xa8] sm:$0xff] (!%p16779_p5)  ;;  %v14239_v46 = vld [vmem:[#allocation4 + $0x60] sm:$0xff] (!%p16779_p5) }
 0xb0b   : > { %14099 = vst.msk [vmem:[#allocation4 + $0x178] sm:$0xff] %vm1772_vm1, %v14051_v6  ;;  %14327 = vadd.xlane.f32.xlu1 (!%p16779_p5), %v14326_v8  ;;  %v14344_v2 = vsel (!%p16779_p5), %vm1772_vm1, %v14294_v62, 0.0  ;;  %v14295_v58 = vmul.f32 (!%p16779_p5), %v25149_v39, %v14217_v15  ;;  %v25204_v42 = vadd.f32 (!%p16779_p5), %v25199_v20, %v14219_v19  ;;  %v25207_v41 = vadd.f32 (!%p16779_p5), %v25201_v59, %v14220_v37  ;;  %v25209_v36 = vld [vmem:[#allocation4 + $0xa8] sm:$0xff] (!%p16779_p5)  ;;  %v14251_v62 = vld [vmem:[#allocation4 + $0xc0] sm:$0xff] (!%p16779_p5) }
 0xb0c   : > { %14098 = vst.msk [vmem:[#allocation4 + $0x170] sm:$0xff] %vm1772_vm1, %v14050_v44  ;;  %14324 = vadd.xlane.f32.xlu0 (!%p16779_p5), %v14323_v54  ;;  %v14341_v47 = vsel (!%p16779_p5), %vm1772_vm1, %v14293_v55, 0.0  ;;  %v25212_v6 = vadd.f32 (!%p16779_p5), %v25209_v36, %v14224_v7  ;;  %v14350_v44 = vsel (!%p16779_p5), %vm1772_vm1, %v14296_v48, 0.0  ;;  %v14298_v60 = vmul.f32 (!%p16779_p5), %v25149_v39, %v14220_v37  ;;  %v14240_v30 = vld [vmem:[#allocation4 + $0x68] sm:$0xff] (!%p16779_p5)  ;;  %v14201_v55 = vld [vmem:[#allocation5] sm:$0x1] (!%p16779_p5) }
 0xb0d   : > { %v14347_v38 = vsel %vm1772_vm1, %v14295_v58, 0.0  ;;  %v14297_v0 = vmul.f32 %v25149_v39, %v14219_v19  ;;  %v14300_v11 = vmul.f32 %v25149_v39, %v14222_v57  ;;  %v25222_v28 = vadd.f32 %v25218_v43, %v14213_v1  ;;  %v14252_v48 = vld [vmem:[#allocation4 + $0xc8] sm:$0xff] }
 0xb0e   : > { %v14356_v21 = vsel %vm1772_vm1, %v14298_v60, 0.0  ;;  %v14299_v51 = vmul.f32 %v25149_v39, %v14221_v27  ;;  %v25230_v33 = vadd.f32 %v25224_v53, %v14225_v10  ;;  %v14302_v9 = vmul.f32 %v25149_v39, %v14224_v7  ;;  %v26897_v7 = vld [vmem:[#allocation17_spill] sm:$0xff] }
 0xb0f   : > { %14333 = vadd.xlane.f32.xlu1 %v14332_v35  ;;  %v14353_v31 = vsel %vm1772_vm1, %v14297_v0, 0.0  ;;  %v25237_v50 = vadd.f32 %v25232_v32, %v25169_v17  ;;  %v14362_v56 = vsel %vm1772_vm1, %v14300_v11, 0.0  ;;  %v14301_v40 = vmul.f32 %v25149_v39, %v14223_v23  ;;  %v14264_v57 = vld [vmem:[#allocation4 + $0x128] sm:$0xff] }
 0xb10   : > { %14330 = vadd.xlane.f32.xlu0 %v14329_v25  ;;  %v14359_v3 = vsel %vm1772_vm1, %v14299_v51, 0.0  ;;  %v25245_v13 = vadd.f32 %v25239_v12, %v14226_v5  ;;  %v14368_v45 = vsel %vm1772_vm1, %v14302_v9, 0.0  ;;  %v14304_v54 = vmul.f32 %v25149_v39, %v14226_v5  ;;  %v14228_v25 = vld [vmem:[#allocation4 + $0x8] sm:$0xff]  ;;  %v14253_v9 = vld [vmem:[#allocation4 + $0xd0] sm:$0xff] }
 0xb11   : > { %v14365_v8 = vsel %vm1772_vm1, %v14301_v40, 0.0  ;;  %v14303_v49 = vmul.f32 %v25149_v39, %v14225_v10  ;;  %v14956_v35 = vmul.f32 %v25149_v39, %v14227_v61  ;;  %v14957_v63 = vmul.f32 %v25149_v39, %v14228_v25  ;;  %v14229_v10 = vld [vmem:[#allocation4 + $0x10] sm:$0xff]  ;;  %v14254_v61 = vld [vmem:[#allocation4 + $0xd8] sm:$0xff] }
 0xb12   : > { %v14374_v17 = vsel %vm1772_vm1, %v14304_v54, 0.0  ;;  %v14968_v16 = vmul.f32 %v25149_v39, %v14239_v46  ;;  %v15125_v19 = vmul.f32 %v25149_v39, %v14252_v48  ;;  %v15137_v11 = vmul.f32 %v25149_v39, %v14264_v57  ;;  %v14255_v46 = vld [vmem:[#allocation4 + $0xe0] sm:$0xff] }
 0xb13   : > { %14339 = vadd.xlane.f32.xlu1 %v14338_v14  ;;  %v14371_v1 = vsel %vm1772_vm1, %v14303_v49, 0.0  ;;  %v14980_v29 = vsel %vm1772_vm1, %v14956_v35, 0.0  ;;  %v14983_v15 = vsel %vm1772_vm1, %v14957_v63, 0.0  ;;  %v14970_v23 = vmul.f32 %v25149_v39, %v25176_v52  ;;  %v14266_v63 = vld [vmem:[#allocation4 + $0x138] sm:$0xff] }
 0xb14   : > { %14336 = vadd.xlane.f32.xlu0 %v14335_v4  ;;  %v15016_v14 = vsel %vm1772_vm1, %v14968_v16, 0.0  ;;  %v14969_v4 = vmul.f32 %v25149_v39, %v14240_v30  ;;  %v15151_v60 = vsel %vm1772_vm1, %v15125_v19, 0.0  ;;  %v14971_v49 = vmul.f32 %v25149_v39, %v25181_v34 }
 0xb15   : > { %v15022_v5 = vsel %vm1772_vm1, %v14970_v23, 0.0  ;;  %v15127_v35 = vmul.f32 %v25149_v39, %v14254_v61  ;;  %v15139_v34 = vmul.f32 %v25149_v39, %v14266_v63  ;;  %v15128_v30 = vmul.f32 %v25149_v39, %v14255_v46  ;;  %v14257_v46 = vld [vmem:[#allocation4 + $0xf0] sm:$0xff] }
 0xb16   : > { %v15019_v37 = vsel %vm1772_vm1, %v14969_v4, 0.0  ;;  %v14260_v4 = vld [vmem:[#allocation4 + $0x108] sm:$0xff]  ;;  %v14977_v23 = vmul.f32 %v25149_v39, %v25209_v36 }
 0xb17   : > { %14345 = vadd.xlane.f32.xlu1 %v14344_v2  ;;  %v15124_v2 = vmul.f32 %v25149_v39, %v14251_v62  ;;  %v15193_v62 = vsel %vm1772_vm1, %v15139_v34, 0.0  ;;  %v14966_v34 = vmul.f32 %v25149_v39, %v25218_v43 }
 0xb18   : > { %14342 = vadd.xlane.f32.xlu0 %v14341_v47  ;;  %v14202_v47 = vmul.f32 4.0, %v14201_v55 }
 0xb19   : > { %v15148_v58 = vsel %vm1772_vm1, %v15124_v2, 0.0  ;;  %v15133_v2 = vmul.f32 %v25149_v39, %v14260_v4  ;;  %v15010_v4 = vsel %vm1772_vm1, %v14966_v34, 0.0 }
 0xb1b   : > { %14351 = vadd.xlane.f32.xlu1 %v14350_v44  ;;  %v14381_v44 = vrot.slane %v14202_v47, %v26897_v7  ;;  %v14271_v47 = vld [vmem:[#allocation4 + $0x160] sm:$0xff]  ;;  %v15175_v19 = vsel %vm1772_vm1, %v15133_v2, 0.0  ;;  %v14261_v2 = vld [vmem:[#allocation4 + $0x110] sm:$0xff] }
 0xb1c   : > { %14348 = vadd.xlane.f32.xlu0 %v14347_v38  ;;  %v14263_v38 = vld [vmem:[#allocation4 + $0x120] sm:$0xff]  ;;  %v15144_v7 = vmul.f32 %v25149_v39, %v14271_v47  ;;  %v14234_v47 = vld [vmem:[#allocation4 + $0x38] sm:$0xff] }
 0xb1d   : > { %v15136_v0 = vmul.f32 %v25149_v39, %v14263_v38  ;;  %v14232_v38 = vld [vmem:[#allocation4 + $0x28] sm:$0xff] }
 0xb1e   : > { %v15208_v57 = vsel %vm1772_vm1, %v15144_v7, 0.0 }
 0xb1f   : > { %14357 = vadd.xlane.f32.xlu1 %v14356_v21  ;;  %v15184_v27 = vsel %vm1772_vm1, %v15136_v0, 0.0  ;;  %v15187_v21 = vsel %vm1772_vm1, %v15137_v11, 0.0  ;;  %v14972_v11 = vmul.f32 %v25149_v39, %v25199_v20  ;;  %v15043_v20 = vsel %vm1772_vm1, %v14977_v23, 0.0 }
 0xb20   : > { %14354 = vadd.xlane.f32.xlu0 %v14353_v31  ;;  %v14958_v31 = vmul.f32 %v25149_v39, %v14229_v10 }
 0xb22   : > { %v14986_v51 = vsel %vm1772_vm1, %v14958_v31, 0.0  ;;  %v14256_v31 = vld [vmem:[#allocation4 + $0xe8] sm:$0xff] }
 0xb23   : > { %14363 = vadd.xlane.f32.xlu1 %v14362_v56  ;;  %v15126_v56 = vmul.f32 %v25149_v39, %v14253_v9 }
 0xb24   : > { %14360 = vadd.xlane.f32.xlu0 %v14359_v3  ;;  %v14230_v3 = vld [vmem:[#allocation4 + $0x18] sm:$0xff] }
 0xb25   : > { %v15154_v40 = vsel %vm1772_vm1, %v15126_v56, 0.0  ;;  %v14259_v56 = vld [vmem:[#allocation4 + $0x100] sm:$0xff] }
 0xb27   : > { %14369 = vadd.xlane.f32.xlu1 %v14368_v45  ;;  %v14959_v45 = vmul.f32 %v25149_v39, %v14230_v3  ;;  %v14268_v3 = vld [vmem:[#allocation4 + $0x148] sm:$0xff] }
 0xb28   : > { %14366 = vadd.xlane.f32.xlu0 %v14365_v8  ;;  %v14265_v8 = vld [vmem:[#allocation4 + $0x130] sm:$0xff] }
 0xb29   : > { %v14989_v54 = vsel %vm1772_vm1, %v14959_v45, 0.0  ;;  %v15138_v52 = vmul.f32 %v25149_v39, %v14265_v8  ;;  %v15141_v45 = vmul.f32 %v25149_v39, %v14268_v3  ;;  %v14267_v8 = vld [vmem:[#allocation4 + $0x140] sm:$0xff]  ;;  %v14979_v3 = vmul.f32 %v25149_v39, %v25239_v12 }
 0xb2b   : > { %14375 = vadd.xlane.f32.xlu1 %v14374_v17  ;;  %v14247_v17 = vld [vmem:[#allocation4 + $0xa0] sm:$0xff]  ;;  %v15190_v25 = vsel %vm1772_vm1, %v15138_v52, 0.0  ;;  %v15199_v52 = vsel %vm1772_vm1, %v15141_v45, 0.0 }
 0xb2c   : > { %14372 = vadd.xlane.f32.xlu0 %v14371_v1  ;;  %v15025_v1 = vsel %vm1772_vm1, %v14971_v49, 0.0  ;;  %v15140_v49 = vmul.f32 %v25149_v39, %v14267_v8  ;;  %v14274_v8 = vld [vmem:[#allocation4 + $0x178] sm:$0xff] }
 0xb2f   : > { %14981 = vadd.xlane.f32.xlu1 %v14980_v29  ;;  %v14976_v29 = vmul.f32 %v25149_v39, %v14247_v17  ;;  %v14272_v17 = vld [vmem:[#allocation4 + $0x168] sm:$0xff] }
 0xb31   : > { %v15040_v16 = vsel %vm1772_vm1, %v14976_v29, 0.0 }
 0xb33   : > { %14984 = vadd.xlane.f32.xlu1 %v14983_v15  ;;  %v15157_v15 = vsel %vm1772_vm1, %v15127_v35, 0.0  ;;  %v15196_v35 = vsel %vm1772_vm1, %v15140_v49, 0.0 }
 0xb37   : > { %15017 = vadd.xlane.f32.xlu1 %v15016_v14  ;;  %v14231_v14 = vld [vmem:[#allocation4 + $0x20] sm:$0xff] }
 0xb38   : > { %v14960_v55 = vmul.f32 %v25149_v39, %v14231_v14  ;;  %v14269_v14 = vld [vmem:[#allocation4 + $0x150] sm:$0xff] }
 0xb3a   : > { %v14992_v48 = vsel %vm1772_vm1, %v14960_v55, 0.0 }
 0xb3b   : > { %15020 = vadd.xlane.f32.xlu1 %v15019_v37  ;;  %v15160_v37 = vsel %vm1772_vm1, %v15128_v30, 0.0  ;;  %v15130_v30 = vmul.f32 %v25149_v39, %v14257_v46 }
 0xb3d   : > { %v15166_v55 = vsel %vm1772_vm1, %v15130_v30, 0.0 }
 0xb3f   : > { %15149 = vadd.xlane.f32.xlu1 %v15148_v58  ;;  %v14964_v58 = vmul.f32 %v25149_v39, %v25190_v18 }
 0xb42   : > { %14383 = vperm.xlu0 %20209, %v14381_v44   ;;  %v14236_v44 = vld [vmem:[#allocation4 + $0x48] sm:$0xff] }
 0xb43   : > { %15152 = vadd.xlane.f32.xlu1 %v15151_v60  ;;  %v15004_v60 = vsel %vm1772_vm1, %v14964_v58, 0.0  ;;  %v14965_v0 = vmul.f32 %v25149_v39, %v14236_v44  ;;  %v14273_v44 = vld [vmem:[#allocation4 + $0x170] sm:$0xff] }
 0xb45   : > { %v15007_v18 = vsel %vm1772_vm1, %v14965_v0, 0.0 }
 0xb47   : > { %15185 = vadd.xlane.f32.xlu1 %v15184_v27  ;;  %v14961_v27 = vmul.f32 %v25149_v39, %v14232_v38  ;;  %v14258_v38 = vld [vmem:[#allocation4 + $0xf8] sm:$0xff] }
 0xb49   : > { %v14995_v10 = vsel %vm1772_vm1, %v14961_v27, 0.0  ;;  %v15146_v27 = vmul.f32 %v25149_v39, %v14273_v44 }
 0xb4b   : > { %15188 = vadd.xlane.f32.xlu1 %v15187_v21  ;;  %v14973_v21 = vmul.f32 %v25149_v39, %v25201_v59  ;;  %v15132_v59 = vmul.f32 %v25149_v39, %v14259_v56 }
 0xb4d   : > { %v15031_v9 = vsel %vm1772_vm1, %v14973_v21, 0.0  ;;  %v15172_v36 = vsel %vm1772_vm1, %v15132_v59, 0.0  ;;  %v15214_v21 = vsel %vm1772_vm1, %v15146_v27, 0.0 }
 0xb4f   : > { %14987 = vadd.xlane.f32.xlu1 %v14986_v51  ;;  %v15028_v51 = vsel %vm1772_vm1, %v14972_v11, 0.0  ;;  %v15131_v11 = vmul.f32 %v25149_v39, %v14258_v38 }
 0xb51   : > { %v15169_v23 = vsel %vm1772_vm1, %v15131_v11, 0.0 }
 0xb53   : > { %15023 = vadd.xlane.f32.xlu1 %v15022_v5  ;;  %v15129_v5 = vmul.f32 %v25149_v39, %v14256_v31 }
 0xb57   : > { %15155 = vadd.xlane.f32.xlu1 %v15154_v40  ;;  %v15163_v40 = vsel %vm1772_vm1, %v15129_v5, 0.0 }
 0xb5b   : > { %14990 = vadd.xlane.f32.xlu1 %v14989_v54  ;;  %v14233_v54 = vld [vmem:[#allocation4 + $0x30] sm:$0xff] }
 0xb5c   : > { %v14962_v61 = vmul.f32 %v25149_v39, %v14233_v54 }
 0xb5e   : > { %v14998_v29 = vsel %vm1772_vm1, %v14962_v61, 0.0  ;;  %v14246_v61 = vld [vmem:[#allocation4 + $0x98] sm:$0xff] }
 0xb5f   : > { %15026 = vadd.xlane.f32.xlu1 %v15025_v1  ;;  %v14245_v1 = vld [vmem:[#allocation4 + $0x90] sm:$0xff] }
 0xb60   : > { %v14974_v63 = vmul.f32 %v25149_v39, %v14245_v1 }
 0xb61   : > { %15191 = vadd.xlane.f32.xlu0 %v15190_v25  ;;  %v15145_v25 = vmul.f32 %v25149_v39, %v14272_v17 }
 0xb63   : > { %15158 = vadd.xlane.f32.xlu1 %v15157_v15  ;;  %v15211_v15 = vsel %vm1772_vm1, %v15145_v25, 0.0  ;;  %v14270_v25 = vld [vmem:[#allocation4 + $0x158] sm:$0xff] }
 0xb65   : > { %15041 = vadd.xlane.f32.xlu0 %v15040_v16  ;;  %v15034_v16 = vsel %vm1772_vm1, %v14974_v63, 0.0 }
 0xb67   : > { %15194 = vadd.xlane.f32.xlu1 %v15193_v62  ;;  %v14978_v62 = vmul.f32 %v25149_v39, %v25224_v53  ;;  %v14963_v53 = vmul.f32 %v25149_v39, %v14234_v47 }
 0xb69   : > { %15161 = vadd.xlane.f32.xlu0 %v15160_v37  ;;  %v15142_v37 = vmul.f32 %v25149_v39, %v14269_v14 }
 0xb6b   : > { %14993 = vadd.xlane.f32.xlu1 %v14992_v48  ;;  %v15046_v48 = vsel %vm1772_vm1, %v14978_v62, 0.0  ;;  %v15202_v7 = vsel %vm1772_vm1, %v15142_v37, 0.0 }
 0xb6d   : > { %15176 = vadd.xlane.f32.xlu0 %v15175_v19  ;;  %v15134_v19 = vmul.f32 %v25149_v39, %v14261_v2 }
 0xb6f   : > { %15005 = vadd.xlane.f32.xlu1 %v15004_v60  ;;  %v15178_v0 = vsel %vm1772_vm1, %v15134_v19, 0.0 }
 0xb71   : > { %15209 = vadd.xlane.f32.xlu0 %v15208_v57 }
 0xb73   : > { %15008 = vadd.xlane.f32.xlu1 %v15007_v18  ;;  %v15001_v18 = vsel %vm1772_vm1, %v14963_v53, 0.0  ;;  %v26899_v53 = vld [vmem:[#allocation16_spill] sm:$0xff] }
 0xb75   : > { %14996 = vadd.xlane.f32.xlu0 %v14995_v10 }
 0xb77   : > { %15029 = vadd.xlane.f32.xlu1 %v15028_v51  ;;  %v14967_v51 = vmul.f32 %v25149_v39, %v25232_v32 }
 0xb79   : > { %15032 = vadd.xlane.f32.xlu0 %v15031_v9  ;;  %v15013_v5 = vsel %vm1772_vm1, %v14967_v51, 0.0 }
 0xb7b   : > { %15044 = vadd.xlane.f32.xlu1 %v15043_v20  ;;  %v14262_v20 = vld [vmem:[#allocation4 + $0x118] sm:$0xff] }
 0xb7c   : > { %v15135_v32 = vmul.f32 %v25149_v39, %v14262_v20 }
 0xb7d   : > { %15164 = vadd.xlane.f32.xlu0 %v15163_v40  ;;  %v15049_v40 = vsel %vm1772_vm1, %v14979_v3, 0.0 }
 0xb7f   : > { %15173 = vadd.xlane.f32.xlu1 %v15172_v36  ;;  %v15181_v36 = vsel %vm1772_vm1, %v15135_v32, 0.0 }
 0xb81   : > { %15200 = vadd.xlane.f32.xlu0 %v15199_v52  ;;  %v15147_v52 = vmul.f32 %v25149_v39, %v14274_v8 }
 0xb83   : > { %15197 = vadd.xlane.f32.xlu1 %v15196_v35  ;;  %v15217_v12 = vsel %vm1772_vm1, %v15147_v52, 0.0  ;;  %v14975_v35 = vmul.f32 %v25149_v39, %v14246_v61 }
 0xb85   : > { %14999 = vadd.xlane.f32.xlu0 %v14998_v29  ;;  %v15037_v63 = vsel %vm1772_vm1, %v14975_v35, 0.0 }
 0xb87   : > { %15212 = vadd.xlane.f32.xlu1 %v15211_v15  ;;  %v15143_v15 = vmul.f32 %v25149_v39, %v14270_v25 }
 0xb89   : > { %15035 = vadd.xlane.f32.xlu0 %v15034_v16  ;;  %v15205_v16 = vsel %vm1772_vm1, %v15143_v15, 0.0 }
 0xb8b   : > { %15011 = vadd.xlane.f32.xlu1 %v15010_v4 }
 0xb8c   : > { %v25336_v43 = vpop.xlane.xlu1 %14312 }
 0xb8d   : > { %15167 = vadd.xlane.f32.xlu0 %v15166_v55  ;;  %v25339_v58 = vpop.xlane.xlu0 %14306 }
 0xb8f   : > { %15047 = vadd.xlane.f32.xlu1 %v15046_v48  ;;  %v26898_v48 = vlaneseq }
 0xb90   : > { %v25344_v60 = vpop.xlane.xlu1 %14315 }
 0xb91   : > { %15203 = vadd.xlane.f32.xlu0 %v15202_v7  ;;  %v25347_v57 = vpop.xlane.xlu0 %14309  ;;  %v14483_v19 = vand.u32 127, %v26898_v48 }
 0xb93   : > { %15179 = vadd.xlane.f32.xlu1 %v15178_v0  ;;  %v25396_v44 = vsub.s32 %v14483_v19, %v26899_v53 }
 0xb94   : > { %v25352_v10 = vpop.xlane.xlu1 %14321 }
 0xb95   : > { %15002 = vadd.xlane.f32.xlu0 %v15001_v18  ;;  %v25355_v31 = vpop.xlane.xlu0 %14318 }
 0xb97   : > { %15215 = vadd.xlane.f32.xlu1 %v15214_v21 }
 0xb98   : > { %v25360_v9 = vpop.xlane.xlu1 %14327 }
 0xb99   : > { %15170 = vadd.xlane.f32.xlu0 %v15169_v23  ;;  %v25363_v56 = vpop.xlane.xlu0 %14324 }
 0xb9b   : > { %15014 = vadd.xlane.f32.xlu1 %v15013_v5 }
 0xb9c   : > { %v14334_v59 = vpop.xlane.xlu1 %14333 }
 0xb9d   : > { %v14331_v45 = vpop.xlane.xlu0 %14330 }
 0xb9f   : > { %15050 = vadd.xlane.f32.xlu1 %v15049_v40 }
 0xba0   : > { %v14340_v54 = vpop.xlane.xlu1 %14339 }
 0xba1   : > { %v14337_v49 = vpop.xlane.xlu0 %14336 }
 0xba3   : > { %15182 = vadd.xlane.f32.xlu1 %v15181_v36 }
 0xba4   : > { %v25371_v17 = vpop.xlane.xlu1 %14345 }
 0xba5   : > { %v25374_v1 = vpop.xlane.xlu0 %14342 }
 0xba7   : > { %15218 = vadd.xlane.f32.xlu1 %v15217_v12 }
 0xba8   : > { %v25377_v29 = vpop.xlane.xlu1 %14351 }
 0xba9   : > { %v25380_v46 = vpop.xlane.xlu0 %14348 }
 0xbab   : > { %15038 = vadd.xlane.f32.xlu1 %v15037_v63 }
 0xbac   : > { %v25383_v34 = vpop.xlane.xlu1 %14357 }
 0xbad   : > { %v25386_v30 = vpop.xlane.xlu0 %14354 }
 0xbaf   : > { %15206 = vadd.xlane.f32.xlu1 %v15205_v16 }
 0xbb0   : > { %v25388_v14 = vpop.xlane.xlu1 %14363 }
 0xbb1   : > { %v25390_v4 = vpop.xlane.xlu0 %14360 }
 0xbb4   : > { %v14370_v62 = vpop.xlane.xlu1 %14369 }
 0xbb5   : > { %v14367_v55 = vpop.xlane.xlu0 %14366 }
 0xbb8   : > { %v14376_v37 = vpop.xlane.xlu1 %14375 }
 0xbb9   : > { %v14373_v2 = vpop.xlane.xlu0 %14372 }
 0xbbc   : > { %v14982_v47 = vpop.xlane.xlu1 %14981 }
 0xbc0   : > { %v14985_v39 = vpop.xlane.xlu1 %14984 }
 0xbc1   : > { %v25393_v7 = vpop.permute.xlu0 %14383 }
 0xbc2   : > { %v14394_v38 = vadd.f32 %v25393_v7, %v14331_v45  ;;  %v14395_v0 = vadd.f32 %v25393_v7, %v14334_v59  ;;  %v14396_v27 = vadd.f32 %v25393_v7, %v14337_v49  ;;  %v14397_v18 = vadd.f32 %v25393_v7, %v14340_v54 }
 0xbc3   : > { %v14406_v11 = vadd.f32 %v25393_v7, %v14367_v55  ;;  %v14407_v21 = vadd.f32 %v25393_v7, %v14370_v62  ;;  %v14408_v51 = vadd.f32 %v25393_v7, %v14373_v2  ;;  %v14409_v23 = vadd.f32 %v25393_v7, %v14376_v37 }
 0xbc4   : > { %v15018_v5 = vpop.xlane.xlu1 %15017  ;;  %v14418_v3 = vmul.f32 10.0, %v14394_v38  ;;  %v14419_v20 = vmul.f32 10.0, %v14395_v0  ;;  %v14420_v40 = vmul.f32 10.0, %v14396_v27  ;;  %v14421_v59 = vmul.f32 10.0, %v14397_v18 }
 0xbc5   : > { %v15052_v45 = vadd.f32 %v14982_v47, %v25393_v7  ;;  %v15053_v32 = vadd.f32 %v14985_v39, %v25393_v7  ;;  %v14430_v8 = vmul.f32 10.0, %v14406_v11  ;;  %v14431_v54 = vmul.f32 10.0, %v14407_v21 }
 0xbc6   : > { %v14432_v36 = vmul.f32 10.0, %v14408_v51  ;;  %v14433_v49 = vmul.f32 10.0, %v14409_v23  ;;  %v14442_v52 = vadd.f32 3.5, %v14418_v3  ;;  %v15064_v61 = vadd.f32 %v15018_v5, %v25393_v7 }
 0xbc7   : > { %v14443_v12 = vadd.f32 3.5, %v14419_v20  ;;  %v14444_v35 = vadd.f32 3.5, %v14420_v40  ;;  %v14445_v25 = vadd.f32 3.5, %v14421_v59  ;;  %v14454_v15 = vadd.f32 3.5, %v14430_v8 }
 0xbc8   : > { %v15021_v63 = vpop.xlane.xlu1 %15020  ;;  %v14455_v16 = vadd.f32 3.5, %v14431_v54  ;;  %v14456_v62 = vadd.f32 3.5, %v14432_v36  ;;  %v14457_v55 = vadd.f32 3.5, %v14433_v49  ;;  %v15076_v2 = vmul.f32 10.0, %v15052_v45 }
 0xbc9   : > { %v15065_v37 = vadd.f32 %v15021_v63, %v25393_v7  ;;  %v14519_v47 = vrot.slane %v14442_v52, %v25396_v44  ;;  %v14523_v48 = vrot.slane %v14443_v12, %v25396_v44  ;;  %v15077_v19 = vmul.f32 10.0, %v15053_v32 }
 0xbca   : > { %v14527_v39 = vrot.slane %v14444_v35, %v25396_v44  ;;  %v14567_v53 = vrot.slane %v14454_v15, %v25396_v44  ;;  %v14571_v38 = vrot.slane %v14455_v16, %v25396_v44  ;;  %v15088_v0 = vmul.f32 10.0, %v15064_v61 }
 0xbcb   : > { %v14531_v27 = vrot.slane %v14445_v25, %v25396_v44  ;;  %v14575_v18 = vrot.slane %v14456_v62, %v25396_v44  ;;  %v14594_v11 = vsel %vm14580_vm5, %v14523_v48, %v14519_v47  ;;  %v15089_v21 = vmul.f32 10.0, %v15065_v37 }
 0xbcc   : > { %v15150_v51 = vpop.xlane.xlu1 %15149  ;;  %v14579_v23 = vrot.slane %v14457_v55, %v25396_v44  ;;  %v14595_v5 = vsel %vm14582_vm6, %v14527_v39, %v14594_v11  ;;  %v14604_v3 = vsel %vm14580_vm5, %v14571_v38, %v14567_v53  ;;  %v15100_v45 = vadd.f32 3.5, %v15076_v2 }
 0xbcd   : > { %v15220_v20 = vadd.f32 %v15150_v51, %v25393_v7  ;;  %v14596_v40 = vsel %vm14584_vm7, %v14531_v27, %v14595_v5  ;;  %v14605_v59 = vsel %vm14582_vm6, %v14575_v18, %v14604_v3  ;;  %v15101_v32 = vadd.f32 3.5, %v15077_v19 }
 0xbce   : > { %v14606_v8 = vsel %vm14584_vm7, %v14579_v23, %v14605_v59  ;;  %14613 = vst.msk [vmem:[%s26900_s11 + $0x8] sm:$0xf] %vm14612_vm8, %v14596_v40  ;;  %v15112_v54 = vadd.f32 3.5, %v15088_v0  ;;  %v14386_v49 = vadd.f32 %v25393_v7, %v25339_v58  ;;  %v14387_v52 = vadd.f32 %v25393_v7, %v25347_v57 }
 0xbcf   : > { %v15244_v36 = vmul.f32 10.0, %v15220_v20  ;;  %14615 = vst.msk [vmem:[%s26900_s11 + $0x18] sm:$0xf] %vm14612_vm8, %v14606_v8  ;;  %v25437_v61 = vadd.f32 3.5, %v15089_v21  ;;  %v14388_v35 = vadd.f32 %v25393_v7, %v25336_v43  ;;  %v14389_v25 = vadd.f32 %v25393_v7, %v25344_v60 }
 0xbd0   : > { %v15153_v12 = vpop.xlane.xlu1 %15152  ;;  %v14390_v63 = vadd.f32 %v25393_v7, %v25355_v31  ;;  %v14391_v58 = vadd.f32 %v25393_v7, %v25352_v10  ;;  %v14392_v57 = vadd.f32 %v25393_v7, %v25363_v56  ;;  %v14393_v62 = vadd.f32 %v25393_v7, %v25360_v9 }
 0xbd1   : > { %v15268_v15 = vadd.f32 3.5, %v15244_v36  ;;  %v15221_v16 = vadd.f32 %v15153_v12, %v25393_v7  ;;  %v14398_v43 = vadd.f32 %v25393_v7, %v25374_v1  ;;  %v14399_v60 = vadd.f32 %v25393_v7, %v25371_v17 }
 0xbd2   : > { %v14400_v31 = vadd.f32 %v25393_v7, %v25380_v46  ;;  %v14401_v10 = vadd.f32 %v25393_v7, %v25377_v29  ;;  %v14402_v56 = vadd.f32 %v25393_v7, %v25386_v30  ;;  %v14403_v9 = vadd.f32 %v25393_v7, %v25383_v34 }
 0xbd3   : > { %v15292_v55 = vsub.f32 %v15100_v45, %v15268_v15  ;;  %v15245_v37 = vmul.f32 10.0, %v15221_v16  ;;  %v14404_v1 = vadd.f32 %v25393_v7, %v25390_v4  ;;  %v14405_v17 = vadd.f32 %v25393_v7, %v25388_v14 }
 0xbd4   : > { %v15186_v2 = vpop.xlane.xlu1 %15185  ;;  %v14410_v47 = vmul.f32 10.0, %v14386_v49  ;;  %v14411_v29 = vmul.f32 10.0, %v14387_v52  ;;  %v14412_v53 = vmul.f32 10.0, %v14388_v35  ;;  %v14413_v38 = vmul.f32 10.0, %v14389_v25 }
 0xbd5   : > { %v15316_v46 = vand.u32 2147483647, %v15292_v55  ;;  %v15364_v48 = vmul.f32 0.5, %v15292_v55  ;;  %v15269_v19 = vadd.f32 3.5, %v15245_v37  ;;  %v15232_v39 = vadd.f32 %v15186_v2, %v25393_v7 }
 0xbd6   : > { %v14414_v30 = vmul.f32 10.0, %v14390_v63  ;;  %v14415_v14 = vmul.f32 10.0, %v14391_v58  ;;  %v14416_v21 = vmul.f32 10.0, %v14392_v57  ;;  %v14417_v51 = vmul.f32 10.0, %v14393_v62 }
 0xbd7   : > { %vm25469_vm9 = vcmp.lt.f32.partialorder %v15316_v46, 1.0  ;;  %v15388_v34 = vmul.f32 %v15364_v48, %v15292_v55  ;;  %v16781_v27 = vadd.f32 -0.5, %v15316_v46  ;;  %v15293_v4 = vsub.f32 %v15101_v32, %v15269_v19 }
 0xbd8   : > { %v15256_v18 = vmul.f32 10.0, %v15232_v39  ;;  %v15189_v11 = vpop.xlane.xlu1 %15188  ;;  %v14422_v20 = vmul.f32 10.0, %v14398_v43  ;;  %v14423_v45 = vmul.f32 10.0, %v14399_v60  ;;  %v14424_v8 = vmul.f32 10.0, %v14400_v31 }
 0xbd9   : > { %v15317_v23 = vand.u32 2147483647, %v15293_v4  ;;  %v15365_v5 = vmul.f32 0.5, %v15293_v4  ;;  %v15233_v3 = vadd.f32 %v15189_v11, %v25393_v7  ;;  %v15436_v40 = vsel %vm25469_vm9, %v15388_v34, %v16781_v27 }
 0xbda   : > { %v15280_v59 = vadd.f32 3.5, %v15256_v18  ;;  %v14425_v32 = vmul.f32 10.0, %v14401_v10  ;;  %v14426_v63 = vmul.f32 10.0, %v14402_v56  ;;  %v14427_v15 = vmul.f32 10.0, %v14403_v9 }
 0xbdb   : > { %v15389_v36 = vmul.f32 %v15365_v5, %v15293_v4  ;;  %v16782_v49 = vadd.f32 -0.5, %v15317_v23  ;;  %v15257_v52 = vmul.f32 10.0, %v15233_v3  ;;  %vm25476_vm10 = vcmp.lt.f32.partialorder %v15317_v23, 1.0 }
 0xbdc   : > { %v15304_v35 = vsub.f32 %v15112_v54, %v15280_v59  ;;  %v14988_v25 = vpop.xlane.xlu1 %14987  ;;  %v25481_v16 = vrot.slane %v15436_v40, %v25396_v44  ;;  %v14428_v62 = vmul.f32 10.0, %v14404_v1  ;;  %v14429_v31 = vmul.f32 10.0, %v14405_v17 }
 0xbdd   : > { %v15281_v58 = vadd.f32 3.5, %v15257_v52  ;;  %v15054_v57 = vadd.f32 %v14988_v25, %v25393_v7  ;;  %v14434_v55 = vadd.f32 3.5, %v14410_v47  ;;  %v15437_v37 = vsel %vm25476_vm10, %v15389_v36, %v16782_v49 }
 0xbde   : > { %v15328_v43 = vand.u32 2147483647, %v15304_v35  ;;  %v15376_v60 = vmul.f32 0.5, %v15304_v35  ;;  %v14435_v54 = vadd.f32 3.5, %v14411_v29  ;;  %v14436_v2 = vadd.f32 3.5, %v14412_v53 }
 0xbdf   : > { %v15305_v10 = vsub.f32 %v25437_v61, %v15281_v58  ;;  %v15078_v48 = vmul.f32 10.0, %v15054_v57  ;;  %v14437_v47 = vadd.f32 3.5, %v14413_v38  ;;  %v15491_v0 = vrot.slane %v15437_v37, %v25396_v44 }
 0xbe0   : > { %vm25487_vm11 = vcmp.lt.f32.partialorder %v15328_v43, 1.0  ;;  %v15400_v9 = vmul.f32 %v15376_v60, %v15304_v35  ;;  %v16793_v46 = vadd.f32 -0.5, %v15328_v43  ;;  %v15024_v19 = vpop.xlane.xlu1 %15023  ;;  %v25493_v34 = vadd.f32 3.5, %v14414_v30 }
 0xbe1   : > { %v15329_v1 = vand.u32 2147483647, %v15305_v10  ;;  %v15377_v39 = vmul.f32 0.5, %v15305_v10  ;;  %v15066_v17 = vadd.f32 %v15024_v19, %v25393_v7  ;;  %v25495_v61 = vadd.f32 3.5, %v14415_v14 }
 0xbe2   : > { %v25497_v29 = vadd.f32 3.5, %v14416_v21  ;;  %v15448_v53 = vsel %vm25487_vm11, %v15400_v9, %v16793_v46  ;;  %v15102_v11 = vadd.f32 3.5, %v15078_v48  ;;  %v25505_v38 = vadd.f32 3.5, %v14417_v51 }
 0xbe3   : > { %vm25501_vm12 = vcmp.lt.f32.partialorder %v15329_v1, 1.0  ;;  %v15401_v4 = vmul.f32 %v15377_v39, %v15305_v10  ;;  %v16794_v18 = vadd.f32 -0.5, %v15329_v1  ;;  %v14446_v5 = vadd.f32 3.5, %v14422_v20 }
 0xbe4   : > { %v15156_v23 = vpop.xlane.xlu1 %15155  ;;  %v14447_v30 = vadd.f32 3.5, %v14423_v45  ;;  %v15090_v3 = vmul.f32 10.0, %v15066_v17  ;;  %v14448_v21 = vadd.f32 3.5, %v14424_v8  ;;  %v14449_v40 = vadd.f32 3.5, %v14425_v32 }
 0xbe5   : > { %v15222_v14 = vadd.f32 %v15156_v23, %v25393_v7  ;;  %v25509_v59 = vrot.slane %v15448_v53, %v25396_v44  ;;  %v15449_v36 = vsel %vm25501_vm12, %v15401_v4, %v16794_v18  ;;  %v14450_v49 = vadd.f32 3.5, %v14426_v63 }
 0xbe6   : > { %v14451_v52 = vadd.f32 3.5, %v14427_v15  ;;  %v14452_v51 = vadd.f32 3.5, %v14428_v62  ;;  %v14487_v20 = vrot.slane %v14434_v55, %v25396_v44  ;;  %v14491_v45 = vrot.slane %v14435_v54, %v25396_v44 }
 0xbe7   : > { %v15246_v12 = vmul.f32 10.0, %v15222_v14  ;;  %v25515_v8 = vadd.f32 3.5, %v14429_v31  ;;  %v14495_v32 = vrot.slane %v14436_v2, %v25396_v44  ;;  %v14535_v25 = vrot.slane %v14446_v5, %v25396_v44 }
 0xbe8   : > { %v14991_v35 = vpop.xlane.xlu1 %14990  ;;  %v14539_v58 = vrot.slane %v14447_v30, %v25396_v44  ;;  %v15539_v63 = vrot.slane %v15449_v36, %v25396_v44  ;;  %v15114_v15 = vadd.f32 3.5, %v15090_v3  ;;  %v14543_v62 = vrot.slane %v14448_v21, %v25396_v44 }
 0xbe9   : > { %v15270_v57 = vadd.f32 3.5, %v15246_v12  ;;  %v14499_v43 = vrot.slane %v14437_v47, %v25396_v44  ;;  %v14503_v60 = vrot.slane %v25493_v34, %v25396_v44  ;;  %v14507_v31 = vrot.slane %v25495_v61, %v25396_v44 }
 0xbea   : > { %v14511_v55 = vrot.slane %v25497_v29, %v25396_v44  ;;  %v14547_v10 = vrot.slane %v14449_v40, %v25396_v44  ;;  %v14581_v54 = vsel %vm14580_vm5, %v14491_v45, %v14487_v20  ;;  %v14597_v2 = vsel %vm14580_vm5, %v14539_v58, %v14535_v25 }
 0xbeb   : > { %v15294_v37 = vsub.f32 %v15102_v11, %v15270_v57  ;;  %v14551_v9 = vrot.slane %v14450_v49, %v25396_v44  ;;  %v14583_v46 = vsel %vm14582_vm6, %v14495_v32, %v14581_v54  ;;  %v14598_v48 = vsel %vm14582_vm6, %v14543_v62, %v14597_v2 }
 0xbec   : > { %v15027_v56 = vpop.xlane.xlu1 %15026  ;;  %v15580_v19 = vsel %vm14580_vm5, %v15491_v0, %v25481_v16  ;;  %v15055_v17 = vadd.f32 %v14991_v35, %v25393_v7  ;;  %v14515_v34 = vrot.slane %v25505_v38, %v25396_v44  ;;  %v14555_v29 = vrot.slane %v14451_v52, %v25396_v44 }
 0xbed   : > { %v15318_v1 = vand.u32 2147483647, %v15294_v37  ;;  %v15366_v39 = vmul.f32 0.5, %v15294_v37  ;;  %v14585_v53 = vsel %vm14584_vm7, %v14499_v43, %v14583_v46  ;;  %v14599_v27 = vsel %vm14584_vm7, %v14547_v10, %v14598_v48 }
 0xbee   : > { %v15192_v47 = vpop.xlane.xlu0 %15191  ;;  %v14559_v16 = vrot.slane %v14452_v51, %v25396_v44  ;;  %v14563_v23 = vrot.slane %v25515_v8, %v25396_v44  ;;  %v14587_v38 = vsel %vm14586_vm13, %v14503_v60, %v14585_v53  ;;  %v14600_v5 = vsel %vm14586_vm13, %v14551_v9, %v14599_v27 }
 0xbef   : > { %v15234_v61 = vadd.f32 %v15192_v47, %v25393_v7  ;;  %vm15342_vm2 = vcmp.lt.f32.partialorder %v15318_v1, 1.0  ;;  %v15390_v4 = vmul.f32 %v15366_v39, %v15294_v37  ;;  %v16783_v18 = vadd.f32 -0.5, %v15318_v1 }
 0xbf0   : > { %v15159_v11 = vpop.xlane.xlu1 %15158  ;;  %v15079_v3 = vmul.f32 10.0, %v15055_v17  ;;  %v14589_v40 = vsel %vm14588_vm14, %v14507_v31, %v14587_v38  ;;  %v15067_v49 = vadd.f32 %v15027_v56, %v25393_v7  ;;  %v14601_v45 = vsel %vm14588_vm14, %v14555_v29, %v14600_v5 }
 0xbf1   : > { %v15258_v0 = vmul.f32 10.0, %v15234_v61  ;;  %v15438_v30 = vsel %vm15342_vm2, %v15390_v4, %v16783_v18  ;;  %v15223_v14 = vadd.f32 %v15159_v11, %v25393_v7  ;;  %v14591_v12 = vsel %vm14590_vm15, %v14511_v55, %v14589_v40 }
 0xbf2   : > { %v15042_v21 = vpop.xlane.xlu0 %15041  ;;  %v15495_v36 = vrot.slane %v15438_v30, %v25396_v44  ;;  %v14593_v20 = vsel %vm14592_vm0, %v14515_v34, %v14591_v12  ;;  %v15590_v35 = vsel %vm14580_vm5, %v15539_v63, %v25509_v59  ;;  %v14602_v25 = vsel %vm14590_vm15, %v14559_v16, %v14601_v45 }
 0xbf3   : > { %v15282_v52 = vadd.f32 3.5, %v15258_v0  ;;  %v15247_v51 = vmul.f32 10.0, %v15223_v14  ;;  %14611 = vst.msk [vmem:[%s26900_s11] sm:$0xff] %vm3870_vm3, %v14593_v20  ;;  %v15103_v57 = vadd.f32 3.5, %v15079_v3  ;;  %v14603_v31 = vsel %vm14592_vm0, %v14563_v23, %v14602_v25 }
 0xbf4   : > { %v15195_v32 = vpop.xlane.xlu1 %15194  ;;  %v15581_v58 = vsel %vm14582_vm6, %v15495_v36, %v15580_v19  ;;  %v15091_v55 = vmul.f32 10.0, %v15067_v49  ;;  %14614 = vst.msk [vmem:[%s26900_s11 + $0x10] sm:$0xff] %vm3870_vm3, %v14603_v31  ;;  %v15072_v12 = vadd.f32 %v15042_v21, %v25393_v7 }
 0xbf5   : > { %v15306_v8 = vsub.f32 %v15114_v15, %v15282_v52  ;;  %v15271_v62 = vadd.f32 3.5, %v15247_v51  ;;  %v15235_v43 = vadd.f32 %v15195_v32, %v25393_v7 }
 0xbf6   : > { %v15162_v60 = vpop.xlane.xlu0 %15161  ;;  %v15115_v19 = vadd.f32 3.5, %v15091_v55 }
 0xbf7   : > { %v15330_v59 = vand.u32 2147483647, %v15306_v8  ;;  %v15378_v63 = vmul.f32 0.5, %v15306_v8  ;;  %v15295_v15 = vsub.f32 %v15103_v57, %v15271_v62  ;;  %v15259_v37 = vmul.f32 10.0, %v15235_v43 }
 0xbf8   : > { %v14994_v2 = vpop.xlane.xlu1 %14993  ;;  %v15224_v14 = vadd.f32 %v15162_v60, %v25393_v7  ;;  %v15096_v57 = vmul.f32 10.0, %v15072_v12 }
 0xbf9   : > { %vm15354_vm4 = vcmp.lt.f32.partialorder %v15330_v59, 1.0  ;;  %v15402_v10 = vmul.f32 %v15378_v63, %v15306_v8  ;;  %v16795_v54 = vadd.f32 -0.5, %v15330_v59  ;;  %v15319_v56 = vand.u32 2147483647, %v15295_v15 }
 0xbfa   : > { %v15367_v9 = vmul.f32 0.5, %v15295_v15  ;;  %v15283_v46 = vadd.f32 3.5, %v15259_v37  ;;  %v15177_v48 = vpop.xlane.xlu0 %15176  ;;  %v15056_v23 = vadd.f32 %v14994_v2, %v25393_v7  ;;  %v15120_v63 = vadd.f32 3.5, %v15096_v57 }
 0xbfb   : > { %v15450_v1 = vsel %vm15354_vm4, %v15402_v10, %v16795_v54  ;;  %vm15343_vm9 = vcmp.lt.f32.partialorder %v15319_v56, 1.0  ;;  %v16784_v47 = vadd.f32 -0.5, %v15319_v56  ;;  %v15229_v8 = vadd.f32 %v15177_v48, %v25393_v7 }
 0xbfc   : > { %v15543_v39 = vrot.slane %v15450_v1, %v25396_v44  ;;  %v15391_v17 = vmul.f32 %v15367_v9, %v15295_v15  ;;  %v15307_v34 = vsub.f32 %v15115_v19, %v15283_v46  ;;  %v15006_v61 = vpop.xlane.xlu1 %15005  ;;  %v15080_v49 = vmul.f32 10.0, %v15056_v23 }
 0xbfd   : > { %v15253_v31 = vmul.f32 10.0, %v15229_v8  ;;  %v15060_v19 = vadd.f32 %v15006_v61, %v25393_v7 }
 0xbfe   : > { %v15439_v29 = vsel %vm15343_vm9, %v15391_v17, %v16784_v47  ;;  %v15210_v53 = vpop.xlane.xlu0 %15209  ;;  %v15591_v27 = vsel %vm14582_vm6, %v15543_v39, %v15590_v35  ;;  %v15331_v18 = vand.u32 2147483647, %v15307_v34  ;;  %v15379_v16 = vmul.f32 0.5, %v15307_v34 }
 0xbff   : > { %v15499_v4 = vrot.slane %v15439_v29, %v25396_v44  ;;  %v15240_v36 = vadd.f32 %v15210_v53, %v25393_v7  ;;  %v15248_v35 = vmul.f32 10.0, %v15224_v14  ;;  %v15104_v25 = vadd.f32 3.5, %v15080_v49 }
 0xc00   : > { %vm15355_vm10 = vcmp.lt.f32.partialorder %v15331_v18, 1.0  ;;  %v15403_v0 = vmul.f32 %v15379_v16, %v15307_v34  ;;  %v16796_v11 = vadd.f32 -0.5, %v15331_v18  ;;  %v15009_v38 = vpop.xlane.xlu1 %15008  ;;  %v15277_v2 = vadd.f32 3.5, %v15253_v31 }
 0xc01   : > { %v25575_v30 = vsel %vm14584_vm7, %v15499_v4, %v15581_v58  ;;  %v15061_v51 = vadd.f32 %v15009_v38, %v25393_v7  ;;  %v15264_v32 = vmul.f32 10.0, %v15240_v36  ;;  %v15272_v60 = vadd.f32 3.5, %v15248_v35 }
 0xc02   : > { %v14997_v5 = vpop.xlane.xlu0 %14996  ;;  %v15451_v3 = vsel %vm15355_vm10, %v15403_v0, %v16796_v11  ;;  %v15084_v11 = vmul.f32 10.0, %v15060_v19 }
 0xc03   : > { %v15547_v40 = vrot.slane %v15451_v3, %v25396_v44  ;;  %v15085_v62 = vmul.f32 10.0, %v15061_v51  ;;  %v15288_v55 = vadd.f32 3.5, %v15264_v32  ;;  %v15296_v59 = vsub.f32 %v15104_v25, %v15272_v60 }
 0xc04   : > { %v15030_v52 = vpop.xlane.xlu1 %15029  ;;  %v15057_v54 = vadd.f32 %v14997_v5, %v25393_v7  ;;  %v15108_v60 = vadd.f32 3.5, %v15084_v11 }
 0xc05   : > { %v25583_v45 = vsel %vm14584_vm7, %v15547_v40, %v15591_v27  ;;  %v15109_v15 = vadd.f32 3.5, %v15085_v62  ;;  %v15312_v56 = vsub.f32 %v15120_v63, %v15288_v55  ;;  %v15320_v46 = vand.u32 2147483647, %v15296_v59 }
 0xc06   : > { %v15033_v20 = vpop.xlane.xlu0 %15032  ;;  %v15368_v48 = vmul.f32 0.5, %v15296_v59  ;;  %v15081_v29 = vmul.f32 10.0, %v15057_v54  ;;  %v15068_v49 = vadd.f32 %v15030_v52, %v25393_v7 }
 0xc07   : > { %v15301_v17 = vsub.f32 %v15109_v15, %v15277_v2  ;;  %v15069_v53 = vadd.f32 %v15033_v20, %v25393_v7  ;;  %v15336_v27 = vand.u32 2147483647, %v15312_v56  ;;  %v15384_v4 = vmul.f32 0.5, %v15312_v56 }
 0xc08   : > { %v15045_v58 = vpop.xlane.xlu1 %15044  ;;  %v15392_v16 = vmul.f32 %v15368_v48, %v15296_v59  ;;  %v16785_v0 = vadd.f32 -0.5, %v15320_v46  ;;  %vm25592_vm11 = vcmp.lt.f32.partialorder %v15320_v46, 1.0  ;;  %v15105_v36 = vadd.f32 3.5, %v15081_v29  ;;  %v20211_v29 = vld [vmem:[#allocation4] sm:$0xff] }
 0xc09   : > { %v15325_v61 = vand.u32 2147483647, %v15301_v17  ;;  %v15373_v3 = vmul.f32 0.5, %v15301_v17  ;;  %v15093_v12 = vmul.f32 10.0, %v15069_v53  ;;  %v15408_v51 = vmul.f32 %v15384_v4, %v15312_v56 }
 0xc0a   : > { %v15165_v43 = vpop.xlane.xlu0 %15164  ;;  %v16801_v20 = vadd.f32 -0.5, %v15336_v27  ;;  %v15440_v32 = vsel %vm25592_vm11, %v15392_v16, %v16785_v0  ;;  %vm25602_vm12 = vcmp.lt.f32.partialorder %v15336_v27, 1.0  ;;  %v15073_v57 = vadd.f32 %v15045_v58, %v25393_v7 }
 0xc0b   : > { %v15225_v37 = vadd.f32 %v15165_v43, %v25393_v7  ;;  %v15397_v31 = vmul.f32 %v15373_v3, %v15301_v17  ;;  %v16790_v52 = vadd.f32 -0.5, %v15325_v61  ;;  %vm25607_vm2 = vcmp.lt.f32.partialorder %v15325_v61, 1.0 }
 0xc0c   : > { %v15174_v21 = vpop.xlane.xlu1 %15173  ;;  %v15092_v63 = vmul.f32 10.0, %v15068_v49  ;;  %v15117_v15 = vadd.f32 3.5, %v15093_v12  ;;  %v15456_v58 = vsel %vm25602_vm12, %v15408_v51, %v16801_v20  ;;  %v15503_v2 = vrot.slane %v15440_v32, %v25396_v44 }
 0xc0d   : > { %v15228_v9 = vadd.f32 %v15174_v21, %v25393_v7  ;;  %v15249_v47 = vmul.f32 10.0, %v15225_v37  ;;  %v15097_v56 = vmul.f32 10.0, %v15073_v57  ;;  %v15445_v17 = vsel %vm25607_vm2, %v15397_v31, %v16790_v52 }
 0xc0e   : > { %v15201_v10 = vpop.xlane.xlu0 %15200  ;;  %v15116_v27 = vadd.f32 3.5, %v15092_v63  ;;  %v25624_v16 = vrot.slane %v15456_v58, %v25396_v44 }
 0xc0f   : > { %v15237_v1 = vadd.f32 %v15201_v10, %v25393_v7  ;;  %v15252_v18 = vmul.f32 10.0, %v15228_v9  ;;  %v15273_v14 = vadd.f32 3.5, %v15249_v47  ;;  %v20210_v47 = vld [vmem:[#allocation3] sm:$0xff] }
 0xc10   : > { %v15198_v39 = vpop.xlane.xlu1 %15197  ;;  %v25620_v53 = vadd.f32 %v20211_v29, %v20210_v47 }
 0xc11   : > { %v15261_v23 = vmul.f32 10.0, %v15237_v1  ;;  %v15276_v35 = vadd.f32 3.5, %v15252_v18  ;;  %v15236_v8 = vadd.f32 %v15198_v39, %v25393_v7  ;;  %v15297_v55 = vsub.f32 %v15105_v36, %v15273_v14 }
 0xc12   : > { %v15000_v34 = vpop.xlane.xlu0 %14999  ;;  %v25632_v14 = vrot.slane %v15445_v17, %v25396_v44 }
 0xc13   : > { %v15285_v62 = vadd.f32 3.5, %v15261_v23  ;;  %v15300_v10 = vsub.f32 %v15108_v60, %v15276_v35  ;;  %v15260_v54 = vmul.f32 10.0, %v15236_v8  ;;  %v15058_v46 = vadd.f32 %v15000_v34, %v25393_v7 }
 0xc14   : > { %v15213_v38 = vpop.xlane.xlu1 %15212  ;;  %v15321_v19 = vand.u32 2147483647, %v15297_v55  ;;  %v15369_v1 = vmul.f32 0.5, %v15297_v55  ;;  %v25628_v23 = vsel %vm14586_vm13, %v15503_v2, %v25575_v30 }
 0xc15   : > { %v15241_v37 = vadd.f32 %v15213_v38, %v25393_v7  ;;  %v25615_v9 = vsub.f32 %v15117_v15, %v15285_v62  ;;  %v15324_v0 = vand.u32 2147483647, %v15300_v10  ;;  %v15372_v34 = vmul.f32 0.5, %v15300_v10 }
 0xc16   : > { %v25596_v40 = vpop.xlane.xlu0 %15035  ;;  %v15284_v11 = vadd.f32 3.5, %v15260_v54  ;;  %v15121_v38 = vadd.f32 3.5, %v15097_v56  ;;  %v15082_v61 = vmul.f32 10.0, %v15058_v46  ;;  %vm25634_vm4 = vcmp.lt.f32.partialorder %v15321_v19, 1.0 }
 0xc17   : > { %v15265_v4 = vmul.f32 10.0, %v15241_v37  ;;  %v15381_v5 = vmul.f32 0.5, %v25615_v9  ;;  %v15393_v49 = vmul.f32 %v15369_v1, %v15297_v55  ;;  %v16786_v12 = vadd.f32 -0.5, %v15321_v19 }
 0xc18   : > { %v15012_v43 = vpop.xlane.xlu1 %15011  ;;  %v15333_v30 = vand.u32 2147483647, %v25615_v9  ;;  %vm25641_vm9 = vcmp.lt.f32.partialorder %v15324_v0, 1.0  ;;  %v15396_v57 = vmul.f32 %v15372_v34, %v15300_v10  ;;  %v16789_v62 = vadd.f32 -0.5, %v15324_v0 }
 0xc19   : > { %v15062_v51 = vadd.f32 %v15012_v43, %v25393_v7  ;;  %v15289_v35 = vadd.f32 3.5, %v15265_v4  ;;  %v15308_v60 = vsub.f32 %v15116_v27, %v15284_v11  ;;  %v25646_v31 = vmul.f32 %v15381_v5, %v25615_v9 }
 0xc1a   : > { %v15168_v59 = vpop.xlane.xlu0 %15167  ;;  %v15106_v52 = vadd.f32 3.5, %v15082_v61  ;;  %v15070_v21 = vadd.f32 %v25596_v40, %v25393_v7  ;;  %v25655_v10 = vadd.f32 -0.5, %v15333_v30  ;;  %v15444_v40 = vsel %vm25641_vm9, %v15396_v57, %v16789_v62 }
 0xc1b   : > { %v15226_v18 = vadd.f32 %v15168_v59, %v25393_v7  ;;  %v15086_v63 = vmul.f32 10.0, %v15062_v51  ;;  %v15313_v58 = vsub.f32 %v15121_v38, %v15289_v35  ;;  %v15332_v46 = vand.u32 2147483647, %v15308_v60 }
 0xc1c   : > { %v15048_v48 = vpop.xlane.xlu1 %15047  ;;  %v15441_v27 = vsel %vm25634_vm4, %v15393_v49, %v16786_v12  ;;  %v15094_v4 = vmul.f32 10.0, %v15070_v21  ;;  %v15519_v35 = vrot.slane %v15444_v40, %v25396_v44 }
 0xc1d   : > { %v15250_v8 = vmul.f32 10.0, %v15226_v18  ;;  %v15074_v43 = vadd.f32 %v15048_v48, %v25393_v7  ;;  %v15380_v48 = vmul.f32 0.5, %v15308_v60  ;;  %v15110_v18 = vadd.f32 3.5, %v15086_v63 }
 0xc1e   : > { %v15204_v39 = vpop.xlane.xlu0 %15203  ;;  %v15337_v11 = vand.u32 2147483647, %v15313_v58  ;;  %v15385_v38 = vmul.f32 0.5, %v15313_v58  ;;  %v25665_v51 = vadd.f32 -0.5, %v15332_v46  ;;  %vm25668_vm10 = vcmp.lt.f32.partialorder %v15332_v46, 1.0 }
 0xc1f   : > { %v15274_v2 = vadd.f32 3.5, %v15250_v8  ;;  %v15098_v1 = vmul.f32 10.0, %v15074_v43  ;;  %v15238_v0 = vadd.f32 %v15204_v39, %v25393_v7  ;;  %v15507_v39 = vrot.slane %v15441_v27, %v25396_v44 }
 0xc20   : > { %v15180_v3 = vpop.xlane.xlu1 %15179  ;;  %vm25678_vm11 = vcmp.lt.f32.partialorder %v15337_v11, 1.0 }
 0xc21   : > { %v15230_v32 = vadd.f32 %v15180_v3, %v25393_v7  ;;  %v15298_v5 = vsub.f32 %v15106_v52, %v15274_v2  ;;  %v25663_v3 = vmul.f32 %v15380_v48, %v15308_v60  ;;  %v15122_v36 = vadd.f32 3.5, %v15098_v1 }
 0xc22   : > { %v15003_v20 = vpop.xlane.xlu0 %15002  ;;  %v15262_v25 = vmul.f32 10.0, %v15238_v0  ;;  %v15409_v60 = vmul.f32 %v15385_v38, %v15313_v58  ;;  %v16802_v52 = vadd.f32 -0.5, %v15337_v11  ;;  %v25685_v58 = vsel %vm14580_vm5, %v25632_v14, %v15519_v35 }
 0xc23   : > { %v15254_v55 = vmul.f32 10.0, %v15230_v32  ;;  %v15059_v15 = vadd.f32 %v15003_v20, %v25393_v7  ;;  %v15118_v32 = vadd.f32 3.5, %v15094_v4  ;;  %v15322_v43 = vand.u32 2147483647, %v15298_v5 }
 0xc24   : > { %v15216_v59 = vpop.xlane.xlu1 %15215  ;;  %v15370_v63 = vmul.f32 0.5, %v15298_v5  ;;  %v15286_v46 = vadd.f32 3.5, %v15262_v25  ;;  %v25690_v40 = vsel %vm14588_vm14, %v15507_v39, %v25628_v23 }
 0xc25   : > { %v15242_v37 = vadd.f32 %v15216_v59, %v25393_v7  ;;  %v15278_v17 = vadd.f32 3.5, %v15254_v55  ;;  %v15083_v34 = vmul.f32 10.0, %v15059_v15  ;;  %v15452_v59 = vsel %vm25668_vm10, %v25663_v3, %v25665_v51 }
 0xc26   : > { %v15171_v54 = vpop.xlane.xlu0 %15170  ;;  %vm25692_vm12 = vcmp.lt.f32.partialorder %v15322_v43, 1.0  ;;  %v15394_v27 = vmul.f32 %v15370_v63, %v15298_v5  ;;  %v16787_v0 = vadd.f32 -0.5, %v15322_v43  ;;  %v15310_v35 = vsub.f32 %v15118_v32, %v15286_v46 }
 0xc27   : > { %v15227_v56 = vadd.f32 %v15171_v54, %v25393_v7  ;;  %v15266_v19 = vmul.f32 10.0, %v15242_v37  ;;  %v15302_v49 = vsub.f32 %v15110_v18, %v15278_v17  ;;  %v15107_v57 = vadd.f32 3.5, %v15083_v34 }
 0xc28   : > { %v15015_v29 = vpop.xlane.xlu1 %15014  ;;  %v15442_v32 = vsel %vm25692_vm12, %v15394_v27, %v16787_v0  ;;  %vm25718_vm10 = vcmp.lt.f32.partialorder %v15333_v30, 1.0 }
 0xc29   : > { %v15251_v47 = vmul.f32 10.0, %v15227_v56  ;;  %v15290_v61 = vadd.f32 3.5, %v15266_v19  ;;  %v15063_v62 = vadd.f32 %v15015_v29, %v25393_v7  ;;  %v15326_v37 = vand.u32 2147483647, %v15302_v49 }
 0xc2a   : > { %v15374_v54 = vmul.f32 0.5, %v15302_v49  ;;  %v15457_v29 = vsel %vm25678_vm11, %v15409_v60, %v16802_v52  ;;  %v25753_v52 = vld [vmem:[%s26896_s3] ss:$0 sm:$0xff] }
 0xc2b   : > { %v15275_v20 = vadd.f32 3.5, %v15251_v47  ;;  %v15314_v55 = vsub.f32 %v15122_v36, %v15290_v61  ;;  %v15087_v48 = vmul.f32 10.0, %v15063_v62  ;;  %v16791_v11 = vadd.f32 -0.5, %v15326_v37 }
 0xc2c   : > { %v15051_v12 = vpop.xlane.xlu1 %15050  ;;  %v15398_v34 = vmul.f32 %v15374_v54, %v15302_v49  ;;  %vm25698_vm2 = vcmp.lt.f32.partialorder %v15326_v37, 1.0  ;;  %v15334_v37 = vand.u32 2147483647, %v15310_v35 }
 0xc2d   : > { %v15299_v15 = vsub.f32 %v15107_v57, %v15275_v20  ;;  %v15075_v2 = vadd.f32 %v15051_v12, %v25393_v7  ;;  %v15338_v17 = vand.u32 2147483647, %v15314_v55  ;;  %v15386_v47 = vmul.f32 0.5, %v15314_v55 }
 0xc2e   : > { %v15111_v3 = vadd.f32 3.5, %v15087_v48  ;;  %v15446_v60 = vsel %vm25698_vm2, %v15398_v34, %v16791_v11  ;;  %vm25731_vm12 = vcmp.lt.f32.partialorder %v15334_v37, 1.0 }
 0xc2f   : > { %v15323_v14 = vand.u32 2147483647, %v15299_v15  ;;  %v15371_v4 = vmul.f32 0.5, %v15299_v15  ;;  %v15099_v38 = vmul.f32 10.0, %v15075_v2  ;;  %vm25703_vm4 = vcmp.lt.f32.partialorder %v15338_v17, 1.0 }
 0xc30   : > { %v15183_v56 = vpop.xlane.xlu1 %15182  ;;  %v15410_v5 = vmul.f32 %v15386_v47, %v15314_v55  ;;  %v16803_v36 = vadd.f32 -0.5, %v15338_v17  ;;  %v15571_v2 = vrot.slane %v15457_v29, %v25396_v44  ;;  %v15382_v17 = vmul.f32 0.5, %v15310_v35 }
 0xc31   : > { %v15231_v19 = vadd.f32 %v15183_v56, %v25393_v7  ;;  %v15395_v12 = vmul.f32 %v15371_v4, %v15299_v15  ;;  %v16788_v49 = vadd.f32 -0.5, %v15323_v14  ;;  %v15123_v57 = vadd.f32 3.5, %v15099_v38 }
 0xc32   : > { %vm25709_vm9 = vcmp.lt.f32.partialorder %v15323_v14, 1.0  ;;  %v15458_v54 = vsel %vm25703_vm4, %v15410_v5, %v16803_v36  ;;  %v15551_v56 = vrot.slane %v15452_v59, %v25396_v44  ;;  %v15527_v30 = vrot.slane %v15446_v60, %v25396_v44  ;;  %v20219_v59 = vld [vmem:[#allocation3 + $0x68] sm:$0xff] }
 0xc33   : > { %v15255_v18 = vmul.f32 10.0, %v15231_v19  ;;  %v15443_v1 = vsel %vm25709_vm9, %v15395_v12, %v16788_v49  ;;  %v15511_v47 = vrot.slane %v15442_v32, %v25396_v44  ;;  %v15575_v0 = vrot.slane %v15458_v54, %v25396_v44 }
 0xc34   : > { %v15219_v61 = vpop.xlane.xlu1 %15218  ;;  %v15515_v34 = vrot.slane %v15443_v1, %v25396_v44  ;;  %v14640_v32 = vmul.f32 %v25753_v52, %v25620_v53  ;;  %v15453_v54 = vsel %vm25718_vm10, %v25646_v31, %v25655_v10  ;;  %v15593_v53 = vsel %vm14586_vm13, %v15551_v56, %v25583_v45  ;;  %v20217_v10 = vld [vmem:[#allocation3 + $0x10] sm:$0xff] }
 0xc35   : > { %v15279_v51 = vadd.f32 3.5, %v15255_v18  ;;  %v15243_v20 = vadd.f32 %v15219_v61, %v25393_v7  ;;  %v15555_v15 = vrot.slane %v15453_v54, %v25396_v44  ;;  %v14656_v54 = vmul.f32 %v25753_v52, %v25204_v42  ;;  %v20232_v42 = vld [vmem:[#allocation4 + $0x30] sm:$0xff] }
 0xc36   : > { %vm15616_vm9 = vcmask 1043456  }
 0xc37   : > { %v15303_v39 = vsub.f32 %v15111_v3, %v15279_v51  ;;  %v15267_v25 = vmul.f32 10.0, %v15243_v20  ;;  %v15406_v3 = vmul.f32 %v15382_v17, %v15310_v35  ;;  %v16799_v51 = vadd.f32 -0.5, %v15334_v37 }
 0xc38   : > { %v15039_v62 = vpop.xlane.xlu1 %15038  ;;  %v15588_v20 = vsel %vm14582_vm6, %v15527_v30, %v25685_v58  ;;  %v15585_v35 = vsel %vm14590_vm15, %v15511_v47, %v25690_v40  ;;  %v20213_v40 = vld [vmem:[#allocation3 + $0x60] sm:$0xff]  ;;  %v14664_v30 = vsel %vm1772_vm1, %v14640_v32, 0.0  ;;  %v20218_v47 = vld [vmem:[#allocation4 + $0x10] sm:$0xff]  ;;  %v15594_v56 = vsel %vm14588_vm14, %v15555_v15, %v15593_v53 }
 0xc39   : > { %v15327_v43 = vand.u32 2147483647, %v15303_v39  ;;  %v15375_v21 = vmul.f32 0.5, %v15303_v39  ;;  %v15291_v55 = vadd.f32 3.5, %v15267_v25  ;;  %v15071_v63 = vadd.f32 %v15039_v62, %v25393_v7 }
 0xc3a   : > { %v15597_v25 = vsel %vm14580_vm5, %v15571_v2, %v25624_v16  ;;  %v15586_v62 = vsel %vm14592_vm0, %v15515_v34, %v15585_v35  ;;  %v15454_v16 = vsel %vm25731_vm12, %v15406_v3, %v16799_v51  ;;  %v14654_v35 = vmul.f32 %v25753_v52, %v25179_v22  ;;  %v20228_v22 = vld [vmem:[#allocation4 + $0x48] sm:$0xff] }
 0xc3b   : > { %v15399_v46 = vmul.f32 %v15375_v21, %v15303_v39  ;;  %v16792_v48 = vadd.f32 -0.5, %v15327_v43  ;;  %v15315_v19 = vsub.f32 %v15123_v57, %v15291_v55  ;;  %vm15351_vm11 = vcmp.lt.f32.partialorder %v15327_v43, 1.0  ;;  %v20214_v43 = vld [vmem:[#allocation4 + $0x60] sm:$0xff] }
 0xc3c   : > { %v15207_v9 = vpop.xlane.xlu1 %15206  ;;  %v15095_v4 = vmul.f32 10.0, %v15071_v63  ;;  %v15598_v58 = vsel %vm14582_vm6, %v15575_v0, %v15597_v25  ;;  %v14628_v21 = vadd.f32 %v20214_v43, %v20213_v40  ;;  %v15604_v2 = vsel %vm3870_vm3, %v15586_v62, 0.0  ;;  %v20225_v62 = vld [vmem:[#allocation3 + $0x28] sm:$0xff] }
 0xc3d   : > { %v15339_v27 = vand.u32 2147483647, %v15315_v19  ;;  %v15387_v14 = vmul.f32 0.5, %v15315_v19  ;;  %v15239_v29 = vadd.f32 %v15207_v9, %v25393_v7  ;;  %v15447_v18 = vsel %vm15351_vm11, %v15399_v46, %v16792_v48  ;;  %v20215_v46 = vld [vmem:[#allocation3 + $0x8] sm:$0xff] }
 0xc3e   : > { %v15531_v23 = vrot.slane %v15447_v18, %v25396_v44  ;;  %v15119_v8 = vadd.f32 3.5, %v15095_v4  ;;  %v20216_v48 = vld [vmem:[#allocation4 + $0x8] sm:$0xff]  ;;  %v15559_v9 = vrot.slane %v15454_v16, %v25396_v44  ;;  %v14652_v31 = vmul.f32 %v25753_v52, %v14628_v21 }
 0xc3f   : > { %v15411_v11 = vmul.f32 %v15387_v14, %v15315_v19  ;;  %v16804_v38 = vadd.f32 -0.5, %v15339_v27  ;;  %v15263_v61 = vmul.f32 10.0, %v15239_v29  ;;  %vm15363_vm2 = vcmp.lt.f32.partialorder %v15339_v27, 1.0  ;;  %v20220_v18 = vld [vmem:[#allocation4 + $0x68] sm:$0xff] }
 0xc40   : > { %v15589_v36 = vsel %vm14584_vm7, %v15531_v23, %v15588_v20  ;;  %v14617_v19 = vadd.f32 %v20216_v48, %v20215_v46  ;;  %v14618_v27 = vadd.f32 %v20218_v47, %v20217_v10  ;;  %v15595_v4 = vsel %vm14590_vm15, %v15559_v9, %v15594_v56  ;;  %v20222_v23 = vld [vmem:[#allocation4 + $0x18] sm:$0xff]  ;;  %v20229_v46 = vld [vmem:[#allocation3 + $0xa0] sm:$0xff] }
 0xc41   : > { %v15287_v5 = vadd.f32 3.5, %v15263_v61  ;;  %v15459_v12 = vsel %vm15363_vm2, %v15411_v11, %v16804_v38  ;;  %v15607_v49 = vsel %vm14612_vm8, %v15589_v36, 0.0  ;;  %v14629_v0 = vadd.f32 %v20220_v18, %v20219_v59  ;;  %v20221_v61 = vld [vmem:[#allocation3 + $0x18] sm:$0xff] }
 0xc42   : > { %v15579_v39 = vrot.slane %v15459_v12, %v25396_v44  ;;  %15608 = vadd.xlane.f32.xlu0 %v15607_v49  ;;  %v14641_v29 = vmul.f32 %v25753_v52, %v14617_v19  ;;  %v14700_v11 = vsel %vm1772_vm1, %v14652_v31, 0.0  ;;  %v14642_v38 = vmul.f32 %v25753_v52, %v14618_v27  ;;  %v20223_v12 = vld [vmem:[#allocation3 + $0x20] sm:$0xff]  ;;  %v20235_v18 = vld [vmem:[#allocation3 + $0x38] sm:$0xff] }
 0xc43   : > { %v15311_v57 = vsub.f32 %v15119_v8, %v15287_v5  ;;  %v14619_v3 = vadd.f32 %v20222_v23, %v20221_v61  ;;  %v14653_v8 = vmul.f32 %v25753_v52, %v14629_v0  ;;  %v20224_v49 = vld [vmem:[#allocation4 + $0x20] sm:$0xff]  ;;  %v14706_v16 = vsel %vm1772_vm1, %v14654_v35, 0.0  ;;  %v20237_v23 = vld [vmem:[#allocation3 + $0x98] sm:$0xff] }
 0xc44   : > { %v15599_v60 = vsel %vm14584_vm7, %v15579_v39, %v15598_v58  ;;  %v14667_v20 = vsel %vm1772_vm1, %v14641_v29, 0.0  ;;  %v14670_v5 = vsel %vm1772_vm1, %v14642_v38, 0.0  ;;  %v14620_v39 = vadd.f32 %v20224_v49, %v20223_v12 }
 0xc45   : > { %v15335_v55 = vand.u32 2147483647, %v15311_v57  ;;  %v15383_v63 = vmul.f32 0.5, %v15311_v57  ;;  %v15613_v37 = vsel %vm14612_vm8, %v15599_v60, 0.0  ;;  %v14643_v36 = vmul.f32 %v25753_v52, %v14619_v3  ;;  %v20226_v60 = vld [vmem:[#allocation4 + $0x28] sm:$0xff] }
 0xc46   : > { %15614 = vadd.xlane.f32.xlu1 %v15613_v37  ;;  %15605 = vadd.xlane.f32.xlu0 %v15604_v2  ;;  %v14703_v25 = vsel %vm1772_vm1, %v14653_v8, 0.0  ;;  %v14644_v58 = vmul.f32 %v25753_v52, %v14620_v39  ;;  %v14621_v32 = vadd.f32 %v20226_v60, %v20225_v62  ;;  %v14655_v40 = vmul.f32 %v25753_v52, %v25184_v24  ;;  %v20230_v24 = vld [vmem:[#allocation4 + $0xa0] sm:$0xff] }
 0xc47   : > { %v15407_v1 = vmul.f32 %v15383_v63, %v15311_v57  ;;  %v16800_v17 = vadd.f32 -0.5, %v15335_v55  ;;  %vm15359_vm4 = vcmp.lt.f32.partialorder %v15335_v55, 1.0  ;;  %v14673_v57 = vsel %vm1772_vm1, %v14643_v36, 0.0  ;;  %v20227_v55 = vld [vmem:[#allocation3 + $0x48] sm:$0xff] }
 0xc48   : > { %v14676_v43 = vsel %vm1772_vm1, %v14644_v58, 0.0  ;;  %v14645_v21 = vmul.f32 %v25753_v52, %v14621_v32  ;;  %v14625_v63 = vadd.f32 %v20228_v22, %v20227_v55  ;;  %v14709_v37 = vsel %vm1772_vm1, %v14655_v40, 0.0 }
 0xc49   : > { %v15455_v14 = vsel %vm15359_vm4, %v15407_v1, %v16800_v17  ;;  %v14636_v48 = vadd.f32 %v20230_v24, %v20229_v46  ;;  %v14712_v19 = vsel %vm1772_vm1, %v14656_v54, 0.0  ;;  %v14648_v1 = vmul.f32 %v25753_v52, %v25193_v26  ;;  %v20234_v26 = vld [vmem:[#allocation4 + $0x90] sm:$0xff] }
 0xc4a   : > { %v15563_v45 = vrot.slane %v15455_v14, %v25396_v44  ;;  %14665 = vadd.xlane.f32.xlu0 %v14664_v30  ;;  %v14679_v2 = vsel %vm1772_vm1, %v14645_v21, 0.0  ;;  %v14649_v53 = vmul.f32 %v25753_v52, %v14625_v63  ;;  %v20231_v30 = vld [vmem:[#allocation3 + $0x30] sm:$0xff]  ;;  %v14657_v10 = vmul.f32 %v25753_v52, %v25207_v41  ;;  %v20236_v41 = vld [vmem:[#allocation4 + $0x38] sm:$0xff] }
 0xc4b   : > { %v14660_v9 = vmul.f32 %v25753_v52, %v14636_v48  ;;  %v14622_v15 = vadd.f32 %v20232_v42, %v20231_v30  ;;  %v14688_v31 = vsel %vm1772_vm1, %v14648_v1, 0.0  ;;  %v20233_v14 = vld [vmem:[#allocation3 + $0x90] sm:$0xff]  ;;  %v14623_v0 = vadd.f32 %v20236_v41, %v20235_v18 }
 0xc4c   : > { %v15596_v34 = vsel %vm14592_vm0, %v15563_v45, %v15595_v4  ;;  %v14691_v17 = vsel %vm1772_vm1, %v14649_v53, 0.0  ;;  %v14634_v45 = vadd.f32 %v20234_v26, %v20233_v14  ;;  %v14715_v56 = vsel %vm1772_vm1, %v14657_v10, 0.0 }
 0xc4d   : > { %v15610_v51 = vsel %vm3870_vm3, %v15596_v34, 0.0  ;;  %v14724_v47 = vsel %vm1772_vm1, %v14660_v9, 0.0  ;;  %v14646_v27 = vmul.f32 %v25753_v52, %v14622_v15  ;;  %v14661_v4 = vmul.f32 %v25753_v52, %v25212_v6  ;;  %v20238_v6 = vld [vmem:[#allocation4 + $0x98] sm:$0xff] }
 0xc4e   : > { %15611 = vadd.xlane.f32.xlu1 %v15610_v51  ;;  %14701 = vadd.xlane.f32.xlu0 %v14700_v11  ;;  %v14658_v59 = vmul.f32 %v25753_v52, %v14634_v45  ;;  %v14650_v11 = vmul.f32 %v25753_v52, %v25222_v28  ;;  %v14647_v61 = vmul.f32 %v25753_v52, %v14623_v0 }
 0xc4f   : > { %v14682_v29 = vsel %vm1772_vm1, %v14646_v27, 0.0  ;;  %v14727_v34 = vsel %vm1772_vm1, %v14661_v4, 0.0  ;;  %v14635_v3 = vadd.f32 %v20238_v6, %v20237_v23  ;;  %v14651_v36 = vmul.f32 %v25753_v52, %v25237_v50 }
 0xc50   : > { %v14718_v38 = vsel %vm1772_vm1, %v14658_v59, 0.0  ;;  %v14694_v51 = vsel %vm1772_vm1, %v14650_v11, 0.0  ;;  %v14685_v8 = vsel %vm1772_vm1, %v14647_v61, 0.0 }
 0xc51   : > { %v14697_v49 = vsel %vm1772_vm1, %v14651_v36, 0.0 }
 0xc52   : > { %14668 = vadd.xlane.f32.xlu1 %v14667_v20  ;;  %14671 = vadd.xlane.f32.xlu0 %v14670_v5  ;;  %v14662_v20 = vmul.f32 %v25753_v52, %v25230_v33  ;;  %v14659_v5 = vmul.f32 %v25753_v52, %v14635_v3  ;;  %v14663_v33 = vmul.f32 %v25753_v52, %v25245_v13 }
 0xc54   : > { %v14730_v28 = vsel %vm1772_vm1, %v14662_v20, 0.0  ;;  %v14721_v12 = vsel %vm1772_vm1, %v14659_v5, 0.0  ;;  %v14733_v39 = vsel %vm1772_vm1, %v14663_v33, 0.0  ;;  %vm15635_vm1 = vcmask 0  }
 0xc56   : > { %14704 = vadd.xlane.f32.xlu1 %v14703_v25  ;;  %14674 = vadd.xlane.f32.xlu0 %v14673_v57 }
 0xc5a   : > { %14707 = vadd.xlane.f32.xlu1 %v14706_v16  ;;  %14677 = vadd.xlane.f32.xlu0 %v14676_v43 }
 0xc5e   : > { %14710 = vadd.xlane.f32.xlu1 %v14709_v37  ;;  %14680 = vadd.xlane.f32.xlu0 %v14679_v2 }
 0xc62   : > { %14713 = vadd.xlane.f32.xlu1 %v14712_v19  ;;  %14692 = vadd.xlane.f32.xlu0 %v14691_v17 }
 0xc66   : > { %14689 = vadd.xlane.f32.xlu1 %v14688_v31  ;;  %14725 = vadd.xlane.f32.xlu0 %v14724_v47 }
 0xc6a   : > { %14716 = vadd.xlane.f32.xlu1 %v14715_v56  ;;  %14683 = vadd.xlane.f32.xlu0 %v14682_v29 }
 0xc6e   : > { %14728 = vadd.xlane.f32.xlu1 %v14727_v34  ;;  %14719 = vadd.xlane.f32.xlu0 %v14718_v38 }
 0xc72   : > { %14695 = vadd.xlane.f32.xlu1 %v14694_v51  ;;  %14686 = vadd.xlane.f32.xlu0 %v14685_v8 }
 0xc76   : > { %14731 = vadd.xlane.f32.xlu1 %v14730_v28  ;;  %14722 = vadd.xlane.f32.xlu0 %v14721_v12 }
 0xc7a   : > { %14698 = vadd.xlane.f32.xlu1 %v14697_v49 }
 0xc7e   : > { %14734 = vadd.xlane.f32.xlu1 %v14733_v39 }
 0xccf   : > { %v15609_v25 = vpop.xlane.xlu0 %15608 }
 0xcd0   : > { %v15617_v35 = vsel %vm15616_vm9, %v15609_v25, 0.0 }
 0xcd3   : > { %v15606_v57 = vpop.xlane.xlu0 %15605  ;;  %v15615_v62 = vpop.xlane.xlu1 %15614 }
 0xcd4   : > { %v15618_v58 = vadd.f32 %v15617_v35, %v15606_v57  ;;  %v15625_v16 = vsel %vm15616_vm9, %v15615_v62, 0.0 }
 0xcd6   : > { %v15619_v50 = vrot.slane %v15618_v58, 4 }
 0xcd7   : > { %v14666_v60 = vpop.xlane.xlu0 %14665 }
 0xcd8   : > { %v15620_v32 = vadd.f32 %v15619_v50, %v15618_v58  ;;  %v14736_v47 = vadd.f32 %v14666_v60, %v25393_v7 }
 0xcda   : > { %v15621_v43 = vrot.slane %v15620_v32, 2  ;;  %v14760_v18 = vmul.f32 10.0, %v14736_v47 }
 0xcdb   : > { %v15612_v40 = vpop.xlane.xlu1 %15611  ;;  %v14702_v55 = vpop.xlane.xlu0 %14701 }
 0xcdc   : > { %v15626_v21 = vadd.f32 %v15625_v16, %v15612_v40  ;;  %v15622_v52 = vadd.f32 %v15621_v43, %v15620_v32  ;;  %v14748_v45 = vadd.f32 %v14702_v55, %v25393_v7  ;;  %v14784_v20 = vadd.f32 3.5, %v14760_v18 }
 0xcde   : > { %v15627_v22 = vrot.slane %v15626_v21, 4  ;;  %v15623_v53 = vrot.slane %v15622_v52, 1  ;;  %v14772_v38 = vmul.f32 10.0, %v14748_v45  ;;  %v14835_v62 = vrot.slane %v14784_v20, %v25396_v44 }
 0xcdf   : > { %v14669_v13 = vpop.xlane.xlu1 %14668  ;;  %v14672_v37 = vpop.xlane.xlu0 %14671 }
 0xce0   : > { %v15628_v63 = vadd.f32 %v15627_v22, %v15626_v21  ;;  %v15624_v1 = vadd.f32 %v15623_v53, %v15622_v52  ;;  %v14737_v31 = vadd.f32 %v14669_v13, %v25393_v7  ;;  %v14738_v27 = vadd.f32 %v14672_v37, %v25393_v7 }
 0xce1   : > { %v14796_v49 = vadd.f32 3.5, %v14772_v38 }
 0xce2   : > { %v15629_v54 = vrot.slane %v15628_v63, 2  ;;  %v14761_v56 = vmul.f32 10.0, %v14737_v31  ;;  %v14762_v41 = vmul.f32 10.0, %v14738_v27 }
 0xce3   : > { %v14705_v2 = vpop.xlane.xlu1 %14704  ;;  %v14675_v24 = vpop.xlane.xlu0 %14674  ;;  %v14883_v55 = vrot.slane %v14796_v49, %v25396_v44 }
 0xce4   : > { %v15630_v46 = vadd.f32 %v15629_v54, %v15628_v63  ;;  %v14749_v14 = vadd.f32 %v14705_v2, %v25393_v7  ;;  %v14739_v4 = vadd.f32 %v14675_v24, %v25393_v7  ;;  %v14785_v61 = vadd.f32 3.5, %v14761_v56 }
 0xce5   : > { %v14786_v8 = vadd.f32 3.5, %v14762_v41 }
 0xce6   : > { %v15631_v48 = vrot.slane %v15630_v46, 1  ;;  %v14773_v0 = vmul.f32 10.0, %v14749_v14  ;;  %v14763_v23 = vmul.f32 10.0, %v14739_v4  ;;  %v14839_v33 = vrot.slane %v14785_v61, %v25396_v44 }
 0xce7   : > { %v14708_v19 = vpop.xlane.xlu1 %14707  ;;  %v14678_v9 = vpop.xlane.xlu0 %14677  ;;  %v14843_v32 = vrot.slane %v14786_v8, %v25396_v44 }
 0xce8   : > { %v15632_v17 = vadd.f32 %v15631_v48, %v15630_v46  ;;  %v14750_v59 = vadd.f32 %v14708_v19, %v25393_v7  ;;  %v14740_v34 = vadd.f32 %v14678_v9, %v25393_v7  ;;  %v14797_v5 = vadd.f32 3.5, %v14773_v0 }
 0xce9   : > { %v14787_v39 = vadd.f32 3.5, %v14763_v23  ;;  %v14928_v22 = vsel %vm14580_vm5, %v14839_v33, %v14835_v62 }
 0xcea   : > { %v15633_v30 = vadd.f32 %v15632_v17, %v15624_v1  ;;  %v14774_v3 = vmul.f32 10.0, %v14750_v59  ;;  %v14764_v28 = vmul.f32 10.0, %v14740_v34  ;;  %v14887_v16 = vrot.slane %v14797_v5, %v25396_v44 }
 0xceb   : > { %v14711_v42 = vpop.xlane.xlu1 %14710  ;;  %v14681_v10 = vpop.xlane.xlu0 %14680  ;;  %v14847_v13 = vrot.slane %v14787_v39, %v25396_v44  ;;  %v14929_v19 = vsel %vm14582_vm6, %v14843_v32, %v14928_v22 }
 0xcec   : > { %v15634_v15 = vmul.f32 0.0052083335, %v15633_v30  ;;  %v14741_v51 = vadd.f32 %v14681_v10, %v25393_v7  ;;  %v14751_v36 = vadd.f32 %v14711_v42, %v25393_v7  ;;  %v14798_v35 = vadd.f32 3.5, %v14774_v3 }
 0xced   : > { %v14788_v40 = vadd.f32 3.5, %v14764_v28  ;;  %v14938_v1 = vsel %vm14580_vm5, %v14887_v16, %v14883_v55  ;;  %v14930_v42 = vsel %vm14584_vm7, %v14847_v13, %v14929_v19 }
 0xcee   : > { %15636 = vst.msk [vmem:[#allocation6] sm:$0x1] %vm15635_vm1, %v15634_v15  ;;  %v14765_v57 = vmul.f32 10.0, %v14741_v51  ;;  %v14775_v43 = vmul.f32 10.0, %v14751_v36  ;;  %v14891_v37 = vrot.slane %v14798_v35, %v25396_v44 }
 0xcef   : > { %v14714_v26 = vpop.xlane.xlu1 %14713  ;;  %v14693_v29 = vpop.xlane.xlu0 %14692  ;;  %v14851_v17 = vrot.slane %v14788_v40, %v25396_v44 }
 0xcf0   : > { %v14752_v50 = vadd.f32 %v14714_v26, %v25393_v7  ;;  %v14789_v54 = vadd.f32 3.5, %v14765_v57  ;;  %v14745_v2 = vadd.f32 %v14693_v29, %v25393_v7  ;;  %v14799_v9 = vadd.f32 3.5, %v14775_v43 }
 0xcf1   : > { %v14939_v27 = vsel %vm14582_vm6, %v14891_v37, %v14938_v1  ;;  %v14931_v18 = vsel %vm14586_vm13, %v14851_v17, %v14930_v42 }
 0xcf2   : > { %v14776_v46 = vmul.f32 10.0, %v14752_v50  ;;  %v14855_v14 = vrot.slane %v14789_v54, %v25396_v44  ;;  %v14769_v26 = vmul.f32 10.0, %v14745_v2  ;;  %v14895_v41 = vrot.slane %v14799_v9, %v25396_v44 }
 0xcf3   : > { %v14690_v11 = vpop.xlane.xlu1 %14689  ;;  %v14726_v6 = vpop.xlane.xlu0 %14725 }
 0xcf4   : > { %v14744_v24 = vadd.f32 %v14690_v11, %v25393_v7  ;;  %v14800_v56 = vadd.f32 3.5, %v14776_v46  ;;  %v14756_v38 = vadd.f32 %v14726_v6, %v25393_v7  ;;  %v14932_v20 = vsel %vm14588_vm14, %v14855_v14, %v14931_v18 }
 0xcf5   : > { %v14793_v8 = vadd.f32 3.5, %v14769_v26  ;;  %v14940_v32 = vsel %vm14584_vm7, %v14895_v41, %v14939_v27 }
 0xcf6   : > { %v14768_v4 = vmul.f32 10.0, %v14744_v24  ;;  %v14899_v36 = vrot.slane %v14800_v56, %v25396_v44 }
 0xcf7   : > { %v14717_v12 = vpop.xlane.xlu1 %14716  ;;  %v14684_v25 = vpop.xlane.xlu0 %14683  ;;  %v14871_v16 = vrot.slane %v14793_v8, %v25396_v44 }
 0xcf8   : > { %v14742_v58 = vadd.f32 %v14684_v25, %v25393_v7  ;;  %v14753_v60 = vadd.f32 %v14717_v12, %v25393_v7  ;;  %v14792_v12 = vadd.f32 3.5, %v14768_v4 }
 0xcfa   : > { %v14766_v52 = vmul.f32 10.0, %v14742_v58  ;;  %v14777_v48 = vmul.f32 10.0, %v14753_v60  ;;  %v14780_v58 = vmul.f32 10.0, %v14756_v38  ;;  %v14867_v55 = vrot.slane %v14792_v12, %v25396_v44 }
 0xcfb   : > { %v14729_v21 = vpop.xlane.xlu1 %14728  ;;  %v14720_v63 = vpop.xlane.xlu0 %14719 }
 0xcfc   : > { %v14754_v53 = vadd.f32 %v14720_v63, %v25393_v7  ;;  %v14790_v15 = vadd.f32 3.5, %v14766_v52  ;;  %v14801_v29 = vadd.f32 3.5, %v14777_v48  ;;  %v14757_v59 = vadd.f32 %v14729_v21, %v25393_v7 }
 0xcfd   : > { %v14941_v21 = vsel %vm14586_vm13, %v14899_v36, %v14940_v32  ;;  %v14935_v1 = vsel %vm14580_vm5, %v14871_v16, %v14867_v55 }
 0xcfe   : > { %v14778_v31 = vmul.f32 10.0, %v14754_v53  ;;  %v14859_v61 = vrot.slane %v14790_v15, %v25396_v44  ;;  %v14903_v49 = vrot.slane %v14801_v29, %v25396_v44  ;;  %v14781_v33 = vmul.f32 10.0, %v14757_v59 }
 0xcff   : > { %v14696_v30 = vpop.xlane.xlu1 %14695  ;;  %v14687_v47 = vpop.xlane.xlu0 %14686  ;;  %v14804_v53 = vadd.f32 3.5, %v14780_v58 }
 0xd00   : > { %v14746_v10 = vadd.f32 %v14696_v30, %v25393_v7  ;;  %v14743_v45 = vadd.f32 %v14687_v47, %v25393_v7  ;;  %v14802_v23 = vadd.f32 3.5, %v14778_v31  ;;  %v14933_v62 = vsel %vm14590_vm15, %v14859_v61, %v14932_v20 }
 0xd01   : > { %v14805_v22 = vadd.f32 3.5, %v14781_v33  ;;  %v14942_v52 = vsel %vm14588_vm14, %v14903_v49, %v14941_v21 }
 0xd02   : > { %v14770_v0 = vmul.f32 10.0, %v14746_v10  ;;  %v14767_v34 = vmul.f32 10.0, %v14743_v45  ;;  %v14907_v50 = vrot.slane %v14802_v23, %v25396_v44 }
 0xd03   : > { %v14732_v11 = vpop.xlane.xlu1 %14731  ;;  %v14723_v51 = vpop.xlane.xlu0 %14722  ;;  %v14919_v17 = vrot.slane %v14805_v22, %v25396_v44 }
 0xd04   : > { %v14758_v3 = vadd.f32 %v14732_v11, %v25393_v7  ;;  %v14791_v5 = vadd.f32 3.5, %v14767_v34  ;;  %v14755_v28 = vadd.f32 %v14723_v51, %v25393_v7  ;;  %v14794_v39 = vadd.f32 3.5, %v14770_v0 }
 0xd05   : > { %v14943_v46 = vsel %vm14590_vm15, %v14907_v50, %v14942_v52 }
 0xd06   : > { %v14863_v6 = vrot.slane %v14791_v5, %v25396_v44  ;;  %v14782_v25 = vmul.f32 10.0, %v14758_v3  ;;  %v14779_v35 = vmul.f32 10.0, %v14755_v28  ;;  %v14875_v63 = vrot.slane %v14794_v39, %v25396_v44 }
 0xd07   : > { %v14699_v57 = vpop.xlane.xlu1 %14698 }
 0xd08   : > { %v14747_v60 = vadd.f32 %v14699_v57, %v25393_v7  ;;  %v14934_v40 = vsel %vm14592_vm0, %v14863_v6, %v14933_v62  ;;  %v14803_v43 = vadd.f32 3.5, %v14779_v35  ;;  %v14806_v37 = vadd.f32 3.5, %v14782_v25 }
 0xd09   : > { %14952 = vst.msk [vmem:[%s26935_s24] sm:$0xff] %vm3870_vm3, %v14934_v40  ;;  %v14936_v42 = vsel %vm14582_vm6, %v14875_v63, %v14935_v1 }
 0xd0a   : > { %v14771_v13 = vmul.f32 10.0, %v14747_v60  ;;  %v14911_v54 = vrot.slane %v14803_v43, %v25396_v44  ;;  %v14923_v15 = vrot.slane %v14806_v37, %v25396_v44 }
 0xd0b   : > { %v14735_v2 = vpop.xlane.xlu1 %14734 }
 0xd0c   : > { %v14795_v24 = vadd.f32 3.5, %v14771_v13  ;;  %v14759_v48 = vadd.f32 %v14735_v2, %v25393_v7  ;;  %v14944_v19 = vsel %vm14592_vm0, %v14911_v54, %v14943_v46  ;;  %v14915_v7 = vrot.slane %v14804_v53, %v25396_v44 }
 0xd0d   : > { %14954 = vst.msk [vmem:[%s26935_s24 + $0x10] sm:$0xff] %vm3870_vm3, %v14944_v19 }
 0xd0e   : > { %v14879_v9 = vrot.slane %v14795_v24, %v25396_v44  ;;  %v14783_v30 = vmul.f32 10.0, %v14759_v48  ;;  %v14945_v47 = vsel %vm14580_vm5, %v14919_v17, %v14915_v7 }
 0xd0f   : > { %v14946_v14 = vsel %vm14582_vm6, %v14923_v15, %v14945_v47 }
 0xd10   : > { %v14937_v31 = vsel %vm14584_vm7, %v14879_v9, %v14936_v42  ;;  %v14807_v10 = vadd.f32 3.5, %v14783_v30 }
 0xd11   : > { %14953 = vst.msk [vmem:[%s26935_s24 + $0x8] sm:$0xf] %vm14612_vm8, %v14937_v31 }
 0xd12   : > { %v14927_v27 = vrot.slane %v14807_v10, %v25396_v44 }
 0xd14   : > { %v14947_v26 = vsel %vm14584_vm7, %v14927_v27, %v14946_v14 }
 0xd15   : > { %14955 = vst.msk [vmem:[%s26935_s24 + $0x18] sm:$0xf] %vm14612_vm8, %v14947_v26 }
 0xd16 PF: > { %s26936_s27 = sld [smem:[#allocation10_spill]]  ;;  %s20285_s6 = smov [#allocation6]  }
 0xd17   : > { %s15650_s26 = sshll.u32 %s20285_s6, 4  ;;  %s15651_s26 = int_to_ptr.vmem [resolvable:$true] %s15650_s26 }
 0xd18   : > { %s20239_s8 = scalar_lea.vmem %s15651_s26, 16  ;;  %s20245_s7 = scalar_lea.vmem %s15651_s26, 32 }
 0xd19   : > { %p20240_p7 = scmp.ne.s32.totalorder %s15651_s26, %s20239_s8  ;;  %p20246_p10 = scmp.lt.s32.totalorder %s15651_s26, %s15651_s26 }
 0xd1a   : > { %p20247_p11 = scmp.lt.s32.totalorder %s20245_s7, %s20239_s8 }
 0xd1c   : > { %p19787_p6 = scmp.eq.s32.totalorder %s26936_s27, 3  ;;  %p20248_p12 = por %p20247_p11, %p20246_p10 }
 0xd1e   : > { %p20241_p8 = pnand %p20240_p7, %p19787_p6 }
 0xd20   : > { %p20242_p9 = pneg %p20241_p8 }
 0xd22   : > { %p20249_p13 = pnand %p20248_p12, %p20242_p9 }
 0xd24   : > { %20252 = shalt.err (!%p20249_p13)
}
 0xd25   : > { %s26937_s16 = sld [smem:[#allocation171_spill]] }
 0xd2b   : > { %s20253_s28 = scalar_lea.hbm %s26937_s16, 16 }
 0xd2c   : > { %p20254_p0 = scmp.ne.s32.totalorder %s26937_s16, %s20253_s28  ;;  %p20259_p3 = scmp.lt.u32.totalorder %s20253_s28, %s26937_s16 }
 0xd2e   : > { %p20255_p1 = pnand %p20254_p0, %p19787_p6 }
 0xd30   : > { %p20256_p2 = pneg %p20255_p1 }
 0xd32   : > { %p20261_p4 = pnand %p20259_p3, %p20256_p2 }
 0xd34   : > { %20264 = shalt.err (!%p20261_p4)
}
 0xd35   : > { %19784 = dma.vmem_to_hbm [thread:$0]  (%p19787_p6), %s15651_s26, 16, %s26937_s16, [#allocation7]  }
 0xd36   : > { %20270 = dma.done.wait (%p19787_p6), [#allocation7], 16  }
 0xd37   : > { %20272 = vsyncadd (%p19787_p6), [#allocation7], 4294967280 }
 0xd38 PF: > { %s26938_s30 = sld [smem:[#allocation9_spill]] }
 0xd3e   : > { %s42_s30 = sadd.s32 1, %s26938_s30  }
 0xd3f   : > { %p39_p5 = scmp.ge.s32.totalorder %s42_s30, 6  }
 0xd41   :  { %41 = sbr.rel (!%p39_p5) target bundleno = 26 (0x1a), region = 235 }
 0xd48   :  { %15669 = vsyncpa [#allocation7], 1 }
 0xd49   :  { %15671 = vsyncpa [#allocation7 + $0x1], 1 }

</bundles_post_ra>
